<compile_context>
chip_gen: v7x
topology: tpu7x:2x2x1
jax: 0.10.0
libtpu: 0.0.40
codegen_flags: <defaults>
</compile_context>

<pallas_src>
import functools

import jax
import jax.numpy as jnp
from jax import lax
from jax.experimental import pallas as pl
from jax.experimental.pallas import tpu as pltpu


# Matmul operand dtype (accumulation stays f32 via preferred_element_type).
_MXU_DTYPE = jnp.bfloat16
_VMEM_LIMIT = 48 * 1024 * 1024   # above the 16/32 MiB default scoped limits, below physical


def _dot(a, b):
    return jnp.dot(a.astype(_MXU_DTYPE), b.astype(_MXU_DTYPE),
                   preferred_element_type=jnp.float32)


def _const_spec(shape):
    """BlockSpec for a grid-invariant (weight) operand: full array, block index 0."""
    n = len(shape)
    return pl.BlockSpec(shape, lambda *_: (0,) * n)


# ----------------------------------------------------------------------------
# Kernel 1: fully fused 1-D encoder (both ConvBlocks in one kernel)
# ----------------------------------------------------------------------------
def _encoder_kernel(x_ref, wst_ref, wcat_ref, bcat_ref, o_ref, *, L):
    T1 = L // 10
    x = x_ref[0]                                    # [Cin=1, L]

    def conv5(inp, T, tapfn):                       # Conv1d(k=5, stride=1, pad=2)
        cin = inp.shape[0]
        z = jnp.zeros((cin, 2), jnp.float32)
        ip = jnp.concatenate([z, inp, z], axis=1)   # [cin, T+4]
        acc = None
        for k in range(5):
            t = tapfn(k, ip[:, k:k + T])
            acc = t if acc is None else acc + t
        return acc                                  # [cout, T]

    def pool_sel(C, T):
        # stride-2 subsample + MaxPool1d(5) of the stride-1 conv C:
        # out[:, t] = max_{p=0..4} C[:, 10t + 2p]
        Tout = T // 10
        cout = C.shape[0]
        Cp = jnp.concatenate([C, jnp.zeros((cout, 8), jnp.float32)], axis=1)
        P = None
        for p in range(5):
            s = Cp[:, 2 * p:2 * p + T]
            P = s if P is None else jnp.maximum(P, s)
        # select every 10th column with a tiny in-kernel one-hot matmul (kept in f32:
        # it is pure data movement).
        sel = (lax.broadcasted_iota(jnp.int32, (T, Tout), 0)
               == 10 * lax.broadcasted_iota(jnp.int32, (T, Tout), 1)
               ).astype(jnp.float32)
        return jnp.dot(P, sel, preferred_element_type=jnp.float32)   # [cout, Tout]

    def block(inp, T, stride_tap, wr1i, wr2i, bsi, br1i, br2i):
        To = T // 10
        C = conv5(inp, T, stride_tap)
        s = jnp.maximum(pool_sel(C, T) + bcat_ref[bsi], 0.0)          # Conv+BN -> pool -> ReLU
        r = jnp.maximum(conv5(s, To, lambda k, xs: _dot(wcat_ref[wr1i, k], xs))
                        + bcat_ref[br1i], 0.0)
        r = jnp.maximum(conv5(r, To, lambda k, xs: _dot(wcat_ref[wr2i, k], xs))
                        + bcat_ref[br2i] + s, 0.0)                    # residual + ReLU
        return r

    # block 1 (cin = 1: taps are broadcast outer products), block 2 (cin = 8: MXU taps)
    r1 = block(x, L, lambda k, xs: wst_ref[k] * xs, 0, 1, 0, 1, 2)    # [8, L/10]
    r2 = block(r1, T1, lambda k, xs: _dot(wcat_ref[2, k], xs), 3, 4, 3, 4, 5)   # [8, L/100]
    o_ref[0] = r2


def encoder_fused(x, ep, S):
    B, Cin, L = x.shape
    assert L == 100 * S, (L, S)
    hd2 = ep["wst"].shape[1]
    return pl.pallas_call(
        functools.partial(_encoder_kernel, L=L),
        out_shape=jax.ShapeDtypeStruct((B, hd2, S), jnp.float32),
        grid=(B,),
        in_specs=[pl.BlockSpec((1, Cin, L), lambda b: (b, 0, 0)),
                  _const_spec(ep["wst"].shape),
                  _const_spec(ep["wcat"].shape),
                  _const_spec(ep["bcat"].shape)],
        out_specs=pl.BlockSpec((1, hd2, S), lambda b: (b, 0, 0)),
        compiler_params=pltpu.CompilerParams(
            dimension_semantics=("parallel",), vmem_limit_bytes=_VMEM_LIMIT),
    )(x, ep["wst"], ep["wcat"], ep["bcat"])


# ----------------------------------------------------------------------------
# Kernel 2: whole DIFFormer in one kernel
# ----------------------------------------------------------------------------
def _difformer_kernel(x3_ref, adj_ref, wiop_ref, g0b0_ref, wqkvb_ref, lnl_ref,
                      o_ref, *, num_layers, num_heads, alpha):
    G, D, S = x3_ref.shape
    N = G * S
    HD = num_heads * D

    # consume the encoder's [G, hd2, S] blocks directly -> feature-major [D, N]
    x = jnp.concatenate([x3_ref[g] for g in range(G)], axis=1)

    def layer_norm(v, g, b):
        mu = jnp.mean(v, axis=0, keepdims=True)
        var = jnp.mean((v - mu) ** 2, axis=0, keepdims=True)
        return (v - mu) * lax.rsqrt(var + 1e-5) * g + b

    w_in = wiop_ref[0:D, 0:D]
    b_in = wiop_ref[0:D, D:D + 1]
    w_out = wiop_ref[D:2 * D, 0:D]
    b_out = wiop_ref[D:2 * D, D:D + 1]
    g0 = g0b0_ref[0:D]
    b0 = g0b0_ref[D:2 * D]

    x = _dot(w_in, x) + b_in
    x = jnp.maximum(layer_norm(x, g0, b0), 0.0)

    adj = adj_ref[...]
    for li in range(num_layers):
        prev = x
        wqkv = wqkvb_ref[li, :, 0:D]
        bqkv = wqkvb_ref[li, :, D:D + 1]
        qkv = _dot(wqkv, x) + bqkv                           # stacked q|k|v: [3*H*D, N]
        q = qkv[0:HD]
        k = qkv[HD:2 * HD]
        v = qkv[2 * HD:3 * HD]
        qn = q * lax.rsqrt(jnp.sum(q * q))                   # global (Frobenius) normalization
        kn = k * lax.rsqrt(jnp.sum(k * k))

        # GCN propagation term batched over heads: mean_h (v_h @ A) == (mean_h v_h) @ A
        vsum = v[0:D]
        for h in range(1, num_heads):
            vsum = vsum + v[h * D:(h + 1) * D]
        gcn = _dot(vsum * (1.0 / num_heads), adj)            # [D, N]

        attn_sum = None
        for h in range(num_heads):
            qh = qn[h * D:(h + 1) * D]
            kh = kn[h * D:(h + 1) * D]
            vh = v[h * D:(h + 1) * D]
            kvs = lax.dot_general(kh, vh, (((1,), (1,)), ((), ())),
                                  preferred_element_type=jnp.float32)      # [D, D]
            num = lax.dot_general(kvs, qh, (((0,), (0,)), ((), ())),
                                  preferred_element_type=jnp.float32)      # [D, N]
            num = num + jnp.sum(vh, axis=1, keepdims=True)
            ksum = jnp.sum(kh, axis=1, keepdims=True)                      # [D, 1]
            denom = jnp.sum(qh * ksum, axis=0, keepdims=True) + float(N)   # [1, N]
            a = num * pl.reciprocal(denom, approx=True)                    # EUP divide
            attn_sum = a if attn_sum is None else attn_sum + a

        h_out = attn_sum * (1.0 / num_heads) + gcn
        lng = lnl_ref[li, 0:D]
        lnb = lnl_ref[li, D:2 * D]
        x = layer_norm(alpha * h_out + (1.0 - alpha) * prev, lng, lnb)

    out = _dot(w_out, x) + b_out                             # [D, N]
    for g in range(G):
        o_ref[g] = out[:, g * S:(g + 1) * S]


def difformer_fused(x3, adj_gcn, dp, num_heads, alpha=0.5):
    G, D, S = x3.shape
    n_layers = int(dp["wqkvb"].shape[0])
    return pl.pallas_call(
        functools.partial(_difformer_kernel, num_layers=n_layers,
                          num_heads=num_heads, alpha=alpha),
        out_shape=jax.ShapeDtypeStruct((G, D, S), jnp.float32),
        compiler_params=pltpu.CompilerParams(vmem_limit_bytes=_VMEM_LIMIT),
    )(x3, adj_gcn, dp["wiop"], dp["g0b0"], dp["wqkvb"], dp["lnl"])


# ----------------------------------------------------------------------------
# Kernel 3: whole 2-D decoder (adj_conv + pair + scale_conv + res_blocks + mlp)
# ----------------------------------------------------------------------------
def _decoder_layout(hd2, hidden):
    """Row layout of the single packed decoder weight array [rows, 9*hidden + 1]."""
    kmax = 9 * hidden
    names = ([("a1", hd2, 9), ("a2", hidden, 9 * hd2)]
             + [("rb%d%s" % (i, s), hidden, 9 * hidden)
                for i in range(4) for s in ("a", "b")]
             + [("sc", hidden, 2 * hidden), ("m1", hidden, hidden),
                ("m2", hd2, hidden), ("m3", 1, hd2)])
    layout, off = {}, 0
    for name, cout, kk in names:
        layout[name] = (off, cout, kk)
        off = ((off + cout + 7) // 8) * 8            # keep row offsets 8-aligned
    return layout, off, kmax


def _decoder_kernel(xg_ref, adjm_ref, wpack_ref, o_ref, *, S, hd2, hidden, layout, kmax):
    HW = S * S

    # column-wrap masks, built once per graph (no DMA'd colx operand)
    f = lax.broadcasted_iota(jnp.int32, (1, HW), 1)
    col = f % S
    masks = {}
    for dil in (1, 2, 4, 8):
        masks[dil] = ((col >= dil).astype(jnp.float32),
                      (col < S - dil).astype(jnp.float32))

    def getwb(name):
        off, cout, kk = layout[name]
        return (wpack_ref[off:off + cout, 0:kk],
                wpack_ref[off:off + cout, kmax:kmax + 1])

    def conv3x3(xin, name, dil):
        """3x3 dilated conv on the flat [C, H*W] layout: 2 lane rolls for the kx shifts,
        zero-filled row-band concats for the ky shifts, one K-stacked MXU matmul."""
        w, b = getwb(name)
        ml, mr = masks[dil]
        xl = pltpu.roll(xin, dil, axis=1) * ml                 # in[.., x-dil]
        xr = pltpu.roll(xin, (HW - dil) % HW, axis=1) * mr     # in[.., x+dil]
        xc = jnp.concatenate([xl, xin, xr], axis=0)            # [3*cin, HW]
        pad = dil * S
        zrow = jnp.zeros((xc.shape[0], pad), jnp.float32)
        xu = jnp.concatenate([zrow, xc[:, 0:HW - pad]], axis=1)   # in[y-dil, ..]
        xd = jnp.concatenate([xc[:, pad:HW], zrow], axis=1)       # in[y+dil, ..]
        xs = jnp.concatenate([xu, xc, xd], axis=0)             # [9*cin, HW]
        return _dot(w, xs) + b

    # adj_conv: two 3x3 convs with folded BN + ReLU
    a = jnp.maximum(conv3x3(adjm_ref[0], "a1", 1), 0.0)        # [hd2, HW]
    a = jnp.maximum(conv3x3(a, "a2", 1), 0.0)                  # [hidden, HW]

    # pair features are never materialized in HBM and need no one-hot matmuls:
    # scale_conv decomposes as W_i@node_i + W_j@node_j + W_adj@adj + b, and the node
    # terms are computed at width S then broadcast (node_i tiles xg along lanes,
    # node_j repeats each xg column S times).
    xg = xg_ref[0]                                             # [hd2, S]
    wsc, bsc = getwb("sc")
    yi = _dot(wsc[:, 0:hd2], xg)                               # [hidden, S]
    yj = _dot(wsc[:, hd2:2 * hd2], xg)                         # [hidden, S]
    pair = jnp.concatenate([yi + yj[:, y:y + 1] for y in range(S)], axis=1)   # [hidden, HW]
    x = pair + _dot(wsc[:, 2 * hd2:], a) + bsc

    # dilated residual blocks (dil = 1, 2, 4, 8), BN folded into weights
    for bi, dil in enumerate((1, 2, 4, 8)):
        r = jnp.maximum(conv3x3(x, "rb%da" % bi, dil), 0.0)
        x = jnp.maximum(conv3x3(r, "rb%db" % bi, dil) + x, 0.0)

    # mlp: three fused 1x1 convs + ReLU
    w1, b1 = getwb("m1")
    w2, b2 = getwb("m2")
    w3, b3 = getwb("m3")
    y = jnp.maximum(_dot(w1, x) + b1, 0.0)
    y = jnp.maximum(_dot(w2, y) + b2, 0.0)
    y = jnp.maximum(_dot(w3, y) + b3, 0.0)                     # [1, HW]
    o_ref[0] = y


def decoder_fused(x3, adj_m, dp, S, hd2, hidden):
    G = x3.shape[0]
    HW = S * S
    adj_flat = adj_m.reshape(G, 1, HW)
    layout, _, kmax = _decoder_layout(hd2, hidden)
    out = pl.pallas_call(
        functools.partial(_decoder_kernel, S=S, hd2=hd2, hidden=hidden,
                          layout=layout, kmax=kmax),
        out_shape=jax.ShapeDtypeStruct((G, 1, HW), jnp.float32),
        grid=(G,),
        in_specs=[pl.BlockSpec((1, hd2, S), lambda g: (g, 0, 0)),
                  pl.BlockSpec((1, 1, HW), lambda g: (g, 0, 0)),
                  _const_spec(dp["wpack"].shape)],
        out_specs=pl.BlockSpec((1, 1, HW), lambda g: (g, 0, 0)),
        compiler_params=pltpu.CompilerParams(
            dimension_semantics=("parallel",), vmem_limit_bytes=_VMEM_LIMIT),
    )(x3, adj_flat, dp["wpack"])
    return out.reshape(G, S, S)


# ----------------------------------------------------------------------------
# Full model forward (graph construction / scatters remain XLA glue)
# ----------------------------------------------------------------------------
def graphchiar_noseq_forward(params, feats, edge_index, edge_attr, G, S, num_heads,
                             hidden_dim):
    hd2 = hidden_dim // 2

    # 1-D encoder: one fused Pallas kernel, output [G, hd2, S]
    x3 = encoder_fused(feats, params["enc"], S)

    N = G * S
    ew = edge_attr.astype(jnp.float32)
    src, dst = edge_index[0], edge_index[1]

    # degree-normalized GCN adjacency (oriented [src, dst] so the kernel computes v @ A)
    deg = jnp.zeros((N,), jnp.float32).at[dst].add(1.0)
    val = jnp.nan_to_num(ew / (jnp.sqrt(deg[dst]) * jnp.sqrt(deg[src])),
                         nan=0.0, posinf=0.0, neginf=0.0)
    adj_gcn = jnp.zeros((N, N), jnp.float32).at[src, dst].add(val)

    # DIFFormer: single fused Pallas kernel, layout stays [G, hd2, S]
    x3 = difformer_fused(x3, adj_gcn, params["dif"], num_heads)

    # adjacency image for adj_conv (index_put_ semantics)
    b_idx = src // S
    i_idx = src - b_idx * S
    j_idx = dst - b_idx * S
    adj_m = jnp.zeros((G, S, S), jnp.float32).at[b_idx, i_idx, j_idx].set(ew)

    # 2-D decoder: single fused per-graph Pallas kernel
    return decoder_fused(x3, adj_m, params["dec"], S, hd2, hidden_dim)


# ----------------------------------------------------------------------------
# Deterministic parameter initialization (synthetic weights, eval-mode BN folded into
# the weights on the host; all per-kernel weights packed into a few operands).
# ----------------------------------------------------------------------------
def init_params(key, hidden_dim=16, feature_dim=1, num_heads=4, n_layers=2, filt=5):
    hd2 = hidden_dim // 2
    cnt = [0]

    def rkey():
        cnt[0] += 1
        return jax.random.fold_in(key, cnt[0])

    def rand(shape, scale=0.1):
        return (scale * jax.random.normal(rkey(), shape)).astype(jnp.float32)

    def bn_fold(C, conv_bias):
        gamma = 1.0 + rand((C,), 0.1)
        beta = rand((C,), 0.1)
        mean = rand((C,), 0.1)
        var = 1.0 + 0.1 * jax.random.uniform(rkey(), (C,), dtype=jnp.float32)
        scale = gamma / jnp.sqrt(var + 1e-5)
        bias = beta + scale * (conv_bias - mean)
        return scale, bias                                     # [C], [C]

    def fold1d(w, conv_bias):                                  # w [Cout,Cin,K] -> [K,Cout,Cin]
        scale, bias = bn_fold(w.shape[0], conv_bias)
        return jnp.transpose(w * scale[:, None, None], (2, 0, 1)), bias[:, None]

    def fold2d_flat(w, conv_bias):                             # w [Cout,Cin,3,3] -> [Cout,9*Cin]
        scale, bias = bn_fold(w.shape[0], conv_bias)
        Cout, Cin = w.shape[0], w.shape[1]
        wf = (w * scale[:, None, None, None]).reshape(Cout, Cin, 9)
        return jnp.transpose(wf, (0, 2, 1)).reshape(Cout, 9 * Cin), bias

    params = {}

    # ---- encoder: two ConvBlocks (resolution=100 -> hidden channel list [fd, 8, 8]) ----
    hiddens = [feature_dim, 8, 8] if feature_dim < 8 else [feature_dim, 16, 16]
    enc_ws, enc_wr, enc_b = [], [], []
    for i in range(len(hiddens) - 1):
        cin, cout = hiddens[i], hiddens[i + 1]
        ws, bs = fold1d(rand((cout, cin, filt), 0.3), rand((cout,), 0.1))
        wr1, br1 = fold1d(rand((cout, cout, filt), 0.2), rand((cout,), 0.1))
        wr2, br2 = fold1d(rand((cout, cout, filt), 0.2), rand((cout,), 0.1))
        enc_ws.append(ws)
        enc_wr.extend([wr1, wr2])
        enc_b.extend([bs, br1, br2])
    params["enc"] = dict(
        wst=enc_ws[0],                                                        # [5, 8, 1]
        wcat=jnp.stack([enc_wr[0], enc_wr[1], enc_ws[1], enc_wr[2], enc_wr[3]]),  # [5,5,8,8]
        bcat=jnp.stack(enc_b))                                                # [6, 8, 1]

    # ---- DIFFormer (in = hid = out = hd2, LayerNorm-style norm, alpha=0.5) ----
    D = hd2
    HD = D * num_heads
    wqkvb, lnl = [], []
    for _ in range(n_layers):
        wq = rand((HD, D), 0.3); bq = rand((HD,), 0.05)
        wk = rand((HD, D), 0.3); bk = rand((HD,), 0.05)
        wv = rand((HD, D), 0.3); bv = rand((HD,), 0.05)
        w = jnp.concatenate([wq, wk, wv], axis=0)
        b = jnp.concatenate([bq, bk, bv], axis=0)[:, None]
        wqkvb.append(jnp.concatenate([w, b], axis=1))          # [3HD, D+1]
        lng = (1.0 + rand((D,), 0.1))[:, None]
        lnb = rand((D,), 0.05)[:, None]
        lnl.append(jnp.concatenate([lng, lnb], axis=0))        # [2D, 1]
    w_in = rand((D, D), 0.3); b_in = rand((D,), 0.05)[:, None]
    w_out = rand((D, D), 0.3); b_out = rand((D,), 0.05)[:, None]
    wiop = jnp.concatenate([jnp.concatenate([w_in, b_in], axis=1),
                            jnp.concatenate([w_out, b_out], axis=1)], axis=0)   # [2D, D+1]
    g0 = (1.0 + rand((D,), 0.1))[:, None]
    b0 = rand((D,), 0.05)[:, None]
    params["dif"] = dict(wiop=wiop, g0b0=jnp.concatenate([g0, b0], axis=0),
                         wqkvb=jnp.stack(wqkvb), lnl=jnp.stack(lnl))

    # ---- decoder: adj_conv, scale_conv, res_blocks, mlp -> ONE packed array ----
    hidden = hidden_dim
    layout, rows, kmax = _decoder_layout(hd2, hidden)
    entries = {}
    entries["a1"] = fold2d_flat(rand((hd2, 1, 3, 3), 0.3), rand((hd2,), 0.05))
    entries["a2"] = fold2d_flat(rand((hidden, hd2, 3, 3), 0.2), rand((hidden,), 0.05))
    for i in range(4):
        entries["rb%da" % i] = fold2d_flat(rand((hidden, hidden, 3, 3), 0.1),
                                           rand((hidden,), 0.05))
        entries["rb%db" % i] = fold2d_flat(rand((hidden, hidden, 3, 3), 0.1),
                                           rand((hidden,), 0.05))
    entries["sc"] = (rand((hidden, 2 * hidden), 0.2), rand((hidden,), 0.05))
    entries["m1"] = (rand((hidden, hidden), 0.2), rand((hidden,), 0.05))
    entries["m2"] = (rand((hd2, hidden), 0.2), rand((hd2,), 0.05))
    entries["m3"] = (rand((1, hd2), 0.2), rand((1,), 0.05))
    wpack = jnp.zeros((rows, kmax + 1), jnp.float32)
    for name, (w, b) in entries.items():
        off, cout, kk = layout[name]
        wpack = wpack.at[off:off + cout, 0:kk].set(w)
        wpack = wpack.at[off:off + cout, kmax].set(b)
    params["dec"] = dict(wpack=wpack)
    return params


# ----------------------------------------------------------------------------
if __name__ == "__main__":
    key = jax.random.PRNGKey(0)

    # resolution=100, window_size=1600 -> matrix_size = 16 nodes per graph,
    # hidden_dim=16 (so hidden_dim//2 = 8 matches the conv-block output channels),
    # feature_dim=1, 2 graphs in the batch.
    G, S = 2, 16
    L = 1600
    feature_dim, hidden_dim, num_heads = 1, 16, 4

    params = init_params(jax.random.fold_in(key, 1), hidden_dim=hidden_dim,
                         feature_dim=feature_dim, num_heads=num_heads)

    feats = jax.random.normal(jax.random.fold_in(key, 2), (G, feature_dim, L),
                              dtype=jnp.float32)

    # deterministic graph: within each graph, ring edges at distances 1 and 2 (both directions)
    src_list, dst_list = [], []
    for g in range(G):
        for s in range(S):
            a = g * S + s
            for d in (1, 2):
                b = g * S + (s + d) % S
                src_list += [a, b]
                dst_list += [b, a]
    edge_index = jnp.array([src_list, dst_list], dtype=jnp.int32)
    E = edge_index.shape[1]
    edge_attr = jax.random.uniform(jax.random.fold_in(key, 3), (E,),
                                   minval=0.1, maxval=1.0).astype(jnp.float32)

    fwd = jax.jit(functools.partial(graphchiar_noseq_forward, G=G, S=S,
                                    num_heads=num_heads, hidden_dim=hidden_dim))
    out = fwd(params, feats, edge_index, edge_attr)
    out = jax.block_until_ready(out)
    assert out.shape == (G, S, S), out.shape
    print("KERNEL_OK")
</pallas_src>

<mosaic_0001>
module attributes {stable_mosaic.version = 11 : i64} {
  func.func private @main(%arg0: i32) attributes {dimension_semantics = [#tpu.dimension_semantics<core_parallel>], iteration_bounds = array<i64: 2>, tpu.core_type = #tpu.core_type<sc_scalar_subcore>, window_params = []} {
    return
  }
}

module attributes {stable_mosaic.version = 11 : i64} {
  func.func private @main(%arg0: i32) attributes {dimension_semantics = [#tpu.dimension_semantics<core_parallel>], iteration_bounds = array<i64: 2>, tpu.core_type = #tpu.core_type<sc_scalar_subcore>, window_params = []} {
    return
  }
}

module attributes {stable_mosaic.version = 11 : i64} {
  func.func @_difformer_kernel(%arg0: memref<2x8x16xf32, #tpu.memory_space<vmem>>, %arg1: memref<32x32xf32, #tpu.memory_space<vmem>>, %arg2: memref<16x9xf32, #tpu.memory_space<vmem>>, %arg3: memref<16x1xf32, #tpu.memory_space<vmem>>, %arg4: memref<2x96x9xf32, #tpu.memory_space<vmem>>, %arg5: memref<2x16x1xf32, #tpu.memory_space<vmem>>, %arg6: memref<2x8x16xf32, #tpu.memory_space<vmem>>) attributes {dimension_semantics = [], scalar_prefetch = 0 : i64, scratch_operands = 0 : i64, tpu.core_type = #tpu.core_type<tc>} {
    %c0 = arith.constant 0 : index
    %c0_0 = arith.constant 0 : index
    %c0_1 = arith.constant 0 : index
    %0 = vector.load %arg0[%c0, %c0_0, %c0_1] : memref<2x8x16xf32, #tpu.memory_space<vmem>>, vector<1x8x16xf32>
    %1 = vector.shape_cast %0 : vector<1x8x16xf32> to vector<8x16xf32>
    %c1 = arith.constant 1 : index
    %c0_2 = arith.constant 0 : index
    %c0_3 = arith.constant 0 : index
    %2 = vector.load %arg0[%c1, %c0_2, %c0_3] : memref<2x8x16xf32, #tpu.memory_space<vmem>>, vector<1x8x16xf32>
    %3 = vector.shape_cast %2 : vector<1x8x16xf32> to vector<8x16xf32>
    %4 = tpu.concatenate %1, %3 in 1 : vector<8x16xf32>, vector<8x16xf32> -> vector<8x32xf32>
    %c0_4 = arith.constant 0 : index
    %c0_5 = arith.constant 0 : index
    %5 = vector.load %arg2[%c0_4, %c0_5] : memref<16x9xf32, #tpu.memory_space<vmem>>, vector<8x8xf32>
    %c0_6 = arith.constant 0 : index
    %c8 = arith.constant 8 : index
    %6 = vector.load %arg2[%c0_6, %c8] : memref<16x9xf32, #tpu.memory_space<vmem>>, vector<8x1xf32>
    %c8_7 = arith.constant 8 : index
    %c0_8 = arith.constant 0 : index
    %7 = vector.load %arg2[%c8_7, %c0_8] : memref<16x9xf32, #tpu.memory_space<vmem>>, vector<8x8xf32>
    %c8_9 = arith.constant 8 : index
    %c8_10 = arith.constant 8 : index
    %8 = vector.load %arg2[%c8_9, %c8_10] : memref<16x9xf32, #tpu.memory_space<vmem>>, vector<8x1xf32>
    %c0_11 = arith.constant 0 : index
    %c0_12 = arith.constant 0 : index
    %9 = vector.load %arg3[%c0_11, %c0_12] : memref<16x1xf32, #tpu.memory_space<vmem>>, vector<8x1xf32>
    %c8_13 = arith.constant 8 : index
    %c0_14 = arith.constant 0 : index
    %10 = vector.load %arg3[%c8_13, %c0_14] : memref<16x1xf32, #tpu.memory_space<vmem>>, vector<8x1xf32>
    %11 = arith.truncf %5 : vector<8x8xf32> to vector<8x8xbf16>
    %12 = arith.truncf %4 : vector<8x32xf32> to vector<8x32xbf16>
    %cst = arith.constant dense<0.000000e+00> : vector<8x32xf32>
    %13 = tpu.matmul %11, %12, %cst {dimension_numbers = #tpu.dot_dimension_numbers<[1], [0], [0], [1], [0, 0, 1, 1], [], []>} : vector<8x8xbf16>, vector<8x32xbf16>, vector<8x32xf32> -> vector<8x32xf32>
    %14 = vector.broadcast %6 : vector<8x1xf32> to vector<8x32xf32>
    %15 = arith.addf %13, %14 : vector<8x32xf32>
    %cst_15 = arith.constant dense<0.000000e+00> : vector<32xf32>
    %16 = vector.multi_reduction <add>, %15, %cst_15 [0] : vector<8x32xf32> to vector<32xf32>
    %17 = vector.shape_cast %16 : vector<32xf32> to vector<1x32xf32>
    %cst_16 = arith.constant 8.000000e+00 : f32
    %18 = vector.broadcast %cst_16 : f32 to vector<1x32xf32>
    %19 = arith.divf %17, %18 : vector<1x32xf32>
    %20 = vector.broadcast %19 : vector<1x32xf32> to vector<8x32xf32>
    %21 = arith.subf %15, %20 : vector<8x32xf32>
    %22 = arith.mulf %21, %21 : vector<8x32xf32>
    %cst_17 = arith.constant dense<0.000000e+00> : vector<32xf32>
    %23 = vector.multi_reduction <add>, %22, %cst_17 [0] : vector<8x32xf32> to vector<32xf32>
    %24 = vector.shape_cast %23 : vector<32xf32> to vector<1x32xf32>
    %cst_18 = arith.constant 8.000000e+00 : f32
    %25 = vector.broadcast %cst_18 : f32 to vector<1x32xf32>
    %26 = arith.divf %24, %25 : vector<1x32xf32>
    %27 = vector.broadcast %19 : vector<1x32xf32> to vector<8x32xf32>
    %28 = arith.subf %15, %27 : vector<8x32xf32>
    %cst_19 = arith.constant 9.99999974E-6 : f32
    %29 = vector.broadcast %cst_19 : f32 to vector<1x32xf32>
    %30 = arith.addf %26, %29 : vector<1x32xf32>
    %31 = math.rsqrt %30 : vector<1x32xf32>
    %32 = vector.broadcast %31 : vector<1x32xf32> to vector<8x32xf32>
    %33 = arith.mulf %28, %32 : vector<8x32xf32>
    %34 = vector.broadcast %9 : vector<8x1xf32> to vector<8x32xf32>
    %35 = arith.mulf %33, %34 : vector<8x32xf32>
    %36 = vector.broadcast %10 : vector<8x1xf32> to vector<8x32xf32>
    %37 = arith.addf %35, %36 : vector<8x32xf32>
    %cst_20 = arith.constant 0.000000e+00 : f32
    %38 = vector.broadcast %cst_20 : f32 to vector<8x32xf32>
    %39 = arith.maximumf %37, %38 : vector<8x32xf32>
    %c0_21 = arith.constant 0 : index
    %c0_22 = arith.constant 0 : index
    %40 = vector.load %arg1[%c0_21, %c0_22] : memref<32x32xf32, #tpu.memory_space<vmem>>, vector<32x32xf32>
    %c0_23 = arith.constant 0 : index
    %c0_24 = arith.constant 0 : index
    %c0_25 = arith.constant 0 : index
    %41 = vector.load %arg4[%c0_23, %c0_24, %c0_25] : memref<2x96x9xf32, #tpu.memory_space<vmem>>, vector<1x96x8xf32>
    %42 = vector.shape_cast %41 : vector<1x96x8xf32> to vector<96x8xf32>
    %c0_26 = arith.constant 0 : index
    %c0_27 = arith.constant 0 : index
    %c8_28 = arith.constant 8 : index
    %43 = vector.load %arg4[%c0_26, %c0_27, %c8_28] : memref<2x96x9xf32, #tpu.memory_space<vmem>>, vector<1x96x1xf32>
    %44 = vector.shape_cast %43 : vector<1x96x1xf32> to vector<96x1xf32>
    %45 = arith.truncf %42 : vector<96x8xf32> to vector<96x8xbf16>
    %46 = arith.truncf %39 : vector<8x32xf32> to vector<8x32xbf16>
    %cst_29 = arith.constant dense<0.000000e+00> : vector<96x32xf32>
    %47 = tpu.matmul %45, %46, %cst_29 {dimension_numbers = #tpu.dot_dimension_numbers<[1], [0], [0], [1], [0, 0, 1, 1], [], []>} : vector<96x8xbf16>, vector<8x32xbf16>, vector<96x32xf32> -> vector<96x32xf32>
    %48 = vector.broadcast %44 : vector<96x1xf32> to vector<96x32xf32>
    %49 = arith.addf %47, %48 : vector<96x32xf32>
    %50 = vector.extract_strided_slice %49 {offsets = [0, 0], sizes = [32, 32], strides = [1, 1]} : vector<96x32xf32> to vector<32x32xf32>
    %51 = vector.extract_strided_slice %49 {offsets = [32, 0], sizes = [32, 32], strides = [1, 1]} : vector<96x32xf32> to vector<32x32xf32>
    %52 = vector.extract_strided_slice %49 {offsets = [64, 0], sizes = [32, 32], strides = [1, 1]} : vector<96x32xf32> to vector<32x32xf32>
    %53 = arith.mulf %50, %50 : vector<32x32xf32>
    %54 = vector.shape_cast %53 : vector<32x32xf32> to vector<1x32x32xf32>
    %cst_30 = arith.constant dense<0.000000e+00> : vector<1xf32>
    %55 = vector.multi_reduction <add>, %54, %cst_30 [1, 2] : vector<1x32x32xf32> to vector<1xf32>
    %56 = vector.shape_cast %55 : vector<1xf32> to vector<1x1x1xf32>
    %57 = vector.extract %56[0, 0, 0] : f32 from vector<1x1x1xf32>
    %58 = math.rsqrt %57 : f32
    %59 = vector.broadcast %58 : f32 to vector<32x32xf32>
    %60 = arith.mulf %50, %59 : vector<32x32xf32>
    %61 = arith.mulf %51, %51 : vector<32x32xf32>
    %62 = vector.shape_cast %61 : vector<32x32xf32> to vector<1x32x32xf32>
    %cst_31 = arith.constant dense<0.000000e+00> : vector<1xf32>
    %63 = vector.multi_reduction <add>, %62, %cst_31 [1, 2] : vector<1x32x32xf32> to vector<1xf32>
    %64 = vector.shape_cast %63 : vector<1xf32> to vector<1x1x1xf32>
    %65 = vector.extract %64[0, 0, 0] : f32 from vector<1x1x1xf32>
    %66 = math.rsqrt %65 : f32
    %67 = vector.broadcast %66 : f32 to vector<32x32xf32>
    %68 = arith.mulf %51, %67 : vector<32x32xf32>
    %69 = vector.extract_strided_slice %52 {offsets = [0, 0], sizes = [8, 32], strides = [1, 1]} : vector<32x32xf32> to vector<8x32xf32>
    %70 = vector.extract_strided_slice %52 {offsets = [8, 0], sizes = [8, 32], strides = [1, 1]} : vector<32x32xf32> to vector<8x32xf32>
    %71 = arith.addf %69, %70 : vector<8x32xf32>
    %72 = vector.extract_strided_slice %52 {offsets = [16, 0], sizes = [8, 32], strides = [1, 1]} : vector<32x32xf32> to vector<8x32xf32>
    %73 = arith.addf %71, %72 : vector<8x32xf32>
    %74 = vector.extract_strided_slice %52 {offsets = [24, 0], sizes = [8, 32], strides = [1, 1]} : vector<32x32xf32> to vector<8x32xf32>
    %75 = arith.addf %73, %74 : vector<8x32xf32>
    %cst_32 = arith.constant 2.500000e-01 : f32
    %76 = vector.broadcast %cst_32 : f32 to vector<8x32xf32>
    %77 = arith.mulf %75, %76 : vector<8x32xf32>
    %78 = arith.truncf %77 : vector<8x32xf32> to vector<8x32xbf16>
    %79 = arith.truncf %40 : vector<32x32xf32> to vector<32x32xbf16>
    %cst_33 = arith.constant dense<0.000000e+00> : vector<8x32xf32>
    %80 = tpu.matmul %78, %79, %cst_33 {dimension_numbers = #tpu.dot_dimension_numbers<[1], [0], [0], [1], [0, 0, 1, 1], [], []>} : vector<8x32xbf16>, vector<32x32xbf16>, vector<8x32xf32> -> vector<8x32xf32>
    %81 = vector.extract_strided_slice %60 {offsets = [0, 0], sizes = [8, 32], strides = [1, 1]} : vector<32x32xf32> to vector<8x32xf32>
    %82 = vector.extract_strided_slice %68 {offsets = [0, 0], sizes = [8, 32], strides = [1, 1]} : vector<32x32xf32> to vector<8x32xf32>
    %83 = vector.extract_strided_slice %52 {offsets = [0, 0], sizes = [8, 32], strides = [1, 1]} : vector<32x32xf32> to vector<8x32xf32>
    %cst_34 = arith.constant dense<0.000000e+00> : vector<8x8xf32>
    %84 = tpu.matmul %82, %83, %cst_34 {dimension_numbers = #tpu.dot_dimension_numbers<[1], [1], [0], [0], [0, 0, 1, 0], [], []>} : vector<8x32xf32>, vector<8x32xf32>, vector<8x8xf32> -> vector<8x8xf32>
    %cst_35 = arith.constant dense<0.000000e+00> : vector<8x32xf32>
    %85 = tpu.matmul %84, %81, %cst_35 {dimension_numbers = #tpu.dot_dimension_numbers<[0], [0], [1], [1], [0, 1, 1, 1], [], []>} : vector<8x8xf32>, vector<8x32xf32>, vector<8x32xf32> -> vector<8x32xf32>
    %cst_36 = arith.constant dense<0.000000e+00> : vector<8xf32>
    %86 = vector.multi_reduction <add>, %83, %cst_36 [1] : vector<8x32xf32> to vector<8xf32>
    %87 = vector.shape_cast %86 : vector<8xf32> to vector<8x1xf32>
    %88 = vector.broadcast %87 : vector<8x1xf32> to vector<8x32xf32>
    %89 = arith.addf %85, %88 : vector<8x32xf32>
    %cst_37 = arith.constant dense<0.000000e+00> : vector<8xf32>
    %90 = vector.multi_reduction <add>, %82, %cst_37 [1] : vector<8x32xf32> to vector<8xf32>
    %91 = vector.shape_cast %90 : vector<8xf32> to vector<8x1xf32>
    %92 = vector.broadcast %91 : vector<8x1xf32> to vector<8x32xf32>
    %93 = arith.mulf %81, %92 : vector<8x32xf32>
    %cst_38 = arith.constant dense<0.000000e+00> : vector<32xf32>
    %94 = vector.multi_reduction <add>, %93, %cst_38 [0] : vector<8x32xf32> to vector<32xf32>
    %95 = vector.shape_cast %94 : vector<32xf32> to vector<1x32xf32>
    %cst_39 = arith.constant 3.200000e+01 : f32
    %96 = vector.broadcast %cst_39 : f32 to vector<1x32xf32>
    %97 = arith.addf %95, %96 : vector<1x32xf32>
    %98 = tpu.reciprocal %97 {approx = true} : vector<1x32xf32> -> vector<1x32xf32>
    %99 = vector.broadcast %98 : vector<1x32xf32> to vector<8x32xf32>
    %100 = arith.mulf %89, %99 : vector<8x32xf32>
    %101 = vector.extract_strided_slice %60 {offsets = [8, 0], sizes = [8, 32], strides = [1, 1]} : vector<32x32xf32> to vector<8x32xf32>
    %102 = vector.extract_strided_slice %68 {offsets = [8, 0], sizes = [8, 32], strides = [1, 1]} : vector<32x32xf32> to vector<8x32xf32>
    %103 = vector.extract_strided_slice %52 {offsets = [8, 0], sizes = [8, 32], strides = [1, 1]} : vector<32x32xf32> to vector<8x32xf32>
    %cst_40 = arith.constant dense<0.000000e+00> : vector<8x8xf32>
    %104 = tpu.matmul %102, %103, %cst_40 {dimension_numbers = #tpu.dot_dimension_numbers<[1], [1], [0], [0], [0, 0, 1, 0], [], []>} : vector<8x32xf32>, vector<8x32xf32>, vector<8x8xf32> -> vector<8x8xf32>
    %cst_41 = arith.constant dense<0.000000e+00> : vector<8x32xf32>
    %105 = tpu.matmul %104, %101, %cst_41 {dimension_numbers = #tpu.dot_dimension_numbers<[0], [0], [1], [1], [0, 1, 1, 1], [], []>} : vector<8x8xf32>, vector<8x32xf32>, vector<8x32xf32> -> vector<8x32xf32>
    %cst_42 = arith.constant dense<0.000000e+00> : vector<8xf32>
    %106 = vector.multi_reduction <add>, %103, %cst_42 [1] : vector<8x32xf32> to vector<8xf32>
    %107 = vector.shape_cast %106 : vector<8xf32> to vector<8x1xf32>
    %108 = vector.broadcast %107 : vector<8x1xf32> to vector<8x32xf32>
    %109 = arith.addf %105, %108 : vector<8x32xf32>
    %cst_43 = arith.constant dense<0.000000e+00> : vector<8xf32>
    %110 = vector.multi_reduction <add>, %102, %cst_43 [1] : vector<8x32xf32> to vector<8xf32>
    %111 = vector.shape_cast %110 : vector<8xf32> to vector<8x1xf32>
    %112 = vector.broadcast %111 : vector<8x1xf32> to vector<8x32xf32>
    %113 = arith.mulf %101, %112 : vector<8x32xf32>
    %cst_44 = arith.constant dense<0.000000e+00> : vector<32xf32>
    %114 = vector.multi_reduction <add>, %113, %cst_44 [0] : vector<8x32xf32> to vector<32xf32>
    %115 = vector.shape_cast %114 : vector<32xf32> to vector<1x32xf32>
    %cst_45 = arith.constant 3.200000e+01 : f32
    %116 = vector.broadcast %cst_45 : f32 to vector<1x32xf32>
    %117 = arith.addf %115, %116 : vector<1x32xf32>
    %118 = tpu.reciprocal %117 {approx = true} : vector<1x32xf32> -> vector<1x32xf32>
    %119 = vector.broadcast %118 : vector<1x32xf32> to vector<8x32xf32>
    %120 = arith.mulf %109, %119 : vector<8x32xf32>
    %121 = arith.addf %100, %120 : vector<8x32xf32>
    %122 = vector.extract_strided_slice %60 {offsets = [16, 0], sizes = [8, 32], strides = [1, 1]} : vector<32x32xf32> to vector<8x32xf32>
    %123 = vector.extract_strided_slice %68 {offsets = [16, 0], sizes = [8, 32], strides = [1, 1]} : vector<32x32xf32> to vector<8x32xf32>
    %124 = vector.extract_strided_slice %52 {offsets = [16, 0], sizes = [8, 32], strides = [1, 1]} : vector<32x32xf32> to vector<8x32xf32>
    %cst_46 = arith.constant dense<0.000000e+00> : vector<8x8xf32>
    %125 = tpu.matmul %123, %124, %cst_46 {dimension_numbers = #tpu.dot_dimension_numbers<[1], [1], [0], [0], [0, 0, 1, 0], [], []>} : vector<8x32xf32>, vector<8x32xf32>, vector<8x8xf32> -> vector<8x8xf32>
    %cst_47 = arith.constant dense<0.000000e+00> : vector<8x32xf32>
    %126 = tpu.matmul %125, %122, %cst_47 {dimension_numbers = #tpu.dot_dimension_numbers<[0], [0], [1], [1], [0, 1, 1, 1], [], []>} : vector<8x8xf32>, vector<8x32xf32>, vector<8x32xf32> -> vector<8x32xf32>
    %cst_48 = arith.constant dense<0.000000e+00> : vector<8xf32>
    %127 = vector.multi_reduction <add>, %124, %cst_48 [1] : vector<8x32xf32> to vector<8xf32>
    %128 = vector.shape_cast %127 : vector<8xf32> to vector<8x1xf32>
    %129 = vector.broadcast %128 : vector<8x1xf32> to vector<8x32xf32>
    %130 = arith.addf %126, %129 : vector<8x32xf32>
    %cst_49 = arith.constant dense<0.000000e+00> : vector<8xf32>
    %131 = vector.multi_reduction <add>, %123, %cst_49 [1] : vector<8x32xf32> to vector<8xf32>
    %132 = vector.shape_cast %131 : vector<8xf32> to vector<8x1xf32>
    %133 = vector.broadcast %132 : vector<8x1xf32> to vector<8x32xf32>
    %134 = arith.mulf %122, %133 : vector<8x32xf32>
    %cst_50 = arith.constant dense<0.000000e+00> : vector<32xf32>
    %135 = vector.multi_reduction <add>, %134, %cst_50 [0] : vector<8x32xf32> to vector<32xf32>
    %136 = vector.shape_cast %135 : vector<32xf32> to vector<1x32xf32>
    %cst_51 = arith.constant 3.200000e+01 : f32
    %137 = vector.broadcast %cst_51 : f32 to vector<1x32xf32>
    %138 = arith.addf %136, %137 : vector<1x32xf32>
    %139 = tpu.reciprocal %138 {approx = true} : vector<1x32xf32> -> vector<1x32xf32>
    %140 = vector.broadcast %139 : vector<1x32xf32> to vector<8x32xf32>
    %141 = arith.mulf %130, %140 : vector<8x32xf32>
    %142 = arith.addf %121, %141 : vector<8x32xf32>
    %143 = vector.extract_strided_slice %60 {offsets = [24, 0], sizes = [8, 32], strides = [1, 1]} : vector<32x32xf32> to vector<8x32xf32>
    %144 = vector.extract_strided_slice %68 {offsets = [24, 0], sizes = [8, 32], strides = [1, 1]} : vector<32x32xf32> to vector<8x32xf32>
    %145 = vector.extract_strided_slice %52 {offsets = [24, 0], sizes = [8, 32], strides = [1, 1]} : vector<32x32xf32> to vector<8x32xf32>
    %cst_52 = arith.constant dense<0.000000e+00> : vector<8x8xf32>
    %146 = tpu.matmul %144, %145, %cst_52 {dimension_numbers = #tpu.dot_dimension_numbers<[1], [1], [0], [0], [0, 0, 1, 0], [], []>} : vector<8x32xf32>, vector<8x32xf32>, vector<8x8xf32> -> vector<8x8xf32>
    %cst_53 = arith.constant dense<0.000000e+00> : vector<8x32xf32>
    %147 = tpu.matmul %146, %143, %cst_53 {dimension_numbers = #tpu.dot_dimension_numbers<[0], [0], [1], [1], [0, 1, 1, 1], [], []>} : vector<8x8xf32>, vector<8x32xf32>, vector<8x32xf32> -> vector<8x32xf32>
    %cst_54 = arith.constant dense<0.000000e+00> : vector<8xf32>
    %148 = vector.multi_reduction <add>, %145, %cst_54 [1] : vector<8x32xf32> to vector<8xf32>
    %149 = vector.shape_cast %148 : vector<8xf32> to vector<8x1xf32>
    %150 = vector.broadcast %149 : vector<8x1xf32> to vector<8x32xf32>
    %151 = arith.addf %147, %150 : vector<8x32xf32>
    %cst_55 = arith.constant dense<0.000000e+00> : vector<8xf32>
    %152 = vector.multi_reduction <add>, %144, %cst_55 [1] : vector<8x32xf32> to vector<8xf32>
    %153 = vector.shape_cast %152 : vector<8xf32> to vector<8x1xf32>
    %154 = vector.broadcast %153 : vector<8x1xf32> to vector<8x32xf32>
    %155 = arith.mulf %143, %154 : vector<8x32xf32>
    %cst_56 = arith.constant dense<0.000000e+00> : vector<32xf32>
    %156 = vector.multi_reduction <add>, %155, %cst_56 [0] : vector<8x32xf32> to vector<32xf32>
    %157 = vector.shape_cast %156 : vector<32xf32> to vector<1x32xf32>
    %cst_57 = arith.constant 3.200000e+01 : f32
    %158 = vector.broadcast %cst_57 : f32 to vector<1x32xf32>
    %159 = arith.addf %157, %158 : vector<1x32xf32>
    %160 = tpu.reciprocal %159 {approx = true} : vector<1x32xf32> -> vector<1x32xf32>
    %161 = vector.broadcast %160 : vector<1x32xf32> to vector<8x32xf32>
    %162 = arith.mulf %151, %161 : vector<8x32xf32>
    %163 = arith.addf %142, %162 : vector<8x32xf32>
    %cst_58 = arith.constant 2.500000e-01 : f32
    %164 = vector.broadcast %cst_58 : f32 to vector<8x32xf32>
    %165 = arith.mulf %163, %164 : vector<8x32xf32>
    %166 = arith.addf %165, %80 : vector<8x32xf32>
    %c0_59 = arith.constant 0 : index
    %c0_60 = arith.constant 0 : index
    %c0_61 = arith.constant 0 : index
    %167 = vector.load %arg5[%c0_59, %c0_60, %c0_61] : memref<2x16x1xf32, #tpu.memory_space<vmem>>, vector<1x8x1xf32>
    %168 = vector.shape_cast %167 : vector<1x8x1xf32> to vector<8x1xf32>
    %c0_62 = arith.constant 0 : index
    %c8_63 = arith.constant 8 : index
    %c0_64 = arith.constant 0 : index
    %169 = vector.load %arg5[%c0_62, %c8_63, %c0_64] : memref<2x16x1xf32, #tpu.memory_space<vmem>>, vector<1x8x1xf32>
    %170 = vector.shape_cast %169 : vector<1x8x1xf32> to vector<8x1xf32>
    %cst_65 = arith.constant 5.000000e-01 : f32
    %171 = vector.broadcast %cst_65 : f32 to vector<8x32xf32>
    %172 = arith.mulf %171, %166 : vector<8x32xf32>
    %cst_66 = arith.constant 5.000000e-01 : f32
    %173 = vector.broadcast %cst_66 : f32 to vector<8x32xf32>
    %174 = arith.mulf %173, %39 : vector<8x32xf32>
    %175 = arith.addf %172, %174 : vector<8x32xf32>
    %cst_67 = arith.constant dense<0.000000e+00> : vector<32xf32>
    %176 = vector.multi_reduction <add>, %175, %cst_67 [0] : vector<8x32xf32> to vector<32xf32>
    %177 = vector.shape_cast %176 : vector<32xf32> to vector<1x32xf32>
    %cst_68 = arith.constant 8.000000e+00 : f32
    %178 = vector.broadcast %cst_68 : f32 to vector<1x32xf32>
    %179 = arith.divf %177, %178 : vector<1x32xf32>
    %180 = vector.broadcast %179 : vector<1x32xf32> to vector<8x32xf32>
    %181 = arith.subf %175, %180 : vector<8x32xf32>
    %182 = arith.mulf %181, %181 : vector<8x32xf32>
    %cst_69 = arith.constant dense<0.000000e+00> : vector<32xf32>
    %183 = vector.multi_reduction <add>, %182, %cst_69 [0] : vector<8x32xf32> to vector<32xf32>
    %184 = vector.shape_cast %183 : vector<32xf32> to vector<1x32xf32>
    %cst_70 = arith.constant 8.000000e+00 : f32
    %185 = vector.broadcast %cst_70 : f32 to vector<1x32xf32>
    %186 = arith.divf %184, %185 : vector<1x32xf32>
    %187 = vector.broadcast %179 : vector<1x32xf32> to vector<8x32xf32>
    %188 = arith.subf %175, %187 : vector<8x32xf32>
    %cst_71 = arith.constant 9.99999974E-6 : f32
    %189 = vector.broadcast %cst_71 : f32 to vector<1x32xf32>
    %190 = arith.addf %186, %189 : vector<1x32xf32>
    %191 = math.rsqrt %190 : vector<1x32xf32>
    %192 = vector.broadcast %191 : vector<1x32xf32> to vector<8x32xf32>
    %193 = arith.mulf %188, %192 : vector<8x32xf32>
    %194 = vector.broadcast %168 : vector<8x1xf32> to vector<8x32xf32>
    %195 = arith.mulf %193, %194 : vector<8x32xf32>
    %196 = vector.broadcast %170 : vector<8x1xf32> to vector<8x32xf32>
    %197 = arith.addf %195, %196 : vector<8x32xf32>
    %c1_72 = arith.constant 1 : index
    %c0_73 = arith.constant 0 : index
    %c0_74 = arith.constant 0 : index
    %198 = vector.load %arg4[%c1_72, %c0_73, %c0_74] : memref<2x96x9xf32, #tpu.memory_space<vmem>>, vector<1x96x8xf32>
    %199 = vector.shape_cast %198 : vector<1x96x8xf32> to vector<96x8xf32>
    %c1_75 = arith.constant 1 : index
    %c0_76 = arith.constant 0 : index
    %c8_77 = arith.constant 8 : index
    %200 = vector.load %arg4[%c1_75, %c0_76, %c8_77] : memref<2x96x9xf32, #tpu.memory_space<vmem>>, vector<1x96x1xf32>
    %201 = vector.shape_cast %200 : vector<1x96x1xf32> to vector<96x1xf32>
    %202 = arith.truncf %199 : vector<96x8xf32> to vector<96x8xbf16>
    %203 = arith.truncf %197 : vector<8x32xf32> to vector<8x32xbf16>
    %cst_78 = arith.constant dense<0.000000e+00> : vector<96x32xf32>
    %204 = tpu.matmul %202, %203, %cst_78 {dimension_numbers = #tpu.dot_dimension_numbers<[1], [0], [0], [1], [0, 0, 1, 1], [], []>} : vector<96x8xbf16>, vector<8x32xbf16>, vector<96x32xf32> -> vector<96x32xf32>
    %205 = vector.broadcast %201 : vector<96x1xf32> to vector<96x32xf32>
    %206 = arith.addf %204, %205 : vector<96x32xf32>
    %207 = vector.extract_strided_slice %206 {offsets = [0, 0], sizes = [32, 32], strides = [1, 1]} : vector<96x32xf32> to vector<32x32xf32>
    %208 = vector.extract_strided_slice %206 {offsets = [32, 0], sizes = [32, 32], strides = [1, 1]} : vector<96x32xf32> to vector<32x32xf32>
    %209 = vector.extract_strided_slice %206 {offsets = [64, 0], sizes = [32, 32], strides = [1, 1]} : vector<96x32xf32> to vector<32x32xf32>
    %210 = arith.mulf %207, %207 : vector<32x32xf32>
    %211 = vector.shape_cast %210 : vector<32x32xf32> to vector<1x32x32xf32>
    %cst_79 = arith.constant dense<0.000000e+00> : vector<1xf32>
    %212 = vector.multi_reduction <add>, %211, %cst_79 [1, 2] : vector<1x32x32xf32> to vector<1xf32>
    %213 = vector.shape_cast %212 : vector<1xf32> to vector<1x1x1xf32>
    %214 = vector.extract %213[0, 0, 0] : f32 from vector<1x1x1xf32>
    %215 = math.rsqrt %214 : f32
    %216 = vector.broadcast %215 : f32 to vector<32x32xf32>
    %217 = arith.mulf %207, %216 : vector<32x32xf32>
    %218 = arith.mulf %208, %208 : vector<32x32xf32>
    %219 = vector.shape_cast %218 : vector<32x32xf32> to vector<1x32x32xf32>
    %cst_80 = arith.constant dense<0.000000e+00> : vector<1xf32>
    %220 = vector.multi_reduction <add>, %219, %cst_80 [1, 2] : vector<1x32x32xf32> to vector<1xf32>
    %221 = vector.shape_cast %220 : vector<1xf32> to vector<1x1x1xf32>
    %222 = vector.extract %221[0, 0, 0] : f32 from vector<1x1x1xf32>
    %223 = math.rsqrt %222 : f32
    %224 = vector.broadcast %223 : f32 to vector<32x32xf32>
    %225 = arith.mulf %208, %224 : vector<32x32xf32>
    %226 = vector.extract_strided_slice %209 {offsets = [0, 0], sizes = [8, 32], strides = [1, 1]} : vector<32x32xf32> to vector<8x32xf32>
    %227 = vector.extract_strided_slice %209 {offsets = [8, 0], sizes = [8, 32], strides = [1, 1]} : vector<32x32xf32> to vector<8x32xf32>
    %228 = arith.addf %226, %227 : vector<8x32xf32>
    %229 = vector.extract_strided_slice %209 {offsets = [16, 0], sizes = [8, 32], strides = [1, 1]} : vector<32x32xf32> to vector<8x32xf32>
    %230 = arith.addf %228, %229 : vector<8x32xf32>
    %231 = vector.extract_strided_slice %209 {offsets = [24, 0], sizes = [8, 32], strides = [1, 1]} : vector<32x32xf32> to vector<8x32xf32>
    %232 = arith.addf %230, %231 : vector<8x32xf32>
    %cst_81 = arith.constant 2.500000e-01 : f32
    %233 = vector.broadcast %cst_81 : f32 to vector<8x32xf32>
    %234 = arith.mulf %232, %233 : vector<8x32xf32>
    %235 = arith.truncf %234 : vector<8x32xf32> to vector<8x32xbf16>
    %236 = arith.truncf %40 : vector<32x32xf32> to vector<32x32xbf16>
    %cst_82 = arith.constant dense<0.000000e+00> : vector<8x32xf32>
    %237 = tpu.matmul %235, %236, %cst_82 {dimension_numbers = #tpu.dot_dimension_numbers<[1], [0], [0], [1], [0, 0, 1, 1], [], []>} : vector<8x32xbf16>, vector<32x32xbf16>, vector<8x32xf32> -> vector<8x32xf32>
    %238 = vector.extract_strided_slice %217 {offsets = [0, 0], sizes = [8, 32], strides = [1, 1]} : vector<32x32xf32> to vector<8x32xf32>
    %239 = vector.extract_strided_slice %225 {offsets = [0, 0], sizes = [8, 32], strides = [1, 1]} : vector<32x32xf32> to vector<8x32xf32>
    %240 = vector.extract_strided_slice %209 {offsets = [0, 0], sizes = [8, 32], strides = [1, 1]} : vector<32x32xf32> to vector<8x32xf32>
    %cst_83 = arith.constant dense<0.000000e+00> : vector<8x8xf32>
    %241 = tpu.matmul %239, %240, %cst_83 {dimension_numbers = #tpu.dot_dimension_numbers<[1], [1], [0], [0], [0, 0, 1, 0], [], []>} : vector<8x32xf32>, vector<8x32xf32>, vector<8x8xf32> -> vector<8x8xf32>
    %cst_84 = arith.constant dense<0.000000e+00> : vector<8x32xf32>
    %242 = tpu.matmul %241, %238, %cst_84 {dimension_numbers = #tpu.dot_dimension_numbers<[0], [0], [1], [1], [0, 1, 1, 1], [], []>} : vector<8x8xf32>, vector<8x32xf32>, vector<8x32xf32> -> vector<8x32xf32>
    %cst_85 = arith.constant dense<0.000000e+00> : vector<8xf32>
    %243 = vector.multi_reduction <add>, %240, %cst_85 [1] : vector<8x32xf32> to vector<8xf32>
    %244 = vector.shape_cast %243 : vector<8xf32> to vector<8x1xf32>
    %245 = vector.broadcast %244 : vector<8x1xf32> to vector<8x32xf32>
    %246 = arith.addf %242, %245 : vector<8x32xf32>
    %cst_86 = arith.constant dense<0.000000e+00> : vector<8xf32>
    %247 = vector.multi_reduction <add>, %239, %cst_86 [1] : vector<8x32xf32> to vector<8xf32>
    %248 = vector.shape_cast %247 : vector<8xf32> to vector<8x1xf32>
    %249 = vector.broadcast %248 : vector<8x1xf32> to vector<8x32xf32>
    %250 = arith.mulf %238, %249 : vector<8x32xf32>
    %cst_87 = arith.constant dense<0.000000e+00> : vector<32xf32>
    %251 = vector.multi_reduction <add>, %250, %cst_87 [0] : vector<8x32xf32> to vector<32xf32>
    %252 = vector.shape_cast %251 : vector<32xf32> to vector<1x32xf32>
    %cst_88 = arith.constant 3.200000e+01 : f32
    %253 = vector.broadcast %cst_88 : f32 to vector<1x32xf32>
    %254 = arith.addf %252, %253 : vector<1x32xf32>
    %255 = tpu.reciprocal %254 {approx = true} : vector<1x32xf32> -> vector<1x32xf32>
    %256 = vector.broadcast %255 : vector<1x32xf32> to vector<8x32xf32>
    %257 = arith.mulf %246, %256 : vector<8x32xf32>
    %258 = vector.extract_strided_slice %217 {offsets = [8, 0], sizes = [8, 32], strides = [1, 1]} : vector<32x32xf32> to vector<8x32xf32>
    %259 = vector.extract_strided_slice %225 {offsets = [8, 0], sizes = [8, 32], strides = [1, 1]} : vector<32x32xf32> to vector<8x32xf32>
    %260 = vector.extract_strided_slice %209 {offsets = [8, 0], sizes = [8, 32], strides = [1, 1]} : vector<32x32xf32> to vector<8x32xf32>
    %cst_89 = arith.constant dense<0.000000e+00> : vector<8x8xf32>
    %261 = tpu.matmul %259, %260, %cst_89 {dimension_numbers = #tpu.dot_dimension_numbers<[1], [1], [0], [0], [0, 0, 1, 0], [], []>} : vector<8x32xf32>, vector<8x32xf32>, vector<8x8xf32> -> vector<8x8xf32>
    %cst_90 = arith.constant dense<0.000000e+00> : vector<8x32xf32>
    %262 = tpu.matmul %261, %258, %cst_90 {dimension_numbers = #tpu.dot_dimension_numbers<[0], [0], [1], [1], [0, 1, 1, 1], [], []>} : vector<8x8xf32>, vector<8x32xf32>, vector<8x32xf32> -> vector<8x32xf32>
    %cst_91 = arith.constant dense<0.000000e+00> : vector<8xf32>
    %263 = vector.multi_reduction <add>, %260, %cst_91 [1] : vector<8x32xf32> to vector<8xf32>
    %264 = vector.shape_cast %263 : vector<8xf32> to vector<8x1xf32>
    %265 = vector.broadcast %264 : vector<8x1xf32> to vector<8x32xf32>
    %266 = arith.addf %262, %265 : vector<8x32xf32>
    %cst_92 = arith.constant dense<0.000000e+00> : vector<8xf32>
    %267 = vector.multi_reduction <add>, %259, %cst_92 [1] : vector<8x32xf32> to vector<8xf32>
    %268 = vector.shape_cast %267 : vector<8xf32> to vector<8x1xf32>
    %269 = vector.broadcast %268 : vector<8x1xf32> to vector<8x32xf32>
    %270 = arith.mulf %258, %269 : vector<8x32xf32>
    %cst_93 = arith.constant dense<0.000000e+00> : vector<32xf32>
    %271 = vector.multi_reduction <add>, %270, %cst_93 [0] : vector<8x32xf32> to vector<32xf32>
    %272 = vector.shape_cast %271 : vector<32xf32> to vector<1x32xf32>
    %cst_94 = arith.constant 3.200000e+01 : f32
    %273 = vector.broadcast %cst_94 : f32 to vector<1x32xf32>
    %274 = arith.addf %272, %273 : vector<1x32xf32>
    %275 = tpu.reciprocal %274 {approx = true} : vector<1x32xf32> -> vector<1x32xf32>
    %276 = vector.broadcast %275 : vector<1x32xf32> to vector<8x32xf32>
    %277 = arith.mulf %266, %276 : vector<8x32xf32>
    %278 = arith.addf %257, %277 : vector<8x32xf32>
    %279 = vector.extract_strided_slice %217 {offsets = [16, 0], sizes = [8, 32], strides = [1, 1]} : vector<32x32xf32> to vector<8x32xf32>
    %280 = vector.extract_strided_slice %225 {offsets = [16, 0], sizes = [8, 32], strides = [1, 1]} : vector<32x32xf32> to vector<8x32xf32>
    %281 = vector.extract_strided_slice %209 {offsets = [16, 0], sizes = [8, 32], strides = [1, 1]} : vector<32x32xf32> to vector<8x32xf32>
    %cst_95 = arith.constant dense<0.000000e+00> : vector<8x8xf32>
    %282 = tpu.matmul %280, %281, %cst_95 {dimension_numbers = #tpu.dot_dimension_numbers<[1], [1], [0], [0], [0, 0, 1, 0], [], []>} : vector<8x32xf32>, vector<8x32xf32>, vector<8x8xf32> -> vector<8x8xf32>
    %cst_96 = arith.constant dense<0.000000e+00> : vector<8x32xf32>
    %283 = tpu.matmul %282, %279, %cst_96 {dimension_numbers = #tpu.dot_dimension_numbers<[0], [0], [1], [1], [0, 1, 1, 1], [], []>} : vector<8x8xf32>, vector<8x32xf32>, vector<8x32xf32> -> vector<8x32xf32>
    %cst_97 = arith.constant dense<0.000000e+00> : vector<8xf32>
    %284 = vector.multi_reduction <add>, %281, %cst_97 [1] : vector<8x32xf32> to vector<8xf32>
    %285 = vector.shape_cast %284 : vector<8xf32> to vector<8x1xf32>
    %286 = vector.broadcast %285 : vector<8x1xf32> to vector<8x32xf32>
    %287 = arith.addf %283, %286 : vector<8x32xf32>
    %cst_98 = arith.constant dense<0.000000e+00> : vector<8xf32>
    %288 = vector.multi_reduction <add>, %280, %cst_98 [1] : vector<8x32xf32> to vector<8xf32>
    %289 = vector.shape_cast %288 : vector<8xf32> to vector<8x1xf32>
    %290 = vector.broadcast %289 : vector<8x1xf32> to vector<8x32xf32>
    %291 = arith.mulf %279, %290 : vector<8x32xf32>
    %cst_99 = arith.constant dense<0.000000e+00> : vector<32xf32>
    %292 = vector.multi_reduction <add>, %291, %cst_99 [0] : vector<8x32xf32> to vector<32xf32>
    %293 = vector.shape_cast %292 : vector<32xf32> to vector<1x32xf32>
    %cst_100 = arith.constant 3.200000e+01 : f32
    %294 = vector.broadcast %cst_100 : f32 to vector<1x32xf32>
    %295 = arith.addf %293, %294 : vector<1x32xf32>
    %296 = tpu.reciprocal %295 {approx = true} : vector<1x32xf32> -> vector<1x32xf32>
    %297 = vector.broadcast %296 : vector<1x32xf32> to vector<8x32xf32>
    %298 = arith.mulf %287, %297 : vector<8x32xf32>
    %299 = arith.addf %278, %298 : vector<8x32xf32>
    %300 = vector.extract_strided_slice %217 {offsets = [24, 0], sizes = [8, 32], strides = [1, 1]} : vector<32x32xf32> to vector<8x32xf32>
    %301 = vector.extract_strided_slice %225 {offsets = [24, 0], sizes = [8, 32], strides = [1, 1]} : vector<32x32xf32> to vector<8x32xf32>
    %302 = vector.extract_strided_slice %209 {offsets = [24, 0], sizes = [8, 32], strides = [1, 1]} : vector<32x32xf32> to vector<8x32xf32>
    %cst_101 = arith.constant dense<0.000000e+00> : vector<8x8xf32>
    %303 = tpu.matmul %301, %302, %cst_101 {dimension_numbers = #tpu.dot_dimension_numbers<[1], [1], [0], [0], [0, 0, 1, 0], [], []>} : vector<8x32xf32>, vector<8x32xf32>, vector<8x8xf32> -> vector<8x8xf32>
    %cst_102 = arith.constant dense<0.000000e+00> : vector<8x32xf32>
    %304 = tpu.matmul %303, %300, %cst_102 {dimension_numbers = #tpu.dot_dimension_numbers<[0], [0], [1], [1], [0, 1, 1, 1], [], []>} : vector<8x8xf32>, vector<8x32xf32>, vector<8x32xf32> -> vector<8x32xf32>
    %cst_103 = arith.constant dense<0.000000e+00> : vector<8xf32>
    %305 = vector.multi_reduction <add>, %302, %cst_103 [1] : vector<8x32xf32> to vector<8xf32>
    %306 = vector.shape_cast %305 : vector<8xf32> to vector<8x1xf32>
    %307 = vector.broadcast %306 : vector<8x1xf32> to vector<8x32xf32>
    %308 = arith.addf %304, %307 : vector<8x32xf32>
    %cst_104 = arith.constant dense<0.000000e+00> : vector<8xf32>
    %309 = vector.multi_reduction <add>, %301, %cst_104 [1] : vector<8x32xf32> to vector<8xf32>
    %310 = vector.shape_cast %309 : vector<8xf32> to vector<8x1xf32>
    %311 = vector.broadcast %310 : vector<8x1xf32> to vector<8x32xf32>
    %312 = arith.mulf %300, %311 : vector<8x32xf32>
    %cst_105 = arith.constant dense<0.000000e+00> : vector<32xf32>
    %313 = vector.multi_reduction <add>, %312, %cst_105 [0] : vector<8x32xf32> to vector<32xf32>
    %314 = vector.shape_cast %313 : vector<32xf32> to vector<1x32xf32>
    %cst_106 = arith.constant 3.200000e+01 : f32
    %315 = vector.broadcast %cst_106 : f32 to vector<1x32xf32>
    %316 = arith.addf %314, %315 : vector<1x32xf32>
    %317 = tpu.reciprocal %316 {approx = true} : vector<1x32xf32> -> vector<1x32xf32>
    %318 = vector.broadcast %317 : vector<1x32xf32> to vector<8x32xf32>
    %319 = arith.mulf %308, %318 : vector<8x32xf32>
    %320 = arith.addf %299, %319 : vector<8x32xf32>
    %cst_107 = arith.constant 2.500000e-01 : f32
    %321 = vector.broadcast %cst_107 : f32 to vector<8x32xf32>
    %322 = arith.mulf %320, %321 : vector<8x32xf32>
    %323 = arith.addf %322, %237 : vector<8x32xf32>
    %c1_108 = arith.constant 1 : index
    %c0_109 = arith.constant 0 : index
    %c0_110 = arith.constant 0 : index
    %324 = vector.load %arg5[%c1_108, %c0_109, %c0_110] : memref<2x16x1xf32, #tpu.memory_space<vmem>>, vector<1x8x1xf32>
    %325 = vector.shape_cast %324 : vector<1x8x1xf32> to vector<8x1xf32>
    %c1_111 = arith.constant 1 : index
    %c8_112 = arith.constant 8 : index
    %c0_113 = arith.constant 0 : index
    %326 = vector.load %arg5[%c1_111, %c8_112, %c0_113] : memref<2x16x1xf32, #tpu.memory_space<vmem>>, vector<1x8x1xf32>
    %327 = vector.shape_cast %326 : vector<1x8x1xf32> to vector<8x1xf32>
    %cst_114 = arith.constant 5.000000e-01 : f32
    %328 = vector.broadcast %cst_114 : f32 to vector<8x32xf32>
    %329 = arith.mulf %328, %323 : vector<8x32xf32>
    %cst_115 = arith.constant 5.000000e-01 : f32
    %330 = vector.broadcast %cst_115 : f32 to vector<8x32xf32>
    %331 = arith.mulf %330, %197 : vector<8x32xf32>
    %332 = arith.addf %329, %331 : vector<8x32xf32>
    %cst_116 = arith.constant dense<0.000000e+00> : vector<32xf32>
    %333 = vector.multi_reduction <add>, %332, %cst_116 [0] : vector<8x32xf32> to vector<32xf32>
    %334 = vector.shape_cast %333 : vector<32xf32> to vector<1x32xf32>
    %cst_117 = arith.constant 8.000000e+00 : f32
    %335 = vector.broadcast %cst_117 : f32 to vector<1x32xf32>
    %336 = arith.divf %334, %335 : vector<1x32xf32>
    %337 = vector.broadcast %336 : vector<1x32xf32> to vector<8x32xf32>
    %338 = arith.subf %332, %337 : vector<8x32xf32>
    %339 = arith.mulf %338, %338 : vector<8x32xf32>
    %cst_118 = arith.constant dense<0.000000e+00> : vector<32xf32>
    %340 = vector.multi_reduction <add>, %339, %cst_118 [0] : vector<8x32xf32> to vector<32xf32>
    %341 = vector.shape_cast %340 : vector<32xf32> to vector<1x32xf32>
    %cst_119 = arith.constant 8.000000e+00 : f32
    %342 = vector.broadcast %cst_119 : f32 to vector<1x32xf32>
    %343 = arith.divf %341, %342 : vector<1x32xf32>
    %344 = vector.broadcast %336 : vector<1x32xf32> to vector<8x32xf32>
    %345 = arith.subf %332, %344 : vector<8x32xf32>
    %cst_120 = arith.constant 9.99999974E-6 : f32
    %346 = vector.broadcast %cst_120 : f32 to vector<1x32xf32>
    %347 = arith.addf %343, %346 : vector<1x32xf32>
    %348 = math.rsqrt %347 : vector<1x32xf32>
    %349 = vector.broadcast %348 : vector<1x32xf32> to vector<8x32xf32>
    %350 = arith.mulf %345, %349 : vector<8x32xf32>
    %351 = vector.broadcast %325 : vector<8x1xf32> to vector<8x32xf32>
    %352 = arith.mulf %350, %351 : vector<8x32xf32>
    %353 = vector.broadcast %327 : vector<8x1xf32> to vector<8x32xf32>
    %354 = arith.addf %352, %353 : vector<8x32xf32>
    %355 = arith.truncf %7 : vector<8x8xf32> to vector<8x8xbf16>
    %356 = arith.truncf %354 : vector<8x32xf32> to vector<8x32xbf16>
    %cst_121 = arith.constant dense<0.000000e+00> : vector<8x32xf32>
    %357 = tpu.matmul %355, %356, %cst_121 {dimension_numbers = #tpu.dot_dimension_numbers<[1], [0], [0], [1], [0, 0, 1, 1], [], []>} : vector<8x8xbf16>, vector<8x32xbf16>, vector<8x32xf32> -> vector<8x32xf32>
    %358 = vector.broadcast %8 : vector<8x1xf32> to vector<8x32xf32>
    %359 = arith.addf %357, %358 : vector<8x32xf32>
    %360 = vector.extract_strided_slice %359 {offsets = [0, 0], sizes = [8, 16], strides = [1, 1]} : vector<8x32xf32> to vector<8x16xf32>
    %c0_122 = arith.constant 0 : index
    %c0_123 = arith.constant 0 : index
    %c0_124 = arith.constant 0 : index
    %361 = vector.load %arg6[%c0_122, %c0_123, %c0_124] : memref<2x8x16xf32, #tpu.memory_space<vmem>>, vector<1x8x16xf32>
    %362 = vector.shape_cast %361 : vector<1x8x16xf32> to vector<8x16xf32>
    %363 = vector.shape_cast %360 : vector<8x16xf32> to vector<1x8x16xf32>
    tpu.vector_store %arg6[%c0_122, %c0_123, %c0_124], %363 {strides = array<i32>} : memref<2x8x16xf32, #tpu.memory_space<vmem>>, vector<1x8x16xf32>,
    %364 = vector.extract_strided_slice %359 {offsets = [0, 16], sizes = [8, 16], strides = [1, 1]} : vector<8x32xf32> to vector<8x16xf32>
    %c1_125 = arith.constant 1 : index
    %c0_126 = arith.constant 0 : index
    %c0_127 = arith.constant 0 : index
    %365 = vector.load %arg6[%c1_125, %c0_126, %c0_127] : memref<2x8x16xf32, #tpu.memory_space<vmem>>, vector<1x8x16xf32>
    %366 = vector.shape_cast %365 : vector<1x8x16xf32> to vector<8x16xf32>
    %367 = vector.shape_cast %364 : vector<8x16xf32> to vector<1x8x16xf32>
    tpu.vector_store %arg6[%c1_125, %c0_126, %c0_127], %367 {strides = array<i32>} : memref<2x8x16xf32, #tpu.memory_space<vmem>>, vector<1x8x16xf32>,
    return
  }
}

module attributes {stable_mosaic.version = 11 : i64} {
  func.func @_encoder_kernel(%arg0: i32, %arg1: memref<1x1x1600xf32, #tpu.memory_space<vmem>>, %arg2: memref<5x8x1xf32, #tpu.memory_space<vmem>>, %arg3: memref<5x5x8x8xf32, #tpu.memory_space<vmem>>, %arg4: memref<6x8x1xf32, #tpu.memory_space<vmem>>, %arg5: memref<1x8x16xf32, #tpu.memory_space<vmem>>) attributes {dimension_semantics = [#tpu.dimension_semantics<parallel>], iteration_bounds = array<i64: 2>, scalar_prefetch = 0 : i64, scratch_operands = 0 : i64, tpu.core_type = #tpu.core_type<tc>, window_params = [{transform_indices = @transform_0, window_bounds = array<i64: 1, 1, 1600>}, {pipeline_mode = #tpu.pipeline_mode<synchronous>, transform_indices = @transform_1, window_bounds = array<i64: 5, 8, 1>}, {pipeline_mode = #tpu.pipeline_mode<synchronous>, transform_indices = @transform_2, window_bounds = array<i64: 5, 5, 8, 8>}, {pipeline_mode = #tpu.pipeline_mode<synchronous>, transform_indices = @transform_3, window_bounds = array<i64: 6, 8, 1>}, {transform_indices = @transform_4, window_bounds = array<i64: 1, 8, 16>}]} {
    %c0 = arith.constant 0 : index
    %c0_0 = arith.constant 0 : index
    %c0_1 = arith.constant 0 : index
    %0 = vector.load %arg1[%c0, %c0_0, %c0_1] : memref<1x1x1600xf32, #tpu.memory_space<vmem>>, vector<1x1x1600xf32>
    %1 = vector.shape_cast %0 : vector<1x1x1600xf32> to vector<1x1600xf32>
    %cst = arith.constant 0.000000e+00 : f32
    %2 = vector.broadcast %cst : f32 to vector<1x2xf32>
    %3 = tpu.concatenate %2, %1, %2 in 1 : vector<1x2xf32>, vector<1x1600xf32>, vector<1x2xf32> -> vector<1x1604xf32>
    %4 = vector.extract_strided_slice %3 {offsets = [0, 0], sizes = [1, 1600], strides = [1, 1]} : vector<1x1604xf32> to vector<1x1600xf32>
    %c0_2 = arith.constant 0 : index
    %c0_3 = arith.constant 0 : index
    %c0_4 = arith.constant 0 : index
    %5 = vector.load %arg2[%c0_2, %c0_3, %c0_4] : memref<5x8x1xf32, #tpu.memory_space<vmem>>, vector<1x8x1xf32>
    %6 = vector.shape_cast %5 : vector<1x8x1xf32> to vector<8x1xf32>
    %7 = vector.broadcast %6 : vector<8x1xf32> to vector<8x1600xf32>
    %8 = vector.broadcast %4 : vector<1x1600xf32> to vector<8x1600xf32>
    %9 = arith.mulf %7, %8 : vector<8x1600xf32>
    %10 = vector.extract_strided_slice %3 {offsets = [0, 1], sizes = [1, 1600], strides = [1, 1]} : vector<1x1604xf32> to vector<1x1600xf32>
    %c1 = arith.constant 1 : index
    %c0_5 = arith.constant 0 : index
    %c0_6 = arith.constant 0 : index
    %11 = vector.load %arg2[%c1, %c0_5, %c0_6] : memref<5x8x1xf32, #tpu.memory_space<vmem>>, vector<1x8x1xf32>
    %12 = vector.shape_cast %11 : vector<1x8x1xf32> to vector<8x1xf32>
    %13 = vector.broadcast %12 : vector<8x1xf32> to vector<8x1600xf32>
    %14 = vector.broadcast %10 : vector<1x1600xf32> to vector<8x1600xf32>
    %15 = arith.mulf %13, %14 : vector<8x1600xf32>
    %16 = arith.addf %9, %15 : vector<8x1600xf32>
    %17 = vector.extract_strided_slice %3 {offsets = [0, 2], sizes = [1, 1600], strides = [1, 1]} : vector<1x1604xf32> to vector<1x1600xf32>
    %c2 = arith.constant 2 : index
    %c0_7 = arith.constant 0 : index
    %c0_8 = arith.constant 0 : index
    %18 = vector.load %arg2[%c2, %c0_7, %c0_8] : memref<5x8x1xf32, #tpu.memory_space<vmem>>, vector<1x8x1xf32>
    %19 = vector.shape_cast %18 : vector<1x8x1xf32> to vector<8x1xf32>
    %20 = vector.broadcast %19 : vector<8x1xf32> to vector<8x1600xf32>
    %21 = vector.broadcast %17 : vector<1x1600xf32> to vector<8x1600xf32>
    %22 = arith.mulf %20, %21 : vector<8x1600xf32>
    %23 = arith.addf %16, %22 : vector<8x1600xf32>
    %24 = vector.extract_strided_slice %3 {offsets = [0, 3], sizes = [1, 1600], strides = [1, 1]} : vector<1x1604xf32> to vector<1x1600xf32>
    %c3 = arith.constant 3 : index
    %c0_9 = arith.constant 0 : index
    %c0_10 = arith.constant 0 : index
    %25 = vector.load %arg2[%c3, %c0_9, %c0_10] : memref<5x8x1xf32, #tpu.memory_space<vmem>>, vector<1x8x1xf32>
    %26 = vector.shape_cast %25 : vector<1x8x1xf32> to vector<8x1xf32>
    %27 = vector.broadcast %26 : vector<8x1xf32> to vector<8x1600xf32>
    %28 = vector.broadcast %24 : vector<1x1600xf32> to vector<8x1600xf32>
    %29 = arith.mulf %27, %28 : vector<8x1600xf32>
    %30 = arith.addf %23, %29 : vector<8x1600xf32>
    %31 = vector.extract_strided_slice %3 {offsets = [0, 4], sizes = [1, 1600], strides = [1, 1]} : vector<1x1604xf32> to vector<1x1600xf32>
    %c4 = arith.constant 4 : index
    %c0_11 = arith.constant 0 : index
    %c0_12 = arith.constant 0 : index
    %32 = vector.load %arg2[%c4, %c0_11, %c0_12] : memref<5x8x1xf32, #tpu.memory_space<vmem>>, vector<1x8x1xf32>
    %33 = vector.shape_cast %32 : vector<1x8x1xf32> to vector<8x1xf32>
    %34 = vector.broadcast %33 : vector<8x1xf32> to vector<8x1600xf32>
    %35 = vector.broadcast %31 : vector<1x1600xf32> to vector<8x1600xf32>
    %36 = arith.mulf %34, %35 : vector<8x1600xf32>
    %37 = arith.addf %30, %36 : vector<8x1600xf32>
    %cst_13 = arith.constant 0.000000e+00 : f32
    %38 = vector.broadcast %cst_13 : f32 to vector<8x8xf32>
    %39 = tpu.concatenate %37, %38 in 1 : vector<8x1600xf32>, vector<8x8xf32> -> vector<8x1608xf32>
    %40 = vector.extract_strided_slice %39 {offsets = [0, 0], sizes = [8, 1600], strides = [1, 1]} : vector<8x1608xf32> to vector<8x1600xf32>
    %41 = vector.extract_strided_slice %39 {offsets = [0, 2], sizes = [8, 1600], strides = [1, 1]} : vector<8x1608xf32> to vector<8x1600xf32>
    %42 = arith.maximumf %40, %41 : vector<8x1600xf32>
    %43 = vector.extract_strided_slice %39 {offsets = [0, 4], sizes = [8, 1600], strides = [1, 1]} : vector<8x1608xf32> to vector<8x1600xf32>
    %44 = arith.maximumf %42, %43 : vector<8x1600xf32>
    %45 = vector.extract_strided_slice %39 {offsets = [0, 6], sizes = [8, 1600], strides = [1, 1]} : vector<8x1608xf32> to vector<8x1600xf32>
    %46 = arith.maximumf %44, %45 : vector<8x1600xf32>
    %47 = vector.extract_strided_slice %39 {offsets = [0, 8], sizes = [8, 1600], strides = [1, 1]} : vector<8x1608xf32> to vector<8x1600xf32>
    %48 = arith.maximumf %46, %47 : vector<8x1600xf32>
    %49 = tpu.iota {dimensions = array<i32: 0>} : vector<1600x160xi32>
    %50 = tpu.iota {dimensions = array<i32: 1>} : vector<1600x160xi32>
    %c10_i32 = arith.constant 10 : i32
    %51 = vector.broadcast %c10_i32 : i32 to vector<1600x160xi32>
    %52 = arith.muli %51, %50 : vector<1600x160xi32>
    %53 = arith.cmpi eq, %49, %52 : vector<1600x160xi32>
    %54 = arith.extui %53 : vector<1600x160xi1> to vector<1600x160xi32>
    %55 = arith.sitofp %54 : vector<1600x160xi32> to vector<1600x160xf32>
    %cst_14 = arith.constant dense<0.000000e+00> : vector<8x160xf32>
    %56 = tpu.matmul %48, %55, %cst_14 {dimension_numbers = #tpu.dot_dimension_numbers<[1], [0], [0], [1], [0, 0, 1, 1], [], []>} : vector<8x1600xf32>, vector<1600x160xf32>, vector<8x160xf32> -> vector<8x160xf32>
    %c0_15 = arith.constant 0 : index
    %c0_16 = arith.constant 0 : index
    %c0_17 = arith.constant 0 : index
    %57 = vector.load %arg4[%c0_15, %c0_16, %c0_17] : memref<6x8x1xf32, #tpu.memory_space<vmem>>, vector<1x8x1xf32>
    %58 = vector.shape_cast %57 : vector<1x8x1xf32> to vector<8x1xf32>
    %59 = vector.broadcast %58 : vector<8x1xf32> to vector<8x160xf32>
    %60 = arith.addf %56, %59 : vector<8x160xf32>
    %cst_18 = arith.constant 0.000000e+00 : f32
    %61 = vector.broadcast %cst_18 : f32 to vector<8x160xf32>
    %62 = arith.maximumf %60, %61 : vector<8x160xf32>
    %cst_19 = arith.constant 0.000000e+00 : f32
    %63 = vector.broadcast %cst_19 : f32 to vector<8x2xf32>
    %64 = tpu.concatenate %63, %62, %63 in 1 : vector<8x2xf32>, vector<8x160xf32>, vector<8x2xf32> -> vector<8x164xf32>
    %65 = vector.extract_strided_slice %64 {offsets = [0, 0], sizes = [8, 160], strides = [1, 1]} : vector<8x164xf32> to vector<8x160xf32>
    %c0_20 = arith.constant 0 : index
    %c0_21 = arith.constant 0 : index
    %c0_22 = arith.constant 0 : index
    %c0_23 = arith.constant 0 : index
    %66 = vector.load %arg3[%c0_20, %c0_21, %c0_22, %c0_23] : memref<5x5x8x8xf32, #tpu.memory_space<vmem>>, vector<1x1x8x8xf32>
    %67 = vector.shape_cast %66 : vector<1x1x8x8xf32> to vector<8x8xf32>
    %68 = arith.truncf %67 : vector<8x8xf32> to vector<8x8xbf16>
    %69 = arith.truncf %65 : vector<8x160xf32> to vector<8x160xbf16>
    %cst_24 = arith.constant dense<0.000000e+00> : vector<8x160xf32>
    %70 = tpu.matmul %68, %69, %cst_24 {dimension_numbers = #tpu.dot_dimension_numbers<[1], [0], [0], [1], [0, 0, 1, 1], [], []>} : vector<8x8xbf16>, vector<8x160xbf16>, vector<8x160xf32> -> vector<8x160xf32>
    %71 = vector.extract_strided_slice %64 {offsets = [0, 1], sizes = [8, 160], strides = [1, 1]} : vector<8x164xf32> to vector<8x160xf32>
    %c0_25 = arith.constant 0 : index
    %c1_26 = arith.constant 1 : index
    %c0_27 = arith.constant 0 : index
    %c0_28 = arith.constant 0 : index
    %72 = vector.load %arg3[%c0_25, %c1_26, %c0_27, %c0_28] : memref<5x5x8x8xf32, #tpu.memory_space<vmem>>, vector<1x1x8x8xf32>
    %73 = vector.shape_cast %72 : vector<1x1x8x8xf32> to vector<8x8xf32>
    %74 = arith.truncf %73 : vector<8x8xf32> to vector<8x8xbf16>
    %75 = arith.truncf %71 : vector<8x160xf32> to vector<8x160xbf16>
    %cst_29 = arith.constant dense<0.000000e+00> : vector<8x160xf32>
    %76 = tpu.matmul %74, %75, %cst_29 {dimension_numbers = #tpu.dot_dimension_numbers<[1], [0], [0], [1], [0, 0, 1, 1], [], []>} : vector<8x8xbf16>, vector<8x160xbf16>, vector<8x160xf32> -> vector<8x160xf32>
    %77 = arith.addf %70, %76 : vector<8x160xf32>
    %78 = vector.extract_strided_slice %64 {offsets = [0, 2], sizes = [8, 160], strides = [1, 1]} : vector<8x164xf32> to vector<8x160xf32>
    %c0_30 = arith.constant 0 : index
    %c2_31 = arith.constant 2 : index
    %c0_32 = arith.constant 0 : index
    %c0_33 = arith.constant 0 : index
    %79 = vector.load %arg3[%c0_30, %c2_31, %c0_32, %c0_33] : memref<5x5x8x8xf32, #tpu.memory_space<vmem>>, vector<1x1x8x8xf32>
    %80 = vector.shape_cast %79 : vector<1x1x8x8xf32> to vector<8x8xf32>
    %81 = arith.truncf %80 : vector<8x8xf32> to vector<8x8xbf16>
    %82 = arith.truncf %78 : vector<8x160xf32> to vector<8x160xbf16>
    %cst_34 = arith.constant dense<0.000000e+00> : vector<8x160xf32>
    %83 = tpu.matmul %81, %82, %cst_34 {dimension_numbers = #tpu.dot_dimension_numbers<[1], [0], [0], [1], [0, 0, 1, 1], [], []>} : vector<8x8xbf16>, vector<8x160xbf16>, vector<8x160xf32> -> vector<8x160xf32>
    %84 = arith.addf %77, %83 : vector<8x160xf32>
    %85 = vector.extract_strided_slice %64 {offsets = [0, 3], sizes = [8, 160], strides = [1, 1]} : vector<8x164xf32> to vector<8x160xf32>
    %c0_35 = arith.constant 0 : index
    %c3_36 = arith.constant 3 : index
    %c0_37 = arith.constant 0 : index
    %c0_38 = arith.constant 0 : index
    %86 = vector.load %arg3[%c0_35, %c3_36, %c0_37, %c0_38] : memref<5x5x8x8xf32, #tpu.memory_space<vmem>>, vector<1x1x8x8xf32>
    %87 = vector.shape_cast %86 : vector<1x1x8x8xf32> to vector<8x8xf32>
    %88 = arith.truncf %87 : vector<8x8xf32> to vector<8x8xbf16>
    %89 = arith.truncf %85 : vector<8x160xf32> to vector<8x160xbf16>
    %cst_39 = arith.constant dense<0.000000e+00> : vector<8x160xf32>
    %90 = tpu.matmul %88, %89, %cst_39 {dimension_numbers = #tpu.dot_dimension_numbers<[1], [0], [0], [1], [0, 0, 1, 1], [], []>} : vector<8x8xbf16>, vector<8x160xbf16>, vector<8x160xf32> -> vector<8x160xf32>
    %91 = arith.addf %84, %90 : vector<8x160xf32>
    %92 = vector.extract_strided_slice %64 {offsets = [0, 4], sizes = [8, 160], strides = [1, 1]} : vector<8x164xf32> to vector<8x160xf32>
    %c0_40 = arith.constant 0 : index
    %c4_41 = arith.constant 4 : index
    %c0_42 = arith.constant 0 : index
    %c0_43 = arith.constant 0 : index
    %93 = vector.load %arg3[%c0_40, %c4_41, %c0_42, %c0_43] : memref<5x5x8x8xf32, #tpu.memory_space<vmem>>, vector<1x1x8x8xf32>
    %94 = vector.shape_cast %93 : vector<1x1x8x8xf32> to vector<8x8xf32>
    %95 = arith.truncf %94 : vector<8x8xf32> to vector<8x8xbf16>
    %96 = arith.truncf %92 : vector<8x160xf32> to vector<8x160xbf16>
    %cst_44 = arith.constant dense<0.000000e+00> : vector<8x160xf32>
    %97 = tpu.matmul %95, %96, %cst_44 {dimension_numbers = #tpu.dot_dimension_numbers<[1], [0], [0], [1], [0, 0, 1, 1], [], []>} : vector<8x8xbf16>, vector<8x160xbf16>, vector<8x160xf32> -> vector<8x160xf32>
    %98 = arith.addf %91, %97 : vector<8x160xf32>
    %c1_45 = arith.constant 1 : index
    %c0_46 = arith.constant 0 : index
    %c0_47 = arith.constant 0 : index
    %99 = vector.load %arg4[%c1_45, %c0_46, %c0_47] : memref<6x8x1xf32, #tpu.memory_space<vmem>>, vector<1x8x1xf32>
    %100 = vector.shape_cast %99 : vector<1x8x1xf32> to vector<8x1xf32>
    %101 = vector.broadcast %100 : vector<8x1xf32> to vector<8x160xf32>
    %102 = arith.addf %98, %101 : vector<8x160xf32>
    %cst_48 = arith.constant 0.000000e+00 : f32
    %103 = vector.broadcast %cst_48 : f32 to vector<8x160xf32>
    %104 = arith.maximumf %102, %103 : vector<8x160xf32>
    %cst_49 = arith.constant 0.000000e+00 : f32
    %105 = vector.broadcast %cst_49 : f32 to vector<8x2xf32>
    %106 = tpu.concatenate %105, %104, %105 in 1 : vector<8x2xf32>, vector<8x160xf32>, vector<8x2xf32> -> vector<8x164xf32>
    %107 = vector.extract_strided_slice %106 {offsets = [0, 0], sizes = [8, 160], strides = [1, 1]} : vector<8x164xf32> to vector<8x160xf32>
    %c1_50 = arith.constant 1 : index
    %c0_51 = arith.constant 0 : index
    %c0_52 = arith.constant 0 : index
    %c0_53 = arith.constant 0 : index
    %108 = vector.load %arg3[%c1_50, %c0_51, %c0_52, %c0_53] : memref<5x5x8x8xf32, #tpu.memory_space<vmem>>, vector<1x1x8x8xf32>
    %109 = vector.shape_cast %108 : vector<1x1x8x8xf32> to vector<8x8xf32>
    %110 = arith.truncf %109 : vector<8x8xf32> to vector<8x8xbf16>
    %111 = arith.truncf %107 : vector<8x160xf32> to vector<8x160xbf16>
    %cst_54 = arith.constant dense<0.000000e+00> : vector<8x160xf32>
    %112 = tpu.matmul %110, %111, %cst_54 {dimension_numbers = #tpu.dot_dimension_numbers<[1], [0], [0], [1], [0, 0, 1, 1], [], []>} : vector<8x8xbf16>, vector<8x160xbf16>, vector<8x160xf32> -> vector<8x160xf32>
    %113 = vector.extract_strided_slice %106 {offsets = [0, 1], sizes = [8, 160], strides = [1, 1]} : vector<8x164xf32> to vector<8x160xf32>
    %c1_55 = arith.constant 1 : index
    %c1_56 = arith.constant 1 : index
    %c0_57 = arith.constant 0 : index
    %c0_58 = arith.constant 0 : index
    %114 = vector.load %arg3[%c1_55, %c1_56, %c0_57, %c0_58] : memref<5x5x8x8xf32, #tpu.memory_space<vmem>>, vector<1x1x8x8xf32>
    %115 = vector.shape_cast %114 : vector<1x1x8x8xf32> to vector<8x8xf32>
    %116 = arith.truncf %115 : vector<8x8xf32> to vector<8x8xbf16>
    %117 = arith.truncf %113 : vector<8x160xf32> to vector<8x160xbf16>
    %cst_59 = arith.constant dense<0.000000e+00> : vector<8x160xf32>
    %118 = tpu.matmul %116, %117, %cst_59 {dimension_numbers = #tpu.dot_dimension_numbers<[1], [0], [0], [1], [0, 0, 1, 1], [], []>} : vector<8x8xbf16>, vector<8x160xbf16>, vector<8x160xf32> -> vector<8x160xf32>
    %119 = arith.addf %112, %118 : vector<8x160xf32>
    %120 = vector.extract_strided_slice %106 {offsets = [0, 2], sizes = [8, 160], strides = [1, 1]} : vector<8x164xf32> to vector<8x160xf32>
    %c1_60 = arith.constant 1 : index
    %c2_61 = arith.constant 2 : index
    %c0_62 = arith.constant 0 : index
    %c0_63 = arith.constant 0 : index
    %121 = vector.load %arg3[%c1_60, %c2_61, %c0_62, %c0_63] : memref<5x5x8x8xf32, #tpu.memory_space<vmem>>, vector<1x1x8x8xf32>
    %122 = vector.shape_cast %121 : vector<1x1x8x8xf32> to vector<8x8xf32>
    %123 = arith.truncf %122 : vector<8x8xf32> to vector<8x8xbf16>
    %124 = arith.truncf %120 : vector<8x160xf32> to vector<8x160xbf16>
    %cst_64 = arith.constant dense<0.000000e+00> : vector<8x160xf32>
    %125 = tpu.matmul %123, %124, %cst_64 {dimension_numbers = #tpu.dot_dimension_numbers<[1], [0], [0], [1], [0, 0, 1, 1], [], []>} : vector<8x8xbf16>, vector<8x160xbf16>, vector<8x160xf32> -> vector<8x160xf32>
    %126 = arith.addf %119, %125 : vector<8x160xf32>
    %127 = vector.extract_strided_slice %106 {offsets = [0, 3], sizes = [8, 160], strides = [1, 1]} : vector<8x164xf32> to vector<8x160xf32>
    %c1_65 = arith.constant 1 : index
    %c3_66 = arith.constant 3 : index
    %c0_67 = arith.constant 0 : index
    %c0_68 = arith.constant 0 : index
    %128 = vector.load %arg3[%c1_65, %c3_66, %c0_67, %c0_68] : memref<5x5x8x8xf32, #tpu.memory_space<vmem>>, vector<1x1x8x8xf32>
    %129 = vector.shape_cast %128 : vector<1x1x8x8xf32> to vector<8x8xf32>
    %130 = arith.truncf %129 : vector<8x8xf32> to vector<8x8xbf16>
    %131 = arith.truncf %127 : vector<8x160xf32> to vector<8x160xbf16>
    %cst_69 = arith.constant dense<0.000000e+00> : vector<8x160xf32>
    %132 = tpu.matmul %130, %131, %cst_69 {dimension_numbers = #tpu.dot_dimension_numbers<[1], [0], [0], [1], [0, 0, 1, 1], [], []>} : vector<8x8xbf16>, vector<8x160xbf16>, vector<8x160xf32> -> vector<8x160xf32>
    %133 = arith.addf %126, %132 : vector<8x160xf32>
    %134 = vector.extract_strided_slice %106 {offsets = [0, 4], sizes = [8, 160], strides = [1, 1]} : vector<8x164xf32> to vector<8x160xf32>
    %c1_70 = arith.constant 1 : index
    %c4_71 = arith.constant 4 : index
    %c0_72 = arith.constant 0 : index
    %c0_73 = arith.constant 0 : index
    %135 = vector.load %arg3[%c1_70, %c4_71, %c0_72, %c0_73] : memref<5x5x8x8xf32, #tpu.memory_space<vmem>>, vector<1x1x8x8xf32>
    %136 = vector.shape_cast %135 : vector<1x1x8x8xf32> to vector<8x8xf32>
    %137 = arith.truncf %136 : vector<8x8xf32> to vector<8x8xbf16>
    %138 = arith.truncf %134 : vector<8x160xf32> to vector<8x160xbf16>
    %cst_74 = arith.constant dense<0.000000e+00> : vector<8x160xf32>
    %139 = tpu.matmul %137, %138, %cst_74 {dimension_numbers = #tpu.dot_dimension_numbers<[1], [0], [0], [1], [0, 0, 1, 1], [], []>} : vector<8x8xbf16>, vector<8x160xbf16>, vector<8x160xf32> -> vector<8x160xf32>
    %140 = arith.addf %133, %139 : vector<8x160xf32>
    %c2_75 = arith.constant 2 : index
    %c0_76 = arith.constant 0 : index
    %c0_77 = arith.constant 0 : index
    %141 = vector.load %arg4[%c2_75, %c0_76, %c0_77] : memref<6x8x1xf32, #tpu.memory_space<vmem>>, vector<1x8x1xf32>
    %142 = vector.shape_cast %141 : vector<1x8x1xf32> to vector<8x1xf32>
    %143 = vector.broadcast %142 : vector<8x1xf32> to vector<8x160xf32>
    %144 = arith.addf %140, %143 : vector<8x160xf32>
    %145 = arith.addf %144, %62 : vector<8x160xf32>
    %cst_78 = arith.constant 0.000000e+00 : f32
    %146 = vector.broadcast %cst_78 : f32 to vector<8x160xf32>
    %147 = arith.maximumf %145, %146 : vector<8x160xf32>
    %cst_79 = arith.constant 0.000000e+00 : f32
    %148 = vector.broadcast %cst_79 : f32 to vector<8x2xf32>
    %149 = tpu.concatenate %148, %147, %148 in 1 : vector<8x2xf32>, vector<8x160xf32>, vector<8x2xf32> -> vector<8x164xf32>
    %150 = vector.extract_strided_slice %149 {offsets = [0, 0], sizes = [8, 160], strides = [1, 1]} : vector<8x164xf32> to vector<8x160xf32>
    %c2_80 = arith.constant 2 : index
    %c0_81 = arith.constant 0 : index
    %c0_82 = arith.constant 0 : index
    %c0_83 = arith.constant 0 : index
    %151 = vector.load %arg3[%c2_80, %c0_81, %c0_82, %c0_83] : memref<5x5x8x8xf32, #tpu.memory_space<vmem>>, vector<1x1x8x8xf32>
    %152 = vector.shape_cast %151 : vector<1x1x8x8xf32> to vector<8x8xf32>
    %153 = arith.truncf %152 : vector<8x8xf32> to vector<8x8xbf16>
    %154 = arith.truncf %150 : vector<8x160xf32> to vector<8x160xbf16>
    %cst_84 = arith.constant dense<0.000000e+00> : vector<8x160xf32>
    %155 = tpu.matmul %153, %154, %cst_84 {dimension_numbers = #tpu.dot_dimension_numbers<[1], [0], [0], [1], [0, 0, 1, 1], [], []>} : vector<8x8xbf16>, vector<8x160xbf16>, vector<8x160xf32> -> vector<8x160xf32>
    %156 = vector.extract_strided_slice %149 {offsets = [0, 1], sizes = [8, 160], strides = [1, 1]} : vector<8x164xf32> to vector<8x160xf32>
    %c2_85 = arith.constant 2 : index
    %c1_86 = arith.constant 1 : index
    %c0_87 = arith.constant 0 : index
    %c0_88 = arith.constant 0 : index
    %157 = vector.load %arg3[%c2_85, %c1_86, %c0_87, %c0_88] : memref<5x5x8x8xf32, #tpu.memory_space<vmem>>, vector<1x1x8x8xf32>
    %158 = vector.shape_cast %157 : vector<1x1x8x8xf32> to vector<8x8xf32>
    %159 = arith.truncf %158 : vector<8x8xf32> to vector<8x8xbf16>
    %160 = arith.truncf %156 : vector<8x160xf32> to vector<8x160xbf16>
    %cst_89 = arith.constant dense<0.000000e+00> : vector<8x160xf32>
    %161 = tpu.matmul %159, %160, %cst_89 {dimension_numbers = #tpu.dot_dimension_numbers<[1], [0], [0], [1], [0, 0, 1, 1], [], []>} : vector<8x8xbf16>, vector<8x160xbf16>, vector<8x160xf32> -> vector<8x160xf32>
    %162 = arith.addf %155, %161 : vector<8x160xf32>
    %163 = vector.extract_strided_slice %149 {offsets = [0, 2], sizes = [8, 160], strides = [1, 1]} : vector<8x164xf32> to vector<8x160xf32>
    %c2_90 = arith.constant 2 : index
    %c2_91 = arith.constant 2 : index
    %c0_92 = arith.constant 0 : index
    %c0_93 = arith.constant 0 : index
    %164 = vector.load %arg3[%c2_90, %c2_91, %c0_92, %c0_93] : memref<5x5x8x8xf32, #tpu.memory_space<vmem>>, vector<1x1x8x8xf32>
    %165 = vector.shape_cast %164 : vector<1x1x8x8xf32> to vector<8x8xf32>
    %166 = arith.truncf %165 : vector<8x8xf32> to vector<8x8xbf16>
    %167 = arith.truncf %163 : vector<8x160xf32> to vector<8x160xbf16>
    %cst_94 = arith.constant dense<0.000000e+00> : vector<8x160xf32>
    %168 = tpu.matmul %166, %167, %cst_94 {dimension_numbers = #tpu.dot_dimension_numbers<[1], [0], [0], [1], [0, 0, 1, 1], [], []>} : vector<8x8xbf16>, vector<8x160xbf16>, vector<8x160xf32> -> vector<8x160xf32>
    %169 = arith.addf %162, %168 : vector<8x160xf32>
    %170 = vector.extract_strided_slice %149 {offsets = [0, 3], sizes = [8, 160], strides = [1, 1]} : vector<8x164xf32> to vector<8x160xf32>
    %c2_95 = arith.constant 2 : index
    %c3_96 = arith.constant 3 : index
    %c0_97 = arith.constant 0 : index
    %c0_98 = arith.constant 0 : index
    %171 = vector.load %arg3[%c2_95, %c3_96, %c0_97, %c0_98] : memref<5x5x8x8xf32, #tpu.memory_space<vmem>>, vector<1x1x8x8xf32>
    %172 = vector.shape_cast %171 : vector<1x1x8x8xf32> to vector<8x8xf32>
    %173 = arith.truncf %172 : vector<8x8xf32> to vector<8x8xbf16>
    %174 = arith.truncf %170 : vector<8x160xf32> to vector<8x160xbf16>
    %cst_99 = arith.constant dense<0.000000e+00> : vector<8x160xf32>
    %175 = tpu.matmul %173, %174, %cst_99 {dimension_numbers = #tpu.dot_dimension_numbers<[1], [0], [0], [1], [0, 0, 1, 1], [], []>} : vector<8x8xbf16>, vector<8x160xbf16>, vector<8x160xf32> -> vector<8x160xf32>
    %176 = arith.addf %169, %175 : vector<8x160xf32>
    %177 = vector.extract_strided_slice %149 {offsets = [0, 4], sizes = [8, 160], strides = [1, 1]} : vector<8x164xf32> to vector<8x160xf32>
    %c2_100 = arith.constant 2 : index
    %c4_101 = arith.constant 4 : index
    %c0_102 = arith.constant 0 : index
    %c0_103 = arith.constant 0 : index
    %178 = vector.load %arg3[%c2_100, %c4_101, %c0_102, %c0_103] : memref<5x5x8x8xf32, #tpu.memory_space<vmem>>, vector<1x1x8x8xf32>
    %179 = vector.shape_cast %178 : vector<1x1x8x8xf32> to vector<8x8xf32>
    %180 = arith.truncf %179 : vector<8x8xf32> to vector<8x8xbf16>
    %181 = arith.truncf %177 : vector<8x160xf32> to vector<8x160xbf16>
    %cst_104 = arith.constant dense<0.000000e+00> : vector<8x160xf32>
    %182 = tpu.matmul %180, %181, %cst_104 {dimension_numbers = #tpu.dot_dimension_numbers<[1], [0], [0], [1], [0, 0, 1, 1], [], []>} : vector<8x8xbf16>, vector<8x160xbf16>, vector<8x160xf32> -> vector<8x160xf32>
    %183 = arith.addf %176, %182 : vector<8x160xf32>
    %cst_105 = arith.constant 0.000000e+00 : f32
    %184 = vector.broadcast %cst_105 : f32 to vector<8x8xf32>
    %185 = tpu.concatenate %183, %184 in 1 : vector<8x160xf32>, vector<8x8xf32> -> vector<8x168xf32>
    %186 = vector.extract_strided_slice %185 {offsets = [0, 0], sizes = [8, 160], strides = [1, 1]} : vector<8x168xf32> to vector<8x160xf32>
    %187 = vector.extract_strided_slice %185 {offsets = [0, 2], sizes = [8, 160], strides = [1, 1]} : vector<8x168xf32> to vector<8x160xf32>
    %188 = arith.maximumf %186, %187 : vector<8x160xf32>
    %189 = vector.extract_strided_slice %185 {offsets = [0, 4], sizes = [8, 160], strides = [1, 1]} : vector<8x168xf32> to vector<8x160xf32>
    %190 = arith.maximumf %188, %189 : vector<8x160xf32>
    %191 = vector.extract_strided_slice %185 {offsets = [0, 6], sizes = [8, 160], strides = [1, 1]} : vector<8x168xf32> to vector<8x160xf32>
    %192 = arith.maximumf %190, %191 : vector<8x160xf32>
    %193 = vector.extract_strided_slice %185 {offsets = [0, 8], sizes = [8, 160], strides = [1, 1]} : vector<8x168xf32> to vector<8x160xf32>
    %194 = arith.maximumf %192, %193 : vector<8x160xf32>
    %195 = tpu.iota {dimensions = array<i32: 0>} : vector<160x16xi32>
    %196 = tpu.iota {dimensions = array<i32: 1>} : vector<160x16xi32>
    %c10_i32_106 = arith.constant 10 : i32
    %197 = vector.broadcast %c10_i32_106 : i32 to vector<160x16xi32>
    %198 = arith.muli %197, %196 : vector<160x16xi32>
    %199 = arith.cmpi eq, %195, %198 : vector<160x16xi32>
    %200 = arith.extui %199 : vector<160x16xi1> to vector<160x16xi32>
    %201 = arith.sitofp %200 : vector<160x16xi32> to vector<160x16xf32>
    %cst_107 = arith.constant dense<0.000000e+00> : vector<8x16xf32>
    %202 = tpu.matmul %194, %201, %cst_107 {dimension_numbers = #tpu.dot_dimension_numbers<[1], [0], [0], [1], [0, 0, 1, 1], [], []>} : vector<8x160xf32>, vector<160x16xf32>, vector<8x16xf32> -> vector<8x16xf32>
    %c3_108 = arith.constant 3 : index
    %c0_109 = arith.constant 0 : index
    %c0_110 = arith.constant 0 : index
    %203 = vector.load %arg4[%c3_108, %c0_109, %c0_110] : memref<6x8x1xf32, #tpu.memory_space<vmem>>, vector<1x8x1xf32>
    %204 = vector.shape_cast %203 : vector<1x8x1xf32> to vector<8x1xf32>
    %205 = vector.broadcast %204 : vector<8x1xf32> to vector<8x16xf32>
    %206 = arith.addf %202, %205 : vector<8x16xf32>
    %cst_111 = arith.constant 0.000000e+00 : f32
    %207 = vector.broadcast %cst_111 : f32 to vector<8x16xf32>
    %208 = arith.maximumf %206, %207 : vector<8x16xf32>
    %cst_112 = arith.constant 0.000000e+00 : f32
    %209 = vector.broadcast %cst_112 : f32 to vector<8x2xf32>
    %210 = tpu.concatenate %209, %208, %209 in 1 : vector<8x2xf32>, vector<8x16xf32>, vector<8x2xf32> -> vector<8x20xf32>
    %211 = vector.extract_strided_slice %210 {offsets = [0, 0], sizes = [8, 16], strides = [1, 1]} : vector<8x20xf32> to vector<8x16xf32>
    %c3_113 = arith.constant 3 : index
    %c0_114 = arith.constant 0 : index
    %c0_115 = arith.constant 0 : index
    %c0_116 = arith.constant 0 : index
    %212 = vector.load %arg3[%c3_113, %c0_114, %c0_115, %c0_116] : memref<5x5x8x8xf32, #tpu.memory_space<vmem>>, vector<1x1x8x8xf32>
    %213 = vector.shape_cast %212 : vector<1x1x8x8xf32> to vector<8x8xf32>
    %214 = arith.truncf %213 : vector<8x8xf32> to vector<8x8xbf16>
    %215 = arith.truncf %211 : vector<8x16xf32> to vector<8x16xbf16>
    %cst_117 = arith.constant dense<0.000000e+00> : vector<8x16xf32>
    %216 = tpu.matmul %214, %215, %cst_117 {dimension_numbers = #tpu.dot_dimension_numbers<[1], [0], [0], [1], [0, 0, 1, 1], [], []>} : vector<8x8xbf16>, vector<8x16xbf16>, vector<8x16xf32> -> vector<8x16xf32>
    %217 = vector.extract_strided_slice %210 {offsets = [0, 1], sizes = [8, 16], strides = [1, 1]} : vector<8x20xf32> to vector<8x16xf32>
    %c3_118 = arith.constant 3 : index
    %c1_119 = arith.constant 1 : index
    %c0_120 = arith.constant 0 : index
    %c0_121 = arith.constant 0 : index
    %218 = vector.load %arg3[%c3_118, %c1_119, %c0_120, %c0_121] : memref<5x5x8x8xf32, #tpu.memory_space<vmem>>, vector<1x1x8x8xf32>
    %219 = vector.shape_cast %218 : vector<1x1x8x8xf32> to vector<8x8xf32>
    %220 = arith.truncf %219 : vector<8x8xf32> to vector<8x8xbf16>
    %221 = arith.truncf %217 : vector<8x16xf32> to vector<8x16xbf16>
    %cst_122 = arith.constant dense<0.000000e+00> : vector<8x16xf32>
    %222 = tpu.matmul %220, %221, %cst_122 {dimension_numbers = #tpu.dot_dimension_numbers<[1], [0], [0], [1], [0, 0, 1, 1], [], []>} : vector<8x8xbf16>, vector<8x16xbf16>, vector<8x16xf32> -> vector<8x16xf32>
    %223 = arith.addf %216, %222 : vector<8x16xf32>
    %224 = vector.extract_strided_slice %210 {offsets = [0, 2], sizes = [8, 16], strides = [1, 1]} : vector<8x20xf32> to vector<8x16xf32>
    %c3_123 = arith.constant 3 : index
    %c2_124 = arith.constant 2 : index
    %c0_125 = arith.constant 0 : index
    %c0_126 = arith.constant 0 : index
    %225 = vector.load %arg3[%c3_123, %c2_124, %c0_125, %c0_126] : memref<5x5x8x8xf32, #tpu.memory_space<vmem>>, vector<1x1x8x8xf32>
    %226 = vector.shape_cast %225 : vector<1x1x8x8xf32> to vector<8x8xf32>
    %227 = arith.truncf %226 : vector<8x8xf32> to vector<8x8xbf16>
    %228 = arith.truncf %224 : vector<8x16xf32> to vector<8x16xbf16>
    %cst_127 = arith.constant dense<0.000000e+00> : vector<8x16xf32>
    %229 = tpu.matmul %227, %228, %cst_127 {dimension_numbers = #tpu.dot_dimension_numbers<[1], [0], [0], [1], [0, 0, 1, 1], [], []>} : vector<8x8xbf16>, vector<8x16xbf16>, vector<8x16xf32> -> vector<8x16xf32>
    %230 = arith.addf %223, %229 : vector<8x16xf32>
    %231 = vector.extract_strided_slice %210 {offsets = [0, 3], sizes = [8, 16], strides = [1, 1]} : vector<8x20xf32> to vector<8x16xf32>
    %c3_128 = arith.constant 3 : index
    %c3_129 = arith.constant 3 : index
    %c0_130 = arith.constant 0 : index
    %c0_131 = arith.constant 0 : index
    %232 = vector.load %arg3[%c3_128, %c3_129, %c0_130, %c0_131] : memref<5x5x8x8xf32, #tpu.memory_space<vmem>>, vector<1x1x8x8xf32>
    %233 = vector.shape_cast %232 : vector<1x1x8x8xf32> to vector<8x8xf32>
    %234 = arith.truncf %233 : vector<8x8xf32> to vector<8x8xbf16>
    %235 = arith.truncf %231 : vector<8x16xf32> to vector<8x16xbf16>
    %cst_132 = arith.constant dense<0.000000e+00> : vector<8x16xf32>
    %236 = tpu.matmul %234, %235, %cst_132 {dimension_numbers = #tpu.dot_dimension_numbers<[1], [0], [0], [1], [0, 0, 1, 1], [], []>} : vector<8x8xbf16>, vector<8x16xbf16>, vector<8x16xf32> -> vector<8x16xf32>
    %237 = arith.addf %230, %236 : vector<8x16xf32>
    %238 = vector.extract_strided_slice %210 {offsets = [0, 4], sizes = [8, 16], strides = [1, 1]} : vector<8x20xf32> to vector<8x16xf32>
    %c3_133 = arith.constant 3 : index
    %c4_134 = arith.constant 4 : index
    %c0_135 = arith.constant 0 : index
    %c0_136 = arith.constant 0 : index
    %239 = vector.load %arg3[%c3_133, %c4_134, %c0_135, %c0_136] : memref<5x5x8x8xf32, #tpu.memory_space<vmem>>, vector<1x1x8x8xf32>
    %240 = vector.shape_cast %239 : vector<1x1x8x8xf32> to vector<8x8xf32>
    %241 = arith.truncf %240 : vector<8x8xf32> to vector<8x8xbf16>
    %242 = arith.truncf %238 : vector<8x16xf32> to vector<8x16xbf16>
    %cst_137 = arith.constant dense<0.000000e+00> : vector<8x16xf32>
    %243 = tpu.matmul %241, %242, %cst_137 {dimension_numbers = #tpu.dot_dimension_numbers<[1], [0], [0], [1], [0, 0, 1, 1], [], []>} : vector<8x8xbf16>, vector<8x16xbf16>, vector<8x16xf32> -> vector<8x16xf32>
    %244 = arith.addf %237, %243 : vector<8x16xf32>
    %c4_138 = arith.constant 4 : index
    %c0_139 = arith.constant 0 : index
    %c0_140 = arith.constant 0 : index
    %245 = vector.load %arg4[%c4_138, %c0_139, %c0_140] : memref<6x8x1xf32, #tpu.memory_space<vmem>>, vector<1x8x1xf32>
    %246 = vector.shape_cast %245 : vector<1x8x1xf32> to vector<8x1xf32>
    %247 = vector.broadcast %246 : vector<8x1xf32> to vector<8x16xf32>
    %248 = arith.addf %244, %247 : vector<8x16xf32>
    %cst_141 = arith.constant 0.000000e+00 : f32
    %249 = vector.broadcast %cst_141 : f32 to vector<8x16xf32>
    %250 = arith.maximumf %248, %249 : vector<8x16xf32>
    %cst_142 = arith.constant 0.000000e+00 : f32
    %251 = vector.broadcast %cst_142 : f32 to vector<8x2xf32>
    %252 = tpu.concatenate %251, %250, %251 in 1 : vector<8x2xf32>, vector<8x16xf32>, vector<8x2xf32> -> vector<8x20xf32>
    %253 = vector.extract_strided_slice %252 {offsets = [0, 0], sizes = [8, 16], strides = [1, 1]} : vector<8x20xf32> to vector<8x16xf32>
    %c4_143 = arith.constant 4 : index
    %c0_144 = arith.constant 0 : index
    %c0_145 = arith.constant 0 : index
    %c0_146 = arith.constant 0 : index
    %254 = vector.load %arg3[%c4_143, %c0_144, %c0_145, %c0_146] : memref<5x5x8x8xf32, #tpu.memory_space<vmem>>, vector<1x1x8x8xf32>
    %255 = vector.shape_cast %254 : vector<1x1x8x8xf32> to vector<8x8xf32>
    %256 = arith.truncf %255 : vector<8x8xf32> to vector<8x8xbf16>
    %257 = arith.truncf %253 : vector<8x16xf32> to vector<8x16xbf16>
    %cst_147 = arith.constant dense<0.000000e+00> : vector<8x16xf32>
    %258 = tpu.matmul %256, %257, %cst_147 {dimension_numbers = #tpu.dot_dimension_numbers<[1], [0], [0], [1], [0, 0, 1, 1], [], []>} : vector<8x8xbf16>, vector<8x16xbf16>, vector<8x16xf32> -> vector<8x16xf32>
    %259 = vector.extract_strided_slice %252 {offsets = [0, 1], sizes = [8, 16], strides = [1, 1]} : vector<8x20xf32> to vector<8x16xf32>
    %c4_148 = arith.constant 4 : index
    %c1_149 = arith.constant 1 : index
    %c0_150 = arith.constant 0 : index
    %c0_151 = arith.constant 0 : index
    %260 = vector.load %arg3[%c4_148, %c1_149, %c0_150, %c0_151] : memref<5x5x8x8xf32, #tpu.memory_space<vmem>>, vector<1x1x8x8xf32>
    %261 = vector.shape_cast %260 : vector<1x1x8x8xf32> to vector<8x8xf32>
    %262 = arith.truncf %261 : vector<8x8xf32> to vector<8x8xbf16>
    %263 = arith.truncf %259 : vector<8x16xf32> to vector<8x16xbf16>
    %cst_152 = arith.constant dense<0.000000e+00> : vector<8x16xf32>
    %264 = tpu.matmul %262, %263, %cst_152 {dimension_numbers = #tpu.dot_dimension_numbers<[1], [0], [0], [1], [0, 0, 1, 1], [], []>} : vector<8x8xbf16>, vector<8x16xbf16>, vector<8x16xf32> -> vector<8x16xf32>
    %265 = arith.addf %258, %264 : vector<8x16xf32>
    %266 = vector.extract_strided_slice %252 {offsets = [0, 2], sizes = [8, 16], strides = [1, 1]} : vector<8x20xf32> to vector<8x16xf32>
    %c4_153 = arith.constant 4 : index
    %c2_154 = arith.constant 2 : index
    %c0_155 = arith.constant 0 : index
    %c0_156 = arith.constant 0 : index
    %267 = vector.load %arg3[%c4_153, %c2_154, %c0_155, %c0_156] : memref<5x5x8x8xf32, #tpu.memory_space<vmem>>, vector<1x1x8x8xf32>
    %268 = vector.shape_cast %267 : vector<1x1x8x8xf32> to vector<8x8xf32>
    %269 = arith.truncf %268 : vector<8x8xf32> to vector<8x8xbf16>
    %270 = arith.truncf %266 : vector<8x16xf32> to vector<8x16xbf16>
    %cst_157 = arith.constant dense<0.000000e+00> : vector<8x16xf32>
    %271 = tpu.matmul %269, %270, %cst_157 {dimension_numbers = #tpu.dot_dimension_numbers<[1], [0], [0], [1], [0, 0, 1, 1], [], []>} : vector<8x8xbf16>, vector<8x16xbf16>, vector<8x16xf32> -> vector<8x16xf32>
    %272 = arith.addf %265, %271 : vector<8x16xf32>
    %273 = vector.extract_strided_slice %252 {offsets = [0, 3], sizes = [8, 16], strides = [1, 1]} : vector<8x20xf32> to vector<8x16xf32>
    %c4_158 = arith.constant 4 : index
    %c3_159 = arith.constant 3 : index
    %c0_160 = arith.constant 0 : index
    %c0_161 = arith.constant 0 : index
    %274 = vector.load %arg3[%c4_158, %c3_159, %c0_160, %c0_161] : memref<5x5x8x8xf32, #tpu.memory_space<vmem>>, vector<1x1x8x8xf32>
    %275 = vector.shape_cast %274 : vector<1x1x8x8xf32> to vector<8x8xf32>
    %276 = arith.truncf %275 : vector<8x8xf32> to vector<8x8xbf16>
    %277 = arith.truncf %273 : vector<8x16xf32> to vector<8x16xbf16>
    %cst_162 = arith.constant dense<0.000000e+00> : vector<8x16xf32>
    %278 = tpu.matmul %276, %277, %cst_162 {dimension_numbers = #tpu.dot_dimension_numbers<[1], [0], [0], [1], [0, 0, 1, 1], [], []>} : vector<8x8xbf16>, vector<8x16xbf16>, vector<8x16xf32> -> vector<8x16xf32>
    %279 = arith.addf %272, %278 : vector<8x16xf32>
    %280 = vector.extract_strided_slice %252 {offsets = [0, 4], sizes = [8, 16], strides = [1, 1]} : vector<8x20xf32> to vector<8x16xf32>
    %c4_163 = arith.constant 4 : index
    %c4_164 = arith.constant 4 : index
    %c0_165 = arith.constant 0 : index
    %c0_166 = arith.constant 0 : index
    %281 = vector.load %arg3[%c4_163, %c4_164, %c0_165, %c0_166] : memref<5x5x8x8xf32, #tpu.memory_space<vmem>>, vector<1x1x8x8xf32>
    %282 = vector.shape_cast %281 : vector<1x1x8x8xf32> to vector<8x8xf32>
    %283 = arith.truncf %282 : vector<8x8xf32> to vector<8x8xbf16>
    %284 = arith.truncf %280 : vector<8x16xf32> to vector<8x16xbf16>
    %cst_167 = arith.constant dense<0.000000e+00> : vector<8x16xf32>
    %285 = tpu.matmul %283, %284, %cst_167 {dimension_numbers = #tpu.dot_dimension_numbers<[1], [0], [0], [1], [0, 0, 1, 1], [], []>} : vector<8x8xbf16>, vector<8x16xbf16>, vector<8x16xf32> -> vector<8x16xf32>
    %286 = arith.addf %279, %285 : vector<8x16xf32>
    %c5 = arith.constant 5 : index
    %c0_168 = arith.constant 0 : index
    %c0_169 = arith.constant 0 : index
    %287 = vector.load %arg4[%c5, %c0_168, %c0_169] : memref<6x8x1xf32, #tpu.memory_space<vmem>>, vector<1x8x1xf32>
    %288 = vector.shape_cast %287 : vector<1x8x1xf32> to vector<8x1xf32>
    %289 = vector.broadcast %288 : vector<8x1xf32> to vector<8x16xf32>
    %290 = arith.addf %286, %289 : vector<8x16xf32>
    %291 = arith.addf %290, %208 : vector<8x16xf32>
    %cst_170 = arith.constant 0.000000e+00 : f32
    %292 = vector.broadcast %cst_170 : f32 to vector<8x16xf32>
    %293 = arith.maximumf %291, %292 : vector<8x16xf32>
    %c0_171 = arith.constant 0 : index
    %c0_172 = arith.constant 0 : index
    %c0_173 = arith.constant 0 : index
    %294 = vector.load %arg5[%c0_171, %c0_172, %c0_173] : memref<1x8x16xf32, #tpu.memory_space<vmem>>, vector<1x8x16xf32>
    %295 = vector.shape_cast %294 : vector<1x8x16xf32> to vector<8x16xf32>
    %296 = vector.shape_cast %293 : vector<8x16xf32> to vector<1x8x16xf32>
    tpu.vector_store %arg5[%c0_171, %c0_172, %c0_173], %296 {strides = array<i32>} : memref<1x8x16xf32, #tpu.memory_space<vmem>>, vector<1x8x16xf32>,
    return
  }
  func.func @transform_0(%arg0: i32) -> (i32, i32, i32) {
    %c0_i32 = arith.constant 0 : i32
    %c0_i32_0 = arith.constant 0 : i32
    %c0_i32_1 = arith.constant 0 : i32
    return %arg0, %c0_i32, %c0_i32_0 : i32, i32, i32
  }
  func.func @transform_1(%arg0: i32) -> (i32, i32, i32) {
    %c0_i32 = arith.constant 0 : i32
    %c0_i32_0 = arith.constant 0 : i32
    %c0_i32_1 = arith.constant 0 : i32
    %c0_i32_2 = arith.constant 0 : i32
    return %c0_i32, %c0_i32_0, %c0_i32_1 : i32, i32, i32
  }
  func.func @transform_2(%arg0: i32) -> (i32, i32, i32, i32) {
    %c0_i32 = arith.constant 0 : i32
    %c0_i32_0 = arith.constant 0 : i32
    %c0_i32_1 = arith.constant 0 : i32
    %c0_i32_2 = arith.constant 0 : i32
    %c0_i32_3 = arith.constant 0 : i32
    return %c0_i32, %c0_i32_0, %c0_i32_1, %c0_i32_2 : i32, i32, i32, i32
  }
  func.func @transform_3(%arg0: i32) -> (i32, i32, i32) {
    %c0_i32 = arith.constant 0 : i32
    %c0_i32_0 = arith.constant 0 : i32
    %c0_i32_1 = arith.constant 0 : i32
    %c0_i32_2 = arith.constant 0 : i32
    return %c0_i32, %c0_i32_0, %c0_i32_1 : i32, i32, i32
  }
  func.func @transform_4(%arg0: i32) -> (i32, i32, i32) {
    %c0_i32 = arith.constant 0 : i32
    %c0_i32_0 = arith.constant 0 : i32
    %c0_i32_1 = arith.constant 0 : i32
    return %arg0, %c0_i32, %c0_i32_0 : i32, i32, i32
  }
}

module attributes {stable_mosaic.version = 11 : i64} {
  func.func @_decoder_kernel(%arg0: i32, %arg1: memref<1x8x16xf32, #tpu.memory_space<vmem>>, %arg2: memref<1x1x256xf32, #tpu.memory_space<vmem>>, %arg3: memref<200x145xf32, #tpu.memory_space<vmem>>, %arg4: memref<1x1x256xf32, #tpu.memory_space<vmem>>) attributes {dimension_semantics = [#tpu.dimension_semantics<parallel>], iteration_bounds = array<i64: 2>, scalar_prefetch = 0 : i64, scratch_operands = 0 : i64, tpu.core_type = #tpu.core_type<tc>, window_params = [{transform_indices = @transform_0, window_bounds = array<i64: 1, 8, 16>}, {transform_indices = @transform_1, window_bounds = array<i64: 1, 1, 256>}, {pipeline_mode = #tpu.pipeline_mode<synchronous>, transform_indices = @transform_2, window_bounds = array<i64: 200, 145>}, {transform_indices = @transform_3, window_bounds = array<i64: 1, 1, 256>}]} {
    %0 = tpu.iota {dimensions = array<i32: 1>} : vector<1x256xi32>
    %c16_i32 = arith.constant 16 : i32
    %c0_i32 = arith.constant 0 : i32
    %1 = arith.cmpi eq, %c16_i32, %c0_i32 : i32
    %c1_i32 = arith.constant 1 : i32
    %2 = arith.select %1, %c1_i32, %c16_i32 : i32
    %3 = vector.broadcast %2 : i32 to vector<1x256xi32>
    %4 = arith.remsi %0, %3 : vector<1x256xi32>
    %c0_i32_0 = arith.constant 0 : i32
    %5 = vector.broadcast %c0_i32_0 : i32 to vector<1x256xi32>
    %6 = arith.cmpi ne, %4, %5 : vector<1x256xi32>
    %c0_i32_1 = arith.constant 0 : i32
    %7 = vector.broadcast %c0_i32_1 : i32 to vector<1x256xi32>
    %8 = arith.cmpi slt, %4, %7 : vector<1x256xi32>
    %c0_i32_2 = arith.constant 0 : i32
    %9 = arith.cmpi slt, %2, %c0_i32_2 : i32
    %10 = vector.broadcast %9 : i1 to vector<1x256xi1>
    %11 = vector.broadcast %10 : vector<1x256xi1> to vector<1x256xi1>
    %12 = arith.xori %8, %11 : vector<1x256xi1>
    %13 = arith.andi %12, %6 : vector<1x256xi1>
    %14 = vector.broadcast %2 : i32 to vector<1x256xi32>
    %15 = arith.addi %4, %14 : vector<1x256xi32>
    %16 = arith.select %13, %15, %4 : vector<1x256xi1>, vector<1x256xi32>
    %c1_i32_3 = arith.constant 1 : i32
    %17 = vector.broadcast %c1_i32_3 : i32 to vector<1x256xi32>
    %18 = arith.cmpi sge, %16, %17 : vector<1x256xi32>
    %19 = arith.extui %18 : vector<1x256xi1> to vector<1x256xi32>
    %20 = arith.sitofp %19 : vector<1x256xi32> to vector<1x256xf32>
    %c15_i32 = arith.constant 15 : i32
    %21 = vector.broadcast %c15_i32 : i32 to vector<1x256xi32>
    %22 = arith.cmpi slt, %16, %21 : vector<1x256xi32>
    %23 = arith.extui %22 : vector<1x256xi1> to vector<1x256xi32>
    %24 = arith.sitofp %23 : vector<1x256xi32> to vector<1x256xf32>
    %c2_i32 = arith.constant 2 : i32
    %25 = vector.broadcast %c2_i32 : i32 to vector<1x256xi32>
    %26 = arith.cmpi sge, %16, %25 : vector<1x256xi32>
    %27 = arith.extui %26 : vector<1x256xi1> to vector<1x256xi32>
    %28 = arith.sitofp %27 : vector<1x256xi32> to vector<1x256xf32>
    %c14_i32 = arith.constant 14 : i32
    %29 = vector.broadcast %c14_i32 : i32 to vector<1x256xi32>
    %30 = arith.cmpi slt, %16, %29 : vector<1x256xi32>
    %31 = arith.extui %30 : vector<1x256xi1> to vector<1x256xi32>
    %32 = arith.sitofp %31 : vector<1x256xi32> to vector<1x256xf32>
    %c4_i32 = arith.constant 4 : i32
    %33 = vector.broadcast %c4_i32 : i32 to vector<1x256xi32>
    %34 = arith.cmpi sge, %16, %33 : vector<1x256xi32>
    %35 = arith.extui %34 : vector<1x256xi1> to vector<1x256xi32>
    %36 = arith.sitofp %35 : vector<1x256xi32> to vector<1x256xf32>
    %c12_i32 = arith.constant 12 : i32
    %37 = vector.broadcast %c12_i32 : i32 to vector<1x256xi32>
    %38 = arith.cmpi slt, %16, %37 : vector<1x256xi32>
    %39 = arith.extui %38 : vector<1x256xi1> to vector<1x256xi32>
    %40 = arith.sitofp %39 : vector<1x256xi32> to vector<1x256xf32>
    %c8_i32 = arith.constant 8 : i32
    %41 = vector.broadcast %c8_i32 : i32 to vector<1x256xi32>
    %42 = arith.cmpi sge, %16, %41 : vector<1x256xi32>
    %43 = arith.extui %42 : vector<1x256xi1> to vector<1x256xi32>
    %44 = arith.sitofp %43 : vector<1x256xi32> to vector<1x256xf32>
    %c8_i32_4 = arith.constant 8 : i32
    %45 = vector.broadcast %c8_i32_4 : i32 to vector<1x256xi32>
    %46 = arith.cmpi slt, %16, %45 : vector<1x256xi32>
    %47 = arith.extui %46 : vector<1x256xi1> to vector<1x256xi32>
    %48 = arith.sitofp %47 : vector<1x256xi32> to vector<1x256xf32>
    %c0 = arith.constant 0 : index
    %c0_5 = arith.constant 0 : index
    %c0_6 = arith.constant 0 : index
    %49 = vector.load %arg2[%c0, %c0_5, %c0_6] : memref<1x1x256xf32, #tpu.memory_space<vmem>>, vector<1x1x256xf32>
    %50 = vector.shape_cast %49 : vector<1x1x256xf32> to vector<1x256xf32>
    %c0_7 = arith.constant 0 : index
    %c0_8 = arith.constant 0 : index
    %51 = vector.load %arg3[%c0_7, %c0_8] : memref<200x145xf32, #tpu.memory_space<vmem>>, vector<8x9xf32>
    %c0_9 = arith.constant 0 : index
    %c144 = arith.constant 144 : index
    %52 = vector.load %arg3[%c0_9, %c144] : memref<200x145xf32, #tpu.memory_space<vmem>>, vector<8x1xf32>
    %c1_i32_10 = arith.constant 1 : i32
    %53 = tpu.dynamic_rotate %50 by %c1_i32_10 dim 1 : vector<1x256xf32>, i32 -> vector<1x256xf32>
    %54 = arith.mulf %53, %20 : vector<1x256xf32>
    %c255_i32 = arith.constant 255 : i32
    %55 = tpu.dynamic_rotate %50 by %c255_i32 dim 1 : vector<1x256xf32>, i32 -> vector<1x256xf32>
    %56 = arith.mulf %55, %24 : vector<1x256xf32>
    %57 = tpu.concatenate %54, %50, %56 in 0 : vector<1x256xf32>, vector<1x256xf32>, vector<1x256xf32> -> vector<3x256xf32>
    %cst = arith.constant 0.000000e+00 : f32
    %58 = vector.broadcast %cst : f32 to vector<3x16xf32>
    %59 = vector.extract_strided_slice %57 {offsets = [0, 0], sizes = [3, 240], strides = [1, 1]} : vector<3x256xf32> to vector<3x240xf32>
    %60 = tpu.concatenate %58, %59 in 1 : vector<3x16xf32>, vector<3x240xf32> -> vector<3x256xf32>
    %61 = vector.extract_strided_slice %57 {offsets = [0, 16], sizes = [3, 240], strides = [1, 1]} : vector<3x256xf32> to vector<3x240xf32>
    %62 = tpu.concatenate %61, %58 in 1 : vector<3x240xf32>, vector<3x16xf32> -> vector<3x256xf32>
    %63 = tpu.concatenate %60, %57, %62 in 0 : vector<3x256xf32>, vector<3x256xf32>, vector<3x256xf32> -> vector<9x256xf32>
    %64 = arith.truncf %51 : vector<8x9xf32> to vector<8x9xbf16>
    %65 = arith.truncf %63 : vector<9x256xf32> to vector<9x256xbf16>
    %cst_11 = arith.constant dense<0.000000e+00> : vector<8x256xf32>
    %66 = tpu.matmul %64, %65, %cst_11 {dimension_numbers = #tpu.dot_dimension_numbers<[1], [0], [0], [1], [0, 0, 1, 1], [], []>} : vector<8x9xbf16>, vector<9x256xbf16>, vector<8x256xf32> -> vector<8x256xf32>
    %67 = vector.broadcast %52 : vector<8x1xf32> to vector<8x256xf32>
    %68 = arith.addf %66, %67 : vector<8x256xf32>
    %cst_12 = arith.constant 0.000000e+00 : f32
    %69 = vector.broadcast %cst_12 : f32 to vector<8x256xf32>
    %70 = arith.maximumf %68, %69 : vector<8x256xf32>
    %c8 = arith.constant 8 : index
    %c0_13 = arith.constant 0 : index
    %71 = vector.load %arg3[%c8, %c0_13] : memref<200x145xf32, #tpu.memory_space<vmem>>, vector<16x72xf32>
    %c8_14 = arith.constant 8 : index
    %c144_15 = arith.constant 144 : index
    %72 = vector.load %arg3[%c8_14, %c144_15] : memref<200x145xf32, #tpu.memory_space<vmem>>, vector<16x1xf32>
    %c1_i32_16 = arith.constant 1 : i32
    %73 = tpu.dynamic_rotate %70 by %c1_i32_16 dim 1 : vector<8x256xf32>, i32 -> vector<8x256xf32>
    %74 = vector.broadcast %20 : vector<1x256xf32> to vector<8x256xf32>
    %75 = arith.mulf %73, %74 : vector<8x256xf32>
    %c255_i32_17 = arith.constant 255 : i32
    %76 = tpu.dynamic_rotate %70 by %c255_i32_17 dim 1 : vector<8x256xf32>, i32 -> vector<8x256xf32>
    %77 = vector.broadcast %24 : vector<1x256xf32> to vector<8x256xf32>
    %78 = arith.mulf %76, %77 : vector<8x256xf32>
    %79 = tpu.concatenate %75, %70, %78 in 0 : vector<8x256xf32>, vector<8x256xf32>, vector<8x256xf32> -> vector<24x256xf32>
    %cst_18 = arith.constant 0.000000e+00 : f32
    %80 = vector.broadcast %cst_18 : f32 to vector<24x16xf32>
    %81 = vector.extract_strided_slice %79 {offsets = [0, 0], sizes = [24, 240], strides = [1, 1]} : vector<24x256xf32> to vector<24x240xf32>
    %82 = tpu.concatenate %80, %81 in 1 : vector<24x16xf32>, vector<24x240xf32> -> vector<24x256xf32>
    %83 = vector.extract_strided_slice %79 {offsets = [0, 16], sizes = [24, 240], strides = [1, 1]} : vector<24x256xf32> to vector<24x240xf32>
    %84 = tpu.concatenate %83, %80 in 1 : vector<24x240xf32>, vector<24x16xf32> -> vector<24x256xf32>
    %85 = tpu.concatenate %82, %79, %84 in 0 : vector<24x256xf32>, vector<24x256xf32>, vector<24x256xf32> -> vector<72x256xf32>
    %86 = arith.truncf %71 : vector<16x72xf32> to vector<16x72xbf16>
    %87 = arith.truncf %85 : vector<72x256xf32> to vector<72x256xbf16>
    %cst_19 = arith.constant dense<0.000000e+00> : vector<16x256xf32>
    %88 = tpu.matmul %86, %87, %cst_19 {dimension_numbers = #tpu.dot_dimension_numbers<[1], [0], [0], [1], [0, 0, 1, 1], [], []>} : vector<16x72xbf16>, vector<72x256xbf16>, vector<16x256xf32> -> vector<16x256xf32>
    %89 = vector.broadcast %72 : vector<16x1xf32> to vector<16x256xf32>
    %90 = arith.addf %88, %89 : vector<16x256xf32>
    %cst_20 = arith.constant 0.000000e+00 : f32
    %91 = vector.broadcast %cst_20 : f32 to vector<16x256xf32>
    %92 = arith.maximumf %90, %91 : vector<16x256xf32>
    %c0_21 = arith.constant 0 : index
    %c0_22 = arith.constant 0 : index
    %c0_23 = arith.constant 0 : index
    %93 = vector.load %arg1[%c0_21, %c0_22, %c0_23] : memref<1x8x16xf32, #tpu.memory_space<vmem>>, vector<1x8x16xf32>
    %94 = vector.shape_cast %93 : vector<1x8x16xf32> to vector<8x16xf32>
    %c152 = arith.constant 152 : index
    %c0_24 = arith.constant 0 : index
    %95 = vector.load %arg3[%c152, %c0_24] : memref<200x145xf32, #tpu.memory_space<vmem>>, vector<16x32xf32>
    %c152_25 = arith.constant 152 : index
    %c144_26 = arith.constant 144 : index
    %96 = vector.load %arg3[%c152_25, %c144_26] : memref<200x145xf32, #tpu.memory_space<vmem>>, vector<16x1xf32>
    %97 = vector.extract_strided_slice %95 {offsets = [0, 0], sizes = [16, 8], strides = [1, 1]} : vector<16x32xf32> to vector<16x8xf32>
    %98 = arith.truncf %97 : vector<16x8xf32> to vector<16x8xbf16>
    %99 = arith.truncf %94 : vector<8x16xf32> to vector<8x16xbf16>
    %cst_27 = arith.constant dense<0.000000e+00> : vector<16x16xf32>
    %100 = tpu.matmul %98, %99, %cst_27 {dimension_numbers = #tpu.dot_dimension_numbers<[1], [0], [0], [1], [0, 0, 1, 1], [], []>} : vector<16x8xbf16>, vector<8x16xbf16>, vector<16x16xf32> -> vector<16x16xf32>
    %101 = vector.extract_strided_slice %95 {offsets = [0, 8], sizes = [16, 8], strides = [1, 1]} : vector<16x32xf32> to vector<16x8xf32>
    %102 = arith.truncf %101 : vector<16x8xf32> to vector<16x8xbf16>
    %103 = arith.truncf %94 : vector<8x16xf32> to vector<8x16xbf16>
    %cst_28 = arith.constant dense<0.000000e+00> : vector<16x16xf32>
    %104 = tpu.matmul %102, %103, %cst_28 {dimension_numbers = #tpu.dot_dimension_numbers<[1], [0], [0], [1], [0, 0, 1, 1], [], []>} : vector<16x8xbf16>, vector<8x16xbf16>, vector<16x16xf32> -> vector<16x16xf32>
    %105 = vector.extract_strided_slice %104 {offsets = [0, 0], sizes = [16, 1], strides = [1, 1]} : vector<16x16xf32> to vector<16x1xf32>
    %106 = vector.broadcast %105 : vector<16x1xf32> to vector<16x16xf32>
    %107 = arith.addf %100, %106 : vector<16x16xf32>
    %108 = vector.extract_strided_slice %104 {offsets = [0, 1], sizes = [16, 1], strides = [1, 1]} : vector<16x16xf32> to vector<16x1xf32>
    %109 = vector.broadcast %108 : vector<16x1xf32> to vector<16x16xf32>
    %110 = arith.addf %100, %109 : vector<16x16xf32>
    %111 = vector.extract_strided_slice %104 {offsets = [0, 2], sizes = [16, 1], strides = [1, 1]} : vector<16x16xf32> to vector<16x1xf32>
    %112 = vector.broadcast %111 : vector<16x1xf32> to vector<16x16xf32>
    %113 = arith.addf %100, %112 : vector<16x16xf32>
    %114 = vector.extract_strided_slice %104 {offsets = [0, 3], sizes = [16, 1], strides = [1, 1]} : vector<16x16xf32> to vector<16x1xf32>
    %115 = vector.broadcast %114 : vector<16x1xf32> to vector<16x16xf32>
    %116 = arith.addf %100, %115 : vector<16x16xf32>
    %117 = vector.extract_strided_slice %104 {offsets = [0, 4], sizes = [16, 1], strides = [1, 1]} : vector<16x16xf32> to vector<16x1xf32>
    %118 = vector.broadcast %117 : vector<16x1xf32> to vector<16x16xf32>
    %119 = arith.addf %100, %118 : vector<16x16xf32>
    %120 = vector.extract_strided_slice %104 {offsets = [0, 5], sizes = [16, 1], strides = [1, 1]} : vector<16x16xf32> to vector<16x1xf32>
    %121 = vector.broadcast %120 : vector<16x1xf32> to vector<16x16xf32>
    %122 = arith.addf %100, %121 : vector<16x16xf32>
    %123 = vector.extract_strided_slice %104 {offsets = [0, 6], sizes = [16, 1], strides = [1, 1]} : vector<16x16xf32> to vector<16x1xf32>
    %124 = vector.broadcast %123 : vector<16x1xf32> to vector<16x16xf32>
    %125 = arith.addf %100, %124 : vector<16x16xf32>
    %126 = vector.extract_strided_slice %104 {offsets = [0, 7], sizes = [16, 1], strides = [1, 1]} : vector<16x16xf32> to vector<16x1xf32>
    %127 = vector.broadcast %126 : vector<16x1xf32> to vector<16x16xf32>
    %128 = arith.addf %100, %127 : vector<16x16xf32>
    %129 = vector.extract_strided_slice %104 {offsets = [0, 8], sizes = [16, 1], strides = [1, 1]} : vector<16x16xf32> to vector<16x1xf32>
    %130 = vector.broadcast %129 : vector<16x1xf32> to vector<16x16xf32>
    %131 = arith.addf %100, %130 : vector<16x16xf32>
    %132 = vector.extract_strided_slice %104 {offsets = [0, 9], sizes = [16, 1], strides = [1, 1]} : vector<16x16xf32> to vector<16x1xf32>
    %133 = vector.broadcast %132 : vector<16x1xf32> to vector<16x16xf32>
    %134 = arith.addf %100, %133 : vector<16x16xf32>
    %135 = vector.extract_strided_slice %104 {offsets = [0, 10], sizes = [16, 1], strides = [1, 1]} : vector<16x16xf32> to vector<16x1xf32>
    %136 = vector.broadcast %135 : vector<16x1xf32> to vector<16x16xf32>
    %137 = arith.addf %100, %136 : vector<16x16xf32>
    %138 = vector.extract_strided_slice %104 {offsets = [0, 11], sizes = [16, 1], strides = [1, 1]} : vector<16x16xf32> to vector<16x1xf32>
    %139 = vector.broadcast %138 : vector<16x1xf32> to vector<16x16xf32>
    %140 = arith.addf %100, %139 : vector<16x16xf32>
    %141 = vector.extract_strided_slice %104 {offsets = [0, 12], sizes = [16, 1], strides = [1, 1]} : vector<16x16xf32> to vector<16x1xf32>
    %142 = vector.broadcast %141 : vector<16x1xf32> to vector<16x16xf32>
    %143 = arith.addf %100, %142 : vector<16x16xf32>
    %144 = vector.extract_strided_slice %104 {offsets = [0, 13], sizes = [16, 1], strides = [1, 1]} : vector<16x16xf32> to vector<16x1xf32>
    %145 = vector.broadcast %144 : vector<16x1xf32> to vector<16x16xf32>
    %146 = arith.addf %100, %145 : vector<16x16xf32>
    %147 = vector.extract_strided_slice %104 {offsets = [0, 14], sizes = [16, 1], strides = [1, 1]} : vector<16x16xf32> to vector<16x1xf32>
    %148 = vector.broadcast %147 : vector<16x1xf32> to vector<16x16xf32>
    %149 = arith.addf %100, %148 : vector<16x16xf32>
    %150 = vector.extract_strided_slice %104 {offsets = [0, 15], sizes = [16, 1], strides = [1, 1]} : vector<16x16xf32> to vector<16x1xf32>
    %151 = vector.broadcast %150 : vector<16x1xf32> to vector<16x16xf32>
    %152 = arith.addf %100, %151 : vector<16x16xf32>
    %153 = tpu.concatenate %107, %110, %113, %116, %119, %122, %125, %128, %131, %134, %137, %140, %143, %146, %149, %152 in 1 : vector<16x16xf32>, vector<16x16xf32>, vector<16x16xf32>, vector<16x16xf32>, vector<16x16xf32>, vector<16x16xf32>, vector<16x16xf32>, vector<16x16xf32>, vector<16x16xf32>, vector<16x16xf32>, vector<16x16xf32>, vector<16x16xf32>, vector<16x16xf32>, vector<16x16xf32>, vector<16x16xf32>, vector<16x16xf32> -> vector<16x256xf32>
    %154 = vector.extract_strided_slice %95 {offsets = [0, 16], sizes = [16, 16], strides = [1, 1]} : vector<16x32xf32> to vector<16x16xf32>
    %155 = arith.truncf %154 : vector<16x16xf32> to vector<16x16xbf16>
    %156 = arith.truncf %92 : vector<16x256xf32> to vector<16x256xbf16>
    %cst_29 = arith.constant dense<0.000000e+00> : vector<16x256xf32>
    %157 = tpu.matmul %155, %156, %cst_29 {dimension_numbers = #tpu.dot_dimension_numbers<[1], [0], [0], [1], [0, 0, 1, 1], [], []>} : vector<16x16xbf16>, vector<16x256xbf16>, vector<16x256xf32> -> vector<16x256xf32>
    %158 = arith.addf %153, %157 : vector<16x256xf32>
    %159 = vector.broadcast %96 : vector<16x1xf32> to vector<16x256xf32>
    %160 = arith.addf %158, %159 : vector<16x256xf32>
    %c24 = arith.constant 24 : index
    %c0_30 = arith.constant 0 : index
    %161 = vector.load %arg3[%c24, %c0_30] : memref<200x145xf32, #tpu.memory_space<vmem>>, vector<16x144xf32>
    %c24_31 = arith.constant 24 : index
    %c144_32 = arith.constant 144 : index
    %162 = vector.load %arg3[%c24_31, %c144_32] : memref<200x145xf32, #tpu.memory_space<vmem>>, vector<16x1xf32>
    %c1_i32_33 = arith.constant 1 : i32
    %163 = tpu.dynamic_rotate %160 by %c1_i32_33 dim 1 : vector<16x256xf32>, i32 -> vector<16x256xf32>
    %164 = vector.broadcast %20 : vector<1x256xf32> to vector<16x256xf32>
    %165 = arith.mulf %163, %164 : vector<16x256xf32>
    %c255_i32_34 = arith.constant 255 : i32
    %166 = tpu.dynamic_rotate %160 by %c255_i32_34 dim 1 : vector<16x256xf32>, i32 -> vector<16x256xf32>
    %167 = vector.broadcast %24 : vector<1x256xf32> to vector<16x256xf32>
    %168 = arith.mulf %166, %167 : vector<16x256xf32>
    %169 = tpu.concatenate %165, %160, %168 in 0 : vector<16x256xf32>, vector<16x256xf32>, vector<16x256xf32> -> vector<48x256xf32>
    %cst_35 = arith.constant 0.000000e+00 : f32
    %170 = vector.broadcast %cst_35 : f32 to vector<48x16xf32>
    %171 = vector.extract_strided_slice %169 {offsets = [0, 0], sizes = [48, 240], strides = [1, 1]} : vector<48x256xf32> to vector<48x240xf32>
    %172 = tpu.concatenate %170, %171 in 1 : vector<48x16xf32>, vector<48x240xf32> -> vector<48x256xf32>
    %173 = vector.extract_strided_slice %169 {offsets = [0, 16], sizes = [48, 240], strides = [1, 1]} : vector<48x256xf32> to vector<48x240xf32>
    %174 = tpu.concatenate %173, %170 in 1 : vector<48x240xf32>, vector<48x16xf32> -> vector<48x256xf32>
    %175 = tpu.concatenate %172, %169, %174 in 0 : vector<48x256xf32>, vector<48x256xf32>, vector<48x256xf32> -> vector<144x256xf32>
    %176 = arith.truncf %161 : vector<16x144xf32> to vector<16x144xbf16>
    %177 = arith.truncf %175 : vector<144x256xf32> to vector<144x256xbf16>
    %cst_36 = arith.constant dense<0.000000e+00> : vector<16x256xf32>
    %178 = tpu.matmul %176, %177, %cst_36 {dimension_numbers = #tpu.dot_dimension_numbers<[1], [0], [0], [1], [0, 0, 1, 1], [], []>} : vector<16x144xbf16>, vector<144x256xbf16>, vector<16x256xf32> -> vector<16x256xf32>
    %179 = vector.broadcast %162 : vector<16x1xf32> to vector<16x256xf32>
    %180 = arith.addf %178, %179 : vector<16x256xf32>
    %cst_37 = arith.constant 0.000000e+00 : f32
    %181 = vector.broadcast %cst_37 : f32 to vector<16x256xf32>
    %182 = arith.maximumf %180, %181 : vector<16x256xf32>
    %c40 = arith.constant 40 : index
    %c0_38 = arith.constant 0 : index
    %183 = vector.load %arg3[%c40, %c0_38] : memref<200x145xf32, #tpu.memory_space<vmem>>, vector<16x144xf32>
    %c40_39 = arith.constant 40 : index
    %c144_40 = arith.constant 144 : index
    %184 = vector.load %arg3[%c40_39, %c144_40] : memref<200x145xf32, #tpu.memory_space<vmem>>, vector<16x1xf32>
    %c1_i32_41 = arith.constant 1 : i32
    %185 = tpu.dynamic_rotate %182 by %c1_i32_41 dim 1 : vector<16x256xf32>, i32 -> vector<16x256xf32>
    %186 = vector.broadcast %20 : vector<1x256xf32> to vector<16x256xf32>
    %187 = arith.mulf %185, %186 : vector<16x256xf32>
    %c255_i32_42 = arith.constant 255 : i32
    %188 = tpu.dynamic_rotate %182 by %c255_i32_42 dim 1 : vector<16x256xf32>, i32 -> vector<16x256xf32>
    %189 = vector.broadcast %24 : vector<1x256xf32> to vector<16x256xf32>
    %190 = arith.mulf %188, %189 : vector<16x256xf32>
    %191 = tpu.concatenate %187, %182, %190 in 0 : vector<16x256xf32>, vector<16x256xf32>, vector<16x256xf32> -> vector<48x256xf32>
    %cst_43 = arith.constant 0.000000e+00 : f32
    %192 = vector.broadcast %cst_43 : f32 to vector<48x16xf32>
    %193 = vector.extract_strided_slice %191 {offsets = [0, 0], sizes = [48, 240], strides = [1, 1]} : vector<48x256xf32> to vector<48x240xf32>
    %194 = tpu.concatenate %192, %193 in 1 : vector<48x16xf32>, vector<48x240xf32> -> vector<48x256xf32>
    %195 = vector.extract_strided_slice %191 {offsets = [0, 16], sizes = [48, 240], strides = [1, 1]} : vector<48x256xf32> to vector<48x240xf32>
    %196 = tpu.concatenate %195, %192 in 1 : vector<48x240xf32>, vector<48x16xf32> -> vector<48x256xf32>
    %197 = tpu.concatenate %194, %191, %196 in 0 : vector<48x256xf32>, vector<48x256xf32>, vector<48x256xf32> -> vector<144x256xf32>
    %198 = arith.truncf %183 : vector<16x144xf32> to vector<16x144xbf16>
    %199 = arith.truncf %197 : vector<144x256xf32> to vector<144x256xbf16>
    %cst_44 = arith.constant dense<0.000000e+00> : vector<16x256xf32>
    %200 = tpu.matmul %198, %199, %cst_44 {dimension_numbers = #tpu.dot_dimension_numbers<[1], [0], [0], [1], [0, 0, 1, 1], [], []>} : vector<16x144xbf16>, vector<144x256xbf16>, vector<16x256xf32> -> vector<16x256xf32>
    %201 = vector.broadcast %184 : vector<16x1xf32> to vector<16x256xf32>
    %202 = arith.addf %200, %201 : vector<16x256xf32>
    %203 = arith.addf %202, %160 : vector<16x256xf32>
    %cst_45 = arith.constant 0.000000e+00 : f32
    %204 = vector.broadcast %cst_45 : f32 to vector<16x256xf32>
    %205 = arith.maximumf %203, %204 : vector<16x256xf32>
    %c56 = arith.constant 56 : index
    %c0_46 = arith.constant 0 : index
    %206 = vector.load %arg3[%c56, %c0_46] : memref<200x145xf32, #tpu.memory_space<vmem>>, vector<16x144xf32>
    %c56_47 = arith.constant 56 : index
    %c144_48 = arith.constant 144 : index
    %207 = vector.load %arg3[%c56_47, %c144_48] : memref<200x145xf32, #tpu.memory_space<vmem>>, vector<16x1xf32>
    %c2_i32_49 = arith.constant 2 : i32
    %208 = tpu.dynamic_rotate %205 by %c2_i32_49 dim 1 : vector<16x256xf32>, i32 -> vector<16x256xf32>
    %209 = vector.broadcast %28 : vector<1x256xf32> to vector<16x256xf32>
    %210 = arith.mulf %208, %209 : vector<16x256xf32>
    %c254_i32 = arith.constant 254 : i32
    %211 = tpu.dynamic_rotate %205 by %c254_i32 dim 1 : vector<16x256xf32>, i32 -> vector<16x256xf32>
    %212 = vector.broadcast %32 : vector<1x256xf32> to vector<16x256xf32>
    %213 = arith.mulf %211, %212 : vector<16x256xf32>
    %214 = tpu.concatenate %210, %205, %213 in 0 : vector<16x256xf32>, vector<16x256xf32>, vector<16x256xf32> -> vector<48x256xf32>
    %cst_50 = arith.constant 0.000000e+00 : f32
    %215 = vector.broadcast %cst_50 : f32 to vector<48x32xf32>
    %216 = vector.extract_strided_slice %214 {offsets = [0, 0], sizes = [48, 224], strides = [1, 1]} : vector<48x256xf32> to vector<48x224xf32>
    %217 = tpu.concatenate %215, %216 in 1 : vector<48x32xf32>, vector<48x224xf32> -> vector<48x256xf32>
    %218 = vector.extract_strided_slice %214 {offsets = [0, 32], sizes = [48, 224], strides = [1, 1]} : vector<48x256xf32> to vector<48x224xf32>
    %219 = tpu.concatenate %218, %215 in 1 : vector<48x224xf32>, vector<48x32xf32> -> vector<48x256xf32>
    %220 = tpu.concatenate %217, %214, %219 in 0 : vector<48x256xf32>, vector<48x256xf32>, vector<48x256xf32> -> vector<144x256xf32>
    %221 = arith.truncf %206 : vector<16x144xf32> to vector<16x144xbf16>
    %222 = arith.truncf %220 : vector<144x256xf32> to vector<144x256xbf16>
    %cst_51 = arith.constant dense<0.000000e+00> : vector<16x256xf32>
    %223 = tpu.matmul %221, %222, %cst_51 {dimension_numbers = #tpu.dot_dimension_numbers<[1], [0], [0], [1], [0, 0, 1, 1], [], []>} : vector<16x144xbf16>, vector<144x256xbf16>, vector<16x256xf32> -> vector<16x256xf32>
    %224 = vector.broadcast %207 : vector<16x1xf32> to vector<16x256xf32>
    %225 = arith.addf %223, %224 : vector<16x256xf32>
    %cst_52 = arith.constant 0.000000e+00 : f32
    %226 = vector.broadcast %cst_52 : f32 to vector<16x256xf32>
    %227 = arith.maximumf %225, %226 : vector<16x256xf32>
    %c72 = arith.constant 72 : index
    %c0_53 = arith.constant 0 : index
    %228 = vector.load %arg3[%c72, %c0_53] : memref<200x145xf32, #tpu.memory_space<vmem>>, vector<16x144xf32>
    %c72_54 = arith.constant 72 : index
    %c144_55 = arith.constant 144 : index
    %229 = vector.load %arg3[%c72_54, %c144_55] : memref<200x145xf32, #tpu.memory_space<vmem>>, vector<16x1xf32>
    %c2_i32_56 = arith.constant 2 : i32
    %230 = tpu.dynamic_rotate %227 by %c2_i32_56 dim 1 : vector<16x256xf32>, i32 -> vector<16x256xf32>
    %231 = vector.broadcast %28 : vector<1x256xf32> to vector<16x256xf32>
    %232 = arith.mulf %230, %231 : vector<16x256xf32>
    %c254_i32_57 = arith.constant 254 : i32
    %233 = tpu.dynamic_rotate %227 by %c254_i32_57 dim 1 : vector<16x256xf32>, i32 -> vector<16x256xf32>
    %234 = vector.broadcast %32 : vector<1x256xf32> to vector<16x256xf32>
    %235 = arith.mulf %233, %234 : vector<16x256xf32>
    %236 = tpu.concatenate %232, %227, %235 in 0 : vector<16x256xf32>, vector<16x256xf32>, vector<16x256xf32> -> vector<48x256xf32>
    %cst_58 = arith.constant 0.000000e+00 : f32
    %237 = vector.broadcast %cst_58 : f32 to vector<48x32xf32>
    %238 = vector.extract_strided_slice %236 {offsets = [0, 0], sizes = [48, 224], strides = [1, 1]} : vector<48x256xf32> to vector<48x224xf32>
    %239 = tpu.concatenate %237, %238 in 1 : vector<48x32xf32>, vector<48x224xf32> -> vector<48x256xf32>
    %240 = vector.extract_strided_slice %236 {offsets = [0, 32], sizes = [48, 224], strides = [1, 1]} : vector<48x256xf32> to vector<48x224xf32>
    %241 = tpu.concatenate %240, %237 in 1 : vector<48x224xf32>, vector<48x32xf32> -> vector<48x256xf32>
    %242 = tpu.concatenate %239, %236, %241 in 0 : vector<48x256xf32>, vector<48x256xf32>, vector<48x256xf32> -> vector<144x256xf32>
    %243 = arith.truncf %228 : vector<16x144xf32> to vector<16x144xbf16>
    %244 = arith.truncf %242 : vector<144x256xf32> to vector<144x256xbf16>
    %cst_59 = arith.constant dense<0.000000e+00> : vector<16x256xf32>
    %245 = tpu.matmul %243, %244, %cst_59 {dimension_numbers = #tpu.dot_dimension_numbers<[1], [0], [0], [1], [0, 0, 1, 1], [], []>} : vector<16x144xbf16>, vector<144x256xbf16>, vector<16x256xf32> -> vector<16x256xf32>
    %246 = vector.broadcast %229 : vector<16x1xf32> to vector<16x256xf32>
    %247 = arith.addf %245, %246 : vector<16x256xf32>
    %248 = arith.addf %247, %205 : vector<16x256xf32>
    %cst_60 = arith.constant 0.000000e+00 : f32
    %249 = vector.broadcast %cst_60 : f32 to vector<16x256xf32>
    %250 = arith.maximumf %248, %249 : vector<16x256xf32>
    %c88 = arith.constant 88 : index
    %c0_61 = arith.constant 0 : index
    %251 = vector.load %arg3[%c88, %c0_61] : memref<200x145xf32, #tpu.memory_space<vmem>>, vector<16x144xf32>
    %c88_62 = arith.constant 88 : index
    %c144_63 = arith.constant 144 : index
    %252 = vector.load %arg3[%c88_62, %c144_63] : memref<200x145xf32, #tpu.memory_space<vmem>>, vector<16x1xf32>
    %c4_i32_64 = arith.constant 4 : i32
    %253 = tpu.dynamic_rotate %250 by %c4_i32_64 dim 1 : vector<16x256xf32>, i32 -> vector<16x256xf32>
    %254 = vector.broadcast %36 : vector<1x256xf32> to vector<16x256xf32>
    %255 = arith.mulf %253, %254 : vector<16x256xf32>
    %c252_i32 = arith.constant 252 : i32
    %256 = tpu.dynamic_rotate %250 by %c252_i32 dim 1 : vector<16x256xf32>, i32 -> vector<16x256xf32>
    %257 = vector.broadcast %40 : vector<1x256xf32> to vector<16x256xf32>
    %258 = arith.mulf %256, %257 : vector<16x256xf32>
    %259 = tpu.concatenate %255, %250, %258 in 0 : vector<16x256xf32>, vector<16x256xf32>, vector<16x256xf32> -> vector<48x256xf32>
    %cst_65 = arith.constant 0.000000e+00 : f32
    %260 = vector.broadcast %cst_65 : f32 to vector<48x64xf32>
    %261 = vector.extract_strided_slice %259 {offsets = [0, 0], sizes = [48, 192], strides = [1, 1]} : vector<48x256xf32> to vector<48x192xf32>
    %262 = tpu.concatenate %260, %261 in 1 : vector<48x64xf32>, vector<48x192xf32> -> vector<48x256xf32>
    %263 = vector.extract_strided_slice %259 {offsets = [0, 64], sizes = [48, 192], strides = [1, 1]} : vector<48x256xf32> to vector<48x192xf32>
    %264 = tpu.concatenate %263, %260 in 1 : vector<48x192xf32>, vector<48x64xf32> -> vector<48x256xf32>
    %265 = tpu.concatenate %262, %259, %264 in 0 : vector<48x256xf32>, vector<48x256xf32>, vector<48x256xf32> -> vector<144x256xf32>
    %266 = arith.truncf %251 : vector<16x144xf32> to vector<16x144xbf16>
    %267 = arith.truncf %265 : vector<144x256xf32> to vector<144x256xbf16>
    %cst_66 = arith.constant dense<0.000000e+00> : vector<16x256xf32>
    %268 = tpu.matmul %266, %267, %cst_66 {dimension_numbers = #tpu.dot_dimension_numbers<[1], [0], [0], [1], [0, 0, 1, 1], [], []>} : vector<16x144xbf16>, vector<144x256xbf16>, vector<16x256xf32> -> vector<16x256xf32>
    %269 = vector.broadcast %252 : vector<16x1xf32> to vector<16x256xf32>
    %270 = arith.addf %268, %269 : vector<16x256xf32>
    %cst_67 = arith.constant 0.000000e+00 : f32
    %271 = vector.broadcast %cst_67 : f32 to vector<16x256xf32>
    %272 = arith.maximumf %270, %271 : vector<16x256xf32>
    %c104 = arith.constant 104 : index
    %c0_68 = arith.constant 0 : index
    %273 = vector.load %arg3[%c104, %c0_68] : memref<200x145xf32, #tpu.memory_space<vmem>>, vector<16x144xf32>
    %c104_69 = arith.constant 104 : index
    %c144_70 = arith.constant 144 : index
    %274 = vector.load %arg3[%c104_69, %c144_70] : memref<200x145xf32, #tpu.memory_space<vmem>>, vector<16x1xf32>
    %c4_i32_71 = arith.constant 4 : i32
    %275 = tpu.dynamic_rotate %272 by %c4_i32_71 dim 1 : vector<16x256xf32>, i32 -> vector<16x256xf32>
    %276 = vector.broadcast %36 : vector<1x256xf32> to vector<16x256xf32>
    %277 = arith.mulf %275, %276 : vector<16x256xf32>
    %c252_i32_72 = arith.constant 252 : i32
    %278 = tpu.dynamic_rotate %272 by %c252_i32_72 dim 1 : vector<16x256xf32>, i32 -> vector<16x256xf32>
    %279 = vector.broadcast %40 : vector<1x256xf32> to vector<16x256xf32>
    %280 = arith.mulf %278, %279 : vector<16x256xf32>
    %281 = tpu.concatenate %277, %272, %280 in 0 : vector<16x256xf32>, vector<16x256xf32>, vector<16x256xf32> -> vector<48x256xf32>
    %cst_73 = arith.constant 0.000000e+00 : f32
    %282 = vector.broadcast %cst_73 : f32 to vector<48x64xf32>
    %283 = vector.extract_strided_slice %281 {offsets = [0, 0], sizes = [48, 192], strides = [1, 1]} : vector<48x256xf32> to vector<48x192xf32>
    %284 = tpu.concatenate %282, %283 in 1 : vector<48x64xf32>, vector<48x192xf32> -> vector<48x256xf32>
    %285 = vector.extract_strided_slice %281 {offsets = [0, 64], sizes = [48, 192], strides = [1, 1]} : vector<48x256xf32> to vector<48x192xf32>
    %286 = tpu.concatenate %285, %282 in 1 : vector<48x192xf32>, vector<48x64xf32> -> vector<48x256xf32>
    %287 = tpu.concatenate %284, %281, %286 in 0 : vector<48x256xf32>, vector<48x256xf32>, vector<48x256xf32> -> vector<144x256xf32>
    %288 = arith.truncf %273 : vector<16x144xf32> to vector<16x144xbf16>
    %289 = arith.truncf %287 : vector<144x256xf32> to vector<144x256xbf16>
    %cst_74 = arith.constant dense<0.000000e+00> : vector<16x256xf32>
    %290 = tpu.matmul %288, %289, %cst_74 {dimension_numbers = #tpu.dot_dimension_numbers<[1], [0], [0], [1], [0, 0, 1, 1], [], []>} : vector<16x144xbf16>, vector<144x256xbf16>, vector<16x256xf32> -> vector<16x256xf32>
    %291 = vector.broadcast %274 : vector<16x1xf32> to vector<16x256xf32>
    %292 = arith.addf %290, %291 : vector<16x256xf32>
    %293 = arith.addf %292, %250 : vector<16x256xf32>
    %cst_75 = arith.constant 0.000000e+00 : f32
    %294 = vector.broadcast %cst_75 : f32 to vector<16x256xf32>
    %295 = arith.maximumf %293, %294 : vector<16x256xf32>
    %c120 = arith.constant 120 : index
    %c0_76 = arith.constant 0 : index
    %296 = vector.load %arg3[%c120, %c0_76] : memref<200x145xf32, #tpu.memory_space<vmem>>, vector<16x144xf32>
    %c120_77 = arith.constant 120 : index
    %c144_78 = arith.constant 144 : index
    %297 = vector.load %arg3[%c120_77, %c144_78] : memref<200x145xf32, #tpu.memory_space<vmem>>, vector<16x1xf32>
    %c8_i32_79 = arith.constant 8 : i32
    %298 = tpu.dynamic_rotate %295 by %c8_i32_79 dim 1 : vector<16x256xf32>, i32 -> vector<16x256xf32>
    %299 = vector.broadcast %44 : vector<1x256xf32> to vector<16x256xf32>
    %300 = arith.mulf %298, %299 : vector<16x256xf32>
    %c248_i32 = arith.constant 248 : i32
    %301 = tpu.dynamic_rotate %295 by %c248_i32 dim 1 : vector<16x256xf32>, i32 -> vector<16x256xf32>
    %302 = vector.broadcast %48 : vector<1x256xf32> to vector<16x256xf32>
    %303 = arith.mulf %301, %302 : vector<16x256xf32>
    %304 = tpu.concatenate %300, %295, %303 in 0 : vector<16x256xf32>, vector<16x256xf32>, vector<16x256xf32> -> vector<48x256xf32>
    %cst_80 = arith.constant 0.000000e+00 : f32
    %305 = vector.broadcast %cst_80 : f32 to vector<48x128xf32>
    %306 = vector.extract_strided_slice %304 {offsets = [0, 0], sizes = [48, 128], strides = [1, 1]} : vector<48x256xf32> to vector<48x128xf32>
    %307 = tpu.concatenate %305, %306 in 1 : vector<48x128xf32>, vector<48x128xf32> -> vector<48x256xf32>
    %308 = vector.extract_strided_slice %304 {offsets = [0, 128], sizes = [48, 128], strides = [1, 1]} : vector<48x256xf32> to vector<48x128xf32>
    %309 = tpu.concatenate %308, %305 in 1 : vector<48x128xf32>, vector<48x128xf32> -> vector<48x256xf32>
    %310 = tpu.concatenate %307, %304, %309 in 0 : vector<48x256xf32>, vector<48x256xf32>, vector<48x256xf32> -> vector<144x256xf32>
    %311 = arith.truncf %296 : vector<16x144xf32> to vector<16x144xbf16>
    %312 = arith.truncf %310 : vector<144x256xf32> to vector<144x256xbf16>
    %cst_81 = arith.constant dense<0.000000e+00> : vector<16x256xf32>
    %313 = tpu.matmul %311, %312, %cst_81 {dimension_numbers = #tpu.dot_dimension_numbers<[1], [0], [0], [1], [0, 0, 1, 1], [], []>} : vector<16x144xbf16>, vector<144x256xbf16>, vector<16x256xf32> -> vector<16x256xf32>
    %314 = vector.broadcast %297 : vector<16x1xf32> to vector<16x256xf32>
    %315 = arith.addf %313, %314 : vector<16x256xf32>
    %cst_82 = arith.constant 0.000000e+00 : f32
    %316 = vector.broadcast %cst_82 : f32 to vector<16x256xf32>
    %317 = arith.maximumf %315, %316 : vector<16x256xf32>
    %c136 = arith.constant 136 : index
    %c0_83 = arith.constant 0 : index
    %318 = vector.load %arg3[%c136, %c0_83] : memref<200x145xf32, #tpu.memory_space<vmem>>, vector<16x144xf32>
    %c136_84 = arith.constant 136 : index
    %c144_85 = arith.constant 144 : index
    %319 = vector.load %arg3[%c136_84, %c144_85] : memref<200x145xf32, #tpu.memory_space<vmem>>, vector<16x1xf32>
    %c8_i32_86 = arith.constant 8 : i32
    %320 = tpu.dynamic_rotate %317 by %c8_i32_86 dim 1 : vector<16x256xf32>, i32 -> vector<16x256xf32>
    %321 = vector.broadcast %44 : vector<1x256xf32> to vector<16x256xf32>
    %322 = arith.mulf %320, %321 : vector<16x256xf32>
    %c248_i32_87 = arith.constant 248 : i32
    %323 = tpu.dynamic_rotate %317 by %c248_i32_87 dim 1 : vector<16x256xf32>, i32 -> vector<16x256xf32>
    %324 = vector.broadcast %48 : vector<1x256xf32> to vector<16x256xf32>
    %325 = arith.mulf %323, %324 : vector<16x256xf32>
    %326 = tpu.concatenate %322, %317, %325 in 0 : vector<16x256xf32>, vector<16x256xf32>, vector<16x256xf32> -> vector<48x256xf32>
    %cst_88 = arith.constant 0.000000e+00 : f32
    %327 = vector.broadcast %cst_88 : f32 to vector<48x128xf32>
    %328 = vector.extract_strided_slice %326 {offsets = [0, 0], sizes = [48, 128], strides = [1, 1]} : vector<48x256xf32> to vector<48x128xf32>
    %329 = tpu.concatenate %327, %328 in 1 : vector<48x128xf32>, vector<48x128xf32> -> vector<48x256xf32>
    %330 = vector.extract_strided_slice %326 {offsets = [0, 128], sizes = [48, 128], strides = [1, 1]} : vector<48x256xf32> to vector<48x128xf32>
    %331 = tpu.concatenate %330, %327 in 1 : vector<48x128xf32>, vector<48x128xf32> -> vector<48x256xf32>
    %332 = tpu.concatenate %329, %326, %331 in 0 : vector<48x256xf32>, vector<48x256xf32>, vector<48x256xf32> -> vector<144x256xf32>
    %333 = arith.truncf %318 : vector<16x144xf32> to vector<16x144xbf16>
    %334 = arith.truncf %332 : vector<144x256xf32> to vector<144x256xbf16>
    %cst_89 = arith.constant dense<0.000000e+00> : vector<16x256xf32>
    %335 = tpu.matmul %333, %334, %cst_89 {dimension_numbers = #tpu.dot_dimension_numbers<[1], [0], [0], [1], [0, 0, 1, 1], [], []>} : vector<16x144xbf16>, vector<144x256xbf16>, vector<16x256xf32> -> vector<16x256xf32>
    %336 = vector.broadcast %319 : vector<16x1xf32> to vector<16x256xf32>
    %337 = arith.addf %335, %336 : vector<16x256xf32>
    %338 = arith.addf %337, %295 : vector<16x256xf32>
    %cst_90 = arith.constant 0.000000e+00 : f32
    %339 = vector.broadcast %cst_90 : f32 to vector<16x256xf32>
    %340 = arith.maximumf %338, %339 : vector<16x256xf32>
    %c168 = arith.constant 168 : index
    %c0_91 = arith.constant 0 : index
    %341 = vector.load %arg3[%c168, %c0_91] : memref<200x145xf32, #tpu.memory_space<vmem>>, vector<16x16xf32>
    %c168_92 = arith.constant 168 : index
    %c144_93 = arith.constant 144 : index
    %342 = vector.load %arg3[%c168_92, %c144_93] : memref<200x145xf32, #tpu.memory_space<vmem>>, vector<16x1xf32>
    %c184 = arith.constant 184 : index
    %c0_94 = arith.constant 0 : index
    %343 = vector.load %arg3[%c184, %c0_94] : memref<200x145xf32, #tpu.memory_space<vmem>>, vector<8x16xf32>
    %c184_95 = arith.constant 184 : index
    %c144_96 = arith.constant 144 : index
    %344 = vector.load %arg3[%c184_95, %c144_96] : memref<200x145xf32, #tpu.memory_space<vmem>>, vector<8x1xf32>
    %c192 = arith.constant 192 : index
    %c0_97 = arith.constant 0 : index
    %345 = vector.load %arg3[%c192, %c0_97] : memref<200x145xf32, #tpu.memory_space<vmem>>, vector<1x8xf32>
    %c192_98 = arith.constant 192 : index
    %c144_99 = arith.constant 144 : index
    %346 = vector.load %arg3[%c192_98, %c144_99] : memref<200x145xf32, #tpu.memory_space<vmem>>, vector<1x1xf32>
    %347 = arith.truncf %341 : vector<16x16xf32> to vector<16x16xbf16>
    %348 = arith.truncf %340 : vector<16x256xf32> to vector<16x256xbf16>
    %cst_100 = arith.constant dense<0.000000e+00> : vector<16x256xf32>
    %349 = tpu.matmul %347, %348, %cst_100 {dimension_numbers = #tpu.dot_dimension_numbers<[1], [0], [0], [1], [0, 0, 1, 1], [], []>} : vector<16x16xbf16>, vector<16x256xbf16>, vector<16x256xf32> -> vector<16x256xf32>
    %350 = vector.broadcast %342 : vector<16x1xf32> to vector<16x256xf32>
    %351 = arith.addf %349, %350 : vector<16x256xf32>
    %cst_101 = arith.constant 0.000000e+00 : f32
    %352 = vector.broadcast %cst_101 : f32 to vector<16x256xf32>
    %353 = arith.maximumf %351, %352 : vector<16x256xf32>
    %354 = arith.truncf %343 : vector<8x16xf32> to vector<8x16xbf16>
    %355 = arith.truncf %353 : vector<16x256xf32> to vector<16x256xbf16>
    %cst_102 = arith.constant dense<0.000000e+00> : vector<8x256xf32>
    %356 = tpu.matmul %354, %355, %cst_102 {dimension_numbers = #tpu.dot_dimension_numbers<[1], [0], [0], [1], [0, 0, 1, 1], [], []>} : vector<8x16xbf16>, vector<16x256xbf16>, vector<8x256xf32> -> vector<8x256xf32>
    %357 = vector.broadcast %344 : vector<8x1xf32> to vector<8x256xf32>
    %358 = arith.addf %356, %357 : vector<8x256xf32>
    %cst_103 = arith.constant 0.000000e+00 : f32
    %359 = vector.broadcast %cst_103 : f32 to vector<8x256xf32>
    %360 = arith.maximumf %358, %359 : vector<8x256xf32>
    %361 = arith.truncf %345 : vector<1x8xf32> to vector<1x8xbf16>
    %362 = arith.truncf %360 : vector<8x256xf32> to vector<8x256xbf16>
    %cst_104 = arith.constant dense<0.000000e+00> : vector<1x256xf32>
    %363 = tpu.matmul %361, %362, %cst_104 {dimension_numbers = #tpu.dot_dimension_numbers<[1], [0], [0], [1], [0, 0, 1, 1], [], []>} : vector<1x8xbf16>, vector<8x256xbf16>, vector<1x256xf32> -> vector<1x256xf32>
    %364 = vector.broadcast %346 : vector<1x1xf32> to vector<1x256xf32>
    %365 = arith.addf %363, %364 : vector<1x256xf32>
    %cst_105 = arith.constant 0.000000e+00 : f32
    %366 = vector.broadcast %cst_105 : f32 to vector<1x256xf32>
    %367 = arith.maximumf %365, %366 : vector<1x256xf32>
    %c0_106 = arith.constant 0 : index
    %c0_107 = arith.constant 0 : index
    %c0_108 = arith.constant 0 : index
    %368 = vector.load %arg4[%c0_106, %c0_107, %c0_108] : memref<1x1x256xf32, #tpu.memory_space<vmem>>, vector<1x1x256xf32>
    %369 = vector.shape_cast %368 : vector<1x1x256xf32> to vector<1x256xf32>
    %370 = vector.shape_cast %367 : vector<1x256xf32> to vector<1x1x256xf32>
    tpu.vector_store %arg4[%c0_106, %c0_107, %c0_108], %370 {strides = array<i32>} : memref<1x1x256xf32, #tpu.memory_space<vmem>>, vector<1x1x256xf32>,
    return
  }
  func.func @transform_0(%arg0: i32) -> (i32, i32, i32) {
    %c0_i32 = arith.constant 0 : i32
    %c0_i32_0 = arith.constant 0 : i32
    %c0_i32_1 = arith.constant 0 : i32
    return %arg0, %c0_i32, %c0_i32_0 : i32, i32, i32
  }
  func.func @transform_1(%arg0: i32) -> (i32, i32, i32) {
    %c0_i32 = arith.constant 0 : i32
    %c0_i32_0 = arith.constant 0 : i32
    %c0_i32_1 = arith.constant 0 : i32
    return %arg0, %c0_i32, %c0_i32_0 : i32, i32, i32
  }
  func.func @transform_2(%arg0: i32) -> (i32, i32) {
    %c0_i32 = arith.constant 0 : i32
    %c0_i32_0 = arith.constant 0 : i32
    %c0_i32_1 = arith.constant 0 : i32
    return %c0_i32, %c0_i32_0 : i32, i32
  }
  func.func @transform_3(%arg0: i32) -> (i32, i32, i32) {
    %c0_i32 = arith.constant 0 : i32
    %c0_i32_0 = arith.constant 0 : i32
    %c0_i32_1 = arith.constant 0 : i32
    return %arg0, %c0_i32, %c0_i32_0 : i32, i32, i32
  }
}

</mosaic_0001>

<bundles_post_ra>
// kernel: graphchiar_noseq_forward.4
= control target key start
LH: loop header
LB: loop body
LE: loop exit
PB: predicated region body
PF: predicated region fallthrough
CT: control target
= control target key end

     0   :  { %11 = vsyncpa [#allocation3], 0  ;;  %s2795_s21 = smov [#allocation2]   ;;  %s3367_s0 = inlined_call_operand.vmem [shape: f32[2,8,16], index: 0, kind: input, shape index: {}]   ;;  %s3368_s1 = inlined_call_operand.hbm [shape: f32[32,32], index: 1, kind: input, shape index: {}]   ;;  %s3369_s2 = inlined_call_operand.vmem [shape: f32[16,9], index: 2, kind: input, shape index: {}]   ;;  %s3370_s3 = inlined_call_operand.vmem [shape: f32[16,1], index: 3, kind: input, shape index: {}]   ;;  %s3371_s4 = inlined_call_operand.vmem [shape: f32[2,96,9], index: 4, kind: input, shape index: {}]   ;;  %s3372_s5 = inlined_call_operand.vmem [shape: f32[2,16,1], index: 5, kind: input, shape index: {}]   ;;  %s3373_s6 = inlined_call_operand.vmem [shape: f32[2,8,16], index: 6, kind: output, shape index: {}]  }
   0x1   :  { %s19_s22 = sshll.u32 %s2795_s21, 4  ;;  %s2771_s25 = scalar_lea.hbm %s3368_s1, 512  ;;  %s20_s22 = int_to_ptr.vmem [resolvable:$true] %s19_s22 }
   0x2   :  { %p2772_p0 = scmp.ne.s32.totalorder %s3368_s1, %s2771_s25  ;;  %p2775_p1 = scmp.lt.u32.totalorder %s2771_s25, %s3368_s1 }
   0x4   :  { %p2777_p2 = pnand %p2775_p1, %p2772_p0 }
   0x6   :  { %2780 = shalt.err (!%p2777_p2)
}
   0x7   :  { %s2781_s30 = scalar_lea.vmem %s20_s22, 512  ;;  %p2786_p4 = scmp.lt.s32.totalorder %s20_s22, %s20_s22 }
   0x8   :  { %p2782_p3 = scmp.ne.s32.totalorder %s20_s22, %s2781_s30  ;;  %p2787_p5 = scmp.lt.s32.totalorder %s2781_s30, %s2781_s30 }
   0xa   :  { %p2788_p6 = por %p2787_p5, %p2786_p4 }
   0xc   :  { %p2789_p7 = pnand %p2788_p6, %p2782_p3 }
   0xe   :  { %2792 = shalt.err (!%p2789_p7)
}
   0xf   :  { %s2796_s7 = smov 128   ;;  %s2797_s8 = smov 8  }
  0x10   :  { %25 = dma.hbm_to_vmem [thread:$0]  %s3368_s1, 512, %s20_s22, [#allocation3], %s2796_s7, %s2796_s7, %s2797_s8  }
  0x11   :  { %2793 = dma.done.wait [#allocation3], 512  }
  0x12   :  { %2794 = vsyncadd [#allocation3], 4294966784  ;;  %v2798_v0 = vmov 0.0   ;;  %vm2799_vm0 = vmmov 0   ;;  %v2800_v1 = vmov 8   ;;  %v2801_v2 = vmov 0  }
  0x13   :  { %2567 = vmatprep.subr.bf16.mxu0 %v2798_v0  ;;  %2569 = vmatprep.mubr.msk.bf16.mxu0 %vm2799_vm0, %v2798_v0  ;;  %v2455_v3 = vld [vmem:[%s3367_s0 + $0x8] sm:$0xff]  ;;  %s2802_s1 = smov 16   ;;  %v49_v4 = vld [vmem:[%s3370_s3] sm:$0xff]  ;;  %v2874_v8 = vld [vmem:[%s3371_s4 + $0x18] sm:$0xff]  ;;  %vm45_vm1 = vcmask 130048   ;;  %vm62_vm2 = vcmask 1043456  }
  0x14   :  { %2730 = vset.pattern.permute.xlu0 %v2800_v1  ;;  %2731 = vset.pattern.permute.xlu1 %v2801_v2  ;;  %v47_v5 = vld [vmem:[%s3369_s2] sm:$0xff]  ;;  %v50_v6 = vld [vmem:[%s3370_s3 + $0x8] sm:$0xff]  ;;  %v2887_v10 = vld [vmem:[%s3371_s4 + $0x38] sm:$0xff]  ;;  %vm58_vm3 = vcmask 64512   ;;  %vm106_vm4 = vcmask 261120   ;;  %s2803_s30 = smov 112  }
  0x15   :  { %42 = vrot.lane.b32.xlu0 %v2455_v3, %s2802_s1  ;;  %131 = vperm.xlu1 %2731, %v49_v4   ;;  %v147_v7 = vld [vmem:[%s3371_s4 + $0x8] sm:$0xff]  ;;  %v38_v11 = vld [vmem:[%s3367_s0] sm:$0xff]  ;;  %v51_v16 = vpack.c.bf16 %v47_v5, %v47_v5  ;;  %v148_v19 = vld [vmem:[%s3371_s4 + $0x10] sm:$0xff] }
  0x16   :  { %v2881_v9 = vld [vmem:[%s3371_s4 + $0x28] sm:$0xff]  ;;  %v146_v17 = vld [vmem:[%s3371_s4] sm:$0xff]  ;;  %v152_v21 = vld [vmem:[%s3371_s4 + $0x30] sm:$0xff]  ;;  %v159_v55 = vpack.c.bf16 %v2874_v8, %v148_v19 }
  0x17   :  { %v158_v18 = vpack.c.bf16 %v147_v7, %v146_v17  ;;  %v150_v20 = vld [vmem:[%s3371_s4 + $0x20] sm:$0xff]  ;;  %v155_v59 = vld [vmem:[%s3371_s4 + $0x48] sm:$0xff]  ;;  %v161_v60 = vpack.c.bf16 %v2887_v10, %v152_v21  ;;  %v156_v62 = vld [vmem:[%s3371_s4 + $0x50] sm:$0xff] }
  0x18   :  { %v160_v57 = vpack.c.bf16 %v2881_v9, %v150_v20  ;;  %v2928_v58 = vld [vmem:[%s3371_s4 + $0x40] sm:$0xff]  ;;  %v2943_v63 = vld [vmem:[%s3371_s4 + $0x58] sm:$0xff] }
  0x19   :  { %55 = vperm.xlu0 %2730, %v47_v5   ;;  %137 = vperm.xlu1 %2731, %v50_v6   ;;  %v162_v61 = vpack.c.bf16 %v155_v59, %v2928_v58  ;;  %v163_v3 = vpack.c.bf16 %v2943_v63, %v156_v62 }
  0x1a   :  { %2575 = vmatprep.mubr.msk.bf16.mxu1 %vm58_vm3, %v158_v18 }
  0x1d   :  { %172 = vperm.xlu0 %2730, %v147_v7   ;;  %2732 = vset.pattern.permute.xlu1 %v2800_v1 }
  0x1e   :  { %167 = vperm.xlu1 %2732, %v146_v17  }
  0x21   :  { %182 = vperm.xlu0 %2730, %v2874_v8  }
  0x22   :  { %177 = vperm.xlu1 %2732, %v148_v19  }
  0x25   :  { %192 = vperm.xlu0 %2730, %v2881_v9  }
  0x26   :  { %187 = vperm.xlu1 %2732, %v150_v20  }
  0x29   :  { %202 = vperm.xlu0 %2730, %v2887_v10  }
  0x2a   :  { %197 = vperm.xlu1 %2732, %v152_v21  }
  0x87   :  { %v43_v12 = vpop.permute.xlu0 %42 }
  0x88   :  { %v46_v13 = vsel %vm45_vm1, %v38_v11, %v43_v12 }
  0x89   :  { %v52_v14 = vpack.c.bf16 %v46_v13, %v46_v13 }
  0x8b   :  { %v64_v15 = vsel %vm62_vm2, %v52_v14, 0 }
  0x8c   :  { %2568 = vmatpush3.bf16.msra.mxu0 %v64_v15 }
  0x8d   :  { %2587 = vmatprep.subr.bf16.mxu0 %v2798_v0 }
  0x8f   :  { %2570 = vmatmul.mubr.msk.bf16.vlgmr.msra.gmra.mrb[0].mxu0 %vm58_vm3, %v51_v16 }
  0x90   :  { %2591 = vmatprep.mubr.msk.bf16.mxu0 %vm2799_vm0, %v2798_v0 }
  0x94   :  { %v132_v47 = vpop.permute.xlu1 %131 }
  0x98   :  { %v56_v22 = vpop.permute.xlu0 %55  ;;  %v138_v51 = vpop.permute.xlu1 %137 }
  0x9c   :  { %v173_v5 = vpop.permute.xlu0 %172 }
  0x9d   :  { %v168_v4 = vpop.permute.xlu1 %167 }
  0xa0   :  { %v183_v7 = vpop.permute.xlu0 %182 }
  0xa1   :  { %v178_v6 = vpop.permute.xlu1 %177 }
  0xa4   :  { %v193_v18 = vpop.permute.xlu0 %192 }
  0xa5   :  { %v188_v13 = vpop.permute.xlu1 %187 }
 0x162   :  { %v100_v23 = vpop.f32.mrb[0].mxu0 }
 0x163   :  { %v101_v24 = vadd.f32 %v100_v23, %v56_v22  ;;  %v2571_v25 = vpop.f32.mrb[1].mxu0 }
 0x164   :  { %v103_v26 = vpop.f32.mrb[2].mxu0  ;;  %v198_v25 = vpop.permute.xlu1 %197 }
 0x165   :  { %v107_v27 = vsel %vm106_vm4, %v101_v24, 0.0  ;;  %v2572_v28 = vpop.f32.mrb[3].mxu0 }
 0x166   :  { %v108_v29 = vrot.slane %v107_v27, 4 }
 0x168   :  { %v109_v30 = vadd.f32 %v108_v29, %v107_v27 }
 0x16a   :  { %v110_v31 = vrot.slane %v109_v30, 2 }
 0x16c   :  { %v111_v32 = vadd.f32 %v110_v31, %v109_v30 }
 0x16e   :  { %v112_v33 = vrot.slane %v111_v32, 1 }
 0x170   :  { %v113_v34 = vadd.f32 %v112_v33, %v111_v32  ;;  %v203_v32 = vpop.permute.xlu0 %202 }
 0x172   :  { %v115_v35 = vmul.f32 0.125, %v113_v34 }
 0x174   :  { %v116_v36 = vsub.f32 %v101_v24, %v115_v35 }
 0x176   :  { %v117_v37 = vmul.f32 %v116_v36, %v116_v36 }
 0x178   :  { %v118_v38 = vsel %vm106_vm4, %v117_v37, 0.0 }
 0x179   :  { %v119_v39 = vrot.slane %v118_v38, 4 }
 0x17b   :  { %v120_v40 = vadd.f32 %v119_v39, %v118_v38 }
 0x17d   :  { %v121_v41 = vrot.slane %v120_v40, 2 }
 0x17f   :  { %v122_v42 = vadd.f32 %v121_v41, %v120_v40 }
 0x181   :  { %v123_v43 = vrot.slane %v122_v42, 1 }
 0x183   :  { %v124_v44 = vadd.f32 %v123_v43, %v122_v42 }
 0x185   :  { %v125_v45 = vmul.f32 0.125, %v124_v44 }
 0x187   :  { %v126_v46 = vadd.f32 1e-05, %v125_v45 }
 0x189   :  { %2741 = vrsqrt.f32 %v126_v46 }
 0x193   :  { %v2742_v48 = vpop.eup %2741 }
 0x194   :  { %v128_v49 = vmul.f32 %v2742_v48, %v116_v36 }
 0x196   :  { %v134_v50 = vmul.f32 %v132_v47, %v128_v49 }
 0x198   :  { %v140_v52 = vadd.f32 %v138_v51, %v134_v50 }
 0x19a   :  { %v2914_v53 = vmax.f32 %v140_v52, 0.0 }
 0x19c   :  { %v164_v54 = vpack.c.bf16 %v2914_v53, %v2914_v53 }
 0x19e   :  { %2703 = vmatprep.subr.msk.bf16.mxu1 %vm62_vm2, %v164_v54  ;;  %v244_v56 = vsel %vm62_vm2, %v164_v54, 0 }
 0x19f   :  { %2574 = vmatpush3.bf16.msra.mxu1 %v244_v56  ;;  %v143_v56 = vld [vmem:[#allocation2 + $0x8] sm:$0xff] }
 0x1a0   :  { %2610 = vmatprep.subr.mxu1 %v2798_v0 }
 0x1a2   :  { %2576 = vmatmul.mubr.msk.bf16.vlgmr.msra.gmra.mrb[0].mxu1 %vm58_vm3, %v159_v55  ;;  %v142_v55 = vld [vmem:[#allocation2] sm:$0xff] }
 0x1a3   :  { %2579 = vmatprep.mubr.msk.bf16.mxu1 %vm58_vm3, %v160_v57  ;;  %v2989_v57 = vpack.c.bf16 %v143_v56, %v142_v55 }
 0x1a5   :  { %2588 = vmatpush3.bf16.msra.mxu0 %v2989_v57 }
 0x1a6   :  { %2589 = vmatprep.subr.bf16.mxu0 %v2798_v0 }
 0x1aa   :  { %2580 = vmatmul.mubr.msk.bf16.gmra.mrb[4].mxu1 %vm58_vm3, %v161_v60  ;;  %v144_v60 = vld [vmem:[#allocation2 + $0x10] sm:$0xff] }
 0x1ab   :  { %2583 = vmatprep.mubr.msk.bf16.mxu1 %vm58_vm3, %v162_v61  ;;  %v145_v61 = vld [vmem:[#allocation2 + $0x18] sm:$0xff] }
 0x1b2   :  { %2584 = vmatmul.mubr.msk.bf16.gmra.mrb[8].mxu1 %vm58_vm3, %v163_v3  ;;  %v2994_v3 = vpack.c.bf16 %v145_v61, %v144_v60 }
 0x1b3   :  { %2612 = vmatprep.mubr.msk.f32.mxu1 %vm2799_vm0, %v2798_v0 }
 0x1b4   :  { %2590 = vmatpush3.bf16.msra.mxu0 %v2994_v3 }
 0x1b5   :  { %2595 = vmatprep.subr.mxu0 %v2798_v0 }
 0x275   :  { %v2577_v8 = vpop.f32.mrb[0].mxu1 }
 0x276   :  { %v280_v9 = vpop.f32.mrb[1].mxu1  ;;  %v2949_v10 = vadd.f32 %v2577_v8, %v178_v6 }
 0x277   :  { %v2951_v11 = vadd.f32 %v280_v9, %v168_v4  ;;  %v2578_v12 = vpop.f32.mrb[2].mxu1 }
 0x278   :  { %v283_v14 = vpop.f32.mrb[3].mxu1  ;;  %v2955_v16 = vadd.f32 %v2578_v12, %v183_v7  ;;  %v329_v19 = vmul.f32 %v2949_v10, %v2949_v10 }
 0x279   :  { %v327_v15 = vmul.f32 %v2951_v11, %v2951_v11  ;;  %v2957_v17 = vadd.f32 %v283_v14, %v173_v5 }
 0x27a   :  { %v330_v22 = vmul.f32 %v2955_v16, %v2955_v16  ;;  %v334_v31 = vsel %vm106_vm4, %v329_v19, 0.0 }
 0x27b   :  { %v328_v20 = vmul.f32 %v2957_v17, %v2957_v17  ;;  %v331_v21 = vsel %vm106_vm4, %v327_v15, 0.0 }
 0x27c   :  { %v336_v38 = vsel %vm106_vm4, %v330_v22, 0.0 }
 0x27d   :  { %v332_v23 = vsel %vm106_vm4, %v328_v20, 0.0  ;;  %v2581_v24 = vpop.f32.mrb[4].mxu1 }
 0x27e   :  { %v296_v26 = vpop.f32.mrb[5].mxu1  ;;  %v333_v27 = vadd.f32 %v332_v23, %v331_v21  ;;  %v2967_v28 = vadd.f32 %v2581_v24, %v198_v25 }
 0x27f   :  { %v2969_v29 = vadd.f32 %v296_v26, %v188_v13  ;;  %v2582_v30 = vpop.f32.mrb[6].mxu1 }
 0x280   :  { %v299_v33 = vpop.f32.mrb[7].mxu1  ;;  %v335_v34 = vadd.f32 %v334_v31, %v333_v27  ;;  %v2974_v36 = vadd.f32 %v2582_v30, %v203_v32  ;;  %v357_v40 = vmul.f32 %v2967_v28, %v2967_v28 }
 0x281   :  { %v355_v35 = vmul.f32 %v2969_v29, %v2969_v29  ;;  %v2976_v37 = vadd.f32 %v299_v33, %v193_v18 }
 0x282   :  { %v337_v39 = vadd.f32 %v336_v38, %v335_v34  ;;  %v358_v43 = vmul.f32 %v2974_v36, %v2974_v36  ;;  %v362_v46 = vsel %vm106_vm4, %v357_v40, 0.0 }
 0x283   :  { %v356_v41 = vmul.f32 %v2976_v37, %v2976_v37  ;;  %v359_v42 = vsel %vm106_vm4, %v355_v35, 0.0 }
 0x284   :  { %338 = vadd.xlane.f32.xlu1 %v337_v39  ;;  %v364_v48 = vsel %vm106_vm4, %v358_v43, 0.0 }
 0x285   :  { %v360_v44 = vsel %vm106_vm4, %v356_v41, 0.0  ;;  %v2585_v50 = vpop.f32.mrb[8].mxu1 }
 0x286   :  { %v361_v45 = vadd.f32 %v360_v44, %v359_v42  ;;  %v312_v51 = vpop.f32.mrb[9].mxu1 }
 0x287   :  { %v2586_v52 = vpop.f32.mrb[10].mxu1 }
 0x288   :  { %v363_v47 = vadd.f32 %v362_v46, %v361_v45  ;;  %v315_v54 = vpop.f32.mrb[11].mxu1 }
 0x28a   :  { %v365_v49 = vadd.f32 %v364_v48, %v363_v47 }
 0x28c   :  { %366 = vadd.xlane.f32.xlu0 %v365_v49 }
 0x295   :  { %212 = vperm.xlu1 %2732, %v155_v59  }
 0x299   :  { %217 = vperm.xlu1 %2732, %v156_v62  }
 0x2a2   :  { %207 = vperm.xlu0 %2730, %v2928_v58  }
 0x2a6   :  { %222 = vperm.xlu0 %2730, %v2943_v63  }
 0x311   :  { %v339_v59 = vpop.xlane.xlu1 %338 }
 0x312   :  { %v340_v62 = vrot.slane %v339_v59, 4 }
 0x314   :  { %v341_v4 = vadd.f32 %v340_v62, %v339_v59 }
 0x315   :  { %v213_v8 = vpop.permute.xlu1 %212 }
 0x316   :  { %v342_v5 = vrot.slane %v341_v4, 2  ;;  %v2999_v14 = vadd.f32 %v315_v54, %v213_v8  ;;  %v1230_v8 = vld [vmem:[%s3372_s5] sm:$0xff] }
 0x318   :  { %v343_v6 = vadd.f32 %v342_v5, %v341_v4 }
 0x319   :  { %v367_v9 = vpop.xlane.xlu0 %366  ;;  %v218_v12 = vpop.permute.xlu1 %217 }
 0x31a   :  { %v344_v7 = vrot.slane %v343_v6, 1  ;;  %v3003_v18 = vadd.f32 %v2585_v50, %v218_v12  ;;  %v368_v25 = vrot.slane %v367_v9, 4 }
 0x31c   :  { %v345_v58 = vadd.f32 %v344_v7, %v343_v6  ;;  %v369_v26 = vadd.f32 %v368_v25, %v367_v9  ;;  %v906_v7 = vsel %vm106_vm4, %v3003_v18, 0.0  ;;  %v3140_v25 = vld [vmem:[%s3371_s4 + $0x98] sm:$0xff] }
 0x31e   :  { %2705 = vpush %v345_v58  ;;  %v370_v27 = vrot.slane %v369_v26, 2  ;;  %v1231_v58 = vld [vmem:[%s3372_s5 + $0x8] sm:$0xff] }
 0x320   :  { %v371_v31 = vadd.f32 %v370_v27, %v369_v26 }
 0x321   :  { %v208_v13 = vpop.permute.xlu0 %207 }
 0x322   :  { %v3001_v15 = vadd.f32 %v312_v51, %v208_v13  ;;  %v372_v32 = vrot.slane %v371_v31, 1 }
 0x324   :  { %v383_v63 = vadd.f32 %v2999_v14, %v3001_v15  ;;  %v373_v34 = vadd.f32 %v372_v32, %v371_v31  ;;  %v509_v6 = vsel %vm106_vm4, %v3001_v15, 0.0 }
 0x325   :  { %v223_v19 = vpop.permute.xlu0 %222 }
 0x326   :  { %v3007_v20 = vadd.f32 %v2586_v52, %v223_v19  ;;  %v384_v21 = vadd.f32 %v383_v63, %v3003_v18  ;;  %v707_v52 = vsel %vm106_vm4, %v2999_v14, 0.0 }
 0x328   :  { %v385_v22 = vadd.f32 %v384_v21, %v3007_v20  ;;  %v1105_v54 = vsel %vm106_vm4, %v3007_v20, 0.0  ;;  %v3123_v21 = vld [vmem:[%s3371_s4 + $0x80] sm:$0xff] }
 0x32a   :  { %v386_v23 = vmul.f32 0.25, %v385_v22  ;;  %v3128_v22 = vld [vmem:[%s3371_s4 + $0x88] sm:$0xff] }
 0x32c   :  { %v387_v24 = vpack.c.bf16 %v386_v23, %v386_v23  ;;  %v1283_v23 = vpack.c.bf16 %v3128_v22, %v3123_v21 }
 0x32e   :  { %2592 = vmatmul.mubr.msk.bf16.vlgmr.msra.gmra.mrb[4].mxu0 %vm106_vm4, %v387_v24  ;;  %v3135_v24 = vld [vmem:[%s3371_s4 + $0x90] sm:$0xff] }
 0x32f   :  { %2596 = vmatpush3.xpose.msk.msra.mxu0 %vm106_vm4, %v3001_v15  ;;  %2597 = vmatprep.mubr.msk.f32.mxu0 %vm2799_vm0, %v2798_v0  ;;  %v2476_v15 = vld [vmem:[%s3371_s4 + $0x60] sm:$0xff] }
 0x330   :  { %2600 = vmatprep.subr.mxu0 %v2798_v0 }
 0x34f   :  { %s2706_s18 = spop %2705 }
 0x350   :  { %v347_v30 = vstv %s2706_s18 }
 0x351   :  { %2743 = vrsqrt.f32 %v347_v30  ;;  %v1284_v30 = vpack.c.bf16 %v3140_v25, %v3135_v24 }
 0x35b   :  { %v2744_v33 = vpop.eup %2743 }
 0x35c   :  { %2707 = vpush %v2744_v33 }
 0x35d   :  { %2709 = vpush %v373_v34 }
 0x38d   :  { %s2708_s19 = spop %2707 }
 0x38e   :  { %v3017_v35 = vstv %s2708_s19  ;;  %s2710_s20 = spop %2709 }
 0x38f   :  { %v3021_v38 = vmul.f32 %v3017_v35, %v2957_v17  ;;  %v375_v39 = vstv %s2710_s20  ;;  %v3028_v43 = vmul.f32 %v3017_v35, %v2951_v11  ;;  %v353_v9 = vmul.f32 %v3017_v35, %v2949_v10 }
 0x390   :  { %2745 = vrsqrt.f32 %v375_v39  ;;  %v354_v13 = vmul.f32 %v3017_v35, %v2955_v16 }
 0x391   :  { %2611 = vmatpush3.msra.mxu1 %v3021_v38 }
 0x392   :  { %2620 = vmatprep.subr.mxu1 %v2798_v0 }
 0x39a   :  { %v2746_v40 = vpop.eup %2745 }
 0x39b   :  { %2711 = vpush %v2746_v40 }
 0x3cc   :  { %s2712_s21 = spop %2711 }
 0x3cd   :  { %v378_v41 = vstv %s2712_s21 }
 0x3ce   :  { %v379_v42 = vmul.f32 %v378_v41, %v2969_v29  ;;  %v381_v48 = vmul.f32 %v378_v41, %v2967_v28  ;;  %v382_v50 = vmul.f32 %v378_v41, %v2974_v36  ;;  %v380_v28 = vmul.f32 %v378_v41, %v2976_v37 }
 0x3d0   :  { %2598 = vmatmul.mubr.msk.f32.vlgmr.msra.gmra.mrb[8].mxu0 %vm106_vm4, %v379_v42  ;;  %v617_v11 = vsel %vm106_vm4, %v379_v42, 0.0  ;;  %v1014_v49 = vsel %vm106_vm4, %v381_v48, 0.0  ;;  %v1213_v51 = vsel %vm106_vm4, %v382_v50, 0.0  ;;  %v815_v5 = vsel %vm106_vm4, %v380_v28, 0.0 }
 0x3d1   :  { %2601 = vmatpush3.msra.mxu0 %v3028_v43  ;;  %2602 = vmatprep.mubr.msk.f32.mxu0 %vm2799_vm0, %v2798_v0 }
 0x3d2   :  { %2605 = vmatprep.subr.mxu0 %v2798_v0 }
 0x401   :  { %v3035_v17 = vpop.f32.mrb[4].mxu0 }
 0x402   :  { %v2593_v44 = vpop.f32.mrb[5].mxu0 }
 0x403   :  { %v430_v45 = vpop.f32.mrb[6].mxu0 }
 0x404   :  { %v2594_v46 = vpop.f32.mrb[7].mxu0 }
 0x4a3   :  { %v505_v47 = vpop.f32.mrb[8].mxu0 }
 0x4a4   :  { %512 = vxpose.xlu1.b32.start.end [1/1] (short) (narrow) %v505_v47, 8  ;;  %v2599_v29 = vpop.f32.mrb[9].mxu0 }
 0x4c2   :  { %2734 = vset.pattern.permute.xlu1 %v2801_v2 }
 0x4cb   :  { %618 = vadd.xlane.f32.xlu1 %v617_v11 }
 0x4cf   :  { %1015 = vadd.xlane.f32.xlu1 %v1014_v49 }
 0x4d3   :  { %1214 = vadd.xlane.f32.xlu1 %v1213_v51 }
 0x4d7   :  { %708 = vadd.xlane.f32.xlu1 %v707_v52 }
 0x4db   :  { %1106 = vadd.xlane.f32.xlu1 %v1105_v54 }
 0x4ec   :  { %1264 = vperm.xlu1 %2734, %v1231_v58  }
 0x4f0   :  { %2735 = vset.pattern.permute.xlu1 %v2800_v1 }
 0x4f1   :  { %1290 = vperm.xlu1 %2735, %v2476_v15  }
 0x524   :  { %v528_v55 = vpop.trf.xlu1 }
 0x525   :  { %2603 = vmatmul.mubr.msk.f32.vlgmr.msra.gmra.mrb[10].mxu0 %vm58_vm3, %v528_v55 }
 0x526   :  { %2606 = vmatpush3.xpose.msk.msra.mxu0 %vm106_vm4, %v2999_v14  ;;  %2607 = vmatprep.mubr.msk.f32.mxu0 %vm2799_vm0, %v2798_v0 }
 0x527   :  { %2615 = vmatprep.subr.mxu0 %v2798_v0 }
 0x529   :  { %2608 = vmatmul.mubr.msk.f32.vlgmr.msra.gmra.mrb[12].mxu0 %vm106_vm4, %v380_v28 }
 0x52a   :  { %2616 = vmatpush3.xpose.msk.msra.mxu0 %vm106_vm4, %v3003_v18  ;;  %2617 = vmatprep.mubr.msk.f32.mxu0 %vm2799_vm0, %v2798_v0  ;;  %v2477_v18 = vld [vmem:[%s3371_s4 + $0x68] sm:$0xff] }
 0x52b   :  { %2625 = vmatprep.subr.mxu0 %v2798_v0  ;;  %v1281_v63 = vpack.c.bf16 %v2477_v18, %v2476_v15  ;;  %1295 = vperm.xlu1 %2735, %v2477_v18  }
 0x52d   :  { %2618 = vmatmul.mubr.msk.f32.vlgmr.msra.gmra.mrb[14].mxu0 %vm106_vm4, %v381_v48 }
 0x52e   :  { %2626 = vmatpush3.xpose.msk.msra.mxu0 %vm106_vm4, %v3007_v20  ;;  %2627 = vmatprep.mubr.msk.f32.mxu0 %vm2799_vm0, %v2798_v0 }
 0x531   :  { %2628 = vmatmul.mubr.msk.f32.vlgmr.msra.gmra.mrb[16].mxu0 %vm106_vm4, %v382_v50 }
 0x532   :  { %2637 = vmatprep.mubr.msk.bf16.mxu0 %vm58_vm3, %v1281_v63 }
 0x558   :  { %v619_v16 = vpop.xlane.xlu1 %618 }
 0x559   :  { %v620_v26 = vmul.f32 %v619_v16, %v3028_v43 }
 0x55b   :  { %v621_v32 = vsel %vm106_vm4, %v620_v26, 0.0 }
 0x55c   :  { %v1016_v27 = vpop.xlane.xlu1 %1015  ;;  %v622_v39 = vrot.slane %v621_v32, 4 }
 0x55d   :  { %v1017_v33 = vmul.f32 %v1016_v27, %v353_v9 }
 0x55e   :  { %v623_v43 = vadd.f32 %v622_v39, %v621_v32 }
 0x55f   :  { %v1018_v41 = vsel %vm106_vm4, %v1017_v33, 0.0 }
 0x560   :  { %v1215_v35 = vpop.xlane.xlu1 %1214  ;;  %v1019_v44 = vrot.slane %v1018_v41, 4  ;;  %v624_v46 = vrot.slane %v623_v43, 2 }
 0x561   :  { %v1216_v42 = vmul.f32 %v1215_v35, %v354_v13 }
 0x562   :  { %v1020_v47 = vadd.f32 %v1019_v44, %v1018_v41  ;;  %v625_v48 = vadd.f32 %v624_v46, %v623_v43  ;;  %v1233_v46 = vmul.f32 0.5, %v2914_v53 }
 0x564   :  { %v1021_v49 = vrot.slane %v1020_v47, 2  ;;  %v626_v52 = vrot.slane %v625_v48, 1 }
 0x566   :  { %v1022_v54 = vadd.f32 %v1021_v49, %v1020_v47 }
 0x5f8   :  { %v3066_v36 = vpop.f32.mrb[10].mxu0 }
 0x5f9   :  { %v2604_v37 = vpop.f32.mrb[11].mxu0 }
 0x5fa   :  { %v627_v37 = vadd.f32 %v626_v52, %v625_v48 }
 0x5fc   :  { %v703_v56 = vpop.f32.mrb[12].mxu0 }
 0x5fd   :  { %710 = vxpose.xlu0.b32.start.end [1/1] (short) (narrow) %v703_v56, 8  ;;  %v2609_v60 = vpop.f32.mrb[13].mxu0  ;;  %v1023_v56 = vrot.slane %v1022_v54, 1 }
 0x600   :  { %v902_v61 = vpop.f32.mrb[14].mxu0 }
 0x601   :  { %909 = vxpose.xlu0.b32.start.end [1/1] (short) (narrow) %v902_v61, 8  ;;  %v2619_v59 = vpop.f32.mrb[15].mxu0 }
 0x602   :  { %v628_v59 = vadd.f32 32.0, %v627_v37 }
 0x604   :  { %v1101_v62 = vpop.f32.mrb[16].mxu0  ;;  %2747 = vrcp.f32 %v628_v59 }
 0x605   :  { %1108 = vxpose.xlu0.b32.start.end [1/1] (short) (narrow) %v1101_v62, 8  ;;  %v2629_v4 = vpop.f32.mrb[17].mxu0  ;;  %v1024_v62 = vadd.f32 %v1023_v56, %v1022_v54 }
 0x62e   :  { %2733 = vset.pattern.permute.xlu0 %v2801_v2 }
 0x632   :  { %816 = vadd.xlane.f32.xlu0 %v815_v5 }
 0x636   :  { %510 = vadd.xlane.f32.xlu0 %v509_v6  ;;  %v1025_v6 = vadd.f32 32.0, %v1024_v62 }
 0x63a   :  { %907 = vadd.xlane.f32.xlu0 %v906_v7 }
 0x650   :  { %1258 = vperm.xlu0 %2733, %v1230_v8  }
 0x654   :  { %2736 = vset.pattern.permute.xlu0 %v2800_v1 }
 0x655   :  { %1325 = vperm.xlu0 %2736, %v3140_v25  }
 0x67d   :  { %v726_v12 = vpop.trf.xlu0 }
 0x67e   :  { %2613 = vmatmul.mubr.msk.f32.vlgmr.msra.gmra.mrb[12].mxu1 %vm58_vm3, %v726_v12  ;;  %v709_v12 = vpop.xlane.xlu1 %708 }
 0x67f   :  { %2621 = vmatpush3.msra.mxu1 %v353_v9  ;;  %2622 = vmatprep.mubr.msk.f32.mxu1 %vm2799_vm0, %v2798_v0 }
 0x680   :  { %2630 = vmatprep.subr.mxu1 %v2798_v0 }
 0x681   :  { %v925_v14 = vpop.trf.xlu0 }
 0x682   :  { %2623 = vmatmul.mubr.msk.f32.vlgmr.msra.gmra.mrb[14].mxu1 %vm58_vm3, %v925_v14  ;;  %v2748_v14 = vpop.eup %2747  ;;  %v1107_v35 = vpop.xlane.xlu1 %1106 }
 0x683   :  { %2631 = vmatpush3.msra.mxu1 %v354_v13  ;;  %2632 = vmatprep.mubr.msk.f32.mxu1 %vm2799_vm0, %v2798_v0 }
 0x684   :  { %2649 = vmatprep.subr.bf16.mxu1 %v2798_v0 }
 0x685   :  { %v1124_v10 = vpop.trf.xlu0 }
 0x686   :  { %2633 = vmatmul.mubr.msk.f32.vlgmr.msra.gmra.mrb[16].mxu1 %vm58_vm3, %v1124_v10 }
 0x687   :  { %2650 = vmatpush3.bf16.msra.mxu1 %v2989_v57  ;;  %2653 = vmatprep.mubr.msk.bf16.mxu1 %vm2799_vm0, %v2798_v0  ;;  %v3110_v57 = vld [vmem:[%s3371_s4 + $0x70] sm:$0xff] }
 0x688   :  { %2651 = vmatprep.subr.bf16.mxu1 %v2798_v0  ;;  %1300 = vperm.xlu1 %2735, %v3110_v57  }
 0x68b   :  { %2652 = vmatpush3.bf16.msra.mxu1 %v2994_v3  ;;  %v3115_v3 = vld [vmem:[%s3371_s4 + $0x78] sm:$0xff] }
 0x68c   :  { %2657 = vmatprep.subr.mxu1 %v2798_v0  ;;  %v1282_v19 = vpack.c.bf16 %v3115_v3, %v3110_v57  ;;  %1305 = vperm.xlu1 %2735, %v3115_v3   ;;  %v2486_v57 = vld [vmem:[%s3371_s4 + $0xb0] sm:$0xff]  ;;  %v2487_v3 = vld [vmem:[%s3371_s4 + $0xb8] sm:$0xff] }
 0x690   :  { %1310 = vperm.xlu1 %2735, %v3123_v21  }
 0x694   :  { %1315 = vperm.xlu1 %2735, %v3128_v22  }
 0x698   :  { %1320 = vperm.xlu1 %2735, %v3135_v24  }
 0x6bf   :  { %v817_v20 = vpop.xlane.xlu0 %816 }
 0x6c0   :  { %v818_v31 = vmul.f32 %v817_v20, %v3021_v38  ;;  %v1217_v38 = vsel %vm106_vm4, %v1216_v42, 0.0 }
 0x6c1   :  { %v1218_v29 = vrot.slane %v1217_v38, 4 }
 0x6c2   :  { %v819_v34 = vsel %vm106_vm4, %v818_v31, 0.0 }
 0x6c3   :  { %v820_v40 = vrot.slane %v819_v34, 4  ;;  %v1219_v50 = vadd.f32 %v1218_v29, %v1217_v38  ;;  %v511_v58 = vpop.xlane.xlu0 %510 }
 0x6c4   :  { %v614_v9 = vadd.f32 %v3066_v36, %v511_v58  ;;  %v1265_v58 = vpop.permute.xlu1 %1264 }
 0x6c5   :  { %v821_v45 = vadd.f32 %v820_v40, %v819_v34  ;;  %v1220_v55 = vrot.slane %v1219_v50, 2 }
 0x6c6   :  { %v630_v18 = vmul.f32 %v2748_v14, %v614_v9 }
 0x6c7   :  { %v822_v11 = vrot.slane %v821_v45, 2  ;;  %v1221_v60 = vadd.f32 %v1220_v55, %v1219_v50  ;;  %v908_v20 = vpop.xlane.xlu0 %907 }
 0x6c8   :  { %v1291_v21 = vpop.permute.xlu1 %1290 }
 0x6c9   :  { %v823_v51 = vadd.f32 %v822_v11, %v821_v45  ;;  %v1222_v4 = vrot.slane %v1221_v60, 1 }
 0x6cb   :  { %v824_v28 = vrot.slane %v823_v51, 1  ;;  %v1223_v7 = vadd.f32 %v1222_v4, %v1221_v60 }
 0x6cc   :  { %v1296_v22 = vpop.permute.xlu1 %1295 }
 0x6cd   :  { %v825_v61 = vadd.f32 %v824_v28, %v823_v51  ;;  %v1224_v8 = vadd.f32 32.0, %v1223_v7 }
 0x6cf   :  { %v826_v5 = vadd.f32 32.0, %v825_v61  ;;  %v1259_v7 = vpop.permute.xlu0 %1258 }
 0x6d1   :  { %2749 = vrcp.f32 %v826_v5 }
 0x6d2   :  { %2751 = vrcp.f32 %v1025_v6 }
 0x6d3   :  { %2753 = vrcp.f32 %v1224_v8 }
 0x6db   :  { %v2750_v15 = vpop.eup %2749 }
 0x6dc   :  { %v2752_v33 = vpop.eup %2751 }
 0x6dd   :  { %v2754_v42 = vpop.eup %2753 }
 0x751   :  { %v811_v13 = vpop.f32.mrb[12].mxu1 }
 0x752   :  { %v812_v10 = vadd.f32 %v811_v13, %v709_v12  ;;  %v2614_v16 = vpop.f32.mrb[13].mxu1 }
 0x753   :  { %v3182_v16 = vld [vmem:[%s3371_s4 + $0xa8] sm:$0xff] }
 0x754   :  { %v828_v63 = vmul.f32 %v2750_v15, %v812_v10  ;;  %v2484_v10 = vld [vmem:[%s3371_s4 + $0xa0] sm:$0xff] }
 0x755   :  { %v1010_v26 = vpop.f32.mrb[14].mxu1  ;;  %v1285_v15 = vpack.c.bf16 %v3182_v16, %v2484_v10 }
 0x756   :  { %v829_v27 = vadd.f32 %v828_v63, %v630_v18  ;;  %v1011_v31 = vadd.f32 %v1010_v26, %v908_v20  ;;  %v2624_v32 = vpop.f32.mrb[15].mxu1 }
 0x758   :  { %v1027_v34 = vmul.f32 %v2752_v33, %v1011_v31 }
 0x759   :  { %v1209_v39 = vpop.f32.mrb[16].mxu1 }
 0x75a   :  { %v1028_v40 = vadd.f32 %v1027_v34, %v829_v27  ;;  %v1210_v36 = vadd.f32 %v1209_v39, %v1107_v35  ;;  %v2634_v41 = vpop.f32.mrb[17].mxu1 }
 0x75c   :  { %v1226_v43 = vmul.f32 %v2754_v42, %v1210_v36 }
 0x75e   :  { %v1227_v44 = vadd.f32 %v1226_v43, %v1028_v40  ;;  %v1326_v43 = vpop.permute.xlu0 %1325 }
 0x760   :  { %v1228_v45 = vmul.f32 0.25, %v1227_v44 }
 0x762   :  { %v1229_v38 = vadd.f32 %v1228_v45, %v3035_v17 }
 0x764   :  { %v1232_v47 = vmul.f32 0.5, %v1229_v38 }
 0x766   :  { %v1234_v29 = vadd.f32 %v1233_v46, %v1232_v47 }
 0x768   :  { %v1235_v11 = vsel %vm106_vm4, %v1234_v29, 0.0 }
 0x769   :  { %v1236_v48 = vrot.slane %v1235_v11, 4 }
 0x76b   :  { %v1237_v49 = vadd.f32 %v1236_v48, %v1235_v11 }
 0x76d   :  { %v1238_v50 = vrot.slane %v1237_v49, 2 }
 0x76f   :  { %v1239_v51 = vadd.f32 %v1238_v50, %v1237_v49 }
 0x771   :  { %v1240_v52 = vrot.slane %v1239_v51, 1 }
 0x773   :  { %v1241_v54 = vadd.f32 %v1240_v52, %v1239_v51 }
 0x775   :  { %v1242_v55 = vmul.f32 0.125, %v1241_v54 }
 0x777   :  { %v1243_v28 = vsub.f32 %v1234_v29, %v1242_v55 }
 0x779   :  { %v1244_v37 = vmul.f32 %v1243_v28, %v1243_v28 }
 0x77b   :  { %v1245_v56 = vsel %vm106_vm4, %v1244_v37, 0.0 }
 0x77c   :  { %v1246_v60 = vrot.slane %v1245_v56, 4 }
 0x77e   :  { %v1247_v61 = vadd.f32 %v1246_v60, %v1245_v56 }
 0x780   :  { %v1248_v17 = vrot.slane %v1247_v61, 2 }
 0x782   :  { %v1249_v59 = vadd.f32 %v1248_v17, %v1247_v61 }
 0x784   :  { %v1250_v53 = vrot.slane %v1249_v59, 1 }
 0x786   :  { %v1251_v62 = vadd.f32 %v1250_v53, %v1249_v59 }
 0x788   :  { %v1252_v4 = vmul.f32 0.125, %v1251_v62 }
 0x78a   :  { %v1253_v5 = vadd.f32 1e-05, %v1252_v4 }
 0x78c   :  { %2755 = vrsqrt.f32 %v1253_v5 }
 0x796   :  { %v2756_v6 = vpop.eup %2755 }
 0x797   :  { %v1255_v8 = vmul.f32 %v2756_v6, %v1243_v28 }
 0x799   :  { %v1261_v9 = vmul.f32 %v1259_v7, %v1255_v8 }
 0x79b   :  { %v3161_v12 = vadd.f32 %v1265_v58, %v1261_v9 }
 0x79d   :  { %v1287_v13 = vpack.c.bf16 %v3161_v12, %v3161_v12 }
 0x79f   :  { %2704 = vmatprep.subr.msk.bf16.mxu0 %vm62_vm2, %v1287_v13  ;;  %v1367_v14 = vsel %vm62_vm2, %v1287_v13, 0 }
 0x7a0   :  { %2636 = vmatpush3.bf16.msra.mxu0 %v1367_v14 }
 0x7a1   :  { %2672 = vmatprep.subr.mxu0 %v2798_v0 }
 0x7a3   :  { %2638 = vmatmul.mubr.msk.bf16.vlgmr.msra.gmra.mrb[20].mxu0 %vm58_vm3, %v1282_v19  ;;  %v1286_v19 = vpack.c.bf16 %v2487_v3, %v2486_v57 }
 0x7a4   :  { %2641 = vmatprep.mubr.msk.bf16.mxu0 %vm58_vm3, %v1283_v23  ;;  %v1301_v23 = vpop.permute.xlu1 %1300 }
 0x7a8   :  { %v1306_v24 = vpop.permute.xlu1 %1305 }
 0x7ab   :  { %2642 = vmatmul.mubr.msk.bf16.gmra.mrb[24].mxu0 %vm58_vm3, %v1284_v30 }
 0x7ac   :  { %2645 = vmatprep.mubr.msk.bf16.mxu0 %vm58_vm3, %v1285_v15  ;;  %v1311_v25 = vpop.permute.xlu1 %1310 }
 0x7b0   :  { %v1316_v27 = vpop.permute.xlu1 %1315 }
 0x7b3   :  { %2646 = vmatmul.mubr.msk.bf16.gmra.mrb[28].mxu0 %vm58_vm3, %v1286_v19 }
 0x7b4   :  { %2674 = vmatprep.mubr.msk.f32.mxu0 %vm2799_vm0, %v2798_v0  ;;  %v1321_v44 = vpop.permute.xlu1 %1320 }
 0x876   :  { %v2639_v30 = vpop.f32.mrb[20].mxu0 }
 0x877   :  { %v1403_v18 = vpop.f32.mrb[21].mxu0  ;;  %v3199_v63 = vadd.f32 %v2639_v30, %v1301_v23 }
 0x878   :  { %v3201_v20 = vadd.f32 %v1403_v18, %v1291_v21  ;;  %v2640_v26 = vpop.f32.mrb[22].mxu0 }
 0x879   :  { %v1406_v31 = vpop.f32.mrb[23].mxu0  ;;  %v3205_v33 = vadd.f32 %v2640_v26, %v1306_v24  ;;  %v1452_v35 = vmul.f32 %v3199_v63, %v3199_v63 }
 0x87a   :  { %v1450_v32 = vmul.f32 %v3201_v20, %v3201_v20  ;;  %v3207_v34 = vadd.f32 %v1406_v31, %v1296_v22 }
 0x87b   :  { %v1453_v36 = vmul.f32 %v3205_v33, %v3205_v33  ;;  %v1457_v11 = vsel %vm106_vm4, %v1452_v35, 0.0 }
 0x87c   :  { %v1451_v39 = vmul.f32 %v3207_v34, %v3207_v34  ;;  %v1454_v40 = vsel %vm106_vm4, %v1450_v32, 0.0 }
 0x87d   :  { %v1459_v54 = vsel %vm106_vm4, %v1453_v36, 0.0 }
 0x87e   :  { %v1455_v41 = vsel %vm106_vm4, %v1451_v39, 0.0  ;;  %v2643_v42 = vpop.f32.mrb[24].mxu0 }
 0x87f   :  { %v1419_v45 = vpop.f32.mrb[25].mxu0  ;;  %v1456_v38 = vadd.f32 %v1455_v41, %v1454_v40  ;;  %v3217_v46 = vadd.f32 %v2643_v42, %v1321_v44 }
 0x880   :  { %v3219_v47 = vadd.f32 %v1419_v45, %v1311_v25  ;;  %v2644_v29 = vpop.f32.mrb[26].mxu0 }
 0x881   :  { %v1422_v48 = vpop.f32.mrb[27].mxu0  ;;  %v3222_v49 = vadd.f32 %v2644_v29, %v1326_v43  ;;  %v1458_v50 = vadd.f32 %v1457_v11, %v1456_v38  ;;  %v1480_v28 = vmul.f32 %v3217_v46, %v3217_v46 }
 0x882   :  { %v1478_v51 = vmul.f32 %v3219_v47, %v3219_v47  ;;  %v3226_v52 = vadd.f32 %v1422_v48, %v1316_v27 }
 0x883   :  { %v1460_v55 = vadd.f32 %v1459_v54, %v1458_v50  ;;  %v1481_v56 = vmul.f32 %v3222_v49, %v3222_v49  ;;  %v1485_v59 = vsel %vm106_vm4, %v1480_v28, 0.0 }
 0x884   :  { %v1479_v37 = vmul.f32 %v3226_v52, %v3226_v52  ;;  %v1482_v60 = vsel %vm106_vm4, %v1478_v51, 0.0 }
 0x885   :  { %1461 = vadd.xlane.f32.xlu1 %v1460_v55  ;;  %v1487_v53 = vsel %vm106_vm4, %v1481_v56, 0.0 }
 0x886   :  { %v1483_v61 = vsel %vm106_vm4, %v1479_v37, 0.0  ;;  %v2647_v5 = vpop.f32.mrb[28].mxu0 }
 0x887   :  { %v1484_v17 = vadd.f32 %v1483_v61, %v1482_v60  ;;  %v1435_v6 = vpop.f32.mrb[29].mxu0 }
 0x888   :  { %v2648_v7 = vpop.f32.mrb[30].mxu0 }
 0x889   :  { %v1486_v62 = vadd.f32 %v1485_v59, %v1484_v17  ;;  %v1438_v8 = vpop.f32.mrb[31].mxu0 }
 0x88b   :  { %v1488_v4 = vadd.f32 %v1487_v53, %v1486_v62 }
 0x88d   :  { %1489 = vadd.xlane.f32.xlu0 %v1488_v4 }
 0x896   :  { %1330 = vperm.xlu1 %2735, %v2484_v10  }
 0x89a   :  { %1340 = vperm.xlu1 %2735, %v2486_v57  }
 0x89e   :  { %1345 = vperm.xlu1 %2735, %v2487_v3  }
 0x8a3   :  { %1335 = vperm.xlu0 %2736, %v3182_v16  }
 0x912   :  { %v1462_v58 = vpop.xlane.xlu1 %1461 }
 0x913   :  { %v1463_v9 = vrot.slane %v1462_v58, 4 }
 0x915   :  { %v1464_v13 = vadd.f32 %v1463_v9, %v1462_v58 }
 0x916   :  { %v1331_v15 = vpop.permute.xlu1 %1330 }
 0x917   :  { %v1465_v14 = vrot.slane %v1464_v13, 2  ;;  %v3240_v25 = vadd.f32 %v1435_v6, %v1331_v15  ;;  %v2508_v15 = vld [vmem:[%s3372_s5 + $0x18] sm:$0xff] }
 0x919   :  { %v1466_v19 = vadd.f32 %v1465_v14, %v1464_v13 }
 0x91a   :  { %v1490_v23 = vpop.xlane.xlu0 %1489  ;;  %v1341_v24 = vpop.permute.xlu1 %1340 }
 0x91b   :  { %v1467_v21 = vrot.slane %v1466_v19, 1  ;;  %v3244_v30 = vadd.f32 %v2647_v5, %v1341_v24  ;;  %v1491_v35 = vrot.slane %v1490_v23, 4 }
 0x91d   :  { %v1468_v22 = vadd.f32 %v1467_v21, %v1466_v19  ;;  %v1492_v39 = vadd.f32 %v1491_v35, %v1490_v23 }
 0x91e   :  { %v1346_v3 = vpop.permute.xlu1 %1345 }
 0x91f   :  { %2713 = vpush %v1468_v22  ;;  %v3248_v18 = vadd.f32 %v2648_v7, %v1346_v3  ;;  %v1493_v40 = vrot.slane %v1492_v39, 2  ;;  %v1630_v7 = vsel %vm106_vm4, %v3240_v25, 0.0 }
 0x921   :  { %v1494_v41 = vadd.f32 %v1493_v40, %v1492_v39  ;;  %v2226_v14 = vsel %vm106_vm4, %v3248_v18, 0.0 }
 0x922   :  { %v1336_v10 = vpop.permute.xlu0 %1335 }
 0x923   :  { %v3242_v57 = vadd.f32 %v1438_v8, %v1336_v10  ;;  %v1495_v42 = vrot.slane %v1494_v41, 1  ;;  %v2027_v8 = vsel %vm106_vm4, %v3244_v30, 0.0 }
 0x925   :  { %v1506_v16 = vadd.f32 %v3242_v57, %v3240_v25  ;;  %v1496_v44 = vadd.f32 %v1495_v42, %v1494_v41  ;;  %v1828_v13 = vsel %vm106_vm4, %v3242_v57, 0.0 }
 0x927   :  { %v1507_v26 = vadd.f32 %v1506_v16, %v3244_v30 }
 0x929   :  { %v1508_v27 = vadd.f32 %v1507_v26, %v3248_v18 }
 0x92b   :  { %v1509_v31 = vmul.f32 0.25, %v1508_v27 }
 0x92d   :  { %v1510_v32 = vpack.c.bf16 %v1509_v31, %v1509_v31 }
 0x92f   :  { %2654 = vmatmul.mubr.msk.bf16.vlgmr.msra.gmra.mrb[20].mxu1 %vm106_vm4, %v1510_v32 }
 0x930   :  { %2658 = vmatpush3.xpose.msk.msra.mxu1 %vm106_vm4, %v3240_v25  ;;  %2659 = vmatprep.mubr.msk.f32.mxu1 %vm2799_vm0, %v2798_v0 }
 0x931   :  { %2662 = vmatprep.subr.mxu1 %v2798_v0 }
 0x950   :  { %s2714_s4 = spop %2713 }
 0x951   :  { %v1470_v36 = vstv %s2714_s4 }
 0x952   :  { %2757 = vrsqrt.f32 %v1470_v36 }
 0x95c   :  { %v2758_v43 = vpop.eup %2757 }
 0x95d   :  { %2715 = vpush %v2758_v43 }
 0x95e   :  { %2717 = vpush %v1496_v44 }
 0x98e   :  { %s2716_s23 = spop %2715 }
 0x98f   :  { %v3258_v45 = vstv %s2716_s23  ;;  %s2718_s24 = spop %2717 }
 0x990   :  { %v3262_v38 = vmul.f32 %v3258_v45, %v3207_v34  ;;  %v1498_v29 = vstv %s2718_s24  ;;  %v3269_v51 = vmul.f32 %v3258_v45, %v3201_v20  ;;  %v1476_v19 = vmul.f32 %v3258_v45, %v3199_v63  ;;  %v3341_v63 = vld [vmem:[%s3369_s2 + $0x8] sm:$0xff] }
 0x991   :  { %2759 = vrsqrt.f32 %v1498_v29  ;;  %v1477_v22 = vmul.f32 %v3258_v45, %v3205_v33 }
 0x992   :  { %2673 = vmatpush3.msra.mxu0 %v3262_v38 }
 0x993   :  { %2682 = vmatprep.subr.mxu0 %v2798_v0 }
 0x99b   :  { %v2760_v11 = vpop.eup %2759 }
 0x99c   :  { %2719 = vpush %v2760_v11 }
 0x9cd   :  { %s2720_s3 = spop %2719 }
 0x9ce   :  { %v1501_v48 = vstv %s2720_s3 }
 0x9cf   :  { %v1502_v50 = vmul.f32 %v1501_v48, %v3219_v47  ;;  %v1503_v20 = vmul.f32 %v1501_v48, %v3226_v52  ;;  %v1504_v60 = vmul.f32 %v1501_v48, %v3217_v46  ;;  %v1505_v52 = vmul.f32 %v1501_v48, %v3222_v49 }
 0x9d1   :  { %2660 = vmatmul.mubr.msk.f32.vlgmr.msra.gmra.mrb[18].mxu1 %vm106_vm4, %v1502_v50  ;;  %v1936_v49 = vsel %vm106_vm4, %v1503_v20, 0.0  ;;  %v2135_v6 = vsel %vm106_vm4, %v1504_v60, 0.0  ;;  %v1738_v58 = vsel %vm106_vm4, %v1502_v50, 0.0  ;;  %v2334_v9 = vsel %vm106_vm4, %v1505_v52, 0.0 }
 0x9d2   :  { %2663 = vmatpush3.msra.mxu1 %v3269_v51  ;;  %2664 = vmatprep.mubr.msk.f32.mxu1 %vm2799_vm0, %v2798_v0 }
 0x9d3   :  { %2667 = vmatprep.subr.mxu1 %v2798_v0 }
 0xa02   :  { %v3276_v34 = vpop.f32.mrb[20].mxu1 }
 0xa03   :  { %v2655_v54 = vpop.f32.mrb[21].mxu1 }
 0xa04   :  { %v1551_v55 = vpop.f32.mrb[22].mxu1 }
 0xa05   :  { %v2656_v28 = vpop.f32.mrb[23].mxu1 }
 0xaa4   :  { %v1626_v37 = vpop.f32.mrb[18].mxu1 }
 0xaa5   :  { %1633 = vxpose.xlu0.b32.start.end [1/1] (short) (narrow) %v1626_v37, 8  ;;  %v2661_v47 = vpop.f32.mrb[19].mxu1 }
 0xb25   :  { %v1649_v56 = vpop.trf.xlu0 }
 0xb26   :  { %2665 = vmatmul.mubr.msk.f32.vlgmr.msra.gmra.mrb[24].mxu1 %vm58_vm3, %v1649_v56 }
 0xb27   :  { %2668 = vmatpush3.xpose.msk.msra.mxu1 %vm106_vm4, %v3242_v57  ;;  %2669 = vmatprep.mubr.msk.f32.mxu1 %vm2799_vm0, %v2798_v0 }
 0xb28   :  { %2677 = vmatprep.subr.mxu1 %v2798_v0 }
 0xb2a   :  { %2670 = vmatmul.mubr.msk.f32.vlgmr.msra.gmra.mrb[26].mxu1 %vm106_vm4, %v1503_v20 }
 0xb2b   :  { %2678 = vmatpush3.xpose.msk.msra.mxu1 %vm106_vm4, %v3244_v30  ;;  %2679 = vmatprep.mubr.msk.f32.mxu1 %vm2799_vm0, %v2798_v0 }
 0xb2c   :  { %2687 = vmatprep.subr.mxu1 %v2798_v0 }
 0xb2e   :  { %2680 = vmatmul.mubr.msk.f32.vlgmr.msra.gmra.mrb[28].mxu1 %vm106_vm4, %v1504_v60 }
 0xb2f   :  { %2688 = vmatpush3.xpose.msk.msra.mxu1 %vm106_vm4, %v3248_v18  ;;  %2689 = vmatprep.mubr.msk.f32.mxu1 %vm2799_vm0, %v2798_v0 }
 0xb30   :  { %2697 = vmatprep.subr.bf16.mxu1 %v2798_v0 }
 0xb32   :  { %2690 = vmatmul.mubr.msk.f32.vlgmr.msra.gmra.mrb[30].mxu1 %vm106_vm4, %v1505_v52 }
 0xb33   :  { %2699 = vmatprep.mubr.msk.bf16.mxu1 %vm2799_vm0, %v2798_v0 }
 0xbf9   :  { %v3302_v46 = vpop.f32.mrb[24].mxu1 }
 0xbfa   :  { %v2666_v61 = vpop.f32.mrb[25].mxu1 }
 0xbfd   :  { %v1824_v17 = vpop.f32.mrb[26].mxu1 }
 0xbfe   :  { %1831 = vxpose.xlu1.b32.start.end [1/1] (short) (narrow) %v1824_v17, 8  ;;  %v2671_v59 = vpop.f32.mrb[27].mxu1 }
 0xc01   :  { %v2023_v53 = vpop.f32.mrb[28].mxu1 }
 0xc02   :  { %2030 = vxpose.xlu0.b32.start.end [1/1] (short) (narrow) %v2023_v53, 8  ;;  %v2681_v62 = vpop.f32.mrb[29].mxu1 }
 0xc05   :  { %v2222_v4 = vpop.f32.mrb[30].mxu1 }
 0xc06   :  { %2229 = vxpose.xlu0.b32.start.end [1/1] (short) (narrow) %v2222_v4, 8  ;;  %v2691_v5 = vpop.f32.mrb[31].mxu1 }
 0xc1c   :  { %2737 = vset.pattern.permute.xlu1 %v2801_v2 }
 0xc25   :  { %1937 = vadd.xlane.f32.xlu1 %v1936_v49 }
 0xc29   :  { %2136 = vadd.xlane.f32.xlu1 %v2135_v6 }
 0xc2d   :  { %1631 = vadd.xlane.f32.xlu1 %v1630_v7 }
 0xc2f   :  { %2738 = vset.pattern.permute.xlu0 %v2801_v2  ;;  %v2507_v2 = vld [vmem:[%s3372_s5 + $0x10] sm:$0xff] }
 0xc31   :  { %2028 = vadd.xlane.f32.xlu1 %v2027_v8 }
 0xc33   :  { %1739 = vadd.xlane.f32.xlu0 %v1738_v58 }
 0xc37   :  { %2335 = vadd.xlane.f32.xlu0 %v2334_v9 }
 0xc3b   :  { %1829 = vadd.xlane.f32.xlu0 %v1828_v13 }
 0xc3f   :  { %2227 = vadd.xlane.f32.xlu0 %v2226_v14 }
 0xc42   :  { %2380 = vperm.xlu1 %2737, %v2507_v2  }
 0xc46   :  { %2739 = vset.pattern.permute.xlu1 %v2800_v1 }
 0xc47   :  { %2394 = vperm.xlu1 %2739, %v3341_v63  }
 0xc55   :  { %2386 = vperm.xlu0 %2738, %v2508_v15  }
 0xc59   :  { %2740 = vset.pattern.permute.xlu0 %v2800_v1 }
 0xc7e   :  { %v1847_v21 = vpop.trf.xlu1 }
 0xc7f   :  { %2675 = vmatmul.mubr.msk.f32.vlgmr.msra.gmra.mrb[18].mxu0 %vm58_vm3, %v1847_v21 }
 0xc80   :  { %2683 = vmatpush3.msra.mxu0 %v1476_v19  ;;  %2684 = vmatprep.mubr.msk.f32.mxu0 %vm2799_vm0, %v2798_v0 }
 0xc81   :  { %2692 = vmatprep.subr.mxu0 %v2798_v0 }
 0xc82   :  { %v2046_v23 = vpop.trf.xlu0 }
 0xc83   :  { %2685 = vmatmul.mubr.msk.f32.vlgmr.msra.gmra.mrb[32].mxu0 %vm58_vm3, %v2046_v23 }
 0xc84   :  { %2693 = vmatpush3.msra.mxu0 %v1477_v22  ;;  %2694 = vmatprep.mubr.msk.f32.mxu0 %vm2799_vm0, %v2798_v0 }
 0xc86   :  { %v2245_v1 = vpop.trf.xlu0 }
 0xc87   :  { %2695 = vmatmul.mubr.msk.f32.vlgmr.msra.gmra.mrb[34].mxu0 %vm58_vm3, %v2245_v1 }
 0xcb2   :  { %v1938_v24 = vpop.xlane.xlu1 %1937 }
 0xcb3   :  { %v1939_v25 = vmul.f32 %v1938_v24, %v3262_v38 }
 0xcb5   :  { %v1940_v0 = vsel %vm106_vm4, %v1939_v25, 0.0 }
 0xcb6   :  { %v2137_v57 = vpop.xlane.xlu1 %2136  ;;  %v1941_v26 = vrot.slane %v1940_v0, 4 }
 0xcb7   :  { %v2138_v30 = vmul.f32 %v2137_v57, %v1476_v19 }
 0xcb8   :  { %v1942_v35 = vadd.f32 %v1941_v26, %v1940_v0  ;;  %v2355_v0 = vmul.f32 0.5, %v3161_v12 }
 0xcb9   :  { %v2139_v27 = vsel %vm106_vm4, %v2138_v30, 0.0 }
 0xcba   :  { %v2140_v39 = vrot.slane %v2139_v27, 4  ;;  %v1943_v41 = vrot.slane %v1942_v35, 2  ;;  %v1632_v59 = vpop.xlane.xlu1 %1631 }
 0xcbb   :  { %v1735_v5 = vadd.f32 %v3302_v46, %v1632_v59 }
 0xcbc   :  { %v2141_v42 = vadd.f32 %v2140_v39, %v2139_v27  ;;  %v1944_v45 = vadd.f32 %v1943_v41, %v1942_v35 }
 0xcbe   :  { %v2142_v38 = vrot.slane %v2141_v42, 2  ;;  %v1945_v48 = vrot.slane %v1944_v45, 1  ;;  %v2029_v9 = vpop.xlane.xlu1 %2028 }
 0xcc0   :  { %v1740_v10 = vpop.xlane.xlu0 %1739  ;;  %v2143_v50 = vadd.f32 %v2142_v38, %v2141_v42  ;;  %v1946_v55 = vadd.f32 %v1945_v48, %v1944_v45 }
 0xcc1   :  { %v1741_v33 = vmul.f32 %v1740_v10, %v3269_v51 }
 0xcc2   :  { %v2144_v28 = vrot.slane %v2143_v50, 1  ;;  %v1947_v56 = vadd.f32 32.0, %v1946_v55 }
 0xcc3   :  { %v1742_v3 = vsel %vm106_vm4, %v1741_v33, 0.0 }
 0xcc4   :  { %v1743_v16 = vrot.slane %v1742_v3, 4  ;;  %v2336_v18 = vpop.xlane.xlu0 %2335  ;;  %v2145_v20 = vadd.f32 %v2144_v28, %v2143_v50  ;;  %v2381_v50 = vpop.permute.xlu1 %2380 }
 0xcc5   :  { %v2337_v31 = vmul.f32 %v2336_v18, %v1477_v22 }
 0xcc6   :  { %v1744_v32 = vadd.f32 %v1743_v16, %v1742_v3  ;;  %v2146_v52 = vadd.f32 32.0, %v2145_v20 }
 0xcc7   :  { %v2338_v40 = vsel %vm106_vm4, %v2337_v31, 0.0 }
 0xcc8   :  { %v1745_v36 = vrot.slane %v1744_v32, 2  ;;  %v2339_v43 = vrot.slane %v2338_v40, 4  ;;  %v1830_v62 = vpop.xlane.xlu0 %1829  ;;  %v2395_v20 = vpop.permute.xlu1 %2394 }
 0xcca   :  { %v1746_v44 = vadd.f32 %v1745_v36, %v1744_v32  ;;  %v2340_v29 = vadd.f32 %v2339_v43, %v2338_v40 }
 0xccc   :  { %v1747_v11 = vrot.slane %v1746_v44, 1  ;;  %v2341_v51 = vrot.slane %v2340_v29, 2  ;;  %v2228_v22 = vpop.xlane.xlu0 %2227 }
 0xcce   :  { %v1748_v54 = vadd.f32 %v1747_v11, %v1746_v44  ;;  %v2342_v37 = vadd.f32 %v2341_v51, %v2340_v29 }
 0xcd0   :  { %v1749_v47 = vadd.f32 32.0, %v1748_v54  ;;  %v2343_v60 = vrot.slane %v2342_v37, 1 }
 0xcd2   :  { %2761 = vrcp.f32 %v1749_v47  ;;  %v2344_v61 = vadd.f32 %v2343_v60, %v2342_v37 }
 0xcd3   :  { %2763 = vrcp.f32 %v1947_v56  ;;  %v2390_v56 = vpack.c.bf16 %v3341_v63, %v3341_v63 }
 0xcd4   :  { %2765 = vrcp.f32 %v2146_v52  ;;  %v2345_v17 = vadd.f32 32.0, %v2344_v61  ;;  %v2387_v54 = vpop.permute.xlu0 %2386 }
 0xcd6   :  { %2767 = vrcp.f32 %v2345_v17 }
 0xcdc   :  { %v2762_v53 = vpop.eup %2761 }
 0xcdd   :  { %v2764_v7 = vpop.eup %2763  ;;  %v1751_v8 = vmul.f32 %v2762_v53, %v1735_v5 }
 0xcde   :  { %v2766_v19 = vpop.eup %2765 }
 0xce0   :  { %v2768_v33 = vpop.eup %2767 }
 0xd52   :  { %v1932_v4 = vpop.f32.mrb[18].mxu0 }
 0xd53   :  { %v1933_v49 = vadd.f32 %v1932_v4, %v1830_v62  ;;  %v2676_v6 = vpop.f32.mrb[19].mxu0 }
 0xd55   :  { %v1949_v58 = vmul.f32 %v2764_v7, %v1933_v49 }
 0xd56   :  { %v2131_v13 = vpop.f32.mrb[32].mxu0 }
 0xd57   :  { %v1950_v14 = vadd.f32 %v1949_v58, %v1751_v8  ;;  %v2132_v2 = vadd.f32 %v2131_v13, %v2029_v9  ;;  %v2686_v15 = vpop.f32.mrb[33].mxu0 }
 0xd59   :  { %v2148_v21 = vmul.f32 %v2766_v19, %v2132_v2 }
 0xd5a   :  { %v2330_v23 = vpop.f32.mrb[34].mxu0 }
 0xd5b   :  { %v2149_v1 = vadd.f32 %v2148_v21, %v1950_v14  ;;  %v2331_v24 = vadd.f32 %v2330_v23, %v2228_v22  ;;  %v2696_v10 = vpop.f32.mrb[35].mxu0 }
 0xd5d   :  { %v2347_v25 = vmul.f32 %v2768_v33, %v2331_v24 }
 0xd5f   :  { %v2348_v46 = vadd.f32 %v2347_v25, %v2149_v1 }
 0xd61   :  { %v2349_v57 = vmul.f32 0.25, %v2348_v46 }
 0xd63   :  { %v2350_v3 = vadd.f32 %v2349_v57, %v3276_v34 }
 0xd65   :  { %v2354_v30 = vmul.f32 0.5, %v2350_v3 }
 0xd67   :  { %v2356_v16 = vadd.f32 %v2355_v0, %v2354_v30 }
 0xd69   :  { %v2357_v18 = vsel %vm106_vm4, %v2356_v16, 0.0 }
 0xd6a   :  { %v2358_v26 = vrot.slane %v2357_v18, 4 }
 0xd6c   :  { %v2359_v27 = vadd.f32 %v2358_v26, %v2357_v18 }
 0xd6e   :  { %v2360_v31 = vrot.slane %v2359_v27, 2 }
 0xd70   :  { %v2361_v32 = vadd.f32 %v2360_v31, %v2359_v27 }
 0xd72   :  { %v2362_v35 = vrot.slane %v2361_v32, 1 }
 0xd74   :  { %v2363_v39 = vadd.f32 %v2362_v35, %v2361_v32 }
 0xd76   :  { %v2364_v40 = vmul.f32 0.125, %v2363_v39 }
 0xd78   :  { %v2365_v36 = vsub.f32 %v2356_v16, %v2364_v40 }
 0xd7a   :  { %v2366_v41 = vmul.f32 %v2365_v36, %v2365_v36 }
 0xd7c   :  { %v2367_v42 = vsel %vm106_vm4, %v2366_v41, 0.0 }
 0xd7d   :  { %v2368_v43 = vrot.slane %v2367_v42, 4 }
 0xd7f   :  { %v2369_v44 = vadd.f32 %v2368_v43, %v2367_v42 }
 0xd81   :  { %v2370_v34 = vrot.slane %v2369_v44, 2 }
 0xd83   :  { %v2371_v45 = vadd.f32 %v2370_v34, %v2369_v44 }
 0xd85   :  { %v2372_v12 = vrot.slane %v2371_v45, 1 }
 0xd87   :  { %v2373_v38 = vadd.f32 %v2372_v12, %v2371_v45 }
 0xd89   :  { %v2374_v29 = vmul.f32 0.125, %v2373_v38 }
 0xd8b   :  { %v2375_v11 = vadd.f32 1e-05, %v2374_v29 }
 0xd8d   :  { %2769 = vrsqrt.f32 %v2375_v11 }
 0xd97   :  { %v2770_v48 = vpop.eup %2769 }
 0xd98   :  { %v2377_v51 = vmul.f32 %v2770_v48, %v2365_v36 }
 0xd9a   :  { %v2383_v55 = vmul.f32 %v2381_v50, %v2377_v51 }
 0xd9c   :  { %v2389_v28 = vadd.f32 %v2387_v54, %v2383_v55 }
 0xd9e   :  { %v2391_v37 = vpack.c.bf16 %v2389_v28, %v2389_v28 }
 0xda0   :  { %v2401_v47 = vsel %vm62_vm2, %v2391_v37, 0 }
 0xda1   :  { %2698 = vmatpush3.bf16.msra.mxu1 %v2401_v47 }
 0xda4   :  { %2700 = vmatmul.mubr.msk.bf16.vlgmr.msra.gmra.mrb[32].mxu1 %vm58_vm3, %v2390_v56 }
 0xe77   :  { %v2437_v60 = vpop.f32.mrb[32].mxu1 }
 0xe78   :  { %v2438_v52 = vadd.f32 %v2437_v60, %v2395_v20  ;;  %v2701_v61 = vpop.f32.mrb[33].mxu1 }
 0xe79   :  { %v2440_v17 = vpop.f32.mrb[34].mxu1 }
 0xe7a   :  { %2443 = vst.msk [vmem:[%s3373_s6] sm:$0xff] %vm45_vm1, %v2438_v52  ;;  %v2702_v59 = vpop.f32.mrb[35].mxu1  ;;  %2445 = vrot.lane.b32.xlu1 %v2438_v52, %s2803_s30 }
 0xeec   :  { %v2446_v53 = vpop.permute.xlu1 %2445 }
 0xeed   :  { %2510 = vst.msk [vmem:[%s3373_s6 + $0x8] sm:$0xff] %vm45_vm1, %v2446_v53 }
 0xeee   :  { %2454 = vsyncpa [#allocation3], 1 }

// kernel: graphchiar_noseq_forward.3
= control target key start
LH: loop header
LB: loop body
LE: loop exit
PB: predicated region body
PF: predicated region fallthrough
CT: control target
= control target key end

     0   :  { %s6253_s15 = smov 0   ;;  %s8953_s0 = inlined_call_operand.vmem [shape: f32[2,1,1600], index: 0, kind: input, shape index: {}]   ;;  %s8954_s1 = inlined_call_operand.vmem [shape: f32[5,8,1], index: 1, kind: input, shape index: {}]   ;;  %s8955_s2 = inlined_call_operand.vmem [shape: f32[5,5,8,8], index: 2, kind: input, shape index: {}]   ;;  %s8956_s3 = inlined_call_operand.vmem [shape: f32[6,8,1], index: 3, kind: input, shape index: {}]   ;;  %s8957_s4 = inlined_call_operand.vmem [shape: f32[2,8,16], index: 4, kind: output, shape index: {}]  }
   0x1 LB: > { %s4627_s16 = sadd.s32 4294967295, %s6214_s15   ;;  %p4631_p0 = scmp.ge.s32.totalorder %s6214_s15, 1  ;;  %s6214_s15 = sphi %s6253_s15, %s14_s15  }
   0x2   : > { %p161_p1 = scmp.lt.s32.totalorder %s6214_s15, 3 }
   0x4   : > { %p162_p2 = pnand %p4631_p0, %p161_p1 }
   0x5   : > { %v4633_v0 = vld [vmem:[%s8954_s1 + $0x8] sm:$0xff] (!%p162_p2)  ;;  %p185_p3 = scmp.lt.s32.totalorder (!%p162_p2), %s4627_s16, 1  ;;  %v198_v1 = vlaneseq (!%p162_p2)  ;;  %v8971_v2 = vmov (!%p162_p2), 0   ;;  %v4634_v4 = vld [vmem:[%s8954_s1 + $0x10] sm:$0xff] (!%p162_p2)  ;;  %s6217_s25 = smov (!%p162_p2), 2   ;;  %v4635_v13 = vld [vmem:[%s8954_s1 + $0x18] sm:$0xff] (!%p162_p2) }
   0x6   : > { %165 = sbr.rel (%p162_p2) target bundleno = 3799 (0xed7), region = 36  ;;  %6091 = vset.pattern.permute.xlu0 (!%p162_p2), %v8971_v2  ;;  %6092 = vset.pattern.permute.xlu1 (!%p162_p2), %v8971_v2  ;;  %v4636_v17 = vld [vmem:[%s8954_s1 + $0x20] sm:$0xff] (!%p162_p2)  ;;  %vm8958_vm0 = vcmask (!%p162_p2), 15360   ;;  %s6218_s6 = smov (!%p162_p2), 127  }
   0x7   : > { %380 = vperm.xlu0 (!%p162_p2), %6091, %v4633_v0   ;;  %v6269_v3 = vshrl.u32 (!%p162_p2), %v198_v1, 7  ;;  %v305_v21 = vld [vmem:[%s8954_s1] sm:$0xff] (!%p162_p2)  ;;  %s6219_s7 = smov (!%p162_p2), 126   ;;  %s6220_s8 = smov (!%p162_p2), 125  }
   0x8   : > { %s6221_s9 = smov (!%p162_p2), 124   ;;  %s6223_s10 = smov (!%p162_p2), 122  }
   0x9   : > { %v216_v5 = vsub.s32 (!%p162_p2), 4, %v6269_v3  ;;  %v208_v6 = vsub.s32 (!%p162_p2), 2, %v6269_v3  ;;  %v212_v7 = vsub.s32 (!%p162_p2), 3, %v6269_v3  ;;  %v220_v12 = vsub.s32 (!%p162_p2), 5, %v6269_v3  ;;  %s6224_s11 = smov (!%p162_p2), 120  }
   0xa   : > { %v204_v15 = vsub.s32 (!%p162_p2), 1, %v6269_v3  ;;  %v228_v16 = vsub.s32 (!%p162_p2), 7, %v6269_v3  ;;  %v224_v20 = vsub.s32 (!%p162_p2), 6, %v6269_v3  ;;  %v6322_v24 = vsub.s32 (!%p162_p2), 0, %v6269_v3 }
   0xb   : > { %478 = vperm.xlu0 (!%p162_p2), %6091, %v4634_v4  }
   0xd   : > { %s9184_s16 = smov (!%p185_p3, %s4627_s16), 1 }
   0xe   : > { %s6070_s21 = smul.u32 13, %s9184_s16 }
  0x10   : > { %s6280_s24 = scalar_lea.vmem %s8953_s0, %s6070_s21 }
  0x11   : > { %v6284_v8 = vld [vmem:[%s6280_s24] sm:$0xff]  ;;  %v6393_v56 = vld [vmem:[%s6280_s24 + $0x8] sm:$0x1f] }
  0x12   : > { %v217_v9 = vrot.slane %v6284_v8, %v216_v5  ;;  %v209_v10 = vrot.slane %v6284_v8, %v208_v6  ;;  %v213_v11 = vrot.slane %v6284_v8, %v212_v7  ;;  %v221_v14 = vrot.slane %v6284_v8, %v220_v12 }
  0x13   : > { %v205_v18 = vrot.slane %v6284_v8, %v204_v15  ;;  %v229_v19 = vrot.slane %v6284_v8, %v228_v16  ;;  %v225_v22 = vrot.slane %v6284_v8, %v224_v20  ;;  %v233_v61 = vrot.slane %v6393_v56, %v6322_v24 }
  0x14   : > { %258 = vrot.lane.b32.xlu0 %v217_v9, %s6217_s25  ;;  %254 = vrot.lane.b32.xlu1 %v209_v10, %s6217_s25  ;;  %v237_v4 = vrot.slane %v6393_v56, %v204_v15  ;;  %v1243_v20 = vand.u32 127, %v198_v1  ;;  %v6222_v1 = vmov 1.0|1.0  }
  0x18   : > { %576 = vperm.xlu0 %6091, %v4635_v13   ;;  %256 = vrot.lane.b32.xlu1 %v213_v11, %s6217_s25 }
  0x1c   : > { %674 = vperm.xlu0 %6091, %v4636_v17   ;;  %260 = vrot.lane.b32.xlu1 %v221_v14, %s6217_s25 }
  0x20   : > { %252 = vrot.lane.b32.xlu1 %v205_v18, %s6217_s25  ;;  %264 = vrot.lane.b32.xlu0 %v229_v19, %s6217_s25  ;;  %v1074_v18 = vadd.s32 256, %v6269_v3  ;;  %v1075_v19 = vadd.s32 264, %v6269_v3 }
  0x24   : > { %308 = vperm.xlu1 %6092, %v305_v21   ;;  %v1244_v21 = vadd.s32 128, %v1243_v20 }
  0x28   : > { %262 = vrot.lane.b32.xlu1 %v225_v22, %s6217_s25  ;;  %v6449_v22 = vmul.u32 10, %v1243_v20 }
  0x2a   : > { %vm1311_vm1 = vcmp.eq.s32.totalorder %v1074_v18, %v6449_v22  ;;  %vm1313_vm2 = vcmp.eq.s32.totalorder %v1075_v19, %v6449_v22 }
  0x2b   : > { %vm5676_vm5 = vmpackc.low %vm1313_vm2, %vm1311_vm1 }
  0x86   : > { %v255_v23 = vpop.permute.xlu1 %254  ;;  %v6325_v27 = vpop.permute.xlu0 %380 }
  0x8a   : > { %v257_v25 = vpop.permute.xlu1 %256  ;;  %v6332_v31 = vpop.permute.xlu0 %478 }
  0x8b   : > { %v279_v26 = vsel %vm8958_vm0, %v255_v23, %v257_v25 }
  0x8c   : > { %v6328_v28 = vrot.slane %v279_v26, %v6322_v24  ;;  %v1078_v26 = vadd.s32 288, %v6269_v3 }
  0x8e   : > { %v261_v29 = vpop.permute.xlu1 %260  ;;  %v386_v30 = vmul.f32 %v6325_v27, %v6328_v28  ;;  %v259_v33 = vpop.permute.xlu0 %258  ;;  %v484_v42 = vmul.f32 %v6332_v31, %v6328_v28  ;;  %vm1319_vm1 = vcmp.eq.s32.totalorder %v1078_v26, %v6449_v22 }
  0x8f   : > { %v280_v35 = vsel %vm8958_vm0, %v257_v25, %v259_v33  ;;  %v281_v36 = vsel %vm8958_vm0, %v259_v33, %v261_v29  ;;  %v1077_v25 = vadd.s32 280, %v6269_v3  ;;  %v1080_v33 = vadd.s32 304, %v6269_v3 }
  0x90   : > { %415 = vrot.lane.b32.xlu0 %v386_v30, %s6218_s6  ;;  %v6342_v37 = vrot.slane %v280_v35, %v6322_v24  ;;  %v6345_v38 = vrot.slane %v281_v36, %v6322_v24  ;;  %v1079_v30 = vadd.s32 296, %v6269_v3  ;;  %v1082_v35 = vadd.s32 320, %v6269_v3 }
  0x91   : > { %vm1317_vm10 = vcmp.eq.s32.totalorder %v1077_v25, %v6449_v22  ;;  %v1083_v36 = vadd.s32 328, %v6269_v3 }
  0x92   : > { %v6335_v32 = vpop.permute.xlu1 %252  ;;  %v388_v40 = vmul.f32 %v6325_v27, %v6345_v38  ;;  %v387_v41 = vmul.f32 %v6325_v27, %v6342_v37  ;;  %v486_v44 = vmul.f32 %v6332_v31, %v6345_v38  ;;  %v485_v45 = vmul.f32 %v6332_v31, %v6342_v37 }
  0x93   : > { %v278_v34 = vsel %vm8958_vm0, %v6335_v32, %v255_v23  ;;  %v1076_v23 = vadd.s32 272, %v6269_v3  ;;  %vm1321_vm2 = vcmp.eq.s32.totalorder %v1079_v30, %v6449_v22 }
  0x94   : > { %v6348_v39 = vrot.slane %v278_v34, %v6322_v24  ;;  %419 = vrot.lane.b32.xlu0 %v388_v40, %s6218_s6  ;;  %417 = vrot.lane.b32.xlu1 %v387_v41, %s6218_s6  ;;  %v1081_v34 = vadd.s32 312, %v6269_v3  ;;  %v1084_v40 = vadd.s32 336, %v6269_v3  ;;  %v1085_v41 = vadd.s32 344, %v6269_v3 }
  0x95   : > { %vm1315_vm9 = vcmp.eq.s32.totalorder %v1076_v23, %v6449_v22 }
  0x96   : > { %v385_v43 = vmul.f32 %v6325_v27, %v6348_v39  ;;  %v483_v48 = vmul.f32 %v6332_v31, %v6348_v39  ;;  %vm5680_vm14 = vmpackc.low %vm1317_vm10, %vm1315_vm9 }
  0x97   : > { %v6366_v46 = vpop.permute.xlu0 %576 }
  0x98   : > { %513 = vrot.lane.b32.xlu0 %v484_v42, %s6219_s7  ;;  %413 = vrot.lane.b32.xlu1 %v385_v43, %s6218_s6  ;;  %v582_v47 = vmul.f32 %v6366_v46, %v6328_v28  ;;  %v584_v50 = vmul.f32 %v6366_v46, %v6345_v38  ;;  %v583_v51 = vmul.f32 %v6366_v46, %v6342_v37  ;;  %v1086_v42 = vadd.s32 352, %v6269_v3 }
  0x99   : > { %v581_v54 = vmul.f32 %v6366_v46, %v6348_v39  ;;  %v1087_v43 = vadd.s32 360, %v6269_v3 }
  0x9b   : > { %v6382_v52 = vpop.permute.xlu0 %674 }
  0x9c   : > { %517 = vrot.lane.b32.xlu0 %v486_v44, %s6219_s7  ;;  %515 = vrot.lane.b32.xlu1 %v485_v45, %s6219_s7  ;;  %v680_v53 = vmul.f32 %v6382_v52, %v6328_v28  ;;  %v682_v57 = vmul.f32 %v6382_v52, %v6345_v38  ;;  %v681_v58 = vmul.f32 %v6382_v52, %v6342_v37  ;;  %v1088_v44 = vadd.s32 368, %v6269_v3 }
  0x9d   : > { %v679_v63 = vmul.f32 %v6382_v52, %v6348_v39  ;;  %v1089_v45 = vadd.s32 376, %v6269_v3 }
  0x9f   : > { %v6400_v60 = vpop.permute.xlu0 %264 }
  0xa0   : > { %611 = vrot.lane.b32.xlu0 %v582_v47, %s6220_s8  ;;  %511 = vrot.lane.b32.xlu1 %v483_v48, %s6219_s7  ;;  %v1090_v47 = vadd.s32 384, %v6269_v3  ;;  %v1091_v48 = vadd.s32 392, %v6269_v3 }
  0xa3   : > { %v6376_v49 = vpop.permute.xlu1 %308 }
  0xa4   : > { %615 = vrot.lane.b32.xlu0 %v584_v50, %s6220_s8  ;;  %613 = vrot.lane.b32.xlu1 %v583_v51, %s6220_s8  ;;  %v1092_v50 = vadd.s32 400, %v6269_v3  ;;  %v1093_v51 = vadd.s32 408, %v6269_v3  ;;  %v367_v20 = vmul.f32 %v6342_v37, %v6376_v49 }
  0xa7   : > { %v263_v55 = vpop.permute.xlu1 %262 }
  0xa8   : > { %709 = vrot.lane.b32.xlu0 %v680_v53, %s6221_s9  ;;  %609 = vrot.lane.b32.xlu1 %v581_v54, %s6220_s8  ;;  %v282_v59 = vsel %vm8958_vm0, %v261_v29, %v263_v55  ;;  %v283_v0 = vsel %vm8958_vm0, %v263_v55, %v6400_v60  ;;  %v6454_v29 = vmul.u32 10, %v1244_v21  ;;  %v1094_v53 = vadd.s32 416, %v6269_v3 }
  0xa9   : > { %v6407_v62 = vrot.slane %v282_v59, %v6322_v24  ;;  %v6419_v9 = vrot.slane %v283_v0, %v6322_v24  ;;  %v1095_v54 = vadd.s32 424, %v6269_v3  ;;  %v1096_v55 = vadd.s32 432, %v6269_v3 }
  0xaa   : > { %vm1312_vm3 = vcmp.eq.s32.totalorder %v1074_v18, %v6454_v29  ;;  %vm1314_vm4 = vcmp.eq.s32.totalorder %v1075_v19, %v6454_v29  ;;  %vm1316_vm6 = vcmp.eq.s32.totalorder %v1076_v23, %v6454_v29  ;;  %vm1318_vm7 = vcmp.eq.s32.totalorder %v1077_v25, %v6454_v29 }
  0xab   : > { %v389_v10 = vmul.f32 %v6325_v27, %v6407_v62  ;;  %v390_v11 = vmul.f32 %v6325_v27, %v6419_v9  ;;  %v487_v12 = vmul.f32 %v6332_v31, %v6407_v62  ;;  %v488_v13 = vmul.f32 %v6332_v31, %v6419_v9  ;;  %vm5674_vm8 = vmpackc.low %vm1314_vm4, %vm1312_vm3 }
  0xac   : > { %713 = vrot.lane.b32.xlu0 %v682_v57, %s6221_s9  ;;  %711 = vrot.lane.b32.xlu1 %v681_v58, %s6221_s9  ;;  %v586_v14 = vmul.f32 %v6366_v46, %v6419_v9  ;;  %v585_v15 = vmul.f32 %v6366_v46, %v6407_v62  ;;  %v684_v16 = vmul.f32 %v6382_v52, %v6419_v9  ;;  %vm5678_vm11 = vmpackc.low %vm1318_vm7, %vm1316_vm6  ;;  %v1097_v57 = vadd.s32 440, %v6269_v3 }
  0xad   : > { %v683_v17 = vmul.f32 %v6382_v52, %v6407_v62  ;;  %5675 = vmatprep.subr.msk.bf16.mxu0 %vm5674_vm8, %v6222_v1  ;;  %vm1320_vm12 = vcmp.eq.s32.totalorder %v1078_v26, %v6454_v29  ;;  %vm1322_vm13 = vcmp.eq.s32.totalorder %v1079_v30, %v6454_v29  ;;  %vm1324_vm3 = vcmp.eq.s32.totalorder %v1080_v33, %v6454_v29 }
  0xae   : > { %5677 = vmatpush1.bf16.msk.msra.mxu0 %vm5676_vm5, %v6222_v1  ;;  %vm5682_vm15 = vmpackc.low %vm1322_vm13, %vm1320_vm12  ;;  %vm1326_vm4 = vcmp.eq.s32.totalorder %v1081_v34, %v6454_v29  ;;  %vm1323_vm7 = vcmp.eq.s32.totalorder %v1080_v33, %v6449_v22  ;;  %vm1325_vm8 = vcmp.eq.s32.totalorder %v1081_v34, %v6449_v22  ;;  %vm1328_vm9 = vcmp.eq.s32.totalorder %v1082_v35, %v6454_v29 }
  0xaf   : > { %5679 = vmatprep.subr.msk.bf16.mxu0 %vm5678_vm11, %v6222_v1  ;;  %vm5684_vm5 = vmpackc.low %vm1321_vm2, %vm1319_vm1  ;;  %vm1330_vm10 = vcmp.eq.s32.totalorder %v1083_v36, %v6454_v29  ;;  %vm1327_vm13 = vcmp.eq.s32.totalorder %v1082_v35, %v6449_v22  ;;  %vm1334_vm1 = vcmp.eq.s32.totalorder %v1085_v41, %v6454_v29  ;;  %v366_v18 = vmul.f32 %v6328_v28, %v6376_v49 }
  0xb0   : > { %266 = vrot.lane.b32.xlu0 %v233_v61, %s6217_s25  ;;  %707 = vrot.lane.b32.xlu1 %v679_v63, %s6221_s9  ;;  %vm5686_vm6 = vmpackc.low %vm1326_vm4, %vm1324_vm3  ;;  %vm1331_vm4 = vcmp.eq.s32.totalorder %v1084_v40, %v6449_v22  ;;  %v1100_v33 = vadd.s32 464, %v6269_v3  ;;  %v1101_v34 = vadd.s32 472, %v6269_v3  ;;  %v365_v35 = vmul.f32 %v6348_v39, %v6376_v49 }
  0xb1   : > { %vm5688_vm11 = vmpackc.low %vm1325_vm8, %vm1323_vm7  ;;  %vm1338_vm7 = vcmp.eq.s32.totalorder %v1087_v43, %v6454_v29 }
  0xb2   : > { %5681 = vmatpush1.bf16.msk.msra.mxu0 %vm5680_vm14, %v6222_v1  ;;  %vm5690_vm12 = vmpackc.low %vm1330_vm10, %vm1328_vm9  ;;  %vm1329_vm14 = vcmp.eq.s32.totalorder %v1083_v36, %v6449_v22  ;;  %vm1335_vm10 = vcmp.eq.s32.totalorder %v1086_v42, %v6449_v22 }
  0xb3   : > { %5683 = vmatprep.subr.msk.bf16.mxu0 %vm5682_vm15, %v6222_v1  ;;  %vm1332_vm15 = vcmp.eq.s32.totalorder %v1084_v40, %v6454_v29  ;;  %vm5692_vm2 = vmpackc.low %vm1329_vm14, %vm1327_vm13  ;;  %vm1342_vm13 = vcmp.eq.s32.totalorder %v1089_v45, %v6454_v29 }
  0xb4   : > { %268 = vrot.lane.b32.xlu1 %v237_v4, %s6217_s25  ;;  %421 = vrot.lane.b32.xlu0 %v389_v10, %s6218_s6  ;;  %vm5694_vm3 = vmpackc.low %vm1334_vm1, %vm1332_vm15  ;;  %vm1339_vm1 = vcmp.eq.s32.totalorder %v1088_v44, %v6449_v22 }
  0xb6   : > { %5685 = vmatpush1.bf16.msk.msra.mxu0 %vm5684_vm5, %v6222_v1  ;;  %vm1333_vm5 = vcmp.eq.s32.totalorder %v1085_v41, %v6449_v22 }
  0xb7   : > { %5687 = vmatprep.subr.msk.bf16.mxu0 %vm5686_vm6, %v6222_v1  ;;  %vm1336_vm6 = vcmp.eq.s32.totalorder %v1086_v42, %v6454_v29  ;;  %vm5696_vm8 = vmpackc.low %vm1333_vm5, %vm1331_vm4  ;;  %vm1346_vm4 = vcmp.eq.s32.totalorder %v1091_v48, %v6454_v29 }
  0xb8   : > { %423 = vrot.lane.b32.xlu1 %v390_v11, %s6218_s6  ;;  %519 = vrot.lane.b32.xlu0 %v487_v12, %s6219_s7  ;;  %vm5698_vm9 = vmpackc.low %vm1338_vm7, %vm1336_vm6  ;;  %vm1343_vm7 = vcmp.eq.s32.totalorder %v1090_v47, %v6449_v22 }
  0xba   : > { %5689 = vmatpush1.bf16.msk.msra.mxu0 %vm5688_vm11, %v6222_v1  ;;  %vm1337_vm11 = vcmp.eq.s32.totalorder %v1087_v43, %v6449_v22 }
  0xbb   : > { %5691 = vmatprep.subr.msk.bf16.mxu0 %vm5690_vm12, %v6222_v1  ;;  %vm1340_vm12 = vcmp.eq.s32.totalorder %v1088_v44, %v6454_v29  ;;  %vm5700_vm14 = vmpackc.low %vm1337_vm11, %vm1335_vm10  ;;  %vm1350_vm10 = vcmp.eq.s32.totalorder %v1093_v51, %v6454_v29 }
  0xbc   : > { %521 = vrot.lane.b32.xlu1 %v488_v13, %s6219_s7  ;;  %619 = vrot.lane.b32.xlu0 %v586_v14, %s6220_s8  ;;  %vm5702_vm15 = vmpackc.low %vm1342_vm13, %vm1340_vm12  ;;  %vm1347_vm13 = vcmp.eq.s32.totalorder %v1092_v50, %v6449_v22 }
  0xbe   : > { %5693 = vmatpush1.bf16.msk.msra.mxu0 %vm5692_vm2, %v6222_v1  ;;  %vm1341_vm2 = vcmp.eq.s32.totalorder %v1089_v45, %v6449_v22 }
  0xbf   : > { %5695 = vmatprep.subr.msk.bf16.mxu0 %vm5694_vm3, %v6222_v1  ;;  %vm1344_vm3 = vcmp.eq.s32.totalorder %v1090_v47, %v6454_v29  ;;  %vm5704_vm5 = vmpackc.low %vm1341_vm2, %vm1339_vm1  ;;  %vm1354_vm1 = vcmp.eq.s32.totalorder %v1095_v54, %v6454_v29 }
  0xc0   : > { %617 = vrot.lane.b32.xlu1 %v585_v15, %s6220_s8  ;;  %717 = vrot.lane.b32.xlu0 %v684_v16, %s6221_s9  ;;  %vm5706_vm6 = vmpackc.low %vm1346_vm4, %vm1344_vm3  ;;  %vm1351_vm4 = vcmp.eq.s32.totalorder %v1094_v53, %v6449_v22  ;;  %v1098_v16 = vadd.s32 448, %v6269_v3 }
  0xc2   : > { %5697 = vmatpush1.bf16.msk.msra.mxu0 %vm5696_vm8, %v6222_v1  ;;  %vm1345_vm8 = vcmp.eq.s32.totalorder %v1091_v48, %v6449_v22 }
  0xc3   : > { %5699 = vmatprep.subr.msk.bf16.mxu0 %vm5698_vm9, %v6222_v1  ;;  %vm1348_vm9 = vcmp.eq.s32.totalorder %v1092_v50, %v6454_v29  ;;  %vm5708_vm11 = vmpackc.low %vm1345_vm8, %vm1343_vm7  ;;  %vm1358_vm7 = vcmp.eq.s32.totalorder %v1097_v57, %v6454_v29  ;;  %v1102_v50 = vadd.s32 480, %v6269_v3 }
  0xc4   : > { %715 = vrot.lane.b32.xlu1 %v683_v17, %s6221_s9  ;;  %vm5710_vm12 = vmpackc.low %vm1350_vm10, %vm1348_vm9  ;;  %vm1355_vm10 = vcmp.eq.s32.totalorder %v1096_v55, %v6449_v22  ;;  %v1099_v17 = vadd.s32 456, %v6269_v3 }
  0xc6   : > { %5701 = vmatpush1.bf16.msk.msra.mxu0 %vm5700_vm14, %v6222_v1  ;;  %vm1349_vm14 = vcmp.eq.s32.totalorder %v1093_v51, %v6449_v22  ;;  %v1103_v51 = vadd.s32 488, %v6269_v3 }
  0xc7   : > { %5703 = vmatprep.subr.msk.bf16.mxu0 %vm5702_vm15, %v6222_v1  ;;  %vm1352_vm15 = vcmp.eq.s32.totalorder %v1094_v53, %v6454_v29  ;;  %vm5712_vm2 = vmpackc.low %vm1349_vm14, %vm1347_vm13  ;;  %vm8960_vm13 = vcmask 1039360   ;;  %vm8964_vm14 = vcmask 1031168  }
  0xc8   : > { %vm5714_vm3 = vmpackc.low %vm1354_vm1, %vm1352_vm15  ;;  %vm8962_vm15 = vcmask 1022976   ;;  %vm8963_vm1 = vcmask 1014784  }
  0xca   : > { %5705 = vmatpush1.bf16.msk.msra.mxu0 %vm5704_vm5, %v6222_v1  ;;  %vm1353_vm5 = vcmp.eq.s32.totalorder %v1095_v54, %v6449_v22 }
  0xcb   : > { %5707 = vmatprep.subr.msk.bf16.mxu0 %vm5706_vm6, %v6222_v1  ;;  %vm1356_vm6 = vcmp.eq.s32.totalorder %v1096_v55, %v6454_v29  ;;  %vm5716_vm8 = vmpackc.low %vm1353_vm5, %vm1351_vm4  ;;  %vm1359_vm5 = vcmp.eq.s32.totalorder %v1098_v16, %v6449_v22 }
  0xcc   : > { %vm5718_vm9 = vmpackc.low %vm1358_vm7, %vm1356_vm6  ;;  %vm1361_vm6 = vcmp.eq.s32.totalorder %v1099_v17, %v6449_v22 }
  0xcd   : > { %vm5724_vm7 = vmpackc.low %vm1361_vm6, %vm1359_vm5  ;;  %vm1367_vm6 = vcmp.eq.s32.totalorder %v1102_v50, %v6449_v22 }
  0xce   : > { %5709 = vmatpush1.bf16.msk.msra.mxu0 %vm5708_vm11, %v6222_v1  ;;  %vm1357_vm11 = vcmp.eq.s32.totalorder %v1097_v57, %v6449_v22 }
  0xcf   : > { %5711 = vmatprep.subr.msk.bf16.mxu0 %vm5710_vm12, %v6222_v1  ;;  %vm5720_vm12 = vmpackc.low %vm1357_vm11, %vm1355_vm10  ;;  %vm1363_vm11 = vcmp.eq.s32.totalorder %v1100_v33, %v6449_v22 }
  0xd2   : > { %5713 = vmatpush1.bf16.msk.msra.mxu0 %vm5712_vm2, %v6222_v1  ;;  %vm1360_vm2 = vcmp.eq.s32.totalorder %v1098_v16, %v6454_v29  ;;  %v1105_v16 = vadd.s32 504, %v6269_v3 }
  0xd3   : > { %5715 = vmatprep.subr.msk.bf16.mxu0 %vm5714_vm3, %v6222_v1  ;;  %vm1362_vm3 = vcmp.eq.s32.totalorder %v1099_v17, %v6454_v29 }
  0xd4   : > { %vm5722_vm4 = vmpackc.low %vm1362_vm3, %vm1360_vm2  ;;  %vm1368_vm3 = vcmp.eq.s32.totalorder %v1102_v50, %v6454_v29 }
  0xd6   : > { %5717 = vmatpush1.bf16.msk.msra.mxu0 %vm5716_vm8, %v6222_v1  ;;  %vm1364_vm8 = vcmp.eq.s32.totalorder %v1100_v33, %v6454_v29 }
  0xd7   : > { %5719 = vmatprep.subr.msk.bf16.mxu0 %vm5718_vm9, %v6222_v1  ;;  %vm1366_vm9 = vcmp.eq.s32.totalorder %v1101_v34, %v6454_v29 }
  0xd8   : > { %vm5726_vm10 = vmpackc.low %vm1366_vm9, %vm1364_vm8 }
  0xda   : > { %5721 = vmatpush1.bf16.msk.msra.mxu0 %vm5720_vm12, %v6222_v1  ;;  %vm1365_vm12 = vcmp.eq.s32.totalorder %v1101_v34, %v6449_v22 }
  0xdb   : > { %5723 = vmatprep.subr.msk.bf16.mxu0 %vm5722_vm4, %v6222_v1  ;;  %vm5728_vm2 = vmpackc.low %vm1365_vm12, %vm1363_vm11  ;;  %vm1370_vm4 = vcmp.eq.s32.totalorder %v1103_v51, %v6454_v29  ;;  %vm1373_vm12 = vcmp.eq.s32.totalorder %v1105_v16, %v6449_v22 }
  0xdc   : > { %vm5730_vm5 = vmpackc.low %vm1370_vm4, %vm1368_vm3 }
  0xde   : > { %5725 = vmatpush1.bf16.msk.msra.mxu0 %vm5724_vm7, %v6222_v1  ;;  %vm1369_vm7 = vcmp.eq.s32.totalorder %v1103_v51, %v6449_v22 }
  0xdf   : > { %5727 = vmatprep.subr.msk.bf16.mxu0 %vm5726_vm10, %v6222_v1  ;;  %vm5732_vm8 = vmpackc.low %vm1369_vm7, %vm1367_vm6  ;;  %vm1374_vm10 = vcmp.eq.s32.totalorder %v1105_v16, %v6454_v29 }
  0xe2   : > { %5729 = vmatpush1.bf16.msk.msra.mxu0 %vm5728_vm2, %v6222_v1 }
  0xe3   : > { %5731 = vmatprep.subr.msk.bf16.mxu0 %vm5730_vm5, %v6222_v1 }
  0xe6   : > { %5733 = vmatpush1.bf16.msk.msra.mxu0 %vm5732_vm8, %v6222_v1 }
 0x102   : > { %v416_v58 = vpop.permute.xlu0 %415 }
 0x106   : > { %v6546_v59 = vpop.permute.xlu0 %419  ;;  %v418_v61 = vpop.permute.xlu1 %417 }
 0x107   : > { %v439_v13 = vsel %vm8960_vm13, %v416_v58, %v418_v61  ;;  %v440_v19 = vsel %vm8960_vm13, %v418_v61, %v6546_v59 }
 0x108   : > { %v464_v23 = vadd.f32 %v439_v13, %v366_v18  ;;  %v465_v28 = vadd.f32 %v440_v19, %v367_v20  ;;  %v1106_v20 = vadd.s32 512, %v6269_v3 }
 0x10a   : > { %v514_v63 = vpop.permute.xlu0 %513  ;;  %v6549_v0 = vpop.permute.xlu1 %413  ;;  %vm1376_vm4 = vcmp.eq.s32.totalorder %v1106_v20, %v6454_v29  ;;  %vm1375_vm6 = vcmp.eq.s32.totalorder %v1106_v20, %v6449_v22 }
 0x10b   : > { %v438_v26 = vsel %vm8960_vm13, %v6549_v0, %v416_v58 }
 0x10c   : > { %v463_v44 = vadd.f32 %v438_v26, %v365_v35 }
 0x10e   : > { %v6551_v4 = vpop.permute.xlu0 %517  ;;  %v516_v10 = vpop.permute.xlu1 %515 }
 0x10f   : > { %v537_v21 = vsel %vm8964_vm14, %v514_v63, %v516_v10  ;;  %v538_v25 = vsel %vm8964_vm14, %v516_v10, %v6551_v4 }
 0x110   : > { %v562_v36 = vadd.f32 %v537_v21, %v464_v23  ;;  %v563_v42 = vadd.f32 %v538_v25, %v465_v28  ;;  %v1107_v21 = vadd.s32 520, %v6269_v3  ;;  %v6825_v28 = vadd.s32 592, %v6269_v3 }
 0x112   : > { %v612_v11 = vpop.permute.xlu0 %611  ;;  %v6553_v12 = vpop.permute.xlu1 %511  ;;  %vm1378_vm5 = vcmp.eq.s32.totalorder %v1107_v21, %v6454_v29  ;;  %vm1377_vm7 = vcmp.eq.s32.totalorder %v1107_v21, %v6449_v22 }
 0x113   : > { %v536_v43 = vsel %vm8964_vm14, %v6553_v12, %v514_v63  ;;  %vm5738_vm8 = vmpackc.low %vm1378_vm5, %vm1376_vm4 }
 0x114   : > { %v561_v53 = vadd.f32 %v536_v43, %v463_v44  ;;  %v245_v43 = vrot.slane %v6393_v56, %v212_v7 }
 0x116   : > { %v6556_v14 = vpop.permute.xlu0 %615  ;;  %v614_v15 = vpop.permute.xlu1 %613 }
 0x117   : > { %v635_v40 = vsel %vm8962_vm15, %v612_v11, %v614_v15  ;;  %v636_v41 = vsel %vm8962_vm15, %v614_v15, %v6556_v14  ;;  %v1104_v15 = vadd.s32 496, %v6269_v3 }
 0x118   : > { %v660_v39 = vadd.f32 %v635_v40, %v562_v36  ;;  %v661_v45 = vadd.f32 %v636_v41, %v563_v42  ;;  %v241_v41 = vrot.slane %v6393_v56, %v208_v6  ;;  %v368_v6 = vmul.f32 %v6345_v38, %v6376_v49 }
 0x119   : > { %vm1372_vm9 = vcmp.eq.s32.totalorder %v1104_v15, %v6454_v29  ;;  %vm1371_vm11 = vcmp.eq.s32.totalorder %v1104_v15, %v6449_v22 }
 0x11a   : > { %v710_v37 = vpop.permute.xlu0 %709  ;;  %v6575_v30 = vpop.permute.xlu1 %609  ;;  %vm5734_vm2 = vmpackc.low %vm1374_vm10, %vm1372_vm9  ;;  %vm8961_vm10 = vcmask 998400  }
 0x11b   : > { %v634_v54 = vsel %vm8962_vm15, %v6575_v30, %v612_v11  ;;  %5735 = vmatprep.subr.msk.bf16.mxu0 %vm5734_vm2, %v6222_v1  ;;  %vm5736_vm3 = vmpackc.low %vm1373_vm12, %vm1371_vm11  ;;  %vm8959_vm11 = vcmask 982016  }
 0x11c   : > { %v659_v63 = vadd.f32 %v634_v54, %v561_v53  ;;  %5737 = vmatpush1.bf16.msk.msra.mxu0 %vm5736_vm3, %v6222_v1  ;;  %vm6648_vm9 = vmpackc.low %vm1377_vm7, %vm1375_vm6 }
 0x11d   : > { %5739 = vmatprep.subr.msk.bf16.mxu0 %vm5738_vm8, %v6222_v1 }
 0x11e   : > { %v6592_v47 = vpop.permute.xlu0 %713  ;;  %v712_v48 = vpop.permute.xlu1 %711 }
 0x11f   : > { %v733_v55 = vsel %vm8963_vm1, %v710_v37, %v712_v48  ;;  %v734_v57 = vsel %vm8963_vm1, %v712_v48, %v6592_v47  ;;  %v369_v48 = vmul.f32 %v6407_v62, %v6376_v49 }
 0x120   : > { %v6603_v58 = vadd.f32 %v733_v55, %v660_v39  ;;  %v6605_v61 = vadd.f32 %v734_v57, %v661_v45 }
 0x122   : > { %v6611_v10 = vpop.permute.xlu1 %707  ;;  %v6093_v11 = vpack.i.bf16 %v6605_v61, %v6603_v58  ;;  %v267_v18 = vpop.permute.xlu0 %266 }
 0x123   : > { %v732_v13 = vsel %vm8963_vm1, %v6611_v10, %v710_v37  ;;  %v284_v25 = vsel %vm8958_vm0, %v6400_v60, %v267_v18 }
 0x124   : > { %v6621_v17 = vadd.f32 %v732_v13, %v659_v63  ;;  %6094 = vrot.lane.b32.xlu0 %v6093_v11, %s6219_s7  ;;  %v6656_v33 = vrot.slane %v284_v25, %v6322_v24 }
 0x126   : > { %787 = vrot.lane.b32.xlu1 %v6621_v17, %s6219_s7  ;;  %v6630_v19 = vpop.permute.xlu1 %268  ;;  %v422_v26 = vpop.permute.xlu0 %421  ;;  %v391_v36 = vmul.f32 %v6325_v27, %v6656_v33  ;;  %v489_v7 = vmul.f32 %v6332_v31, %v6656_v33  ;;  %v685_v25 = vmul.f32 %v6382_v52, %v6656_v33 }
 0x127   : > { %v285_v37 = vsel %vm8958_vm0, %v267_v18, %v6630_v19  ;;  %v441_v39 = vsel %vm8960_vm13, %v6546_v59, %v422_v26  ;;  %v587_v18 = vmul.f32 %v6366_v46, %v6656_v33 }
 0x128   : > { %6099 = vrot.lane.b32.xlu0 %v6093_v11, %s6221_s9  ;;  %v6661_v60 = vrot.slane %v285_v37, %v6322_v24  ;;  %v466_v51 = vadd.f32 %v441_v39, %v368_v6  ;;  %v201_v37 = vrot.slane %v6284_v8, %v6322_v24 }
 0x12a   : > { %851 = vrot.lane.b32.xlu1 %v6621_v17, %s6221_s9  ;;  %v6643_v23 = vpop.permute.xlu1 %423  ;;  %v520_v35 = vpop.permute.xlu0 %519  ;;  %v392_v40 = vmul.f32 %v6325_v27, %v6661_v60  ;;  %v490_v38 = vmul.f32 %v6332_v31, %v6661_v60 }
 0x12b   : > { %v442_v45 = vsel %vm8960_vm13, %v422_v26, %v6643_v23  ;;  %v539_v50 = vsel %vm8964_vm14, %v6551_v4, %v520_v35 }
 0x12c   : > { %6104 = vrot.lane.b32.xlu0 %v6093_v11, %s6223_s10  ;;  %v467_v53 = vadd.f32 %v442_v45, %v369_v48  ;;  %v564_v57 = vadd.f32 %v539_v50, %v466_v51 }
 0x12e   : > { %915 = vrot.lane.b32.xlu1 %v6621_v17, %s6223_s10  ;;  %v6663_v34 = vpop.permute.xlu1 %521  ;;  %v6680_v44 = vpop.permute.xlu0 %619 }
 0x12f   : > { %v540_v59 = vsel %vm8964_vm14, %v520_v35, %v6663_v34  ;;  %v249_v35 = vrot.slane %v6393_v56, %v216_v5 }
 0x130   : > { %6109 = vrot.lane.b32.xlu0 %v6093_v11, %s6224_s11  ;;  %v565_v63 = vadd.f32 %v540_v59, %v467_v53  ;;  %v588_v11 = vmul.f32 %v6366_v46, %v6661_v60 }
 0x132   : > { %980 = vrot.lane.b32.xlu1 %v6621_v17, %s6224_s11  ;;  %v618_v42 = vpop.permute.xlu1 %617  ;;  %v6705_v4 = vpop.permute.xlu0 %717 }
 0x133   : > { %v637_v62 = vsel %vm8962_vm15, %v6556_v14, %v618_v42  ;;  %v638_v55 = vsel %vm8962_vm15, %v618_v42, %v6680_v44 }
 0x134   : > { %425 = vrot.lane.b32.xlu0 %v391_v36, %s6218_s6  ;;  %v662_v16 = vadd.f32 %v637_v62, %v564_v57  ;;  %v663_v14 = vadd.f32 %v638_v55, %v565_v63  ;;  %v1109_v62 = vadd.s32 536, %v6269_v3 }
 0x136   : > { %427 = vrot.lane.b32.xlu1 %v392_v40, %s6218_s6  ;;  %v716_v54 = vpop.permute.xlu1 %715  ;;  %vm1382_vm2 = vcmp.eq.s32.totalorder %v1109_v62, %v6454_v29  ;;  %vm1381_vm5 = vcmp.eq.s32.totalorder %v1109_v62, %v6449_v22  ;;  %v371_v62 = vmul.f32 %v6656_v33, %v6376_v49  ;;  %v6848_v33 = vadd.s32 608, %v6269_v3 }
 0x137   : > { %v735_v13 = vsel %vm8963_vm1, %v6592_v47, %v716_v54  ;;  %v736_v15 = vsel %vm8963_vm1, %v716_v54, %v6705_v4  ;;  %v686_v47 = vmul.f32 %v6382_v52, %v6661_v60 }
 0x138   : > { %270 = vrot.lane.b32.xlu0 %v241_v41, %s6217_s25  ;;  %v6717_v20 = vadd.f32 %v735_v13, %v662_v16  ;;  %v6719_v21 = vadd.f32 %v736_v15, %v663_v14 }
 0x13a   : > { %272 = vrot.lane.b32.xlu1 %v245_v43, %s6217_s25  ;;  %v6113_v26 = vpack.i.bf16 %v6719_v21, %v6717_v20 }
 0x13c   : > { %523 = vrot.lane.b32.xlu0 %v489_v7, %s6219_s7 }
 0x13e   : > { %525 = vrot.lane.b32.xlu1 %v490_v38, %s6219_s7  ;;  %v1108_v38 = vadd.s32 528, %v6269_v3 }
 0x140   : > { %623 = vrot.lane.b32.xlu0 %v588_v11, %s6220_s8  ;;  %vm1380_vm12 = vcmp.eq.s32.totalorder %v1108_v38, %v6454_v29  ;;  %vm1379_vm4 = vcmp.eq.s32.totalorder %v1108_v38, %v6449_v22 }
 0x141   : > { %vm5742_vm3 = vmpackc.low %vm1382_vm2, %vm1380_vm12 }
 0x142   : > { %621 = vrot.lane.b32.xlu1 %v587_v18, %s6220_s8  ;;  %vm5744_vm8 = vmpackc.low %vm1381_vm5, %vm1379_vm4 }
 0x144   : > { %719 = vrot.lane.b32.xlu0 %v685_v25, %s6221_s9 }
 0x146   : > { %721 = vrot.lane.b32.xlu1 %v686_v47, %s6221_s9  ;;  %v1110_v47 = vadd.s32 544, %v6269_v3 }
 0x148   : > { %6114 = vrot.lane.b32.xlu0 %v6113_v26, %s6219_s7  ;;  %vm1384_vm6 = vcmp.eq.s32.totalorder %v1110_v47, %v6454_v29 }
 0x14a   : > { %6119 = vrot.lane.b32.xlu1 %v6113_v26, %s6221_s9 }
 0x14c   : > { %6124 = vrot.lane.b32.xlu0 %v6113_v26, %s6223_s10 }
 0x14e   : > { %6129 = vrot.lane.b32.xlu1 %v6113_v26, %s6224_s11  ;;  %v1111_v26 = vadd.s32 552, %v6269_v3 }
 0x150   : > { %250 = vrot.lane.b32.xlu0 %v201_v37, %s6217_s25  ;;  %vm1386_vm7 = vcmp.eq.s32.totalorder %v1111_v26, %v6454_v29  ;;  %vm1385_vm2 = vcmp.eq.s32.totalorder %v1111_v26, %v6449_v22  ;;  %v6874_v26 = vadd.s32 616, %v6269_v3 }
 0x151   : > { %vm5746_vm12 = vmpackc.low %vm1386_vm7, %vm1384_vm6 }
 0x152   : > { %274 = vrot.lane.b32.xlu1 %v249_v35, %s6217_s25 }
 0x196   : > { %v6741_v36 = vpop.permute.xlu0 %6094 }
 0x197   : > { %v6097_v41 = vunpack.i.h.bf16 %v6741_v36  ;;  %v6096_v42 = vunpack.i.l.bf16 %v6741_v36 }
 0x198   : > { %v6743_v40 = vpop.permute.xlu1 %787 }
 0x199   : > { %v811_v5 = vsel %vm8964_vm14, %v6743_v40, %v6096_v42  ;;  %v812_v56 = vsel %vm8964_vm14, %v6096_v42, %v6097_v41 }
 0x19a   : > { %v6747_v43 = vpop.permute.xlu0 %6099  ;;  %v836_v51 = vmax.f32 %v6621_v17, %v811_v5  ;;  %v837_v54 = vmax.f32 %v6603_v58, %v812_v56  ;;  %v1112_v5 = vadd.s32 560, %v6269_v3  ;;  %v1113_v56 = vadd.s32 568, %v6269_v3 }
 0x19b   : > { %v6102_v8 = vunpack.i.h.bf16 %v6747_v43  ;;  %v6101_v39 = vunpack.i.l.bf16 %v6747_v43 }
 0x19c   : > { %v6751_v45 = vpop.permute.xlu1 %851  ;;  %vm1390_vm4 = vcmp.eq.s32.totalorder %v1113_v56, %v6454_v29  ;;  %vm1387_vm6 = vcmp.eq.s32.totalorder %v1112_v5, %v6449_v22  ;;  %vm1389_vm7 = vcmp.eq.s32.totalorder %v1113_v56, %v6449_v22  ;;  %v6916_v56 = vadd.s32 624, %v6269_v3 }
 0x19d   : > { %v875_v48 = vsel %vm8963_vm1, %v6751_v45, %v6101_v39  ;;  %v876_v59 = vsel %vm8963_vm1, %v6101_v39, %v6102_v8 }
 0x19e   : > { %v6758_v6 = vpop.permute.xlu0 %6104  ;;  %v900_v63 = vmax.f32 %v836_v51, %v875_v48  ;;  %v901_v17 = vmax.f32 %v837_v54, %v876_v59  ;;  %v6810_v51 = vadd.s32 576, %v6269_v3 }
 0x19f   : > { %v6107_v7 = vunpack.i.h.bf16 %v6758_v6  ;;  %v6106_v50 = vunpack.i.l.bf16 %v6758_v6 }
 0x1a0   : > { %v6768_v53 = vpop.permute.xlu1 %915 }
 0x1a1   : > { %v940_v55 = vsel %vm8961_vm10, %v6768_v53, %v6106_v50  ;;  %v941_v57 = vsel %vm8961_vm10, %v6106_v50, %v6107_v7  ;;  %v370_v50 = vmul.f32 %v6419_v9, %v6376_v49  ;;  %v1115_v9 = vadd.s32 584, %v6269_v3 }
 0x1a2   : > { %v6778_v11 = vpop.permute.xlu0 %6109  ;;  %v965_v15 = vmax.f32 %v900_v63, %v940_v55  ;;  %v966_v14 = vmax.f32 %v901_v17, %v941_v57  ;;  %v6836_v17 = vadd.s32 600, %v6269_v3  ;;  %vm1400_vm10 = vcmp.eq.s32.totalorder %v6848_v33, %v6454_v29 }
 0x1a3   : > { %v6112_v13 = vunpack.i.h.bf16 %v6778_v11  ;;  %v6111_v58 = vunpack.i.l.bf16 %v6778_v11 }
 0x1a4   : > { %v6782_v16 = vpop.permute.xlu1 %980 }
 0x1a5   : > { %v1005_v18 = vsel %vm8959_vm11, %v6782_v16, %v6111_v58  ;;  %v1006_v25 = vsel %vm8959_vm11, %v6111_v58, %v6112_v13  ;;  %vm1396_vm11 = vcmp.eq.s32.totalorder %v6825_v28, %v6454_v29 }
 0x1a6   : > { %v426_v37 = vpop.permute.xlu0 %425  ;;  %v1031_v35 = vmax.f32 %v966_v14, %v1006_v25  ;;  %v1030_v42 = vmax.f32 %v965_v15, %v1005_v18 }
 0x1a7   : > { %v443_v25 = vsel %vm8960_vm13, %v6643_v23, %v426_v37 }
 0x1a8   : > { %2591 = vmatprep.mubr.f32.mxu0 %v1031_v35  ;;  %v6793_v39 = vpop.permute.xlu1 %427 }
 0x1a9   : > { %2592 = vmatmul.mubr.f32.vlgmr.msra.gmra.mrb[0].mxu0 %v1030_v42 }
 0x1aa   : > { %5741 = vmatpush1.bf16.msk.msra.mxu0 %vm6648_vm9, %v6222_v1  ;;  %v271_v48 = vpop.permute.xlu0 %270  ;;  %vm1383_vm9 = vcmp.eq.s32.totalorder %v1110_v47, %v6449_v22  ;;  %v444_v47 = vsel %vm8960_vm13, %v426_v37, %v6793_v39  ;;  %vm1397_vm13 = vcmp.eq.s32.totalorder %v6836_v17, %v6449_v22 }
 0x1ab   : > { %v286_v59 = vsel %vm8958_vm0, %v6630_v19, %v271_v48  ;;  %5743 = vmatprep.subr.msk.bf16.mxu0 %vm5742_vm3, %v6222_v1  ;;  %vm1388_vm3 = vcmp.eq.s32.totalorder %v1112_v5, %v6454_v29  ;;  %vm6839_vm5 = vmpackc.low %vm1385_vm2, %vm1383_vm9  ;;  %vm1394_vm9 = vcmp.eq.s32.totalorder %v1115_v9, %v6454_v29  ;;  %vm1391_vm2 = vcmp.eq.s32.totalorder %v6810_v51, %v6449_v22 }
 0x1ac   : > { %v6813_v54 = vrot.slane %v286_v59, %v6322_v24  ;;  %v6815_v38 = vpop.permute.xlu1 %272  ;;  %v469_v59 = vadd.f32 %v444_v47, %v371_v62  ;;  %v6925_v62 = vadd.s32 632, %v6269_v3  ;;  %v6951_v47 = vadd.s32 648, %v6269_v3 }
 0x1ad   : > { %v287_v19 = vsel %vm8958_vm0, %v271_v48, %v6815_v38  ;;  %vm1393_vm0 = vcmp.eq.s32.totalorder %v1115_v9, %v6449_v22 }
 0x1ae   : > { %v6830_v55 = vrot.slane %v287_v19, %v6322_v24  ;;  %5745 = vmatpush1.bf16.msk.msra.mxu0 %vm5744_vm8, %v6222_v1  ;;  %v524_v57 = vpop.permute.xlu0 %523  ;;  %v393_v63 = vmul.f32 %v6325_v27, %v6813_v54  ;;  %vm1392_vm8 = vcmp.eq.s32.totalorder %v6810_v51, %v6454_v29  ;;  %v491_v23 = vmul.f32 %v6332_v31, %v6813_v54 }
 0x1af   : > { %5747 = vmatprep.subr.msk.bf16.mxu0 %vm5746_vm12, %v6222_v1  ;;  %vm6859_vm12 = vmpackc.low %vm1390_vm4, %vm1388_vm3  ;;  %vm1398_vm3 = vcmp.eq.s32.totalorder %v6836_v17, %v6454_v29  ;;  %vm1395_vm4 = vcmp.eq.s32.totalorder %v6825_v28, %v6449_v22  ;;  %v541_v37 = vsel %vm8964_vm14, %v6663_v34, %v524_v57  ;;  %v468_v34 = vadd.f32 %v443_v25, %v370_v50 }
 0x1b0   : > { %v6850_v15 = vpop.permute.xlu1 %525  ;;  %429 = vrot.lane.b32.xlu0 %v393_v63, %s6218_s6  ;;  %v394_v14 = vmul.f32 %v6325_v27, %v6830_v55  ;;  %v492_v5 = vmul.f32 %v6332_v31, %v6830_v55  ;;  %v6948_v25 = vadd.s32 640, %v6269_v3  ;;  %v589_v9 = vmul.f32 %v6366_v46, %v6813_v54 }
 0x1b1   : > { %v542_v42 = vsel %vm8964_vm14, %v524_v57, %v6850_v15  ;;  %v566_v63 = vadd.f32 %v541_v37, %v468_v34  ;;  %v688_v28 = vmul.f32 %v6382_v52, %v6830_v55 }
 0x1b2   : > { %5749 = vmatpush1.bf16.msk.msra.mxu0 %vm6839_vm5, %v6222_v1  ;;  %v6879_v35 = vpop.permute.xlu0 %623  ;;  %431 = vrot.lane.b32.xlu1 %v394_v14, %s6218_s6  ;;  %vm6899_vm5 = vmpackc.low %vm1389_vm7, %vm1387_vm6  ;;  %vm1402_vm7 = vcmp.eq.s32.totalorder %v6874_v26, %v6454_v29  ;;  %v567_v58 = vadd.f32 %v542_v42, %v469_v59 }
 0x1b3   : > { %5751 = vmatprep.subr.msk.bf16.mxu0 %vm6859_vm12, %v6222_v1  ;;  %vm5754_vm6 = vmpackc.low %vm1394_vm9, %vm1392_vm8  ;;  %vm1399_vm12 = vcmp.eq.s32.totalorder %v6848_v33, %v6449_v22  ;;  %vm1401_vm9 = vcmp.eq.s32.totalorder %v6874_v26, %v6449_v22 }
 0x1b4   : > { %v622_v19 = vpop.permute.xlu1 %621  ;;  %527 = vrot.lane.b32.xlu0 %v491_v23, %s6219_s7  ;;  %vm6939_vm8 = vmpackc.low %vm1393_vm0, %vm1391_vm2  ;;  %vm1404_vm2 = vcmp.eq.s32.totalorder %v6916_v56, %v6454_v29 }
 0x1b5   : > { %v639_v57 = vsel %vm8962_vm15, %v6680_v44, %v622_v19  ;;  %v640_v50 = vsel %vm8962_vm15, %v622_v19, %v6879_v35  ;;  %v590_v44 = vmul.f32 %v6366_v46, %v6830_v55  ;;  %vm5758_vm0 = vmpackc.low %vm1398_vm3, %vm1396_vm11  ;;  %vm1405_vm11 = vcmp.eq.s32.totalorder %v6925_v62, %v6449_v22 }
 0x1b6   : > { %5753 = vmatpush1.bf16.msk.msra.mxu0 %vm6899_vm5, %v6222_v1  ;;  %v720_v14 = vpop.permute.xlu0 %719  ;;  %529 = vrot.lane.b32.xlu1 %v492_v5, %s6219_s7  ;;  %v664_v23 = vadd.f32 %v639_v57, %v566_v63  ;;  %v665_v51 = vadd.f32 %v640_v50, %v567_v58  ;;  %vm1406_vm5 = vcmp.eq.s32.totalorder %v6925_v62, %v6454_v29  ;;  %vm6995_vm3 = vmpackc.low %vm1397_vm13, %vm1395_vm4  ;;  %v7025_v58 = vadd.s32 656, %v6269_v3 }
 0x1b7   : > { %5755 = vmatprep.subr.msk.bf16.mxu0 %vm5754_vm6, %v6222_v1  ;;  %v737_v42 = vsel %vm8963_vm1, %v6705_v4, %v720_v14  ;;  %vm1403_vm6 = vcmp.eq.s32.totalorder %v6916_v56, %v6449_v22  ;;  %v687_v4 = vmul.f32 %v6382_v52, %v6813_v54  ;;  %vm1410_vm15 = vcmp.eq.s32.totalorder %v6951_v47, %v6454_v29  ;;  %vm7016_vm13 = vmpackc.low %vm1402_vm7, %vm1400_vm10 }
 0x1b8   : > { %v6953_v37 = vpop.permute.xlu1 %721  ;;  %627 = vrot.lane.b32.xlu0 %v590_v44, %s6220_s8  ;;  %v7003_v50 = vadd.f32 %v737_v42, %v664_v23  ;;  %vm1407_vm4 = vcmp.eq.s32.totalorder %v6948_v25, %v6449_v22  ;;  %vm5764_vm10 = vmpackc.low %vm1401_vm9, %vm1399_vm12  ;;  %vm8993_vm9 = vcmask 982016   ;;  %v1126_v56 = vadd.s32 672, %v6269_v3 }
 0x1b9   : > { %v738_v48 = vsel %vm8963_vm1, %v720_v14, %v6953_v37  ;;  %vm5766_vm7 = vmpackc.low %vm1406_vm5, %vm1404_vm2  ;;  %vm8994_vm2 = vcmask 15360   ;;  %v1127_v62 = vadd.s32 680, %v6269_v3 }
 0x1ba   : > { %v6974_v34 = vadd.f32 %v738_v48, %v665_v51  ;;  %5757 = vmatpush1.bf16.msk.msra.mxu0 %vm6939_vm8, %v6222_v1  ;;  %v6979_v59 = vpop.permute.xlu0 %6114  ;;  %625 = vrot.lane.b32.xlu1 %v589_v9, %s6220_s8  ;;  %vm1408_vm8 = vcmp.eq.s32.totalorder %v6948_v25, %v6454_v29  ;;  %vm8995_vm5 = vmmov %vm8994_vm2  ;;  %v1128_v25 = vadd.s32 688, %v6269_v3 }
 0x1bb   : > { %v6117_v19 = vunpack.i.h.bf16 %v6979_v59  ;;  %v6116_v5 = vunpack.i.l.bf16 %v6979_v59  ;;  %5759 = vmatprep.subr.msk.bf16.mxu0 %vm5758_vm0, %v6222_v1  ;;  %vm1409_vm0 = vcmp.eq.s32.totalorder %v6951_v47, %v6449_v22  ;;  %v1129_v47 = vadd.s32 696, %v6269_v3 }
 0x1bc   : > { %v7005_v63 = vpop.permute.xlu1 %6119  ;;  %723 = vrot.lane.b32.xlu0 %v687_v4, %s6221_s9  ;;  %v6133_v36 = vpack.i.bf16 %v6974_v34, %v7003_v50  ;;  %v7661_v59 = vadd.s32 1080, %v6269_v3 }
 0x1bd   : > { %v813_v14 = vsel %vm8964_vm14, %v6097_v41, %v6116_v5  ;;  %v814_v44 = vsel %vm8964_vm14, %v6116_v5, %v6117_v19  ;;  %v6122_v18 = vunpack.i.h.bf16 %v7005_v63  ;;  %v6121_v23 = vunpack.i.l.bf16 %v7005_v63 }
 0x1be   : > { %v838_v51 = vmax.f32 %v6605_v61, %v813_v14  ;;  %v839_v9 = vmax.f32 %v6717_v20, %v814_v44  ;;  %5761 = vmatpush1.bf16.msk.msra.mxu0 %vm6995_vm3, %v6222_v1  ;;  %v7040_v42 = vpop.permute.xlu0 %6124  ;;  %725 = vrot.lane.b32.xlu1 %v688_v28, %s6221_s9  ;;  %v1125_v41 = vadd.s32 664, %v6269_v3  ;;  %vm8991_vm3 = vcmask 998400  }
 0x1bf   : > { %v877_v48 = vsel %vm8963_vm1, %v6102_v8, %v6121_v23  ;;  %v878_v61 = vsel %vm8963_vm1, %v6121_v23, %v6122_v18  ;;  %v6127_v20 = vunpack.i.h.bf16 %v7040_v42  ;;  %v6126_v4 = vunpack.i.l.bf16 %v7040_v42  ;;  %5763 = vmatprep.subr.msk.bf16.mxu0 %vm7016_vm13, %v6222_v1  ;;  %vm8992_vm12 = vmmov %vm8991_vm3 }
 0x1c0   : > { %v902_v43 = vmax.f32 %v838_v51, %v877_v48  ;;  %v903_v8 = vmax.f32 %v839_v9, %v878_v61  ;;  %v7063_v5 = vpop.permute.xlu1 %6129  ;;  %6134 = vrot.lane.b32.xlu0 %v6133_v36, %s6219_s7  ;;  %vm5768_vm13 = vmpackc.low %vm1405_vm11, %vm1403_vm6  ;;  %vm1412_vm11 = vcmp.eq.s32.totalorder %v7025_v58, %v6454_v29  ;;  %v1062_v63 = vadd.s32 160, %v6269_v3 }
 0x1c1   : > { %v942_v33 = vsel %vm8991_vm3, %v6107_v7, %v6126_v4  ;;  %v943_v26 = vsel %vm8992_vm12, %v6126_v4, %v6127_v20  ;;  %v6132_v57 = vunpack.i.h.bf16 %v7063_v5  ;;  %v6131_v28 = vunpack.i.l.bf16 %v7063_v5  ;;  %vm5770_vm6 = vmpackc.low %vm1410_vm15, %vm1408_vm8 }
 0x1c2   : > { %v967_v17 = vmax.f32 %v902_v43, %v942_v33  ;;  %5765 = vmatpush1.bf16.msk.msra.mxu0 %vm5764_vm10, %v6222_v1  ;;  %6139 = vrot.lane.b32.xlu1 %v6133_v36, %s6221_s9  ;;  %v251_v14 = vpop.permute.xlu0 %250  ;;  %v968_v44 = vmax.f32 %v903_v8, %v943_v26  ;;  %vm8996_vm10 = vmmov %vm8993_vm9  ;;  %vm1411_vm3 = vcmp.eq.s32.totalorder %v7025_v58, %v6449_v22  ;;  %v1130_v43 = vadd.s32 704, %v6269_v3 }
 0x1c3   : > { %v1007_v6 = vsel %vm8993_vm9, %v6112_v13, %v6131_v28  ;;  %v277_v7 = vsel %vm8994_vm2, %v251_v14, %v6335_v32  ;;  %v302_v23 = vsel %vm8995_vm5, 0.0, %v251_v14  ;;  %5767 = vmatprep.subr.msk.bf16.mxu0 %vm5766_vm7, %v6222_v1  ;;  %v1008_v11 = vsel %vm8996_vm10, %v6131_v28, %v6132_v57  ;;  %vm5772_vm15 = vmpackc.low %vm1409_vm0, %vm1407_vm4 }
 0x1c4   : > { %v7098_v51 = vmax.f32 %v967_v17, %v1007_v6  ;;  %v7101_v13 = vrot.slane %v302_v23, %v6322_v24  ;;  %v7104_v32 = vrot.slane %v277_v7, %v6322_v24  ;;  %6144 = vrot.lane.b32.xlu0 %v6133_v36, %s6223_s10  ;;  %v1033_v9 = vmax.f32 %v968_v44, %v1008_v11 }
 0x1c5   : > { %vm1414_vm7 = vcmp.eq.s32.totalorder %v1125_v41, %v6454_v29  ;;  %vm1413_vm12 = vcmp.eq.s32.totalorder %v1125_v41, %v6449_v22  ;;  %vm1416_vm9 = vcmp.eq.s32.totalorder %v1126_v56, %v6454_v29  ;;  %vm1418_vm2 = vcmp.eq.s32.totalorder %v1127_v62, %v6454_v29 }
 0x1c6   : > { %5769 = vmatpush1.bf16.msk.msra.mxu0 %vm5768_vm13, %v6222_v1  ;;  %6149 = vrot.lane.b32.xlu1 %v6133_v36, %s6224_s11  ;;  %v384_v48 = vmul.f32 %v6325_v27, %v7104_v32  ;;  %v383_v61 = vmul.f32 %v6325_v27, %v7101_v13  ;;  %vm5774_vm8 = vmpackc.low %vm1414_vm7, %vm1412_vm11  ;;  %v275_v36 = vpop.permute.xlu1 %274  ;;  %v482_v4 = vmul.f32 %v6332_v31, %v7104_v32  ;;  %vm303_vm4 = vcmask 539648  }
 0x1c7   : > { %2662 = vmatprep.mubr.f32.mxu0 %v1033_v9  ;;  %5771 = vmatprep.subr.msk.bf16.mxu0 %vm5770_vm6, %v6222_v1  ;;  %vm5776_vm0 = vmpackc.low %vm1413_vm12, %vm1411_vm3  ;;  %v288_v58 = vsel %vm8995_vm5, %v6815_v38, %v275_v36  ;;  %v481_v41 = vmul.f32 %v6332_v31, %v7101_v13  ;;  %vm1415_vm10 = vcmp.eq.s32.totalorder %v1126_v56, %v6449_v22  ;;  %v1131_v8 = vadd.s32 712, %v6269_v3 }
 0x1c8   : > { %411 = vrot.lane.b32.xlu0 %v384_v48, %s6218_s6  ;;  %vm5778_vm13 = vmpackc.low %vm1418_vm2, %vm1416_vm9  ;;  %vm1417_vm6 = vcmp.eq.s32.totalorder %v1127_v62, %v6449_v22  ;;  %vm1420_vm11 = vcmp.eq.s32.totalorder %v1128_v25, %v6454_v29  ;;  %vm1422_vm7 = vcmp.eq.s32.totalorder %v1129_v47, %v6454_v29  ;;  %v580_v38 = vmul.f32 %v6366_v46, %v7104_v32 }
 0x1c9   : > { %v304_v33 = vsel %vm303_vm4, %v288_v58, 0.0  ;;  %v579_v26 = vmul.f32 %v6366_v46, %v7101_v13  ;;  %vm1419_vm3 = vcmp.eq.s32.totalorder %v1128_v25, %v6449_v22  ;;  %vm1421_vm12 = vcmp.eq.s32.totalorder %v1129_v47, %v6449_v22 }
 0x1ca   : > { %5773 = vmatpush1.bf16.msk.msra.mxu0 %vm5772_vm15, %v6222_v1  ;;  %409 = vrot.lane.b32.xlu1 %v383_v61, %s6218_s6  ;;  %vm5780_vm15 = vmpackc.low %vm1417_vm6, %vm1415_vm10  ;;  %vm1424_vm9 = vcmp.eq.s32.totalorder %v1130_v43, %v6454_v29  ;;  %vm1426_vm2 = vcmp.eq.s32.totalorder %v1131_v8, %v6454_v29  ;;  %v1132_v28 = vadd.s32 720, %v6269_v3  ;;  %v1133_v17 = vadd.s32 728, %v6269_v3 }
 0x1cb   : > { %5775 = vmatprep.subr.msk.bf16.mxu0 %vm5774_vm8, %v6222_v1  ;;  %vm5782_vm8 = vmpackc.low %vm1422_vm7, %vm1420_vm11  ;;  %v7171_v14 = vrot.slane %v304_v33, %v6322_v24  ;;  %v678_v44 = vmul.f32 %v6382_v52, %v7104_v32  ;;  %v677_v6 = vmul.f32 %v6382_v52, %v7101_v13  ;;  %vm1423_vm5 = vcmp.eq.s32.totalorder %v1130_v43, %v6449_v22 }
 0x1cc   : > { %509 = vrot.lane.b32.xlu0 %v482_v4, %s6219_s7  ;;  %vm5784_vm4 = vmpackc.low %vm1421_vm12, %vm1419_vm3  ;;  %vm1428_vm10 = vcmp.eq.s32.totalorder %v1132_v28, %v6454_v29  ;;  %vm1430_vm6 = vcmp.eq.s32.totalorder %v1133_v17, %v6454_v29  ;;  %v1134_v24 = vadd.s32 736, %v6269_v3  ;;  %v1135_v7 = vadd.s32 744, %v6269_v3 }
 0x1cd   : > { %v395_v23 = vmul.f32 %v6325_v27, %v7171_v14  ;;  %v493_v11 = vmul.f32 %v6332_v31, %v7171_v14  ;;  %vm5790_vm7 = vmpackc.low %vm1430_vm6, %vm1428_vm10  ;;  %v1136_v9 = vadd.s32 752, %v6269_v3  ;;  %v1137_v27 = vadd.s32 760, %v6269_v3 }
 0x1ce   : > { %5777 = vmatpush1.bf16.msk.msra.mxu0 %vm5776_vm0, %v6222_v1  ;;  %507 = vrot.lane.b32.xlu1 %v481_v41, %s6219_s7  ;;  %vm5786_vm0 = vmpackc.low %vm1426_vm2, %vm1424_vm9  ;;  %vm1432_vm3 = vcmp.eq.s32.totalorder %v1134_v24, %v6454_v29  ;;  %vm1434_vm12 = vcmp.eq.s32.totalorder %v1135_v7, %v6454_v29  ;;  %v591_v31 = vmul.f32 %v6366_v46, %v7171_v14  ;;  %v1138_v56 = vadd.s32 768, %v6269_v3 }
 0x1cf   : > { %5779 = vmatprep.subr.msk.bf16.mxu0 %vm5778_vm13, %v6222_v1  ;;  %vm1425_vm13 = vcmp.eq.s32.totalorder %v1131_v8, %v6449_v22  ;;  %vm5794_vm2 = vmpackc.low %vm1434_vm12, %vm1432_vm3  ;;  %v1139_v62 = vadd.s32 776, %v6269_v3  ;;  %v689_v46 = vmul.f32 %v6382_v52, %v7171_v14  ;;  %v1140_v48 = vadd.s32 784, %v6269_v3 }
 0x1d0   : > { %607 = vrot.lane.b32.xlu0 %v580_v38, %s6220_s8  ;;  %vm5788_vm11 = vmpackc.low %vm1425_vm13, %vm1423_vm5  ;;  %vm1436_vm5 = vcmp.eq.s32.totalorder %v1136_v9, %v6454_v29  ;;  %vm1438_vm13 = vcmp.eq.s32.totalorder %v1137_v27, %v6454_v29  ;;  %v1141_v61 = vadd.s32 792, %v6269_v3  ;;  %v1142_v52 = vadd.s32 800, %v6269_v3 }
 0x1d1   : > { %vm5798_vm6 = vmpackc.low %vm1438_vm13, %vm1436_vm5  ;;  %v1143_v36 = vadd.s32 808, %v6269_v3  ;;  %v1144_v25 = vadd.s32 816, %v6269_v3  ;;  %v1145_v47 = vadd.s32 824, %v6269_v3  ;;  %v1147_v4 = vadd.s32 840, %v6269_v3 }
 0x1d2   : > { %5781 = vmatpush1.bf16.msk.msra.mxu0 %vm5780_vm15, %v6222_v1  ;;  %605 = vrot.lane.b32.xlu1 %v579_v26, %s6220_s8  ;;  %vm1427_vm15 = vcmp.eq.s32.totalorder %v1132_v28, %v6449_v22  ;;  %v1043_v58 = vadd.s32 8, %v6269_v3  ;;  %v1148_v41 = vadd.s32 848, %v6269_v3  ;;  %v1149_v43 = vadd.s32 856, %v6269_v3 }
 0x1d3   : > { %5783 = vmatprep.subr.msk.bf16.mxu0 %vm5782_vm8, %v6222_v1  ;;  %vm1429_vm8 = vcmp.eq.s32.totalorder %v1133_v17, %v6449_v22  ;;  %v1044_v8 = vadd.s32 16, %v6269_v3  ;;  %v1045_v38 = vadd.s32 24, %v6269_v3  ;;  %v1150_v33 = vadd.s32 864, %v6269_v3 }
 0x1d4   : > { %705 = vrot.lane.b32.xlu0 %v678_v44, %s6221_s9  ;;  %vm5792_vm9 = vmpackc.low %vm1429_vm8, %vm1427_vm15  ;;  %vm1440_vm15 = vcmp.eq.s32.totalorder %v1138_v56, %v6454_v29  ;;  %vm1442_vm8 = vcmp.eq.s32.totalorder %v1139_v62, %v6454_v29  ;;  %vm1462_vm1 = vcmp.eq.s32.totalorder %v1149_v43, %v6454_v29  ;;  %v1151_v26 = vadd.s32 872, %v6269_v3 }
 0x1d5   : > { %vm5802_vm12 = vmpackc.low %vm1442_vm8, %vm1440_vm15  ;;  %v1046_v17 = vadd.s32 32, %v6269_v3  ;;  %v1047_v44 = vadd.s32 40, %v6269_v3 }
 0x1d6   : > { %5785 = vmatpush1.bf16.msk.msra.mxu0 %vm5784_vm4, %v6222_v1  ;;  %703 = vrot.lane.b32.xlu1 %v677_v6, %s6221_s9  ;;  %vm1431_vm4 = vcmp.eq.s32.totalorder %v1134_v24, %v6449_v22  ;;  %v1152_v6 = vadd.s32 880, %v6269_v3  ;;  %v1153_v24 = vadd.s32 888, %v6269_v3 }
 0x1d7   : > { %5787 = vmatprep.subr.msk.bf16.mxu0 %vm5786_vm0, %v6222_v1  ;;  %vm1433_vm0 = vcmp.eq.s32.totalorder %v1135_v7, %v6449_v22  ;;  %v8999_v7 = vmov 0 }
 0x1d8   : > { %433 = vrot.lane.b32.xlu0 %v395_v23, %s6218_s6  ;;  %vm5796_vm10 = vmpackc.low %vm1433_vm0, %vm1431_vm4  ;;  %vm1444_vm4 = vcmp.eq.s32.totalorder %v1140_v48, %v6454_v29  ;;  %vm1446_vm0 = vcmp.eq.s32.totalorder %v1141_v61, %v6454_v29  ;;  %v1048_v23 = vadd.s32 48, %v6269_v3 }
 0x1d9   : > { %vm5806_vm13 = vmpackc.low %vm1446_vm0, %vm1444_vm4 }
 0x1da   : > { %5789 = vmatpush1.bf16.msk.msra.mxu0 %vm5788_vm11, %v6222_v1  ;;  %531 = vrot.lane.b32.xlu1 %v493_v11, %s6219_s7  ;;  %vm1435_vm11 = vcmp.eq.s32.totalorder %v1136_v9, %v6449_v22  ;;  %v1049_v11 = vadd.s32 56, %v6269_v3  ;;  %v1154_v9 = vadd.s32 896, %v6269_v3 }
 0x1db   : > { %5791 = vmatprep.subr.msk.bf16.mxu0 %vm5790_vm7, %v6222_v1  ;;  %vm1437_vm7 = vcmp.eq.s32.totalorder %v1137_v27, %v6449_v22  ;;  %v1155_v27 = vadd.s32 904, %v6269_v3 }
 0x1dc   : > { %629 = vrot.lane.b32.xlu0 %v591_v31, %s6220_s8  ;;  %vm5800_vm3 = vmpackc.low %vm1437_vm7, %vm1435_vm11  ;;  %vm1448_vm11 = vcmp.eq.s32.totalorder %v1142_v52, %v6454_v29  ;;  %vm1450_vm7 = vcmp.eq.s32.totalorder %v1143_v36, %v6454_v29  ;;  %v9001_v31 = vmov 0  ;;  %vm1262_vm14 = vcmp.eq.s32.totalorder %v1049_v11, %v6454_v29 }
 0x1dd   : > { %vm5810_vm8 = vmpackc.low %vm1450_vm7, %vm1448_vm11  ;;  %vm1248_vm11 = vcmp.eq.s32.totalorder %v6269_v3, %v6454_v29  ;;  %vm1250_vm7 = vcmp.eq.s32.totalorder %v1043_v58, %v6454_v29 }
 0x1de   : > { %5793 = vmatpush1.bf16.msk.msra.mxu0 %vm5792_vm9, %v6222_v1  ;;  %vm1439_vm9 = vcmp.eq.s32.totalorder %v1138_v56, %v6449_v22  ;;  %v1050_v56 = vadd.s32 64, %v6269_v3 }
 0x1df   : > { %5795 = vmatprep.subr.msk.bf16.mxu0 %vm5794_vm2, %v6222_v1  ;;  %vm1441_vm2 = vcmp.eq.s32.totalorder %v1139_v62, %v6449_v22  ;;  %v1051_v62 = vadd.s32 72, %v6269_v3 }
 0x1e0   : > { %727 = vrot.lane.b32.xlu0 %v689_v46, %s6221_s9  ;;  %vm5804_vm5 = vmpackc.low %vm1441_vm2, %vm1439_vm9  ;;  %vm1452_vm9 = vcmp.eq.s32.totalorder %v1144_v25, %v6454_v29  ;;  %vm1454_vm2 = vcmp.eq.s32.totalorder %v1145_v47, %v6454_v29  ;;  %v1156_v46 = vadd.s32 912, %v6269_v3 }
 0x1e1   : > { %vm5814_vm0 = vmpackc.low %vm1454_vm2, %vm1452_vm9  ;;  %vm1457_vm2 = vcmp.eq.s32.totalorder %v1147_v4, %v6449_v22 }
 0x1e2   : > { %5797 = vmatpush1.bf16.msk.msra.mxu0 %vm5796_vm10, %v6222_v1  ;;  %vm1443_vm10 = vcmp.eq.s32.totalorder %v1140_v48, %v6449_v22  ;;  %v1157_v48 = vadd.s32 920, %v6269_v3 }
 0x1e3   : > { %5799 = vmatprep.subr.msk.bf16.mxu0 %vm5798_vm6, %v6222_v1  ;;  %vm1445_vm6 = vcmp.eq.s32.totalorder %v1141_v61, %v6449_v22  ;;  %v9003_v61 = vmov 0 }
 0x1e4   : > { %vm5808_vm15 = vmpackc.low %vm1445_vm6, %vm1443_vm10  ;;  %vm1458_vm6 = vcmp.eq.s32.totalorder %v1147_v4, %v6454_v29  ;;  %v1054_v4 = vadd.s32 96, %v6269_v3 }
 0x1e6   : > { %5801 = vmatpush1.bf16.msk.msra.mxu0 %vm5800_vm3, %v6222_v1  ;;  %vm1447_vm3 = vcmp.eq.s32.totalorder %v1142_v52, %v6449_v22  ;;  %v1052_v52 = vadd.s32 80, %v6269_v3 }
 0x1e7   : > { %5803 = vmatprep.subr.msk.bf16.mxu0 %vm5802_vm12, %v6222_v1  ;;  %vm1449_vm12 = vcmp.eq.s32.totalorder %v1143_v36, %v6449_v22  ;;  %v1053_v36 = vadd.s32 88, %v6269_v3 }
 0x1e8   : > { %vm5812_vm4 = vmpackc.low %vm1449_vm12, %vm1447_vm3  ;;  %vm1249_vm3 = vcmp.eq.s32.totalorder %v1043_v58, %v6449_v22  ;;  %v1055_v58 = vadd.s32 104, %v6269_v3 }
 0x1e9   : > { %2663 = vmatmul.mubr.f32.vlgmr.msra.gmra.mrb[0].mxu0 %v7098_v51  ;;  %v1146_v51 = vadd.s32 832, %v6269_v3 }
 0x1ea   : > { %5805 = vmatpush1.bf16.msk.msra.mxu0 %vm5804_vm5, %v6222_v1  ;;  %vm1451_vm5 = vcmp.eq.s32.totalorder %v1144_v25, %v6449_v22  ;;  %v1158_v25 = vadd.s32 928, %v6269_v3 }
 0x1eb   : > { %5807 = vmatprep.subr.msk.bf16.mxu0 %vm5806_vm13, %v6222_v1  ;;  %vm1453_vm13 = vcmp.eq.s32.totalorder %v1145_v47, %v6449_v22  ;;  %vm1456_vm10 = vcmp.eq.s32.totalorder %v1146_v51, %v6454_v29  ;;  %vm1455_vm9 = vcmp.eq.s32.totalorder %v1146_v51, %v6449_v22  ;;  %v1159_v47 = vadd.s32 936, %v6269_v3 }
 0x1ec   : > { %vm5818_vm12 = vmpackc.low %vm1458_vm6, %vm1456_vm10  ;;  %vm1254_vm10 = vcmp.eq.s32.totalorder %v1045_v38, %v6454_v29  ;;  %v9007_v51 = vmov 0 }
 0x1ed   : > { %vm5820_vm6 = vmpackc.low %vm1457_vm2, %vm1455_vm9  ;;  %vm1466_vm9 = vcmp.eq.s32.totalorder %v1151_v26, %v6454_v29 }
 0x1ee   : > { %5809 = vmatpush1.bf16.msk.msra.mxu0 %vm5808_vm15, %v6222_v1  ;;  %vm5816_vm15 = vmpackc.low %vm1453_vm13, %vm1451_vm5  ;;  %vm1252_vm13 = vcmp.eq.s32.totalorder %v1044_v8, %v6454_v29 }
 0x1ef   : > { %5811 = vmatprep.subr.msk.bf16.mxu0 %vm5810_vm8, %v6222_v1  ;;  %vm1247_vm8 = vcmp.eq.s32.totalorder %v6269_v3, %v6449_v22  ;;  %vm5614_vm2 = vmpackc.low %vm1254_vm10, %vm1252_vm13  ;;  %vm1255_vm10 = vcmp.eq.s32.totalorder %v1046_v17, %v6449_v22 }
 0x1f0   : > { %vm7279_vm5 = vmpackc.low %vm1249_vm3, %vm1247_vm8  ;;  %vm1459_vm8 = vcmp.eq.s32.totalorder %v1148_v41, %v6449_v22  ;;  %vm1461_vm3 = vcmp.eq.s32.totalorder %v1149_v43, %v6449_v22  ;;  %v1161_v43 = vadd.s32 952, %v6269_v3 }
 0x1f1   : > { %vm5824_vm13 = vmpackc.low %vm1461_vm3, %vm1459_vm8  ;;  %vm1470_vm8 = vcmp.eq.s32.totalorder %v1153_v24, %v6454_v29 }
 0x1f2   : > { %5813 = vmatpush1.bf16.msk.msra.mxu0 %vm5812_vm4, %v6222_v1  ;;  %vm1460_vm4 = vcmp.eq.s32.totalorder %v1148_v41, %v6454_v29  ;;  %v1160_v41 = vadd.s32 944, %v6269_v3 }
 0x1f3   : > { %5815 = vmatprep.subr.msk.bf16.mxu0 %vm5814_vm0, %v6222_v1  ;;  %vm5610_vm0 = vmpackc.low %vm1250_vm7, %vm1248_vm11  ;;  %vm1251_vm11 = vcmp.eq.s32.totalorder %v1044_v8, %v6449_v22  ;;  %vm1253_vm7 = vcmp.eq.s32.totalorder %v1045_v38, %v6449_v22  ;;  %v9011_v8 = vmov 0  ;;  %v7446_v38 = vadd.s32 112, %v6269_v3 }
 0x1f4   : > { %5611 = vmatprep.subr.msk.bf16.mxu1 %vm5610_vm0, %v6222_v1  ;;  %vm1258_vm0 = vcmp.eq.s32.totalorder %v1047_v44, %v6454_v29 }
 0x1f5   : > { %5613 = vmatpush1.bf16.msk.msra.mxu1 %vm7279_vm5, %v6222_v1 }
 0x1f6   : > { %5817 = vmatpush1.bf16.msk.msra.mxu0 %vm5816_vm15, %v6222_v1  ;;  %vm5822_vm15 = vmpackc.low %vm1462_vm1, %vm1460_vm4  ;;  %5615 = vmatprep.subr.msk.bf16.mxu1 %vm5614_vm2, %v6222_v1  ;;  %vm1256_vm4 = vcmp.eq.s32.totalorder %v1046_v17, %v6454_v29  ;;  %vm1468_vm2 = vcmp.eq.s32.totalorder %v1152_v6, %v6454_v29  ;;  %v1163_v17 = vadd.s32 968, %v6269_v3 }
 0x1f7   : > { %5819 = vmatprep.subr.msk.bf16.mxu0 %vm5818_vm12, %v6222_v1  ;;  %vm1464_vm12 = vcmp.eq.s32.totalorder %v1150_v33, %v6454_v29  ;;  %vm7311_vm1 = vmpackc.low %vm1253_vm7, %vm1251_vm11  ;;  %vm1463_vm7 = vcmp.eq.s32.totalorder %v1150_v33, %v6449_v22  ;;  %v7449_v33 = vadd.s32 120, %v6269_v3 }
 0x1f8   : > { %v9000_v7 = vsel %vm7311_vm1, 4294967295, %v8999_v7  ;;  %vm5826_vm11 = vmpackc.low %vm1466_vm9, %vm1464_vm12  ;;  %vm1260_vm9 = vcmp.eq.s32.totalorder %v1048_v23, %v6454_v29 }
 0x1f9   : > { %5617 = vmatpush1.bf16.msk.msra.mxu1 %vm7311_vm1, %v6222_v1  ;;  %vm5618_vm3 = vmpackc.low %vm1258_vm0, %vm1256_vm4  ;;  %vm1259_vm0 = vcmp.eq.s32.totalorder %v1048_v23, %v6449_v22  ;;  %v1166_v23 = vadd.s32 992, %v6269_v3 }
 0x1fa   : > { %5821 = vmatpush1.bf16.msk.msra.mxu0 %vm5820_vm6, %v6222_v1  ;;  %vm1257_vm6 = vcmp.eq.s32.totalorder %v1047_v44, %v6449_v22  ;;  %5619 = vmatprep.subr.msk.bf16.mxu1 %vm5618_vm3, %v6222_v1  ;;  %vm1472_vm3 = vcmp.eq.s32.totalorder %v1154_v9, %v6454_v29  ;;  %v9015_v44 = vmov 0 }
 0x1fb   : > { %5823 = vmatprep.subr.msk.bf16.mxu0 %vm5822_vm15, %v6222_v1  ;;  %vm1465_vm15 = vcmp.eq.s32.totalorder %v1151_v26, %v6449_v22  ;;  %vm7343_vm12 = vmpackc.low %vm1257_vm6, %vm1255_vm10  ;;  %vm1467_vm6 = vcmp.eq.s32.totalorder %v1152_v6, %v6449_v22  ;;  %v1162_v26 = vadd.s32 960, %v6269_v3  ;;  %v1164_v6 = vadd.s32 976, %v6269_v3 }
 0x1fc   : > { %v9002_v31 = vsel %vm7343_vm12, 4294967295, %v9001_v31  ;;  %vm5828_vm4 = vmpackc.low %vm1465_vm15, %vm1463_vm7  ;;  %vm1476_vm7 = vcmp.eq.s32.totalorder %v1156_v46, %v6454_v29 }
 0x1fd   : > { %5621 = vmatpush1.bf16.msk.msra.mxu1 %vm7343_vm12, %v6222_v1  ;;  %vm5830_vm10 = vmpackc.low %vm1470_vm8, %vm1468_vm2  ;;  %vm1264_vm8 = vcmp.eq.s32.totalorder %v1050_v56, %v6454_v29  ;;  %vm1278_vm12 = vcmp.eq.s32.totalorder %v7449_v33, %v6454_v29 }
 0x1fe   : > { %5825 = vmatpush1.bf16.msk.msra.mxu0 %vm5824_vm13, %v6222_v1  ;;  %vm1261_vm13 = vcmp.eq.s32.totalorder %v1049_v11, %v6449_v22  ;;  %vm5622_vm15 = vmpackc.low %vm1262_vm14, %vm1260_vm9  ;;  %vm1263_vm9 = vcmp.eq.s32.totalorder %v1050_v56, %v6449_v22  ;;  %v1167_v11 = vadd.s32 1000, %v6269_v3  ;;  %v7517_v56 = vadd.s32 1024, %v6269_v3 }
 0x1ff   : > { %5827 = vmatprep.subr.msk.bf16.mxu0 %vm5826_vm11, %v6222_v1  ;;  %vm1469_vm11 = vcmp.eq.s32.totalorder %v1153_v24, %v6449_v22  ;;  %5623 = vmatprep.subr.msk.bf16.mxu1 %vm5622_vm15, %v6222_v1  ;;  %vm7375_vm2 = vmpackc.low %vm1261_vm13, %vm1259_vm0  ;;  %vm9005_vm0 = vcmp.eq.s32.totalorder %v1155_v27, %v6454_v29  ;;  %vm1471_vm15 = vcmp.eq.s32.totalorder %v1154_v9, %v6449_v22  ;;  %v1165_v24 = vadd.s32 984, %v6269_v3 }
 0x200   : > { %v9004_v61 = vsel %vm7375_vm2, 4294967295, %v9003_v61  ;;  %vm5832_vm14 = vmpackc.low %vm1469_vm11, %vm1467_vm6  ;;  %vm9006_vm11 = vcmp.eq.s32.totalorder %v1051_v62, %v6454_v29  ;;  %vm1480_vm6 = vcmp.eq.s32.totalorder %v1158_v25, %v6454_v29  ;;  %v1168_v9 = vadd.s32 1008, %v6269_v3 }
 0x201   : > { %5625 = vmatpush1.bf16.msk.msra.mxu1 %vm7375_vm2, %v6222_v1  ;;  %vm5834_vm13 = vmpackc.low %vm9005_vm0, %vm1472_vm3  ;;  %vm1268_vm0 = vcmp.eq.s32.totalorder %v1052_v52, %v6454_v29 }
 0x202   : > { %5829 = vmatpush1.bf16.msk.msra.mxu0 %vm5828_vm4, %v6222_v1  ;;  %vm1265_vm4 = vcmp.eq.s32.totalorder %v1051_v62, %v6449_v22  ;;  %vm5626_vm2 = vmpackc.low %vm9006_vm11, %vm1264_vm8  ;;  %vm1475_vm11 = vcmp.eq.s32.totalorder %v1156_v46, %v6449_v22  ;;  %v7520_v62 = vadd.s32 1032, %v6269_v3 }
 0x203   : > { %5831 = vmatprep.subr.msk.bf16.mxu0 %vm5830_vm10, %v6222_v1  ;;  %vm1473_vm10 = vcmp.eq.s32.totalorder %v1155_v27, %v6449_v22  ;;  %5627 = vmatprep.subr.msk.bf16.mxu1 %vm5626_vm2, %v6222_v1  ;;  %vm7407_vm3 = vmpackc.low %vm1265_vm4, %vm1263_vm9  ;;  %vm1267_vm2 = vcmp.eq.s32.totalorder %v1052_v52, %v6449_v22  ;;  %vm9009_vm9 = vcmp.eq.s32.totalorder %v1157_v48, %v6454_v29  ;;  %v1169_v27 = vadd.s32 1016, %v6269_v3 }
 0x204   : > { %v9008_v51 = vsel %vm7407_vm3, 4294967295, %v9007_v51  ;;  %vm5836_vm8 = vmpackc.low %vm1473_vm10, %vm1471_vm15  ;;  %vm9010_vm10 = vcmp.eq.s32.totalorder %v1053_v36, %v6454_v29  ;;  %vm1484_vm15 = vcmp.eq.s32.totalorder %v1160_v41, %v6454_v29 }
 0x205   : > { %5629 = vmatpush1.bf16.msk.msra.mxu1 %vm7407_vm3, %v6222_v1  ;;  %vm5838_vm4 = vmpackc.low %vm9009_vm9, %vm1476_vm7  ;;  %vm1272_vm9 = vcmp.eq.s32.totalorder %v1054_v4, %v6454_v29 }
 0x206   : > { %5833 = vmatpush1.bf16.msk.msra.mxu0 %vm5832_vm14, %v6222_v1  ;;  %vm1269_vm14 = vcmp.eq.s32.totalorder %v1053_v36, %v6449_v22  ;;  %vm5630_vm3 = vmpackc.low %vm9010_vm10, %vm1268_vm0  ;;  %vm1479_vm10 = vcmp.eq.s32.totalorder %v1158_v25, %v6449_v22  ;;  %v372_v25 = vmul.f32 %v6661_v60, %v6376_v49  ;;  %v7556_v60 = vmul.f32 %v6830_v55, %v6376_v49 }
 0x207   : > { %5835 = vmatprep.subr.msk.bf16.mxu0 %vm5834_vm13, %v6222_v1  ;;  %vm1477_vm13 = vcmp.eq.s32.totalorder %v1157_v48, %v6449_v22  ;;  %5631 = vmatprep.subr.msk.bf16.mxu1 %vm5630_vm3, %v6222_v1  ;;  %vm7439_vm7 = vmpackc.low %vm1269_vm14, %vm1267_vm2  ;;  %vm1271_vm3 = vcmp.eq.s32.totalorder %v1054_v4, %v6449_v22  ;;  %vm9013_vm2 = vcmp.eq.s32.totalorder %v1159_v47, %v6454_v29 }
 0x208   : > { %v9012_v8 = vsel %vm7439_vm7, 4294967295, %v9011_v8  ;;  %vm5840_vm0 = vmpackc.low %vm1477_vm13, %vm1475_vm11  ;;  %vm1486_vm11 = vcmp.eq.s32.totalorder %v1161_v43, %v6454_v29  ;;  %vm9014_vm13 = vcmp.eq.s32.totalorder %v1055_v58, %v6454_v29  ;;  %v7570_v55 = vmul.f32 %v7171_v14, %v6376_v49 }
 0x209   : > { %5633 = vmatpush1.bf16.msk.msra.mxu1 %vm7439_vm7, %v6222_v1  ;;  %vm5842_vm14 = vmpackc.low %vm9013_vm2, %vm1480_vm6  ;;  %vm1276_vm2 = vcmp.eq.s32.totalorder %v7446_v38, %v6454_v29  ;;  %v1059_v14 = vadd.s32 136, %v6269_v3 }
 0x20a   : > { %5837 = vmatpush1.bf16.msk.msra.mxu0 %vm5836_vm8, %v6222_v1  ;;  %vm1273_vm8 = vcmp.eq.s32.totalorder %v1055_v58, %v6449_v22  ;;  %vm5634_vm7 = vmpackc.low %vm9014_vm13, %vm1272_vm9 }
 0x20b   : > { %5839 = vmatprep.subr.msk.bf16.mxu0 %vm5838_vm4, %v6222_v1  ;;  %vm1481_vm4 = vcmp.eq.s32.totalorder %v1159_v47, %v6449_v22  ;;  %5635 = vmatprep.subr.msk.bf16.mxu1 %vm5634_vm7, %v6222_v1  ;;  %vm7475_vm6 = vmpackc.low %vm1273_vm8, %vm1271_vm3  ;;  %vm1483_vm7 = vcmp.eq.s32.totalorder %v1160_v41, %v6449_v22  ;;  %vm1488_vm3 = vcmp.eq.s32.totalorder %v1162_v26, %v6454_v29 }
 0x20c   : > { %v9016_v44 = vsel %vm7475_vm6, 4294967295, %v9015_v44  ;;  %vm5844_vm1 = vmpackc.low %vm1481_vm4, %vm1479_vm10  ;;  %vm1490_vm8 = vcmp.eq.s32.totalorder %v1163_v17, %v6454_v29  ;;  %vm1487_vm10 = vcmp.eq.s32.totalorder %v1162_v26, %v6449_v22  ;;  %vm1489_vm4 = vcmp.eq.s32.totalorder %v1163_v17, %v6449_v22 }
 0x20d   : > { %5637 = vmatpush1.bf16.msk.msra.mxu1 %vm7475_vm6, %v6222_v1  ;;  %vm5846_vm9 = vmpackc.low %vm1486_vm11, %vm1484_vm15  ;;  %vm1492_vm11 = vcmp.eq.s32.totalorder %v1164_v6, %v6454_v29  ;;  %vm1494_vm6 = vcmp.eq.s32.totalorder %v1165_v24, %v6454_v29 }
 0x20e   : > { %5841 = vmatpush1.bf16.msk.msra.mxu0 %vm5840_vm0, %v6222_v1  ;;  %vm1485_vm0 = vcmp.eq.s32.totalorder %v1161_v43, %v6449_v22  ;;  %vm5638_vm13 = vmpackc.low %vm1278_vm12, %vm1276_vm2  ;;  %vm1491_vm2 = vcmp.eq.s32.totalorder %v1164_v6, %v6449_v22  ;;  %v373_v43 = vmul.f32 %v6813_v54, %v6376_v49 }
 0x20f   : > { %5843 = vmatprep.subr.msk.bf16.mxu0 %vm5842_vm14, %v6222_v1  ;;  %5639 = vmatprep.subr.msk.bf16.mxu1 %vm5638_vm13, %v6222_v1  ;;  %vm5848_vm15 = vmpackc.low %vm1485_vm0, %vm1483_vm7  ;;  %vm1496_vm7 = vcmp.eq.s32.totalorder %v1166_v23, %v6454_v29  ;;  %vm1498_vm0 = vcmp.eq.s32.totalorder %v1167_v11, %v6454_v29  ;;  %vm1497_vm13 = vcmp.eq.s32.totalorder %v1167_v11, %v6449_v22 }
 0x210   : > { %vm5850_vm14 = vmpackc.low %vm1490_vm8, %vm1488_vm3 }
 0x211   : > { %vm5854_vm12 = vmpackc.low %vm1494_vm6, %vm1492_vm11  ;;  %vm1495_vm6 = vcmp.eq.s32.totalorder %v1166_v23, %v6449_v22  ;;  %vm1499_vm11 = vcmp.eq.s32.totalorder %v1168_v9, %v6449_v22  ;;  %v9021_v23 = vmov 0 }
 0x212   : > { %5845 = vmatpush1.bf16.msk.msra.mxu0 %vm5844_vm1, %v6222_v1  ;;  %vm5852_vm1 = vmpackc.low %vm1489_vm4, %vm1487_vm10 }
 0x213   : > { %5847 = vmatprep.subr.msk.bf16.mxu0 %vm5846_vm9, %v6222_v1  ;;  %vm1493_vm9 = vcmp.eq.s32.totalorder %v1165_v24, %v6449_v22  ;;  %vm5858_vm8 = vmpackc.low %vm1498_vm0, %vm1496_vm7  ;;  %vm9017_vm0 = vcmask 1039360   ;;  %v7573_v24 = vadd.s32 1040, %v6269_v3 }
 0x214   : > { %vm5856_vm3 = vmpackc.low %vm1493_vm9, %vm1491_vm2  ;;  %vm1506_vm2 = vcmp.eq.s32.totalorder %v7520_v62, %v6454_v29 }
 0x215   : > { %vm5860_vm10 = vmpackc.low %vm1497_vm13, %vm1495_vm6  ;;  %vm1275_vm13 = vcmp.eq.s32.totalorder %v7446_v38, %v6449_v22 }
 0x216   : > { %5849 = vmatpush1.bf16.msk.msra.mxu0 %vm5848_vm15, %v6222_v1  ;;  %vm1500_vm15 = vcmp.eq.s32.totalorder %v1168_v9, %v6454_v29 }
 0x217   : > { %5851 = vmatprep.subr.msk.bf16.mxu0 %vm5850_vm14, %v6222_v1  ;;  %vm1502_vm14 = vcmp.eq.s32.totalorder %v1169_v27, %v6454_v29 }
 0x218   : > { %vm5862_vm4 = vmpackc.low %vm1502_vm14, %vm1500_vm15  ;;  %vm1277_vm15 = vcmp.eq.s32.totalorder %v7449_v33, %v6449_v22 }
 0x219   : > { %vm7575_vm14 = vmpackc.low %vm1277_vm15, %vm1275_vm13  ;;  %vm1508_vm13 = vcmp.eq.s32.totalorder %v7573_v24, %v6454_v29 }
 0x21a   : > { %5853 = vmatpush1.bf16.msk.msra.mxu0 %vm5852_vm1, %v6222_v1  ;;  %vm1501_vm1 = vcmp.eq.s32.totalorder %v1169_v27, %v6449_v22  ;;  %v9022_v23 = vsel %vm7575_vm14, 4294967295, %v9021_v23  ;;  %5641 = vmatpush1.bf16.msk.msra.mxu1 %vm7575_vm14, %v6222_v1  ;;  %v7589_v27 = vadd.s32 1048, %v6269_v3 }
 0x21b   : > { %5855 = vmatprep.subr.msk.bf16.mxu0 %vm5854_vm12, %v6222_v1  ;;  %vm1504_vm12 = vcmp.eq.s32.totalorder %v7517_v56, %v6454_v29  ;;  %vm5864_vm9 = vmpackc.low %vm1501_vm1, %vm1499_vm11  ;;  %vm9025_vm11 = vcmask 1014784  }
 0x21c   : > { %vm5866_vm7 = vmpackc.low %vm1506_vm2, %vm1504_vm12  ;;  %vm1282_vm12 = vcmp.eq.s32.totalorder %v1059_v14, %v6454_v29  ;;  %vm1510_vm15 = vcmp.eq.s32.totalorder %v7589_v27, %v6454_v29 }
 0x21e   : > { %5857 = vmatpush1.bf16.msk.msra.mxu0 %vm5856_vm3, %v6222_v1  ;;  %vm9018_vm3 = vmmov %vm9017_vm0 }
 0x21f   : > { %5859 = vmatprep.subr.msk.bf16.mxu0 %vm5858_vm8, %v6222_v1  ;;  %vm9019_vm8 = vcmask 1031168  }
 0x220   : > { %vm9020_vm6 = vmmov %vm9019_vm8 }
 0x222   : > { %v430_v46 = vpop.permute.xlu0 %429  ;;  %5861 = vmatpush1.bf16.msk.msra.mxu0 %vm5860_vm10, %v6222_v1  ;;  %vm9023_vm10 = vcmask 1022976  }
 0x223   : > { %5863 = vmatprep.subr.msk.bf16.mxu0 %vm5862_vm4, %v6222_v1  ;;  %v445_v36 = vsel %vm9017_vm0, %v6793_v39, %v430_v46  ;;  %v7552_v39 = vmul.f32 %v7104_v32, %v6376_v49  ;;  %vm9024_vm4 = vmmov %vm9023_vm10 }
 0x224   : > { %v7532_v48 = vpop.permute.xlu1 %431  ;;  %v470_v41 = vadd.f32 %v445_v36, %v372_v25  ;;  %v7602_v25 = vadd.s32 1064, %v6269_v3  ;;  %vm9026_vm0 = vmmov %vm9025_vm11 }
 0x225   : > { %v446_v4 = vsel %vm9018_vm3, %v430_v46, %v7532_v48  ;;  %v7592_v46 = vadd.s32 1056, %v6269_v3  ;;  %vm1503_vm3 = vcmp.eq.s32.totalorder %v7517_v56, %v6449_v22  ;;  %v7733_v56 = vadd.s32 1088, %v6269_v3 }
 0x226   : > { %v528_v52 = vpop.permute.xlu0 %527  ;;  %5865 = vmatpush1.bf16.msk.msra.mxu0 %vm5864_vm9, %v6222_v1  ;;  %v471_v54 = vadd.f32 %v446_v4, %v373_v43  ;;  %v7605_v4 = vadd.s32 1072, %v6269_v3 }
 0x227   : > { %5867 = vmatprep.subr.msk.bf16.mxu0 %vm5866_vm7, %v6222_v1  ;;  %v543_v58 = vsel %vm9019_vm8, %v6850_v15, %v528_v52  ;;  %v7562_v15 = vmul.f32 %v7101_v13, %v6376_v49  ;;  %v1058_v49 = vadd.s32 128, %v6269_v3  ;;  %vm1281_vm7 = vcmp.eq.s32.totalorder %v1059_v14, %v6449_v22 }
 0x228   : > { %v7540_v47 = vpop.permute.xlu1 %529  ;;  %v568_v32 = vadd.f32 %v543_v58, %v470_v41  ;;  %vm1505_vm8 = vcmp.eq.s32.totalorder %v7520_v62, %v6449_v22  ;;  %v9027_v58 = vmov 0  ;;  %v1060_v41 = vadd.s32 144, %v6269_v3 }
 0x229   : > { %v544_v17 = vsel %vm9020_vm6, %v528_v52, %v7540_v47  ;;  %vm1280_vm1 = vcmp.eq.s32.totalorder %v1058_v49, %v6454_v29  ;;  %vm1279_vm2 = vcmp.eq.s32.totalorder %v1058_v49, %v6449_v22 }
 0x22a   : > { %v7548_v26 = vpop.permute.xlu0 %627  ;;  %v569_v33 = vadd.f32 %v544_v17, %v471_v54  ;;  %vm5642_vm9 = vmpackc.low %vm1282_vm12, %vm1280_vm1  ;;  %vm1507_vm12 = vcmp.eq.s32.totalorder %v7573_v24, %v6449_v22 }
 0x22b   : > { %5643 = vmatprep.subr.msk.bf16.mxu1 %vm5642_vm9, %v6222_v1  ;;  %vm7615_vm6 = vmpackc.low %vm1281_vm7, %vm1279_vm2 }
 0x22c   : > { %v626_v6 = vpop.permute.xlu1 %625  ;;  %v9028_v58 = vsel %vm7615_vm6, 4294967295, %v9027_v58  ;;  %5645 = vmatpush1.bf16.msk.msra.mxu1 %vm7615_vm6, %v6222_v1  ;;  %vm9031_vm7 = vmmov %vm9026_vm0 }
 0x22d   : > { %v641_v13 = vsel %vm9023_vm10, %v6879_v35, %v626_v6  ;;  %v642_v38 = vsel %vm9024_vm4, %v626_v6, %v7548_v26  ;;  %vm1284_vm10 = vcmp.eq.s32.totalorder %v1060_v41, %v6454_v29  ;;  %vm1283_vm4 = vcmp.eq.s32.totalorder %v1060_v41, %v6449_v22 }
 0x22e   : > { %v666_v11 = vadd.f32 %v641_v13, %v568_v32  ;;  %v724_v9 = vpop.permute.xlu0 %723  ;;  %v667_v52 = vadd.f32 %v642_v38, %v569_v33  ;;  %v1061_v32 = vadd.s32 152, %v6269_v3 }
 0x22f   : > { %v739_v35 = vsel %vm9025_vm11, %v6953_v37, %v724_v9  ;;  %vm9029_vm11 = vcmask 1031168  }
 0x230   : > { %v7599_v36 = vpop.permute.xlu1 %725  ;;  %v7620_v43 = vadd.f32 %v739_v35, %v666_v11  ;;  %vm9030_vm1 = vmmov %vm9029_vm11  ;;  %vm1286_vm9 = vcmp.eq.s32.totalorder %v1061_v32, %v6454_v29 }
 0x231   : > { %v740_v37 = vsel %vm9026_vm0, %v724_v9, %v7599_v36 }
 0x232   : > { %v7622_v17 = vadd.f32 %v740_v37, %v667_v52  ;;  %v7624_v54 = vpop.permute.xlu0 %6134 }
 0x233   : > { %v6137_v6 = vunpack.i.h.bf16 %v7624_v54  ;;  %v6136_v13 = vunpack.i.l.bf16 %v7624_v54 }
 0x234   : > { %v7637_v38 = vpop.permute.xlu1 %6139  ;;  %v6163_v49 = vpack.i.bf16 %v7622_v17, %v7620_v43 }
 0x235   : > { %v815_v14 = vsel %vm9029_vm11, %v6117_v19, %v6136_v13  ;;  %v816_v33 = vsel %vm9030_vm1, %v6136_v13, %v6137_v6  ;;  %v8973_v11 = vunpack.i.h.bf16 %v7637_v38  ;;  %v6141_v9 = vunpack.i.l.bf16 %v7637_v38  ;;  %vm5646_vm11 = vmpackc.low %vm1286_vm9, %vm1284_vm10 }
 0x236   : > { %v840_v35 = vmax.f32 %v6719_v21, %v815_v14  ;;  %v841_v52 = vmax.f32 %v7003_v50, %v816_v33  ;;  %6164 = vrot.lane.b32.xlu0 %v6163_v49, %s6223_s10  ;;  %6154 = vrot.lane.b32.xlu1 %v6163_v49, %s6219_s7  ;;  %v7654_v37 = vpop.permute.xlu0 %6144  ;;  %vm1285_vm1 = vcmp.eq.s32.totalorder %v1061_v32, %v6449_v22 }
 0x237   : > { %v879_v21 = vsel %vm9031_vm7, %v6122_v18, %v6141_v9  ;;  %v880_v19 = vsel %vm9026_vm0, %v6141_v9, %v8973_v11  ;;  %v6147_v50 = vunpack.i.h.bf16 %v7654_v37  ;;  %v6146_v13 = vunpack.i.l.bf16 %v7654_v37  ;;  %5647 = vmatprep.subr.msk.bf16.mxu1 %vm5646_vm11, %v6222_v1  ;;  %vm7689_vm10 = vmpackc.low %vm1285_vm1, %vm1283_vm4 }
 0x238   : > { %v904_v14 = vmax.f32 %v840_v35, %v879_v21  ;;  %v905_v33 = vmax.f32 %v841_v52, %v880_v19  ;;  %v7674_v2 = vpop.permute.xlu1 %6149  ;;  %vm9032_vm7 = vcmask 998400   ;;  %v9034_v52 = vmov 0  ;;  %5649 = vmatpush1.bf16.msk.msra.mxu1 %vm7689_vm10, %v6222_v1 }
 0x239   : > { %v944_v18 = vsel %vm9032_vm7, %v6127_v20, %v6146_v13  ;;  %vm9033_vm0 = vmmov %vm9032_vm7  ;;  %v6152_v11 = vunpack.i.h.bf16 %v7674_v2  ;;  %v6151_v35 = vunpack.i.l.bf16 %v7674_v2  ;;  %v9035_v52 = vsel %vm7689_vm10, 4294967295, %v9034_v52 }
 0x23a   : > { %v945_v9 = vsel %vm9033_vm0, %v6146_v13, %v6147_v50  ;;  %v969_v32 = vmax.f32 %v904_v14, %v944_v18  ;;  %6159 = vrot.lane.b32.xlu1 %v6163_v49, %s6221_s9  ;;  %v412_v42 = vpop.permute.xlu0 %411  ;;  %v1063_v20 = vadd.s32 168, %v6269_v3  ;;  %vm9036_vm4 = vcmask 982016   ;;  %vm7716_vm0 = vmpackc.low %vm1505_vm8, %vm1503_vm3 }
 0x23b   : > { %v970_v21 = vmax.f32 %v905_v33, %v945_v9  ;;  %v1009_v41 = vsel %vm9036_vm4, %v6132_v57, %v6151_v35  ;;  %vm9037_vm11 = vmmov %vm9036_vm4  ;;  %vm1288_vm3 = vcmp.eq.s32.totalorder %v1062_v63, %v6454_v29  ;;  %vm1287_vm7 = vcmp.eq.s32.totalorder %v1062_v63, %v6449_v22 }
 0x23c   : > { %v1010_v19 = vsel %vm9037_vm11, %v6151_v35, %v6152_v11  ;;  %v1034_v13 = vmax.f32 %v969_v32, %v1009_v41  ;;  %v410_v14 = vpop.permute.xlu1 %409  ;;  %vm7728_vm11 = vmpackc.low %vm1510_vm15, %vm1508_vm13  ;;  %vm1290_vm8 = vcmp.eq.s32.totalorder %v1063_v20, %v6454_v29  ;;  %vm1518_vm13 = vcmp.eq.s32.totalorder %v7661_v59, %v6454_v29 }
 0x23d   : > { %v1035_v33 = vmax.f32 %v970_v21, %v1010_v19  ;;  %vm5650_vm15 = vmpackc.low %vm1290_vm8, %vm1288_vm3  ;;  %vm1289_vm1 = vcmp.eq.s32.totalorder %v1063_v20, %v6449_v22  ;;  %v7747_v18 = vadd.s32 1096, %v6269_v3  ;;  %v1065_v63 = vadd.s32 184, %v6269_v3 }
 0x23e   : > { %6169 = vrot.lane.b32.xlu1 %v6163_v49, %s6224_s11  ;;  %v510_v62 = vpop.permute.xlu0 %509  ;;  %5651 = vmatprep.subr.msk.bf16.mxu1 %vm5650_vm15, %v6222_v1  ;;  %vm5652_vm2 = vmpackc.low %vm1289_vm1, %vm1287_vm7  ;;  %v1064_v49 = vadd.s32 176, %v6269_v3  ;;  %vm9042_vm4 = vcmask 1039360   ;;  %v7760_v32 = vadd.s32 1104, %v6269_v3  ;;  %v7763_v21 = vadd.s32 1112, %v6269_v3 }
 0x23f   : > { %2733 = vmatprep.mubr.f32.mxu0 %v1035_v33  ;;  %v437_v9 = vsel %vm9042_vm4, %v412_v42, %v6549_v0  ;;  %5653 = vmatpush1.bf16.msk.msra.mxu1 %vm5652_vm2, %v6222_v1  ;;  %vm9043_vm1 = vmmov %vm9042_vm4  ;;  %vm9044_vm7 = vcmp.eq.s32.totalorder %v7589_v27, %v6449_v22  ;;  %v7783_v41 = vadd.s32 1120, %v6269_v3  ;;  %vm9048_vm8 = vcmp.eq.s32.totalorder %v7592_v46, %v6454_v29 }
 0x240   : > { %2734 = vmatmul.mubr.f32.vlgmr.msra.gmra.mrb[0].mxu0 %v1034_v13  ;;  %v508_v35 = vpop.permute.xlu1 %507  ;;  %v436_v20 = vsel %vm9043_vm1, %v410_v14, %v412_v42  ;;  %vm1292_vm2 = vcmp.eq.s32.totalorder %v1064_v49, %v6454_v29  ;;  %vm1294_vm1 = vcmp.eq.s32.totalorder %v1065_v63, %v6454_v29  ;;  %vm1293_vm4 = vcmp.eq.s32.totalorder %v1065_v63, %v6449_v22 }
 0x241   : > { %5869 = vmatpush1.bf16.msk.msra.mxu0 %vm7716_vm0, %v6222_v1  ;;  %vm7776_vm0 = vmpackc.low %vm9044_vm7, %vm1507_vm12  ;;  %vm9049_vm12 = vcmp.eq.s32.totalorder %v7602_v25, %v6454_v29  ;;  %vm1291_vm7 = vcmp.eq.s32.totalorder %v1064_v49, %v6449_v22  ;;  %v462_v27 = vadd.f32 %v437_v9, %v7552_v39  ;;  %vm1522_vm3 = vcmp.eq.s32.totalorder %v7747_v18, %v6454_v29 }
 0x242   : > { %5871 = vmatprep.subr.msk.bf16.mxu0 %vm7728_vm11, %v6222_v1  ;;  %vm9047_vm11 = vcmask 1031168   ;;  %v608_v19 = vpop.permute.xlu0 %607  ;;  %vm7794_vm15 = vmpackc.low %vm9049_vm12, %vm9048_vm8  ;;  %v461_v13 = vadd.f32 %v436_v20, %v7562_v15  ;;  %v1066_v39 = vadd.s32 192, %v6269_v3  ;;  %v1067_v33 = vadd.s32 200, %v6269_v3 }
 0x243   : > { %v535_v42 = vsel %vm9047_vm11, %v510_v62, %v6553_v12  ;;  %v534_v12 = vsel %vm9047_vm11, %v508_v35, %v510_v62  ;;  %vm5654_vm8 = vmpackc.low %vm1294_vm1, %vm1292_vm2  ;;  %vm9052_vm2 = vcmask 1022976   ;;  %v1071_v62 = vadd.s32 232, %v6269_v3 }
 0x244   : > { %v606_v14 = vpop.permute.xlu1 %605  ;;  %5655 = vmatprep.subr.msk.bf16.mxu1 %vm5654_vm8, %v6222_v1  ;;  %vm5656_vm11 = vmpackc.low %vm1293_vm4, %vm1291_vm7  ;;  %v560_v5 = vadd.f32 %v535_v42, %v462_v27  ;;  %v633_v57 = vsel %vm9052_vm2, %v608_v19, %v6575_v30  ;;  %vm9055_vm4 = vcmp.eq.s32.totalorder %v7602_v25, %v6449_v22  ;;  %v1068_v30 = vadd.s32 208, %v6269_v3 }
 0x245   : > { %5873 = vmatpush1.bf16.msk.msra.mxu0 %vm7776_vm0, %v6222_v1  ;;  %vm9053_vm1 = vmmov %vm9052_vm2  ;;  %vm9054_vm0 = vcmp.eq.s32.totalorder %v7592_v46, %v6449_v22  ;;  %5657 = vmatpush1.bf16.msk.msra.mxu1 %vm5656_vm11, %v6222_v1  ;;  %v559_v49 = vadd.f32 %v534_v12, %v461_v13  ;;  %vm9058_vm8 = vcmp.eq.s32.totalorder %v7605_v4, %v6454_v29  ;;  %v1208_v2 = vadd.s32 1328, %v6269_v3 }
 0x246   : > { %v632_v15 = vsel %vm9053_vm1, %v606_v14, %v608_v19  ;;  %5875 = vmatprep.subr.msk.bf16.mxu0 %vm7794_vm15, %v6222_v1  ;;  %vm7828_vm7 = vmpackc.low %vm9055_vm4, %vm9054_vm0  ;;  %v706_v63 = vpop.permute.xlu0 %705  ;;  %vm1296_vm2 = vcmp.eq.s32.totalorder %v1066_v39, %v6454_v29  ;;  %vm1298_vm1 = vcmp.eq.s32.totalorder %v1067_v33, %v6454_v29  ;;  %vm1295_vm11 = vcmp.eq.s32.totalorder %v1066_v39, %v6449_v22 }
 0x247   : > { %vm7840_vm15 = vmpackc.low %vm1518_vm13, %vm9058_vm8  ;;  %vm9061_vm0 = vcmask 1014784   ;;  %vm1297_vm13 = vcmp.eq.s32.totalorder %v1067_v33, %v6449_v22  ;;  %v658_v9 = vadd.f32 %v633_v57, %v560_v5  ;;  %v657_v35 = vadd.f32 %v632_v15, %v559_v49 }
 0x248   : > { %v731_v25 = vsel %vm9061_vm0, %v706_v63, %v6611_v10  ;;  %vm5658_vm9 = vmpackc.low %vm1298_vm1, %vm1296_vm2  ;;  %v704_v20 = vpop.permute.xlu1 %703  ;;  %v1069_v10 = vadd.s32 216, %v6269_v3  ;;  %vm9062_vm4 = vcmask 1014784   ;;  %vm9063_vm2 = vcmp.eq.s32.totalorder %v7605_v4, %v6449_v22 }
 0x249   : > { %5877 = vmatpush1.bf16.msk.msra.mxu0 %vm7828_vm7, %v6222_v1  ;;  %5659 = vmatprep.subr.msk.bf16.mxu1 %vm5658_vm9, %v6222_v1  ;;  %vm5660_vm0 = vmpackc.low %vm1297_vm13, %vm1295_vm11  ;;  %v730_v0 = vsel %vm9062_vm4, %v704_v20, %v706_v63  ;;  %vm9064_vm7 = vcmp.eq.s32.totalorder %v7661_v59, %v6449_v22  ;;  %v7876_v19 = vadd.s32 1128, %v6269_v3  ;;  %vm1300_vm9 = vcmp.eq.s32.totalorder %v1068_v30, %v6454_v29 }
 0x24a   : > { %5879 = vmatprep.subr.msk.bf16.mxu0 %vm7840_vm15, %v6222_v1  ;;  %vm7871_vm1 = vmpackc.low %vm9064_vm7, %vm9063_vm2  ;;  %5661 = vmatpush1.bf16.msk.msra.mxu1 %vm5660_vm0, %v6222_v1  ;;  %vm1299_vm11 = vcmp.eq.s32.totalorder %v1068_v30, %v6449_v22  ;;  %v7881_v24 = vadd.f32 %v731_v25, %v658_v9  ;;  %v7883_v27 = vadd.f32 %v730_v0, %v657_v35  ;;  %v434_v4 = vpop.permute.xlu0 %433  ;;  %vm9070_vm7 = vcmask 1039360  }
 0x24b   : > { %vm9067_vm4 = vcmp.eq.s32.totalorder %v7733_v56, %v6454_v29  ;;  %vm1302_vm0 = vcmp.eq.s32.totalorder %v1069_v10, %v6454_v29  ;;  %vm1301_vm2 = vcmp.eq.s32.totalorder %v1069_v10, %v6449_v22  ;;  %v447_v12 = vsel %vm9070_vm7, %v7532_v48, %v434_v4 }
 0x24c   : > { %vm7891_vm13 = vmpackc.low %vm1522_vm3, %vm9067_vm4  ;;  %v473_v13 = vadd.f32 %v434_v4, %v7570_v55  ;;  %vm1525_vm15 = vcmp.eq.s32.totalorder %v7763_v21, %v6449_v22  ;;  %vm1528_vm8 = vcmp.eq.s32.totalorder %v7783_v41, %v6454_v29  ;;  %v472_v14 = vadd.f32 %v447_v12, %v7556_v60  ;;  %v532_v39 = vpop.permute.xlu1 %531 }
 0x24d   : > { %vm5662_vm12 = vmpackc.low %vm1302_vm0, %vm1300_vm9  ;;  %v6178_v33 = vpack.i.bf16 %v7883_v27, %v7881_v24  ;;  %5881 = vmatpush1.bf16.msk.msra.mxu0 %vm7871_vm1, %v6222_v1  ;;  %v7911_v48 = vadd.s32 1136, %v6269_v3  ;;  %vm9073_vm9 = vcmask 1031168   ;;  %vm9074_vm1 = vcmp.eq.s32.totalorder %v7733_v56, %v6449_v22 }
 0x24e   : > { %vm7915_vm3 = vmpackc.low %vm1301_vm2, %vm1299_vm11  ;;  %v545_v60 = vsel %vm9073_vm9, %v7540_v47, %v532_v39  ;;  %v571_v5 = vadd.f32 %v532_v39, %v473_v13  ;;  %5883 = vmatprep.subr.msk.bf16.mxu0 %vm7891_vm13, %v6222_v1  ;;  %vm9075_vm4 = vcmp.eq.s32.totalorder %v7747_v18, %v6449_v22  ;;  %vm1530_vm11 = vcmp.eq.s32.totalorder %v7876_v19, %v6454_v29  ;;  %v630_v56 = vpop.permute.xlu0 %629 }
 0x24f   : > { %vm7930_vm0 = vmpackc.low %vm9075_vm4, %vm9074_vm1  ;;  %5663 = vmatprep.subr.msk.bf16.mxu1 %vm5662_vm12, %v6222_v1  ;;  %v1070_v47 = vadd.s32 224, %v6269_v3  ;;  %v570_v15 = vadd.f32 %v545_v60, %v472_v14  ;;  %6179 = vrot.lane.b32.xlu1 %v6178_v33, %s6221_s9  ;;  %vm9078_vm13 = vcmp.eq.s32.totalorder %v7760_v32, %v6454_v29  ;;  %vm9079_vm2 = vcmp.eq.s32.totalorder %v7763_v21, %v6454_v29  ;;  %v2447_v60 = vld [vmem:[%s8956_s3] sm:$0xff] }
 0x250   : > { %6174 = vrot.lane.b32.xlu0 %v6178_v33, %s6219_s7  ;;  %vm5886_vm7 = vmpackc.low %vm9079_vm2, %vm9078_vm13  ;;  %vm1527_vm9 = vcmp.eq.s32.totalorder %v7783_v41, %v6449_v22  ;;  %v1185_v18 = vadd.s32 1144, %v6269_v3  ;;  %vm9080_vm12 = vcmask 1022976   ;;  %vm9081_vm1 = vcmp.eq.s32.totalorder %v7760_v32, %v6449_v22  ;;  %5665 = vmatpush1.bf16.msk.msra.mxu1 %vm7915_vm3, %v6222_v1 }
 0x251   : > { %v643_v30 = vsel %vm9080_vm12, %v7548_v26, %v630_v56  ;;  %vm7958_vm4 = vmpackc.low %vm1525_vm15, %vm9081_vm1  ;;  %vm1304_vm2 = vcmp.eq.s32.totalorder %v1070_v47, %v6454_v29  ;;  %vm1303_vm12 = vcmp.eq.s32.totalorder %v1070_v47, %v6449_v22  ;;  %5885 = vmatpush1.bf16.msk.msra.mxu0 %vm7930_vm0, %v6222_v1  ;;  %vm1306_vm3 = vcmp.eq.s32.totalorder %v1071_v62, %v6454_v29 }
 0x252   : > { %vm7978_vm15 = vmpackc.low %vm1530_vm11, %vm1528_vm8  ;;  %vm1305_vm1 = vcmp.eq.s32.totalorder %v1071_v62, %v6449_v22  ;;  %v669_v32 = vadd.f32 %v630_v56, %v571_v5  ;;  %5887 = vmatprep.subr.msk.bf16.mxu0 %vm5886_vm7, %v6222_v1  ;;  %vm1532_vm0 = vcmp.eq.s32.totalorder %v7911_v48, %v6454_v29  ;;  %v1072_v21 = vadd.s32 240, %v6269_v3  ;;  %v728_v25 = vpop.permute.xlu0 %727 }
 0x253   : > { %vm5666_vm13 = vmpackc.low %vm1306_vm3, %vm1304_vm2  ;;  %v1073_v63 = vadd.s32 248, %v6269_v3  ;;  %v668_v46 = vadd.f32 %v643_v30, %v570_v15  ;;  %6189 = vrot.lane.b32.xlu1 %v6178_v33, %s6224_s11  ;;  %vm1534_vm8 = vcmp.eq.s32.totalorder %v1185_v18, %v6454_v29  ;;  %v1186_v9 = vadd.s32 1152, %v6269_v3 }
 0x254   : > { %6184 = vrot.lane.b32.xlu0 %v6178_v33, %s6223_s10  ;;  %v1187_v35 = vadd.s32 1160, %v6269_v3  ;;  %vm5668_vm11 = vmpackc.low %vm1305_vm1, %vm1303_vm12  ;;  %vm9086_vm7 = vcmask 1014784   ;;  %v767_v10 = vadd.f32 %v728_v25, %v669_v32  ;;  %5667 = vmatprep.subr.msk.bf16.mxu1 %vm5666_vm13, %v6222_v1  ;;  %v1234_v0 = vadd.s32 1536, %v6269_v3 }
 0x255   : > { %v741_v20 = vsel %vm9086_vm7, %v7599_v36, %v728_v25  ;;  %5889 = vmatpush1.bf16.msk.msra.mxu0 %vm7958_vm4, %v6222_v1  ;;  %vm9087_vm12 = vcmp.eq.s32.totalorder %v7876_v19, %v6449_v22  ;;  %5669 = vmatpush1.bf16.msk.msra.mxu1 %vm5668_vm11, %v6222_v1  ;;  %vm1308_vm13 = vcmp.eq.s32.totalorder %v1072_v21, %v6454_v29  ;;  %v1235_v4 = vadd.s32 1544, %v6269_v3 }
 0x256   : > { %v8002_v42 = vadd.f32 %v741_v20, %v668_v46  ;;  %vm8013_vm3 = vmpackc.low %vm9087_vm12, %vm1527_vm9  ;;  %vm1310_vm1 = vcmp.eq.s32.totalorder %v1073_v63, %v6454_v29  ;;  %vm9090_vm7 = vcmask 523264   ;;  %5891 = vmatprep.subr.msk.bf16.mxu0 %vm7978_vm15, %v6222_v1  ;;  %vm1307_vm11 = vcmp.eq.s32.totalorder %v1072_v21, %v6449_v22 }
 0x257   : > { %v8022_v59 = vsel %vm9090_vm7, %v767_v10, 0.0  ;;  %vm8032_vm9 = vmpackc.low %vm1534_vm8, %vm1532_vm0  ;;  %vm1309_vm12 = vcmp.eq.s32.totalorder %v1073_v63, %v6449_v22  ;;  %vm1538_vm7 = vcmp.eq.s32.totalorder %v1187_v35, %v6454_v29  ;;  %v1188_v19 = vadd.s32 1168, %v6269_v3 }
 0x258   : > { %807 = vrot.lane.b32.xlu1 %v8022_v59, %s6219_s7  ;;  %805 = vrot.lane.b32.xlu0 %v8002_v42, %s6219_s7  ;;  %vm5670_vm0 = vmpackc.low %vm1310_vm1, %vm1308_vm13  ;;  %v1189_v12 = vadd.s32 1176, %v6269_v3  ;;  %vm1632_vm4 = vcmp.eq.s32.totalorder %v1234_v0, %v6454_v29  ;;  %vm1634_vm2 = vcmp.eq.s32.totalorder %v1235_v4, %v6454_v29  ;;  %vm9093_vm15 = vcmp.eq.s32.totalorder %v7911_v48, %v6449_v22 }
 0x259   : > { %5671 = vmatprep.subr.msk.bf16.mxu1 %vm5670_vm0, %v6222_v1  ;;  %vm5672_vm8 = vmpackc.low %vm1309_vm12, %vm1307_vm11  ;;  %5893 = vmatpush1.bf16.msk.msra.mxu0 %vm8013_vm3, %v6222_v1  ;;  %vm9094_vm13 = vcmp.eq.s32.totalorder %v1185_v18, %v6449_v22  ;;  %vm1631_vm11 = vcmp.eq.s32.totalorder %v1234_v0, %v6449_v22  ;;  %vm1633_vm12 = vcmp.eq.s32.totalorder %v1235_v4, %v6449_v22  ;;  %v1190_v14 = vadd.s32 1184, %v6269_v3 }
 0x25a   : > { %vm8058_vm1 = vmpackc.low %vm9094_vm13, %vm9093_vm15  ;;  %5673 = vmatpush1.bf16.msk.msra.mxu1 %vm5672_vm8, %v6222_v1  ;;  %5895 = vmatprep.subr.msk.bf16.mxu0 %vm8032_vm9, %v6222_v1  ;;  %vm9097_vm3 = vcmp.eq.s32.totalorder %v1186_v9, %v6454_v29  ;;  %vm1535_vm15 = vcmp.eq.s32.totalorder %v1186_v9, %v6449_v22  ;;  %vm1537_vm8 = vcmp.eq.s32.totalorder %v1187_v35, %v6449_v22  ;;  %v1191_v39 = vadd.s32 1192, %v6269_v3 }
 0x25b   : > { %vm5898_vm0 = vmpackc.low %vm1538_vm7, %vm9097_vm3  ;;  %vm1540_vm10 = vcmp.eq.s32.totalorder %v1188_v19, %v6454_v29  ;;  %vm1542_vm6 = vcmp.eq.s32.totalorder %v1189_v12, %v6454_v29  ;;  %vm1539_vm7 = vcmp.eq.s32.totalorder %v1188_v19, %v6449_v22  ;;  %v1192_v48 = vadd.s32 1200, %v6269_v3 }
 0x25c   : > { %871 = vrot.lane.b32.xlu1 %v8022_v59, %s6221_s9  ;;  %869 = vrot.lane.b32.xlu0 %v8002_v42, %s6221_s9  ;;  %vm5994_vm13 = vmpackc.low %vm1634_vm2, %vm1632_vm4  ;;  %vm1546_vm3 = vcmp.eq.s32.totalorder %v1191_v39, %v6454_v29  ;;  %v1193_v55 = vadd.s32 1208, %v6269_v3  ;;  %v1194_v5 = vadd.s32 1216, %v6269_v3  ;;  %v1195_v57 = vadd.s32 1224, %v6269_v3 }
 0x25d   : > { %5995 = vmatprep.subr.msk.bf16.mxu1 %vm5994_vm13, %v6222_v1  ;;  %vm8081_vm9 = vmpackc.low %vm1633_vm12, %vm1631_vm11  ;;  %5897 = vmatpush1.bf16.msk.msra.mxu0 %vm8058_vm1, %v6222_v1  ;;  %vm1541_vm11 = vcmp.eq.s32.totalorder %v1189_v12, %v6449_v22  ;;  %vm1544_vm12 = vcmp.eq.s32.totalorder %v1190_v14, %v6454_v29  ;;  %v1196_v47 = vadd.s32 1232, %v6269_v3  ;;  %v1197_v15 = vadd.s32 1240, %v6269_v3 }
 0x25e   : > { %5899 = vmatprep.subr.msk.bf16.mxu0 %vm5898_vm0, %v6222_v1  ;;  %vm5900_vm2 = vmpackc.low %vm1537_vm8, %vm1535_vm15  ;;  %vm1545_vm0 = vcmp.eq.s32.totalorder %v1191_v39, %v6449_v22  ;;  %vm1548_vm15 = vcmp.eq.s32.totalorder %v1192_v48, %v6454_v29  ;;  %vm1550_vm8 = vcmp.eq.s32.totalorder %v1193_v55, %v6454_v29  ;;  %v1198_v56 = vadd.s32 1248, %v6269_v3 }
 0x25f   : > { %vm5902_vm4 = vmpackc.low %vm1542_vm6, %vm1540_vm10  ;;  %vm1543_vm10 = vcmp.eq.s32.totalorder %v1190_v14, %v6449_v22  ;;  %v1199_v18 = vadd.s32 1256, %v6269_v3  ;;  %v1200_v62 = vadd.s32 1264, %v6269_v3  ;;  %v1201_v30 = vadd.s32 1272, %v6269_v3 }
 0x260   : > { %935 = vrot.lane.b32.xlu1 %v8022_v59, %s6223_s10  ;;  %933 = vrot.lane.b32.xlu0 %v8002_v42, %s6223_s10  ;;  %vm5904_vm1 = vmpackc.low %vm1541_vm11, %vm1539_vm7  ;;  %vm1549_vm7 = vcmp.eq.s32.totalorder %v1193_v55, %v6449_v22  ;;  %vm1552_vm11 = vcmp.eq.s32.totalorder %v1194_v5, %v6454_v29  ;;  %v1202_v49 = vadd.s32 1280, %v6269_v3  ;;  %v1203_v26 = vadd.s32 1288, %v6269_v3 }
 0x261   : > { %5901 = vmatpush1.bf16.msk.msra.mxu0 %vm5900_vm2, %v6222_v1  ;;  %vm5906_vm6 = vmpackc.low %vm1546_vm3, %vm1544_vm12  ;;  %vm1554_vm12 = vcmp.eq.s32.totalorder %v1195_v57, %v6454_v29  ;;  %v1205_v41 = vadd.s32 1304, %v6269_v3  ;;  %v9102_v19 = vunpack.i.h.bf16 %v7637_v38  ;;  %v6225_v33 = vmov 0.0  }
 0x262   : > { %5903 = vmatprep.subr.msk.bf16.mxu0 %vm5902_vm4, %v6222_v1  ;;  %vm5908_vm13 = vmpackc.low %vm1545_vm0, %vm1543_vm10  ;;  %vm1547_vm4 = vcmp.eq.s32.totalorder %v1192_v48, %v6449_v22  ;;  %vm1553_vm10 = vcmp.eq.s32.totalorder %v1195_v57, %v6449_v22  ;;  %vm1556_vm0 = vcmp.eq.s32.totalorder %v1196_v47, %v6454_v29  ;;  %v1206_v57 = vadd.s32 1312, %v6269_v3 }
 0x263   : > { %vm5910_vm2 = vmpackc.low %vm1550_vm8, %vm1548_vm15  ;;  %vm1558_vm15 = vcmp.eq.s32.totalorder %v1197_v15, %v6454_v29 }
 0x264   : > { %1000 = vrot.lane.b32.xlu1 %v8022_v59, %s6224_s11  ;;  %998 = vrot.lane.b32.xlu0 %v8002_v42, %s6224_s11  ;;  %vm5912_vm3 = vmpackc.low %vm1549_vm7, %vm1547_vm4  ;;  %vm1557_vm4 = vcmp.eq.s32.totalorder %v1197_v15, %v6449_v22  ;;  %vm1560_vm7 = vcmp.eq.s32.totalorder %v1198_v56, %v6454_v29 }
 0x265   : > { %5905 = vmatpush1.bf16.msk.msra.mxu0 %vm5904_vm1, %v6222_v1  ;;  %vm5914_vm1 = vmpackc.low %vm1554_vm12, %vm1552_vm11  ;;  %vm1562_vm11 = vcmp.eq.s32.totalorder %v1199_v18, %v6454_v29 }
 0x266   : > { %5907 = vmatprep.subr.msk.bf16.mxu0 %vm5906_vm6, %v6222_v1  ;;  %vm1551_vm6 = vcmp.eq.s32.totalorder %v1194_v5, %v6449_v22 }
 0x267   : > { %vm5916_vm8 = vmpackc.low %vm1553_vm10, %vm1551_vm6  ;;  %vm1561_vm6 = vcmp.eq.s32.totalorder %v1199_v18, %v6449_v22  ;;  %vm1564_vm10 = vcmp.eq.s32.totalorder %v1200_v62, %v6454_v29  ;;  %v1210_v18 = vadd.s32 1344, %v6269_v3 }
 0x268   : > { %2450 = vperm.xlu0 %6091, %v2447_v60  }
 0x269   : > { %5909 = vmatpush1.bf16.msk.msra.mxu0 %vm5908_vm13, %v6222_v1  ;;  %vm5918_vm13 = vmpackc.low %vm1558_vm15, %vm1556_vm0  ;;  %vm1566_vm0 = vcmp.eq.s32.totalorder %v1201_v30, %v6454_v29 }
 0x26a   : > { %5911 = vmatprep.subr.msk.bf16.mxu0 %vm5910_vm2, %v6222_v1  ;;  %vm1555_vm2 = vcmp.eq.s32.totalorder %v1196_v47, %v6449_v22  ;;  %v1207_v47 = vadd.s32 1320, %v6269_v3 }
 0x26b   : > { %vm5920_vm12 = vmpackc.low %vm1557_vm4, %vm1555_vm2  ;;  %vm1565_vm2 = vcmp.eq.s32.totalorder %v1201_v30, %v6449_v22  ;;  %vm1568_vm4 = vcmp.eq.s32.totalorder %v1202_v49, %v6454_v29  ;;  %v8225_v30 = vadd.s32 1360, %v6269_v3 }
 0x26d   : > { %5913 = vmatpush1.bf16.msk.msra.mxu0 %vm5912_vm3, %v6222_v1  ;;  %vm5922_vm3 = vmpackc.low %vm1562_vm11, %vm1560_vm7  ;;  %vm1570_vm7 = vcmp.eq.s32.totalorder %v1203_v26, %v6454_v29 }
 0x26e   : > { %5915 = vmatprep.subr.msk.bf16.mxu0 %vm5914_vm1, %v6222_v1  ;;  %vm1559_vm1 = vcmp.eq.s32.totalorder %v1198_v56, %v6449_v22  ;;  %vm5930_vm14 = vmpackc.low %vm1570_vm7, %vm1568_vm4 }
 0x26f   : > { %vm5924_vm15 = vmpackc.low %vm1561_vm6, %vm1559_vm1  ;;  %vm1567_vm6 = vcmp.eq.s32.totalorder %v1202_v49, %v6449_v22  ;;  %v8229_v49 = vadd.s32 1368, %v6269_v3 }
 0x271   : > { %5917 = vmatpush1.bf16.msk.msra.mxu0 %vm5916_vm8, %v6222_v1  ;;  %vm5926_vm8 = vmpackc.low %vm1566_vm0, %vm1564_vm10  ;;  %vm1569_vm10 = vcmp.eq.s32.totalorder %v1203_v26, %v6449_v22  ;;  %vm9105_vm0 = vcmask 998400  }
 0x272   : > { %5919 = vmatprep.subr.msk.bf16.mxu0 %vm5918_vm13, %v6222_v1  ;;  %vm1563_vm13 = vcmp.eq.s32.totalorder %v1200_v62, %v6449_v22  ;;  %vm5932_vm7 = vmpackc.low %vm1569_vm10, %vm1567_vm6  ;;  %v1211_v62 = vadd.s32 1352, %v6269_v3 }
 0x273   : > { %vm5928_vm11 = vmpackc.low %vm1565_vm2, %vm1563_vm13  ;;  %vm1574_vm13 = vcmp.eq.s32.totalorder %v1205_v41, %v6454_v29  ;;  %vm9107_vm2 = vcmask 982016  }
 0x274   : > { %vm9108_vm4 = vmmov %vm9107_vm2 }
 0x275   : > { %5921 = vmatpush1.bf16.msk.msra.mxu0 %vm5920_vm12, %v6222_v1  ;;  %vm9100_vm12 = vcmask 1031168  }
 0x276   : > { %5923 = vmatprep.subr.msk.bf16.mxu0 %vm5922_vm3, %v6222_v1  ;;  %vm9101_vm3 = vmmov %vm9100_vm12 }
 0x279   : > { %5925 = vmatpush1.bf16.msk.msra.mxu0 %vm5924_vm15, %v6222_v1  ;;  %vm9106_vm15 = vmmov %vm9105_vm0 }
 0x27a   : > { %5927 = vmatprep.subr.msk.bf16.mxu0 %vm5926_vm8, %v6222_v1 }
 0x27d   : > { %5929 = vmatpush1.bf16.msk.msra.mxu0 %vm5928_vm11, %v6222_v1 }
 0x27e   : > { %5931 = vmatprep.subr.msk.bf16.mxu0 %vm5930_vm14, %v6222_v1  ;;  %vm9103_vm14 = vcmask 1014784  }
 0x27f   : > { %vm9104_vm1 = vmmov %vm9103_vm14 }
 0x2a8   : > { %v8156_v32 = vpop.permute.xlu1 %6154  ;;  %v8160_v46 = vpop.permute.xlu0 %6164 }
 0x2a9   : > { %v6157_v21 = vunpack.i.h.bf16 %v8156_v32  ;;  %v6156_v63 = vunpack.i.l.bf16 %v8156_v32  ;;  %v6167_v20 = vunpack.i.h.bf16 %v8160_v46  ;;  %v6166_v10 = vunpack.i.l.bf16 %v8160_v46 }
 0x2ab   : > { %v817_v25 = vsel %vm9100_vm12, %v6137_v6, %v6156_v63  ;;  %v818_v9 = vsel %vm9101_vm3, %v6156_v63, %v6157_v21  ;;  %v1204_v6 = vadd.s32 1296, %v6269_v3  ;;  %vm1573_vm3 = vcmp.eq.s32.totalorder %v1205_v41, %v6449_v22 }
 0x2ac   : > { %v8168_v35 = vpop.permute.xlu1 %6159  ;;  %v842_v4 = vmax.f32 %v6974_v34, %v817_v25  ;;  %v843_v54 = vmax.f32 %v7620_v43, %v818_v9  ;;  %v946_v34 = vsel %vm9105_vm0, %v6147_v50, %v6166_v10  ;;  %v947_v43 = vsel %vm9106_vm15, %v6166_v10, %v6167_v20 }
 0x2ad   : > { %v6162_v0 = vunpack.i.h.bf16 %v8168_v35  ;;  %v6161_v36 = vunpack.i.l.bf16 %v8168_v35  ;;  %vm1572_vm8 = vcmp.eq.s32.totalorder %v1204_v6, %v6454_v29  ;;  %vm1571_vm12 = vcmp.eq.s32.totalorder %v1204_v6, %v6449_v22 }
 0x2ae   : > { %vm5934_vm11 = vmpackc.low %vm1574_vm13, %vm1572_vm8  ;;  %vm1575_vm0 = vcmp.eq.s32.totalorder %v1206_v57, %v6449_v22  ;;  %vm1577_vm15 = vcmp.eq.s32.totalorder %v1207_v47, %v6449_v22  ;;  %vm1580_vm8 = vcmp.eq.s32.totalorder %v1208_v2, %v6454_v29  ;;  %v8240_v63 = vadd.s32 1376, %v6269_v3 }
 0x2af   : > { %v881_v12 = vsel %vm9103_vm14, %v9102_v19, %v6161_v36  ;;  %v882_v13 = vsel %vm9104_vm1, %v6161_v36, %v6162_v0  ;;  %vm1576_vm14 = vcmp.eq.s32.totalorder %v1206_v57, %v6454_v29  ;;  %vm1578_vm1 = vcmp.eq.s32.totalorder %v1207_v47, %v6454_v29  ;;  %vm5936_vm6 = vmpackc.low %vm1573_vm3, %vm1571_vm12 }
 0x2b0   : > { %v906_v14 = vmax.f32 %v842_v4, %v881_v12  ;;  %v907_v39 = vmax.f32 %v843_v54, %v882_v13  ;;  %v8184_v48 = vpop.permute.xlu1 %6169  ;;  %vm5938_vm10 = vmpackc.low %vm1578_vm1, %vm1576_vm14  ;;  %vm1584_vm12 = vcmp.eq.s32.totalorder %v1210_v18, %v6454_v29  ;;  %vm1586_vm3 = vcmp.eq.s32.totalorder %v1211_v62, %v6454_v29 }
 0x2b1   : > { %v6172_v38 = vunpack.i.h.bf16 %v8184_v48  ;;  %v6171_v55 = vunpack.i.l.bf16 %v8184_v48  ;;  %vm1583_vm14 = vcmp.eq.s32.totalorder %v1210_v18, %v6449_v22  ;;  %vm1585_vm1 = vcmp.eq.s32.totalorder %v1211_v62, %v6449_v22 }
 0x2b2   : > { %v971_v60 = vmax.f32 %v906_v14, %v946_v34  ;;  %v972_v5 = vmax.f32 %v907_v39, %v947_v43  ;;  %v8255_v10 = vadd.s32 1384, %v6269_v3  ;;  %v8277_v19 = vadd.s32 1552, %v6269_v3 }
 0x2b3   : > { %v1011_v37 = vsel %vm9107_vm2, %v6152_v11, %v6171_v55  ;;  %v1012_v50 = vsel %vm9108_vm4, %v6171_v55, %v6172_v38  ;;  %v1209_v11 = vadd.s32 1336, %v6269_v3  ;;  %vm5940_vm2 = vmpackc.low %vm1577_vm15, %vm1575_vm0  ;;  %vm1587_vm0 = vcmp.eq.s32.totalorder %v8225_v30, %v6449_v22 }
 0x2b4   : > { %v1036_v15 = vmax.f32 %v971_v60, %v1011_v37  ;;  %v1037_v56 = vmax.f32 %v972_v5, %v1012_v50  ;;  %vm1591_vm15 = vcmp.eq.s32.totalorder %v8240_v63, %v6449_v22  ;;  %v8280_v12 = vadd.s32 1560, %v6269_v3 }
 0x2b5   : > { %vm1582_vm13 = vcmp.eq.s32.totalorder %v1209_v11, %v6454_v29  ;;  %v8286_v39 = vadd.s32 1392, %v6269_v3  ;;  %v8289_v34 = vadd.s32 1400, %v6269_v3  ;;  %v1241_v35 = vadd.s32 1592, %v6269_v3 }
 0x2b6   : > { %2804 = vmatprep.mubr.f32.mxu0 %v1037_v56  ;;  %vm8232_vm4 = vmpackc.low %vm1582_vm13, %vm1580_vm8  ;;  %v8317_v56 = vadd.s32 1568, %v6269_v3 }
 0x2b7   : > { %2805 = vmatmul.mubr.f32.vlgmr.msra.gmra.mrb[0].mxu0 %v1036_v15  ;;  %vm8268_vm13 = vmpackc.low %vm1586_vm3, %vm1584_vm12 }
 0x2b8   : > { %5933 = vmatpush1.bf16.msk.msra.mxu0 %vm5932_vm7, %v6222_v1  ;;  %vm1579_vm7 = vcmp.eq.s32.totalorder %v1208_v2, %v6449_v22  ;;  %vm5948_vm3 = vmpackc.low %vm1585_vm1, %vm1583_vm14  ;;  %vm1593_vm1 = vcmp.eq.s32.totalorder %v8255_v10, %v6449_v22 }
 0x2b9   : > { %5935 = vmatprep.subr.msk.bf16.mxu0 %vm5934_vm11, %v6222_v1  ;;  %vm1581_vm11 = vcmp.eq.s32.totalorder %v1209_v11, %v6449_v22 }
 0x2ba   : > { %vm5944_vm8 = vmpackc.low %vm1581_vm11, %vm1579_vm7  ;;  %vm9115_vm11 = vcmask 1014784  }
 0x2bb   : > { %vm9116_vm12 = vmmov %vm9115_vm11 }
 0x2bc   : > { %5937 = vmatpush1.bf16.msk.msra.mxu0 %vm5936_vm6, %v6222_v1  ;;  %vm1588_vm6 = vcmp.eq.s32.totalorder %v8225_v30, %v6454_v29  ;;  %v1230_v30 = vadd.s32 1504, %v6269_v3 }
 0x2bd   : > { %5939 = vmatprep.subr.msk.bf16.mxu0 %vm5938_vm10, %v6222_v1  ;;  %vm1590_vm10 = vcmp.eq.s32.totalorder %v8229_v49, %v6454_v29 }
 0x2c0   : > { %5941 = vmatpush1.bf16.msk.msra.mxu0 %vm5940_vm2, %v6222_v1  ;;  %vm1592_vm2 = vcmp.eq.s32.totalorder %v8240_v63, %v6454_v29 }
 0x2c1   : > { %v6180_v25 = vpop.permute.xlu1 %6179  ;;  %5943 = vmatprep.subr.msk.bf16.mxu0 %vm8232_vm4, %v6222_v1  ;;  %vm9113_vm4 = vcmask 1031168  }
 0x2c2   : > { %v6175_v9 = vpop.permute.xlu0 %6174  ;;  %v6182_v36 = vunpack.i.h.bf16 %v6180_v25  ;;  %v6181_v4 = vunpack.i.l.bf16 %v6180_v25  ;;  %vm9114_vm7 = vmmov %vm9113_vm4 }
 0x2c3   : > { %v6177_v54 = vunpack.i.h.bf16 %v6175_v9  ;;  %v6176_v6 = vunpack.i.l.bf16 %v6175_v9  ;;  %v8332_v9 = vadd.s32 1576, %v6269_v3 }
 0x2c4   : > { %v873_v43 = vsel %vm9115_vm11, %v6182_v36, %v6181_v4  ;;  %5945 = vmatpush1.bf16.msk.msra.mxu0 %vm5944_vm8, %v6222_v1  ;;  %v874_v50 = vsel %vm9116_vm12, %v6181_v4, %v6751_v45  ;;  %vm8310_vm8 = vmpackc.low %vm1590_vm10, %vm1588_vm6  ;;  %vm1636_vm6 = vcmp.eq.s32.totalorder %v8277_v19, %v6454_v29  ;;  %vm1638_vm10 = vcmp.eq.s32.totalorder %v8280_v12, %v6454_v29 }
 0x2c5   : > { %v809_v13 = vsel %vm9113_vm4, %v6177_v54, %v6176_v6  ;;  %v810_v14 = vsel %vm9114_vm7, %v6176_v6, %v6743_v40  ;;  %v6190_v60 = vpop.permute.xlu1 %6189  ;;  %5947 = vmatprep.subr.msk.bf16.mxu0 %vm8268_vm13, %v6222_v1  ;;  %vm1594_vm13 = vcmp.eq.s32.totalorder %v8255_v10, %v6454_v29  ;;  %vm9119_vm4 = vcmask 998400  }
 0x2c6   : > { %v834_v55 = vmax.f32 %v7883_v27, %v809_v13  ;;  %v6185_v5 = vpop.permute.xlu0 %6184  ;;  %v835_v37 = vmax.f32 %v7881_v24, %v810_v14  ;;  %v6192_v40 = vunpack.i.h.bf16 %v6190_v60  ;;  %v6191_v57 = vunpack.i.l.bf16 %v6190_v60  ;;  %vm9120_vm14 = vmmov %vm9119_vm4 }
 0x2c7   : > { %v6187_v47 = vunpack.i.h.bf16 %v6185_v5  ;;  %v6186_v15 = vunpack.i.l.bf16 %v6185_v5  ;;  %vm9121_vm11 = vcmp.eq.s32.totalorder %v8229_v49, %v6449_v22  ;;  %v8371_v49 = vadd.s32 1416, %v6269_v3 }
 0x2c8   : > { %v899_v24 = vmax.f32 %v835_v37, %v874_v50  ;;  %v898_v27 = vmax.f32 %v834_v55, %v873_v43  ;;  %5949 = vmatpush1.bf16.msk.msra.mxu0 %vm5948_vm3, %v6222_v1  ;;  %vm5952_vm12 = vmpackc.low %vm9121_vm11, %vm1587_vm0  ;;  %vm9122_vm3 = vcmask 982016   ;;  %vm1637_vm0 = vcmp.eq.s32.totalorder %v8280_v12, %v6449_v22 }
 0x2c9   : > { %v938_v2 = vsel %vm9119_vm4, %v6187_v47, %v6186_v15  ;;  %v939_v11 = vsel %vm9120_vm14, %v6186_v15, %v6768_v53  ;;  %5951 = vmatprep.subr.msk.bf16.mxu0 %vm8310_vm8, %v6222_v1  ;;  %v1004_v36 = vsel %vm9122_vm3, %v6191_v57, %v6782_v16  ;;  %vm9123_vm4 = vmmov %vm9122_vm3  ;;  %vm1635_vm14 = vcmp.eq.s32.totalorder %v8277_v19, %v6449_v22 }
 0x2ca   : > { %v8327_v18 = vpop.permute.xlu1 %807  ;;  %v806_v62 = vpop.permute.xlu0 %805  ;;  %v964_v26 = vmax.f32 %v899_v24, %v939_v11  ;;  %v963_v25 = vmax.f32 %v898_v27, %v938_v2  ;;  %v1003_v4 = vsel %vm9123_vm4, %v6192_v40, %v6191_v57  ;;  %vm8357_vm8 = vmpackc.low %vm1594_vm13, %vm1592_vm2  ;;  %vm1598_vm11 = vcmp.eq.s32.totalorder %v8289_v34, %v6454_v29 }
 0x2cb   : > { %v819_v53 = vsel %vm9114_vm7, %v6157_v21, %v806_v62  ;;  %vm1596_vm7 = vcmp.eq.s32.totalorder %v8286_v39, %v6454_v29  ;;  %v8368_v16 = vadd.s32 1408, %v6269_v3  ;;  %vm8383_vm2 = vmpackc.low %vm1638_vm10, %vm1636_vm6  ;;  %vm1640_vm13 = vcmp.eq.s32.totalorder %v8317_v56, %v6454_v29 }
 0x2cc   : > { %v1029_v32 = vmax.f32 %v964_v26, %v1004_v36  ;;  %v1028_v21 = vmax.f32 %v963_v25, %v1003_v4  ;;  %v844_v54 = vmax.f32 %v7622_v17, %v819_v53  ;;  %5953 = vmatpush1.bf16.msk.msra.mxu0 %vm5952_vm12, %v6222_v1  ;;  %vm1642_vm12 = vcmp.eq.s32.totalorder %v8332_v9, %v6454_v29  ;;  %vm8405_vm6 = vmpackc.low %vm1593_vm1, %vm1591_vm15 }
 0x2cd   : > { %vm9128_vm3 = vcmask 1031168   ;;  %vm9129_vm4 = vcmask 1014784   ;;  %5955 = vmatprep.subr.msk.bf16.mxu0 %vm8357_vm8, %v6222_v1  ;;  %v1240_v55 = vadd.s32 1584, %v6269_v3  ;;  %vm8420_vm10 = vmpackc.low %vm1598_vm11, %vm1596_vm7  ;;  %vm1595_vm15 = vcmp.eq.s32.totalorder %v8286_v39, %v6449_v22 }
 0x2ce   : > { %v8375_v6 = vpop.permute.xlu1 %871  ;;  %v870_v41 = vpop.permute.xlu0 %869  ;;  %2520 = vmatprep.mubr.f32.mxu1 %v1029_v32  ;;  %v820_v17 = vsel %vm9128_vm3, %v806_v62, %v8327_v18  ;;  %vm1597_vm1 = vcmp.eq.s32.totalorder %v8289_v34, %v6449_v22  ;;  %v8429_v10 = vadd.s32 1424, %v6269_v3  ;;  %vm8443_vm8 = vmpackc.low %vm1637_vm0, %vm1635_vm14  ;;  %vm1600_vm7 = vcmp.eq.s32.totalorder %v8368_v16, %v6454_v29  ;;  %v5438_v34 = vld [vmem:[%s8955_s2 + $0x8] sm:$0xff] }
 0x2cf   : > { %v883_v14 = vsel %vm9129_vm4, %v6162_v0, %v870_v41  ;;  %2521 = vmatmul.mubr.f32.vlgmr.msra.gmra.mrb[0].mxu1 %v1028_v21  ;;  %vm1602_vm11 = vcmp.eq.s32.totalorder %v8371_v49, %v6454_v29  ;;  %v1221_v37 = vadd.s32 1432, %v6269_v3  ;;  %v845_v50 = vmax.f32 %v8002_v42, %v820_v17  ;;  %vm6002_vm14 = vmpackc.low %vm1642_vm12, %vm1640_vm13 }
 0x2d0   : > { %v908_v0 = vmax.f32 %v844_v54, %v883_v14  ;;  %5997 = vmatpush1.bf16.msk.msra.mxu1 %vm8081_vm9, %v6222_v1  ;;  %2946 = vmatprep.mubr.f32.mxu1 %v6225_v33  ;;  %vm9134_vm9 = vmmov %vm9129_vm4  ;;  %vm1639_vm0 = vcmp.eq.s32.totalorder %v8317_v56, %v6449_v22  ;;  %vm9137_vm3 = vcmask 998400   ;;  %vm1644_vm12 = vcmp.eq.s32.totalorder %v1240_v55, %v6454_v29 }
 0x2d1   : > { %v884_v60 = vsel %vm9134_vm9, %v870_v41, %v8375_v6  ;;  %5999 = vmatprep.subr.msk.bf16.mxu1 %vm8383_vm2, %v6222_v1  ;;  %5957 = vmatpush1.bf16.msk.msra.mxu0 %vm8405_vm6, %v6222_v1  ;;  %vm1641_vm2 = vcmp.eq.s32.totalorder %v8332_v9, %v6449_v22  ;;  %vm9138_vm4 = vmmov %vm9137_vm3  ;;  %vm1646_vm6 = vcmp.eq.s32.totalorder %v1241_v35, %v6454_v29  ;;  %v1222_v47 = vadd.s32 1440, %v6269_v3 }
 0x2d2   : > { %v936_v19 = vpop.permute.xlu1 %935  ;;  %v934_v12 = vpop.permute.xlu0 %933  ;;  %5959 = vmatprep.subr.msk.bf16.mxu0 %vm8420_vm10, %v6222_v1  ;;  %vm8479_vm13 = vmpackc.low %vm1597_vm1, %vm1595_vm15  ;;  %v909_v46 = vmax.f32 %v845_v50, %v884_v60  ;;  %vm1599_vm15 = vcmp.eq.s32.totalorder %v8368_v16, %v6449_v22  ;;  %vm1601_vm1 = vcmp.eq.s32.totalorder %v8371_v49, %v6449_v22  ;;  %v1223_v15 = vadd.s32 1448, %v6269_v3 }
 0x2d3   : > { %v948_v42 = vsel %vm9137_vm3, %v6167_v20, %v934_v12  ;;  %v949_v40 = vsel %vm9138_vm4, %v934_v12, %v936_v19  ;;  %vm8494_vm10 = vmpackc.low %vm1602_vm11, %vm1600_vm7  ;;  %vm1606_vm7 = vcmp.eq.s32.totalorder %v1221_v37, %v6454_v29  ;;  %v846_v2 = vmax.f32 %v8022_v59, %v8327_v18 }
 0x2d4   : > { %v973_v20 = vmax.f32 %v908_v0, %v948_v42  ;;  %6001 = vmatpush1.bf16.msk.msra.mxu1 %vm8443_vm8, %v6222_v1  ;;  %vm8506_vm9 = vmpackc.low %vm1641_vm2, %vm1639_vm0  ;;  %vm1604_vm8 = vcmp.eq.s32.totalorder %v8429_v10, %v6454_v29  ;;  %v974_v45 = vmax.f32 %v909_v46, %v949_v40  ;;  %vm1645_vm0 = vcmp.eq.s32.totalorder %v1241_v35, %v6449_v22 }
 0x2d5   : > { %6003 = vmatprep.subr.msk.bf16.mxu1 %vm6002_vm14, %v6222_v1  ;;  %5961 = vmatpush1.bf16.msk.msra.mxu0 %vm8479_vm13, %v6222_v1  ;;  %vm8522_vm11 = vmpackc.low %vm1646_vm6, %vm1644_vm12  ;;  %vm1643_vm14 = vcmp.eq.s32.totalorder %v1240_v55, %v6449_v22  ;;  %vm9147_vm2 = vcmask 982016   ;;  %vm1603_vm13 = vcmp.eq.s32.totalorder %v8429_v10, %v6449_v22  ;;  %vm1605_vm6 = vcmp.eq.s32.totalorder %v1221_v37, %v6449_v22 }
 0x2d6   : > { %v1001_v24 = vpop.permute.xlu1 %1000  ;;  %v999_v27 = vpop.permute.xlu0 %998  ;;  %vm9148_vm3 = vmmov %vm9147_vm2  ;;  %5963 = vmatprep.subr.msk.bf16.mxu0 %vm8494_vm10, %v6222_v1  ;;  %v910_v18 = vmax.f32 %v846_v2, %v8375_v6  ;;  %v1225_v26 = vadd.s32 1464, %v6269_v3  ;;  %v1226_v53 = vadd.s32 1472, %v6269_v3  ;;  %v1227_v36 = vadd.s32 1480, %v6269_v3  ;;  %v2967_v2 = vld [vmem:[%s8955_s2] sm:$0xff] }
 0x2d7   : > { %v1013_v11 = vsel %vm9147_vm2, %v6172_v38, %v999_v27  ;;  %v1014_v62 = vsel %vm9148_vm3, %v999_v27, %v1001_v24  ;;  %vm5964_vm4 = vmpackc.low %vm1601_vm1, %vm1599_vm15  ;;  %v1224_v38 = vadd.s32 1456, %v6269_v3  ;;  %vm1608_vm15 = vcmp.eq.s32.totalorder %v1222_v47, %v6454_v29 }
 0x2d8   : > { %v8545_v59 = vmax.f32 %v973_v20, %v1013_v11  ;;  %v1039_v48 = vmax.f32 %v974_v45, %v1014_v62  ;;  %6005 = vmatpush1.bf16.msk.msra.mxu1 %vm8506_vm9, %v6222_v1  ;;  %vm5966_vm12 = vmpackc.low %vm1606_vm7, %vm1604_vm8  ;;  %vm1610_vm1 = vcmp.eq.s32.totalorder %v1223_v15, %v6454_v29  ;;  %v975_v25 = vmax.f32 %v910_v18, %v936_v19  ;;  %v5452_v20 = vld [vmem:[%s8956_s3 + $0x8] sm:$0xff]  ;;  %v5443_v18 = vld [vmem:[%s8955_s2 + $0x10] sm:$0xff] }
 0x2d9   : > { %6007 = vmatprep.subr.msk.bf16.mxu1 %vm8522_vm11, %v6222_v1  ;;  %vm6008_vm10 = vmpackc.low %vm1645_vm0, %vm1643_vm14  ;;  %5965 = vmatpush1.bf16.msk.msra.mxu0 %vm5964_vm4, %v6222_v1  ;;  %vm1607_vm7 = vcmp.eq.s32.totalorder %v1222_v47, %v6449_v22  ;;  %vm1609_vm11 = vcmp.eq.s32.totalorder %v1223_v15, %v6449_v22  ;;  %vm1612_vm14 = vcmp.eq.s32.totalorder %v1224_v38, %v6454_v29  ;;  %vm9149_vm2 = vcmask 523264  }
 0x2da   : > { %2875 = vmatprep.mubr.f32.mxu0 %v1039_v48  ;;  %5967 = vmatprep.subr.msk.bf16.mxu0 %vm5966_vm12, %v6222_v1  ;;  %vm5968_vm9 = vmpackc.low %vm1605_vm6, %vm1603_vm13  ;;  %v1040_v9 = vmax.f32 %v975_v25, %v1001_v24  ;;  %vm1614_vm0 = vcmp.eq.s32.totalorder %v1225_v26, %v6454_v29  ;;  %vm1611_vm13 = vcmp.eq.s32.totalorder %v1224_v38, %v6449_v22  ;;  %v9150_v4 = vmov 0  }
 0x2db   : > { %vm5970_vm8 = vmpackc.low %vm1610_vm1, %vm1608_vm15  ;;  %vm1613_vm12 = vcmp.eq.s32.totalorder %v1225_v26, %v6449_v22  ;;  %vm1616_vm6 = vcmp.eq.s32.totalorder %v1226_v53, %v6454_v29  ;;  %v1228_v32 = vadd.s32 1488, %v6269_v3  ;;  %v1229_v21 = vadd.s32 1496, %v6269_v3 }
 0x2dc   : > { %6009 = vmatpush1.bf16.msk.msra.mxu1 %vm6008_vm10, %v6222_v1  ;;  %vm5972_vm3 = vmpackc.low %vm1609_vm11, %vm1607_vm7  ;;  %vm1618_vm10 = vcmp.eq.s32.totalorder %v1227_v36, %v6454_v29  ;;  %v1231_v16 = vadd.s32 1512, %v6269_v3  ;;  %v1232_v49 = vadd.s32 1520, %v6269_v3  ;;  %v1233_v54 = vadd.s32 1528, %v6269_v3 }
 0x2dd   : > { %5969 = vmatpush1.bf16.msk.msra.mxu0 %vm5968_vm9, %v6222_v1  ;;  %vm5974_vm4 = vmpackc.low %vm1614_vm0, %vm1612_vm14  ;;  %vm1615_vm9 = vcmp.eq.s32.totalorder %v1226_v53, %v6449_v22  ;;  %vm1620_vm7 = vcmp.eq.s32.totalorder %v1228_v32, %v6454_v29  ;;  %vm1622_vm11 = vcmp.eq.s32.totalorder %v1229_v21, %v6454_v29  ;;  %v2973_v24 = vpack.c.bf16 %v5438_v34, %v5438_v34 }
 0x2de   : > { %5971 = vmatprep.subr.msk.bf16.mxu0 %vm5970_vm8, %v6222_v1  ;;  %vm5976_vm15 = vmpackc.low %vm1613_vm12, %vm1611_vm13  ;;  %vm1617_vm8 = vcmp.eq.s32.totalorder %v1227_v36, %v6449_v22  ;;  %vm1626_vm13 = vcmp.eq.s32.totalorder %v1231_v16, %v6454_v29  ;;  %v2968_v62 = vpack.c.bf16 %v2967_v2, %v2967_v2  ;;  %v3086_v25 = vpack.c.bf16 %v5443_v18, %v5443_v18 }
 0x2df   : > { %5437 = vmatmul.mubr.msk.f32.vlgmr.msra.gmra.mrb[2].mxu1 %vm9149_vm2, %v1040_v9  ;;  %vm5978_vm1 = vmpackc.low %vm1618_vm10, %vm1616_vm6  ;;  %vm1619_vm2 = vcmp.eq.s32.totalorder %v1228_v32, %v6449_v22  ;;  %vm1623_vm10 = vcmp.eq.s32.totalorder %v1230_v30, %v6449_v22  ;;  %v5446_v32 = vld [vmem:[%s8955_s2 + $0x18] sm:$0xff] }
 0x2e0   : > { %3025 = vmatprep.mubr.bf16.mxu1 %v9150_v4  ;;  %vm5980_vm14 = vmpackc.low %vm1617_vm8, %vm1615_vm9  ;;  %vm1630_vm9 = vcmp.eq.s32.totalorder %v1233_v54, %v6454_v29 }
 0x2e1   : > { %5973 = vmatpush1.bf16.msk.msra.mxu0 %vm5972_vm3, %v6222_v1  ;;  %vm5982_vm0 = vmpackc.low %vm1622_vm11, %vm1620_vm7  ;;  %vm1621_vm3 = vcmp.eq.s32.totalorder %v1229_v21, %v6449_v22  ;;  %vm1627_vm11 = vcmp.eq.s32.totalorder %v1232_v49, %v6449_v22 }
 0x2e2   : > { %5975 = vmatprep.subr.msk.bf16.mxu0 %vm5974_vm4, %v6222_v1  ;;  %vm1624_vm4 = vcmp.eq.s32.totalorder %v1230_v30, %v6454_v29  ;;  %vm5984_vm12 = vmpackc.low %vm1621_vm3, %vm1619_vm2  ;;  %vm2965_vm2 = vcmask 277504   ;;  %vm9151_vm3 = vcmask 15360   ;;  %v3147_v30 = vpack.c.bf16 %v5446_v32, %v5446_v32 }
 0x2e3   : > { %vm5986_vm6 = vmpackc.low %vm1626_vm13, %vm1624_vm4  ;;  %vm2986_vm13 = vcmask 1043456  }
 0x2e4   : > { %vm9152_vm4 = vmmov %vm9151_vm3 }
 0x2e5   : > { %5977 = vmatpush1.bf16.msk.msra.mxu0 %vm5976_vm15, %v6222_v1  ;;  %vm1625_vm15 = vcmp.eq.s32.totalorder %v1231_v16, %v6449_v22 }
 0x2e6   : > { %5979 = vmatprep.subr.msk.bf16.mxu0 %vm5978_vm1, %v6222_v1  ;;  %vm1628_vm1 = vcmp.eq.s32.totalorder %v1232_v49, %v6454_v29  ;;  %vm5988_vm8 = vmpackc.low %vm1625_vm15, %vm1623_vm10  ;;  %vm9154_vm10 = vcmask 1031168   ;;  %vm9155_vm15 = vcmask 1022976  }
 0x2e7   : > { %vm5990_vm7 = vmpackc.low %vm1630_vm9, %vm1628_vm1  ;;  %v2451_v13 = vpop.permute.xlu0 %2450  ;;  %vm9156_vm1 = vcmask 1014784  }
 0x2e8   : > { %vm9157_vm9 = vmmov %vm9151_vm3 }
 0x2e9   : > { %5981 = vmatpush1.bf16.msk.msra.mxu0 %vm5980_vm14, %v6222_v1  ;;  %vm1629_vm14 = vcmp.eq.s32.totalorder %v1233_v54, %v6449_v22  ;;  %v5449_v54 = vld [vmem:[%s8955_s2 + $0x20] sm:$0xff] }
 0x2ea   : > { %5983 = vmatprep.subr.msk.bf16.mxu0 %vm5982_vm0, %v6222_v1  ;;  %vm5992_vm0 = vmpackc.low %vm1629_vm14, %vm1627_vm11 }
 0x2eb   : > { %vm9160_vm11 = vmmov %vm9154_vm10 }
 0x2ec   : > { %vm9161_vm14 = vmmov %vm9155_vm15 }
 0x2ed   : > { %5985 = vmatpush1.bf16.msk.msra.mxu0 %vm5984_vm12, %v6222_v1  ;;  %vm9153_vm12 = vcmask 1039360  }
 0x2ee   : > { %5987 = vmatprep.subr.msk.bf16.mxu0 %vm5986_vm6, %v6222_v1  ;;  %vm2982_vm6 = vcmask 64512  }
 0x2f1   : > { %5989 = vmatpush1.bf16.msk.msra.mxu0 %vm5988_vm8, %v6222_v1  ;;  %vm9158_vm8 = vmmov %vm9151_vm3 }
 0x2f2   : > { %5991 = vmatprep.subr.msk.bf16.mxu0 %vm5990_vm7, %v6222_v1  ;;  %vm9159_vm7 = vmmov %vm9153_vm12 }
 0x2f5   : > { %5993 = vmatpush1.bf16.msk.msra.mxu0 %vm5992_vm0, %v6222_v1  ;;  %vm9162_vm0 = vmmov %vm9156_vm1 }
 0x2f8   : > { %2876 = vmatmul.mubr.f32.vlgmr.msra.gmra.mrb[0].mxu0 %v8545_v59 }
 0x3a2   : > { %v2522_v3 = vpop.f32.mrb[0].mxu1 }
 0x3a3   : > { %v2524_v29 = vpop.f32.mrb[1].mxu1  ;;  %v2523_v17 = vadd.f32 %v2522_v3, %v2451_v13  ;;  %v3208_v3 = vpack.c.bf16 %v5449_v54, %v5449_v54 }
 0x3a4   : > { %v2525_v14 = vadd.f32 %v2524_v29, %v2451_v13 }
 0x3b2   : > { %v2948_v6 = vpop.f32.mrb[2].mxu1 }
 0x3b3   : > { %v2950_v41 = vpop.f32.mrb[3].mxu1 }
 0x3cb   : > { %v2877_v43 = vpop.f32.mrb[0].mxu0 }
 0x3cc   : > { %v6041_v55 = vadd.f32 %v2877_v43, %v2523_v17  ;;  %v2879_v35 = vpop.f32.mrb[1].mxu0 }
 0x3cd   : > { %v6044_v22 = vadd.f32 %v2879_v35, %v2525_v14 }
 0x3ce   : > { %v8620_v0 = vadd.f32 %v6041_v55, %v2948_v6 }
 0x3cf   : > { %v8622_v63 = vadd.f32 %v6044_v22, %v2950_v41 }
 0x3d0   : > { %v2953_v10 = vmax.f32 %v8620_v0, 0.0 }
 0x3d1   : > { %v2954_v60 = vmax.f32 %v8622_v63, 0.0 }
 0x3d3   : > { %v6193_v5 = vpack.i.bf16 %v2954_v60, %v2953_v10 }
 0x3d5   : > { %6194 = vrot.lane.b32.xlu1 %v6193_v5, %s6217_s25 }
 0x447   : > { %v6195_v37 = vpop.permute.xlu1 %6194 }
 0x448   : > { %v6197_v50 = vunpack.i.h.bf16 %v6195_v37  ;;  %v6196_v19 = vunpack.i.l.bf16 %v6195_v37 }
 0x44a   : > { %v2961_v12 = vsel %vm9151_vm3, %v6196_v19, %v6197_v50  ;;  %v2964_v42 = vsel %vm9152_vm4, 0.0, %v6196_v19  ;;  %vm9163_vm4 = vmmov %vm9151_vm3 }
 0x44b   : > { %v2966_v40 = vsel %vm2965_vm2, %v2961_v12, 0.0  ;;  %v2969_v57 = vpack.c.bf16 %v2964_v42, %v2964_v42 }
 0x44c   : > { %v2970_v46 = vpack.c.bf16 %v2966_v40, %v2966_v40 }
 0x44d   : > { %2976 = vrot.lane.b32.xlu0 %v2969_v57, %s6218_s6  ;;  %v3038_v27 = vsel %vm2986_vm13, %v2969_v57, 0 }
 0x44e   : > { %2978 = vrot.lane.b32.xlu1 %v2970_v46, %s6218_s6 }
 0x451   : > { %3087 = vrot.lane.b32.xlu0 %v2969_v57, %s6219_s7 }
 0x452   : > { %3089 = vrot.lane.b32.xlu1 %v2970_v46, %s6219_s7 }
 0x455   : > { %3148 = vrot.lane.b32.xlu0 %v2969_v57, %s6220_s8 }
 0x456   : > { %3150 = vrot.lane.b32.xlu1 %v2970_v46, %s6220_s8 }
 0x459   : > { %3209 = vrot.lane.b32.xlu0 %v2969_v57, %s6221_s9 }
 0x45a   : > { %3211 = vrot.lane.b32.xlu1 %v2970_v46, %s6221_s9 }
 0x45d   : > { %3271 = vperm.xlu0 %6091, %v5452_v20  }
 0x4bf   : > { %v2977_v39 = vpop.permute.xlu0 %2976 }
 0x4c0   : > { %v2979_v47 = vpop.permute.xlu1 %2978 }
 0x4c1   : > { %v2981_v15 = vsel %vm9153_vm12, %v2977_v39, %v2979_v47  ;;  %5439 = vmatprep.subr.msk.bf16.mxu1 %vm2986_vm13, %v2979_v47  ;;  %vm9165_vm12 = vmmov %vm9154_vm10 }
 0x4c2   : > { %v2988_v45 = vsel %vm2986_vm13, %v2981_v15, 0 }
 0x4c3   : > { %2994 = vmatpush1.bf16.msra.mxu1 %v2988_v45  ;;  %v3088_v11 = vpop.permute.xlu0 %3087 }
 0x4c4   : > { %5441 = vmatprep.subr.msk.bf16.mxu1 %vm2986_vm13, %v2970_v46  ;;  %v3090_v56 = vpop.permute.xlu1 %3089 }
 0x4c5   : > { %v3092_v59 = vsel %vm9154_vm10, %v3088_v11, %v3090_v56  ;;  %vm9166_vm10 = vmmov %vm9161_vm14 }
 0x4c6   : > { %5440 = vmatmul.mubr.msk.bf16.vlgmr.msra.gmra.mrb[4].mxu1 %vm2982_vm6, %v2973_v24  ;;  %v3097_v48 = vsel %vm2986_vm13, %v3092_v59, 0 }
 0x4c7   : > { %3044 = vmatpush1.bf16.msra.mxu1 %v3038_v27  ;;  %3075 = vmatprep.mubr.bf16.mxu1 %v9150_v4  ;;  %v3149_v26 = vpop.permute.xlu0 %3148 }
 0x4c8   : > { %5444 = vmatprep.subr.msk.bf16.mxu1 %vm2986_vm13, %v3090_v56  ;;  %v3151_v38 = vpop.permute.xlu1 %3150 }
 0x4c9   : > { %v3153_v9 = vsel %vm9155_vm15, %v3149_v26, %v3151_v38  ;;  %vm9167_vm15 = vmmov %vm9162_vm0 }
 0x4ca   : > { %v3158_v53 = vsel %vm2986_vm13, %v3153_v9, 0 }
 0x4cb   : > { %v3210_v21 = vpop.permute.xlu0 %3209 }
 0x4cc   : > { %v3212_v36 = vpop.permute.xlu1 %3211 }
 0x4cd   : > { %v3214_v16 = vsel %vm9156_vm1, %v3210_v21, %v3212_v36  ;;  %vm9168_vm1 = vnez %v9000_v7 }
 0x4ce   : > { %5442 = vmatmul.mubr.msk.bf16.vlgmr.msra.gmra.mrb[8].mxu1 %vm2982_vm6, %v2968_v62  ;;  %v3219_v49 = vsel %vm2986_vm13, %v3214_v16, 0 }
 0x4cf   : > { %3103 = vmatpush1.bf16.msra.mxu1 %v3097_v48  ;;  %3134 = vmatprep.mubr.bf16.mxu1 %v9150_v4 }
 0x4d0   : > { %5447 = vmatprep.subr.msk.bf16.mxu1 %vm2986_vm13, %v3151_v38 }
 0x4d6   : > { %5445 = vmatmul.mubr.msk.bf16.vlgmr.msra.gmra.mrb[12].mxu1 %vm2982_vm6, %v3086_v25 }
 0x4d7   : > { %3164 = vmatpush1.bf16.msra.mxu1 %v3158_v53  ;;  %3195 = vmatprep.mubr.bf16.mxu1 %v9150_v4 }
 0x4d8   : > { %5450 = vmatprep.subr.msk.bf16.mxu1 %vm2986_vm13, %v3212_v36 }
 0x4dc   : > { %v3272_v24 = vpop.permute.xlu0 %3271 }
 0x4de   : > { %5448 = vmatmul.mubr.msk.bf16.vlgmr.msra.gmra.mrb[16].mxu1 %vm2982_vm6, %v3147_v30  ;;  %v5468_v30 = vld [vmem:[%s8956_s3 + $0x10] sm:$0xff] }
 0x4df   : > { %3225 = vmatpush1.bf16.msra.mxu1 %v3219_v49  ;;  %3256 = vmatprep.mubr.bf16.mxu1 %v9150_v4  ;;  %v5454_v49 = vld [vmem:[%s8955_s2 + $0x30] sm:$0xff] }
 0x4e6   : > { %5451 = vmatmul.mubr.msk.bf16.vlgmr.msra.gmra.mrb[20].mxu1 %vm2982_vm6, %v3208_v3 }
 0x4e7   : > { %3345 = vmatprep.mubr.bf16.mxu1 %v9150_v4 }
 0x599   : > { %v3027_v29 = vpop.f32.mrb[4].mxu1 }
 0x59a   : > { %v3029_v6 = vpop.f32.mrb[5].mxu1 }
 0x59b   : > { %v3031_v41 = vpop.f32.mrb[6].mxu1 }
 0x59c   : > { %v3032_v13 = vpop.f32.mrb[7].mxu1 }
 0x5a1   : > { %v3077_v17 = vpop.f32.mrb[8].mxu1 }
 0x5a2   : > { %v3078_v14 = vadd.f32 %v3077_v17, %v3027_v29  ;;  %v3079_v43 = vpop.f32.mrb[9].mxu1  ;;  %v5453_v17 = vld [vmem:[%s8955_s2 + $0x28] sm:$0xff] }
 0x5a3   : > { %v3080_v55 = vadd.f32 %v3079_v43, %v3029_v6  ;;  %v3081_v35 = vpop.f32.mrb[10].mxu1  ;;  %v3296_v6 = vpack.c.bf16 %v5454_v49, %v5454_v49  ;;  %v3291_v43 = vpack.c.bf16 %v5453_v17, %v5453_v17 }
 0x5a4   : > { %v3082_v22 = vpop.f32.mrb[11].mxu1 }
 0x5a9   : > { %v3136_v5 = vpop.f32.mrb[12].mxu1 }
 0x5aa   : > { %v3143_v37 = vadd.f32 %v3136_v5, %v3078_v14  ;;  %v3138_v50 = vpop.f32.mrb[13].mxu1  ;;  %v5459_v5 = vld [vmem:[%s8955_s2 + $0x38] sm:$0xff] }
 0x5ab   : > { %v3144_v19 = vadd.f32 %v3138_v50, %v3080_v55  ;;  %v3140_v12 = vpop.f32.mrb[14].mxu1  ;;  %v3406_v50 = vpack.c.bf16 %v5459_v5, %v5459_v5 }
 0x5ac   : > { %v3141_v42 = vpop.f32.mrb[15].mxu1 }
 0x5b1   : > { %v3197_v40 = vpop.f32.mrb[16].mxu1 }
 0x5b2   : > { %v3204_v57 = vadd.f32 %v3197_v40, %v3143_v37  ;;  %v3199_v46 = vpop.f32.mrb[17].mxu1  ;;  %v5462_v40 = vld [vmem:[%s8955_s2 + $0x40] sm:$0xff] }
 0x5b3   : > { %v3205_v20 = vadd.f32 %v3199_v46, %v3144_v19  ;;  %v3201_v39 = vpop.f32.mrb[18].mxu1  ;;  %v3466_v46 = vpack.c.bf16 %v5462_v40, %v5462_v40 }
 0x5b4   : > { %v3202_v34 = vpop.f32.mrb[19].mxu1 }
 0x5b5   : > { %v5465_v34 = vld [vmem:[%s8955_s2 + $0x48] sm:$0xff] }
 0x5b9   : > { %v3258_v47 = vpop.f32.mrb[20].mxu1 }
 0x5ba   : > { %v3265_v15 = vadd.f32 %v3258_v47, %v3204_v57  ;;  %v3260_v45 = vpop.f32.mrb[21].mxu1  ;;  %v3526_v47 = vpack.c.bf16 %v5465_v34, %v5465_v34 }
 0x5bb   : > { %v3266_v27 = vadd.f32 %v3260_v45, %v3205_v20  ;;  %v3262_v56 = vpop.f32.mrb[22].mxu1 }
 0x5bc   : > { %v3274_v2 = vadd.f32 %v3272_v24, %v3265_v15  ;;  %v3263_v11 = vpop.f32.mrb[23].mxu1 }
 0x5bd   : > { %v3275_v62 = vadd.f32 %v3272_v24, %v3266_v27 }
 0x5be   : > { %v3276_v59 = vmax.f32 %v3274_v2, 0.0 }
 0x5bf   : > { %v3277_v48 = vmax.f32 %v3275_v62, 0.0 }
 0x5c1   : > { %v6198_v38 = vpack.i.bf16 %v3277_v48, %v3276_v59 }
 0x5c3   : > { %6199 = vrot.lane.b32.xlu1 %v6198_v38, %s6217_s25 }
 0x635   : > { %v6200_v18 = vpop.permute.xlu1 %6199 }
 0x636   : > { %v6202_v26 = vunpack.i.h.bf16 %v6200_v18  ;;  %v6201_v25 = vunpack.i.l.bf16 %v6200_v18 }
 0x638   : > { %v3284_v9 = vsel %vm9157_vm9, %v6201_v25, %v6202_v26  ;;  %v3287_v53 = vsel %vm9158_vm8, 0.0, %v6201_v25  ;;  %vm9169_vm9 = vnez %v9002_v31  ;;  %vm9170_vm8 = vnez %v9004_v61 }
 0x639   : > { %v3288_v36 = vsel %vm2965_vm2, %v3284_v9, 0.0  ;;  %v3292_v32 = vpack.c.bf16 %v3287_v53, %v3287_v53 }
 0x63a   : > { %v3293_v21 = vpack.c.bf16 %v3288_v36, %v3288_v36 }
 0x63b   : > { %3299 = vrot.lane.b32.xlu0 %v3292_v32, %s6218_s6  ;;  %v3358_v41 = vsel %vm2986_vm13, %v3292_v32, 0 }
 0x63c   : > { %3301 = vrot.lane.b32.xlu1 %v3293_v21, %s6218_s6 }
 0x63f   : > { %3407 = vrot.lane.b32.xlu0 %v3292_v32, %s6219_s7 }
 0x640   : > { %3409 = vrot.lane.b32.xlu1 %v3293_v21, %s6219_s7 }
 0x643   : > { %3467 = vrot.lane.b32.xlu0 %v3292_v32, %s6220_s8 }
 0x644   : > { %3469 = vrot.lane.b32.xlu1 %v3293_v21, %s6220_s8 }
 0x647   : > { %3527 = vrot.lane.b32.xlu0 %v3292_v32, %s6221_s9 }
 0x648   : > { %3529 = vrot.lane.b32.xlu1 %v3293_v21, %s6221_s9 }
 0x64b   : > { %3588 = vperm.xlu0 %6091, %v5468_v30  }
 0x6ad   : > { %v3300_v16 = vpop.permute.xlu0 %3299 }
 0x6ae   : > { %v3302_v54 = vpop.permute.xlu1 %3301 }
 0x6af   : > { %v3303_v3 = vsel %vm9159_vm7, %v3300_v16, %v3302_v54  ;;  %5455 = vmatprep.subr.msk.bf16.mxu1 %vm2986_vm13, %v3302_v54 }
 0x6b0   : > { %v3308_v29 = vsel %vm2986_vm13, %v3303_v3, 0 }
 0x6b1   : > { %3314 = vmatpush1.bf16.msra.mxu1 %v3308_v29  ;;  %v3408_v14 = vpop.permute.xlu0 %3407 }
 0x6b2   : > { %5457 = vmatprep.subr.msk.bf16.mxu1 %vm2986_vm13, %v3293_v21  ;;  %v3410_v13 = vpop.permute.xlu1 %3409 }
 0x6b3   : > { %v3411_v55 = vsel %vm9160_vm11, %v3408_v14, %v3410_v13  ;;  %vm9173_vm11 = vnez %v9016_v44 }
 0x6b4   : > { %5456 = vmatmul.mubr.msk.bf16.vlgmr.msra.gmra.mrb[24].mxu1 %vm2982_vm6, %v3296_v6  ;;  %v3416_v35 = vsel %vm2986_vm13, %v3411_v55, 0 }
 0x6b5   : > { %3364 = vmatpush1.bf16.msra.mxu1 %v3358_v41  ;;  %3395 = vmatprep.mubr.bf16.mxu1 %v9150_v4  ;;  %v3468_v37 = vpop.permute.xlu0 %3467 }
 0x6b6   : > { %5460 = vmatprep.subr.msk.bf16.mxu1 %vm2986_vm13, %v3410_v13  ;;  %v3470_v22 = vpop.permute.xlu1 %3469 }
 0x6b7   : > { %v3471_v19 = vsel %vm9161_vm14, %v3468_v37, %v3470_v22  ;;  %vm9174_vm14 = vnez %v9022_v23 }
 0x6b8   : > { %v3476_v12 = vsel %vm2986_vm13, %v3471_v19, 0 }
 0x6b9   : > { %v3528_v57 = vpop.permute.xlu0 %3527 }
 0x6ba   : > { %v3530_v42 = vpop.permute.xlu1 %3529 }
 0x6bb   : > { %v3531_v20 = vsel %vm9162_vm0, %v3528_v57, %v3530_v42  ;;  %vm9175_vm0 = vnez %v9028_v58 }
 0x6bc   : > { %5458 = vmatmul.mubr.msk.bf16.vlgmr.msra.gmra.mrb[28].mxu1 %vm2982_vm6, %v3291_v43  ;;  %v3536_v39 = vsel %vm2986_vm13, %v3531_v20, 0 }
 0x6bd   : > { %3422 = vmatpush1.bf16.msra.mxu1 %v3416_v35  ;;  %3453 = vmatprep.mubr.bf16.mxu1 %v9150_v4 }
 0x6be   : > { %5463 = vmatprep.subr.msk.bf16.mxu1 %vm2986_vm13, %v3470_v22 }
 0x6c4   : > { %5461 = vmatmul.mubr.msk.bf16.vlgmr.msra.gmra.mrb[32].mxu1 %vm2982_vm6, %v3406_v50 }
 0x6c5   : > { %3482 = vmatpush1.bf16.msra.mxu1 %v3476_v12  ;;  %3513 = vmatprep.mubr.bf16.mxu1 %v9150_v4 }
 0x6c6   : > { %5466 = vmatprep.subr.msk.bf16.mxu1 %vm2986_vm13, %v3530_v42 }
 0x6ca   : > { %v3589_v6 = vpop.permute.xlu0 %3588 }
 0x6cc   : > { %5464 = vmatmul.mubr.msk.bf16.vlgmr.msra.gmra.mrb[36].mxu1 %vm2982_vm6, %v3466_v46 }
 0x6cd   : > { %3542 = vmatpush1.bf16.msra.mxu1 %v3536_v39  ;;  %3573 = vmatprep.mubr.bf16.mxu1 %v9150_v4 }
 0x6d4   : > { %5467 = vmatmul.mubr.msk.bf16.vlgmr.msra.gmra.mrb[40].mxu1 %vm2982_vm6, %v3526_v47 }
 0x6d5   : > { %3664 = vmatprep.mubr.bf16.mxu1 %v9150_v4 }
 0x787   : > { %v3347_v15 = vpop.f32.mrb[24].mxu1 }
 0x788   : > { %v3349_v45 = vpop.f32.mrb[25].mxu1 }
 0x789   : > { %v3351_v24 = vpop.f32.mrb[26].mxu1 }
 0x78a   : > { %v3352_v27 = vpop.f32.mrb[27].mxu1 }
 0x78f   : > { %v3397_v56 = vpop.f32.mrb[28].mxu1 }
 0x790   : > { %v3398_v2 = vadd.f32 %v3397_v56, %v3347_v15  ;;  %v3399_v11 = vpop.f32.mrb[29].mxu1 }
 0x791   : > { %v3400_v62 = vadd.f32 %v3399_v11, %v3349_v45  ;;  %v3401_v59 = vpop.f32.mrb[30].mxu1  ;;  %v5469_v45 = vld [vmem:[%s8955_s2 + $0x50] sm:$0xff] }
 0x792   : > { %v3402_v48 = vpop.f32.mrb[31].mxu1  ;;  %v3610_v27 = vpack.c.bf16 %v5469_v45, %v5469_v45 }
 0x797   : > { %v3455_v38 = vpop.f32.mrb[32].mxu1 }
 0x798   : > { %v3462_v18 = vadd.f32 %v3455_v38, %v3398_v2  ;;  %v3457_v26 = vpop.f32.mrb[33].mxu1 }
 0x799   : > { %v3463_v25 = vadd.f32 %v3457_v26, %v3400_v62  ;;  %v3459_v9 = vpop.f32.mrb[34].mxu1  ;;  %v5475_v62 = vld [vmem:[%s8955_s2 + $0x60] sm:$0xff] }
 0x79a   : > { %v3460_v53 = vpop.f32.mrb[35].mxu1  ;;  %v3725_v48 = vpack.c.bf16 %v5475_v62, %v5475_v62  ;;  %v5512_v62 = vld [vmem:[%s8955_s2 + $0x90] sm:$0xff] }
 0x79f   : > { %v3515_v36 = vpop.f32.mrb[36].mxu1 }
 0x7a0   : > { %v3522_v32 = vadd.f32 %v3515_v36, %v3462_v18  ;;  %v3517_v21 = vpop.f32.mrb[37].mxu1 }
 0x7a1   : > { %v3523_v30 = vadd.f32 %v3517_v21, %v3463_v25  ;;  %v3519_v16 = vpop.f32.mrb[38].mxu1  ;;  %v5478_v25 = vld [vmem:[%s8955_s2 + $0x68] sm:$0xff]  ;;  %v5481_v21 = vld [vmem:[%s8955_s2 + $0x70] sm:$0xff] }
 0x7a2   : > { %v3520_v49 = vpop.f32.mrb[39].mxu1  ;;  %v3785_v53 = vpack.c.bf16 %v5478_v25, %v5478_v25  ;;  %v6226_v16 = vmov 0.0|0.0  }
 0x7a7   : > { %v3575_v54 = vpop.f32.mrb[40].mxu1 }
 0x7a8   : > { %v3582_v3 = vadd.f32 %v3575_v54, %v3522_v32  ;;  %v3577_v29 = vpop.f32.mrb[41].mxu1 }
 0x7a9   : > { %v3583_v41 = vadd.f32 %v3577_v29, %v3523_v30  ;;  %v3579_v13 = vpop.f32.mrb[42].mxu1  ;;  %v3845_v30 = vpack.c.bf16 %v5481_v21, %v5481_v21 }
 0x7aa   : > { %v3591_v17 = vadd.f32 %v3589_v6, %v3582_v3  ;;  %v3580_v14 = vpop.f32.mrb[43].mxu1 }
 0x7ab   : > { %v3592_v43 = vadd.f32 %v3589_v6, %v3583_v41 }
 0x7ac   : > { %v3593_v55 = vadd.f32 %v3591_v17, %v2953_v10  ;;  %v5470_v10 = vld [vmem:[%s8955_s2 + $0x58] sm:$0xff] }
 0x7ad   : > { %v3594_v35 = vadd.f32 %v3592_v43, %v2954_v60  ;;  %v3615_v34 = vpack.c.bf16 %v5470_v10, %v5470_v10  ;;  %v5507_v10 = vld [vmem:[%s8955_s2 + $0x80] sm:$0xff] }
 0x7ae   : > { %v3595_v22 = vmax.f32 %v3593_v55, 0.0 }
 0x7af   : > { %v3596_v5 = vmax.f32 %v3594_v35, 0.0 }
 0x7b1   : > { %v6203_v37 = vpack.i.bf16 %v3596_v5, %v3595_v22 }
 0x7b3   : > { %6204 = vrot.lane.b32.xlu1 %v6203_v37, %s6217_s25 }
 0x825   : > { %v6205_v50 = vpop.permute.xlu1 %6204 }
 0x826   : > { %v6207_v19 = vunpack.i.h.bf16 %v6205_v50  ;;  %v6206_v12 = vunpack.i.l.bf16 %v6205_v50 }
 0x828   : > { %v3603_v42 = vsel %vm9151_vm3, %v6206_v12, %v6207_v19  ;;  %v3606_v40 = vsel %vm9163_vm4, 0.0, %v6206_v12  ;;  %vm9176_vm3 = vnez %v9035_v52  ;;  %vm3903_vm4 = vcmask 261120  }
 0x829   : > { %v3607_v57 = vsel %vm2965_vm2, %v3603_v42, 0.0  ;;  %v3611_v46 = vpack.c.bf16 %v3606_v40, %v3606_v40  ;;  %vm9164_vm2 = vmmov %vm9159_vm7  ;;  %vm9171_vm7 = vnez %v9008_v51 }
 0x82a   : > { %v3612_v0 = vpack.c.bf16 %v3607_v57, %v3607_v57 }
 0x82b   : > { %3618 = vrot.lane.b32.xlu0 %v3611_v46, %s6218_s6  ;;  %v3677_v47 = vsel %vm2986_vm13, %v3611_v46, 0 }
 0x82c   : > { %3620 = vrot.lane.b32.xlu1 %v3612_v0, %s6218_s6 }
 0x82f   : > { %3726 = vrot.lane.b32.xlu0 %v3611_v46, %s6219_s7 }
 0x830   : > { %3728 = vrot.lane.b32.xlu1 %v3612_v0, %s6219_s7 }
 0x833   : > { %3786 = vrot.lane.b32.xlu0 %v3611_v46, %s6220_s8 }
 0x834   : > { %3788 = vrot.lane.b32.xlu1 %v3612_v0, %s6220_s8 }
 0x837   : > { %3846 = vrot.lane.b32.xlu0 %v3611_v46, %s6221_s9 }
 0x838   : > { %3848 = vrot.lane.b32.xlu1 %v3612_v0, %s6221_s9 }
 0x89d   : > { %v3619_v63 = vpop.permute.xlu0 %3618 }
 0x89e   : > { %v3621_v60 = vpop.permute.xlu1 %3620 }
 0x89f   : > { %v3622_v20 = vsel %vm9164_vm2, %v3619_v63, %v3621_v60  ;;  %5471 = vmatprep.subr.msk.bf16.mxu1 %vm2986_vm13, %v3621_v60  ;;  %vm9177_vm2 = vmmov %vm9165_vm12  ;;  %v5516_v63 = vld [vmem:[%s8956_s3 + $0x20] sm:$0xff] }
 0x8a0   : > { %v3627_v39 = vsel %vm2986_vm13, %v3622_v20, 0 }
 0x8a1   : > { %3633 = vmatpush1.bf16.msra.mxu1 %v3627_v39  ;;  %v3727_v24 = vpop.permute.xlu0 %3726  ;;  %v4037_v39 = vpack.c.bf16 %v5507_v10, %v5507_v10 }
 0x8a2   : > { %5473 = vmatprep.subr.msk.bf16.mxu1 %vm2986_vm13, %v3612_v0  ;;  %v3729_v15 = vpop.permute.xlu1 %3728 }
 0x8a3   : > { %v3730_v56 = vsel %vm9165_vm12, %v3727_v24, %v3729_v15  ;;  %vm9178_vm12 = vmmov %vm9167_vm15 }
 0x8a4   : > { %5472 = vmatmul.mubr.msk.bf16.vlgmr.msra.gmra.mrb[44].mxu1 %vm2982_vm6, %v3615_v34  ;;  %v3735_v2 = vsel %vm2986_vm13, %v3730_v56, 0 }
 0x8a5   : > { %3683 = vmatpush1.bf16.msra.mxu1 %v3677_v47  ;;  %3714 = vmatprep.mubr.bf16.mxu1 %v9150_v4  ;;  %v3787_v59 = vpop.permute.xlu0 %3786  ;;  %v5506_v47 = vld [vmem:[%s8955_s2 + $0x78] sm:$0xff] }
 0x8a6   : > { %5476 = vmatprep.subr.msk.bf16.mxu1 %vm2986_vm13, %v3729_v15  ;;  %v3789_v11 = vpop.permute.xlu1 %3788  ;;  %v4033_v15 = vpack.c.bf16 %v5506_v47, %v5506_v47 }
 0x8a7   : > { %v3790_v38 = vsel %vm9166_vm10, %v3787_v59, %v3789_v11  ;;  %vm9179_vm10 = vcmask 998400   ;;  %v4187_v59 = vpack.c.bf16 %v5512_v62, %v5512_v62 }
 0x8a8   : > { %v3795_v18 = vsel %vm2986_vm13, %v3790_v38, 0 }
 0x8a9   : > { %v3847_v9 = vpop.permute.xlu0 %3846 }
 0x8aa   : > { %v3849_v26 = vpop.permute.xlu1 %3848 }
 0x8ab   : > { %v3850_v36 = vsel %vm9167_vm15, %v3847_v9, %v3849_v26  ;;  %vm9180_vm15 = vcmask 982016  }
 0x8ac   : > { %v3855_v32 = vsel %vm2986_vm13, %v3850_v36, 0 }
 0x8b0   : > { %5474 = vmatmul.mubr.msk.bf16.vlgmr.msra.gmra.mrb[44].mxu1 %vm2982_vm6, %v3610_v27  ;;  %v5510_v27 = vld [vmem:[%s8955_s2 + $0x88] sm:$0xff] }
 0x8b1   : > { %3741 = vmatpush1.bf16.msra.mxu1 %v3735_v2  ;;  %3772 = vmatprep.mubr.bf16.mxu1 %v9150_v4  ;;  %v4135_v56 = vpack.c.bf16 %v5510_v27, %v5510_v27 }
 0x8b2   : > { %5479 = vmatprep.subr.msk.bf16.mxu1 %vm2986_vm13, %v3789_v11 }
 0x8bc   : > { %5477 = vmatmul.mubr.msk.bf16.vlgmr.msra.gmra.mrb[44].mxu1 %vm2982_vm6, %v3725_v48 }
 0x8bd   : > { %3801 = vmatpush1.bf16.msra.mxu1 %v3795_v18  ;;  %3832 = vmatprep.mubr.bf16.mxu1 %v9150_v4  ;;  %v5514_v18 = vld [vmem:[%s8955_s2 + $0x98] sm:$0xff] }
 0x8be   : > { %5482 = vmatprep.subr.msk.bf16.mxu1 %vm2986_vm13, %v3849_v26  ;;  %v4239_v26 = vpack.c.bf16 %v5514_v18, %v5514_v18 }
 0x8c8   : > { %5480 = vmatmul.mubr.msk.bf16.vlgmr.msra.gmra.mrb[44].mxu1 %vm2982_vm6, %v3785_v53 }
 0x8c9   : > { %3861 = vmatpush1.bf16.msra.mxu1 %v3855_v32  ;;  %3892 = vmatprep.mubr.bf16.mxu1 %v9150_v4 }
 0x8ca   : > { %6010 = vmatprep.subr.bf16.mxu1 %v6226_v16 }
 0x8d4   : > { %5483 = vmatmul.mubr.msk.bf16.vlgmr.msra.gmra.mrb[44].mxu1 %vm2982_vm6, %v3845_v30 }
 0x8d5   : > { %6012 = vmatpush1.bf16.msk.msra.mxu1 %vm7279_vm5, %v6222_v1  ;;  %vm9172_vm5 = vnez %v9012_v8 }
 0x8d6   : > { %6013 = vmatprep.subr.bf16.mxu1 %v6226_v16 }
 0x8d9   : > { %6015 = vmatpush1.bf16.msk.msra.mxu1 %vm9168_vm1, %v6222_v1  ;;  %vm6227_vm1 = vmmov 0  }
 0x8da   : > { %6016 = vmatprep.subr.bf16.mxu1 %v6226_v16 }
 0x8dd   : > { %6018 = vmatpush1.bf16.msk.msra.mxu1 %vm9169_vm9, %v6222_v1  ;;  %vm4029_vm9 = vcmask 146432  }
 0x8de   : > { %6019 = vmatprep.subr.bf16.mxu1 %v6226_v16 }
 0x8e1   : > { %6021 = vmatpush1.bf16.msk.msra.mxu1 %vm9170_vm8, %v6222_v1  ;;  %vm9181_vm8 = vcmask 15360  }
 0x8e2   : > { %6022 = vmatprep.subr.bf16.mxu1 %v6226_v16 }
 0x8e5   : > { %6024 = vmatpush1.bf16.msk.msra.mxu1 %vm9171_vm7, %v6222_v1  ;;  %vm9182_vm7 = vmmov %vm9181_vm8 }
 0x8e6   : > { %6025 = vmatprep.subr.bf16.mxu1 %v6226_v16 }
 0x8e9   : > { %6027 = vmatpush1.bf16.msk.msra.mxu1 %vm9172_vm5, %v6222_v1 }
 0x8ea   : > { %6028 = vmatprep.subr.bf16.mxu1 %v6226_v16 }
 0x8ed   : > { %6030 = vmatpush1.bf16.msk.msra.mxu1 %vm9173_vm11, %v6222_v1 }
 0x8ee   : > { %6031 = vmatprep.subr.bf16.mxu1 %v6226_v16 }
 0x8f1   : > { %6033 = vmatpush1.bf16.msk.msra.mxu1 %vm9174_vm14, %v6222_v1 }
 0x8f2   : > { %6034 = vmatprep.subr.bf16.mxu1 %v6226_v16 }
 0x8f5   : > { %6036 = vmatpush1.bf16.msk.msra.mxu1 %vm9175_vm0, %v6222_v1 }
 0x8f6   : > { %6037 = vmatprep.subr.bf16.mxu1 %v6226_v16 }
 0x8f9   : > { %6039 = vmatpush1.bf16.msk.msra.mxu1 %vm9176_vm3, %v6222_v1  ;;  %v5484_v1 = vld [vmem:[%s8956_s3 + $0x18] sm:$0xff] }
 0x8fa   : > { %5550 = vmatprep.subr.bf16.mxu1 %v6225_v33 }
 0x9a7   : > { %v3894_v28 = vpop.f32.mrb[44].mxu1 }
 0x9a8   : > { %3907 = vrot.lane.b32.xlu0 %v3894_v28, %s6219_s7  ;;  %v3896_v7 = vpop.f32.mrb[45].mxu1 }
 0x9a9   : > { %v3904_v31 = vsel %vm3903_vm4, %v3896_v7, 0.0  ;;  %v3898_v61 = vpop.f32.mrb[46].mxu1 }
 0x9aa   : > { %3909 = vrot.lane.b32.xlu1 %v3904_v31, %s6219_s7  ;;  %v3899_v51 = vpop.f32.mrb[47].mxu1 }
 0x9ac   : > { %3916 = vrot.lane.b32.xlu0 %v3894_v28, %s6221_s9 }
 0x9ae   : > { %3918 = vrot.lane.b32.xlu1 %v3904_v31, %s6221_s9 }
 0x9b0   : > { %3925 = vrot.lane.b32.xlu0 %v3894_v28, %s6223_s10 }
 0x9b2   : > { %3927 = vrot.lane.b32.xlu1 %v3904_v31, %s6223_s10  ;;  %s4632_s10 = sshll.u32 %s9184_s16, 3 }
 0x9b3   : > { %s192_s19 = scalar_lea.vmem %s8957_s4, %s4632_s10 }
 0x9b4   : > { %3934 = vrot.lane.b32.xlu0 %v3894_v28, %s6224_s11 }
 0x9b6   : > { %3936 = vrot.lane.b32.xlu1 %v3904_v31, %s6224_s11 }
 0x9b8   : > { %3947 = vperm.xlu0 %6091, %v5484_v1  }
 0xa1a   : > { %v3908_v8 = vpop.permute.xlu0 %3907 }
 0xa1c   : > { %v3910_v44 = vpop.permute.xlu1 %3909 }
 0xa1d   : > { %v3911_v52 = vsel %vm9177_vm2, %v3908_v8, %v3910_v44  ;;  %v3915_v49 = vmax.f32 %v3904_v31, %v3910_v44 }
 0xa1e   : > { %v3917_v23 = vpop.permute.xlu0 %3916  ;;  %v3914_v3 = vmax.f32 %v3894_v28, %v3911_v52 }
 0xa20   : > { %v3919_v58 = vpop.permute.xlu1 %3918 }
 0xa21   : > { %v3920_v54 = vsel %vm9178_vm12, %v3917_v23, %v3919_v58  ;;  %v3924_v6 = vmax.f32 %v3915_v49, %v3919_v58 }
 0xa22   : > { %v3926_v4 = vpop.permute.xlu0 %3925  ;;  %v3923_v13 = vmax.f32 %v3914_v3, %v3920_v54 }
 0xa24   : > { %v3928_v29 = vpop.permute.xlu1 %3927 }
 0xa25   : > { %v3929_v41 = vsel %vm9179_vm10, %v3926_v4, %v3928_v29  ;;  %v3933_v17 = vmax.f32 %v3924_v6, %v3928_v29 }
 0xa26   : > { %v3932_v14 = vmax.f32 %v3923_v13, %v3929_v41  ;;  %v3935_v43 = vpop.permute.xlu0 %3934 }
 0xa28   : > { %v3937_v55 = vpop.permute.xlu1 %3936 }
 0xa29   : > { %v3938_v35 = vsel %vm9180_vm15, %v3935_v43, %v3937_v55  ;;  %v3942_v22 = vmax.f32 %v3933_v17, %v3937_v55 }
 0xa2a   : > { %v3941_v5 = vmax.f32 %v3932_v14, %v3938_v35  ;;  %v5527_v35 = vld [vmem:[%s8956_s3 + $0x28] sm:$0xff] }
 0xa2b   : > { %5505 = vmatprep.mubr.msk.f32.mxu1 %vm3903_vm4, %v3942_v22  ;;  %v5518_v22 = vld [vmem:[%s8955_s2 + $0xa8] sm:$0xff] }
 0xa2c   : > { %4018 = vmatmul.mubr.f32.vlgmr.msra.gmra.mrb[48].mxu1 %v3941_v5 }
 0xa2d   : > { %5552 = vmatprep.mubr.msk.bf16.mxu1 %vm6227_vm1, %v6225_v33 }
 0xa37   : > { %v3948_v37 = vpop.permute.xlu0 %3947 }
 0xaff   : > { %v4019_v50 = vpop.f32.mrb[48].mxu1 }
 0xb00   : > { %v8840_v19 = vadd.f32 %v4019_v50, %v3948_v37  ;;  %v4021_v12 = vpop.f32.mrb[49].mxu1  ;;  %v4310_v50 = vpack.c.bf16 %v5518_v22, %v5518_v22 }
 0xb02   : > { %v4023_v42 = vmax.f32 %v8840_v19, 0.0 }
 0xb04   : > { %4025 = vrot.lane.b32.xlu1 %v4023_v42, %s6217_s25 }
 0xb76   : > { %v4026_v40 = vpop.permute.xlu1 %4025 }
 0xb77   : > { %v4028_v57 = vsel %vm9181_vm8, 0.0, %v4026_v40  ;;  %v5517_v40 = vld [vmem:[%s8955_s2 + $0xa0] sm:$0xff] }
 0xb78   : > { %v4030_v46 = vsel %vm4029_vm9, %v4028_v57, 0.0  ;;  %v4306_v57 = vpack.c.bf16 %v5517_v40, %v5517_v40 }
 0xb79   : > { %v4034_v0 = vpack.c.bf16 %v4030_v46, %v4030_v46 }
 0xb7b   : > { %4136 = vrot.lane.b32.xlu1 %v4034_v0, %s6219_s7  ;;  %4039 = vrot.lane.b32.xlu0 %v4034_v0, %s6218_s6  ;;  %v4091_v34 = vsel %vm2986_vm13, %v4034_v0, 0 }
 0xb7f   : > { %4240 = vrot.lane.b32.xlu1 %v4034_v0, %s6221_s9  ;;  %4188 = vrot.lane.b32.xlu0 %v4034_v0, %s6220_s8 }
 0xb83   : > { %4293 = vperm.xlu0 %6091, %v5516_v63   ;;  %v5521_v63 = vld [vmem:[%s8955_s2 + $0xb0] sm:$0xff] }
 0xb84   : > { %v4408_v10 = vpack.c.bf16 %v5521_v63, %v5521_v63 }
 0xbed   : > { %v4040_v60 = vpop.permute.xlu0 %4039  ;;  %v4137_v45 = vpop.permute.xlu1 %4136 }
 0xbee   : > { %v4045_v20 = vsel %vm2986_vm13, %v4040_v60, 0  ;;  %v4142_v24 = vsel %vm2986_vm13, %v4137_v45, 0  ;;  %v5525_v45 = vld [vmem:[%s8955_s2 + $0xc0] sm:$0xff] }
 0xbef   : > { %5551 = vmatpush3.bf16.msra.mxu1 %v4045_v20 }
 0xbf0   : > { %5556 = vmatprep.subr.bf16.mxu1 %v6225_v33 }
 0xbf1   : > { %v4189_v2 = vpop.permute.xlu0 %4188  ;;  %v4241_v48 = vpop.permute.xlu1 %4240 }
 0xbf2   : > { %5553 = vmatmul.mubr.msk.bf16.vlgmr.msra.gmra.mrb[52].mxu1 %vm2982_vm6, %v4037_v39  ;;  %v4194_v11 = vsel %vm2986_vm13, %v4189_v2, 0  ;;  %v4246_v38 = vsel %vm2986_vm13, %v4241_v48, 0  ;;  %v5523_v39 = vld [vmem:[%s8955_s2 + $0xb8] sm:$0xff] }
 0xbf3   : > { %5557 = vmatpush3.bf16.msra.mxu1 %v4091_v34  ;;  %5558 = vmatprep.mubr.msk.bf16.mxu1 %vm6227_vm1, %v6225_v33  ;;  %v4460_v34 = vpack.c.bf16 %v5523_v39, %v5523_v39 }
 0xbf4   : > { %5562 = vmatprep.subr.bf16.mxu1 %v6225_v33 }
 0xbfa   : > { %5559 = vmatmul.mubr.msk.bf16.vlgmr.msra.gmra.mrb[56].mxu1 %vm2982_vm6, %v4033_v15 }
 0xbfb   : > { %5563 = vmatpush3.bf16.msra.mxu1 %v4142_v24  ;;  %5564 = vmatprep.mubr.msk.bf16.mxu1 %vm6227_vm1, %v6225_v33  ;;  %v4512_v24 = vpack.c.bf16 %v5525_v45, %v5525_v45 }
 0xbfc   : > { %5568 = vmatprep.subr.bf16.mxu1 %v6225_v33 }
 0xc02   : > { %5565 = vmatmul.mubr.msk.bf16.vlgmr.msra.gmra.mrb[60].mxu1 %vm2982_vm6, %v4135_v56  ;;  %v4294_v3 = vpop.permute.xlu0 %4293 }
 0xc03   : > { %5569 = vmatpush3.bf16.msra.mxu1 %v4194_v11  ;;  %5570 = vmatprep.mubr.msk.bf16.mxu1 %vm6227_vm1, %v6225_v33 }
 0xc04   : > { %5574 = vmatprep.subr.bf16.mxu1 %v6225_v33 }
 0xc0a   : > { %5571 = vmatmul.mubr.msk.bf16.vlgmr.msra.gmra.mrb[64].mxu1 %vm2982_vm6, %v4187_v59 }
 0xc0b   : > { %5575 = vmatpush3.bf16.msra.mxu1 %v4246_v38  ;;  %5576 = vmatprep.mubr.msk.bf16.mxu1 %vm6227_vm1, %v6225_v33 }
 0xc0c   : > { %5580 = vmatprep.subr.bf16.mxu1 %v6225_v33 }
 0xc12   : > { %5577 = vmatmul.mubr.msk.bf16.vlgmr.msra.gmra.mrb[68].mxu1 %vm2982_vm6, %v4239_v26 }
 0xc13   : > { %5582 = vmatprep.mubr.msk.bf16.mxu1 %vm6227_vm1, %v6225_v33 }
 0xcc5   : > { %v4081_v25 = vpop.f32.mrb[52].mxu1 }
 0xcc6   : > { %v5554_v9 = vpop.f32.mrb[53].mxu1 }
 0xcc7   : > { %v4084_v53 = vpop.f32.mrb[54].mxu1 }
 0xcc8   : > { %v5555_v36 = vpop.f32.mrb[55].mxu1 }
 0xccd   : > { %v4127_v32 = vpop.f32.mrb[56].mxu1 }
 0xcce   : > { %v4128_v21 = vadd.f32 %v4127_v32, %v4081_v25  ;;  %v5560_v30 = vpop.f32.mrb[57].mxu1 }
 0xccf   : > { %v4130_v16 = vpop.f32.mrb[58].mxu1 }
 0xcd0   : > { %v5561_v28 = vpop.f32.mrb[59].mxu1 }
 0xcd5   : > { %v4178_v7 = vpop.f32.mrb[60].mxu1 }
 0xcd6   : > { %v4184_v31 = vadd.f32 %v4178_v7, %v4128_v21  ;;  %v5566_v61 = vpop.f32.mrb[61].mxu1 }
 0xcd7   : > { %v4181_v51 = vpop.f32.mrb[62].mxu1 }
 0xcd8   : > { %v5567_v1 = vpop.f32.mrb[63].mxu1 }
 0xcdd   : > { %v4230_v8 = vpop.f32.mrb[64].mxu1 }
 0xcde   : > { %v4236_v44 = vadd.f32 %v4230_v8, %v4184_v31  ;;  %v5572_v23 = vpop.f32.mrb[65].mxu1 }
 0xcdf   : > { %v4233_v58 = vpop.f32.mrb[66].mxu1 }
 0xce0   : > { %v5573_v52 = vpop.f32.mrb[67].mxu1 }
 0xce5   : > { %v4282_v4 = vpop.f32.mrb[68].mxu1 }
 0xce6   : > { %v4288_v49 = vadd.f32 %v4282_v4, %v4236_v44  ;;  %v5578_v54 = vpop.f32.mrb[69].mxu1 }
 0xce7   : > { %v4285_v29 = vpop.f32.mrb[70].mxu1 }
 0xce8   : > { %v4296_v6 = vadd.f32 %v4294_v3, %v4288_v49  ;;  %v5579_v41 = vpop.f32.mrb[71].mxu1 }
 0xcea   : > { %v4297_v13 = vmax.f32 %v4296_v6, 0.0 }
 0xcec   : > { %4299 = vrot.lane.b32.xlu1 %v4297_v13, %s6217_s25 }
 0xd5e   : > { %v4300_v17 = vpop.permute.xlu1 %4299 }
 0xd5f   : > { %v4302_v14 = vsel %vm9182_vm7, 0.0, %v4300_v17 }
 0xd60   : > { %v4303_v43 = vsel %vm4029_vm9, %v4302_v14, 0.0 }
 0xd61   : > { %v4307_v55 = vpack.c.bf16 %v4303_v43, %v4303_v43 }
 0xd63   : > { %4409 = vrot.lane.b32.xlu1 %v4307_v55, %s6219_s7  ;;  %4312 = vrot.lane.b32.xlu0 %v4307_v55, %s6218_s6  ;;  %v4364_v12 = vsel %vm2986_vm13, %v4307_v55, 0 }
 0xd67   : > { %4513 = vrot.lane.b32.xlu1 %v4307_v55, %s6221_s9  ;;  %4461 = vrot.lane.b32.xlu0 %v4307_v55, %s6220_s8 }
 0xd6b   : > { %4566 = vperm.xlu0 %6091, %v5527_v35  }
 0xdd5   : > { %v4313_v5 = vpop.permute.xlu0 %4312  ;;  %v4410_v46 = vpop.permute.xlu1 %4409 }
 0xdd6   : > { %v4318_v37 = vsel %vm2986_vm13, %v4313_v5, 0  ;;  %v4415_v0 = vsel %vm2986_vm13, %v4410_v46, 0 }
 0xdd7   : > { %5581 = vmatpush3.bf16.msra.mxu1 %v4318_v37 }
 0xdd8   : > { %5586 = vmatprep.subr.bf16.mxu1 %v6225_v33 }
 0xdd9   : > { %v4462_v60 = vpop.permute.xlu0 %4461  ;;  %v4514_v47 = vpop.permute.xlu1 %4513 }
 0xdda   : > { %5583 = vmatmul.mubr.msk.bf16.vlgmr.msra.gmra.mrb[72].mxu1 %vm2982_vm6, %v4310_v50  ;;  %v4467_v20 = vsel %vm2986_vm13, %v4462_v60, 0  ;;  %v4519_v15 = vsel %vm2986_vm13, %v4514_v47, 0  ;;  %vm4572_vm13 = vcmask 130048  }
 0xddb   : > { %5587 = vmatpush3.bf16.msra.mxu1 %v4364_v12  ;;  %5588 = vmatprep.mubr.msk.bf16.mxu1 %vm6227_vm1, %v6225_v33 }
 0xddc   : > { %5592 = vmatprep.subr.bf16.mxu1 %v6225_v33 }
 0xde2   : > { %5589 = vmatmul.mubr.msk.bf16.vlgmr.msra.gmra.mrb[76].mxu1 %vm2982_vm6, %v4306_v57 }
 0xde3   : > { %5593 = vmatpush3.bf16.msra.mxu1 %v4415_v0  ;;  %5594 = vmatprep.mubr.msk.bf16.mxu1 %vm6227_vm1, %v6225_v33 }
 0xde4   : > { %5598 = vmatprep.subr.bf16.mxu1 %v6225_v33 }
 0xdea   : > { %5595 = vmatmul.mubr.msk.bf16.vlgmr.msra.gmra.mrb[80].mxu1 %vm2982_vm6, %v4408_v10  ;;  %v4567_v61 = vpop.permute.xlu0 %4566 }
 0xdeb   : > { %5599 = vmatpush3.bf16.msra.mxu1 %v4467_v20  ;;  %5600 = vmatprep.mubr.msk.bf16.mxu1 %vm6227_vm1, %v6225_v33 }
 0xdec   : > { %5604 = vmatprep.subr.bf16.mxu1 %v6225_v33 }
 0xdf2   : > { %5601 = vmatmul.mubr.msk.bf16.vlgmr.msra.gmra.mrb[84].mxu1 %vm2982_vm6, %v4460_v34 }
 0xdf3   : > { %5605 = vmatpush3.bf16.msra.mxu1 %v4519_v15  ;;  %5606 = vmatprep.mubr.msk.bf16.mxu1 %vm6227_vm1, %v6225_v33 }
 0xdfa   : > { %5607 = vmatmul.mubr.msk.bf16.vlgmr.msra.gmra.mrb[88].mxu1 %vm2982_vm6, %v4512_v24 }
 0xead   : > { %v4354_v27 = vpop.f32.mrb[72].mxu1 }
 0xeae   : > { %v5584_v56 = vpop.f32.mrb[73].mxu1 }
 0xeaf   : > { %v4357_v2 = vpop.f32.mrb[74].mxu1 }
 0xeb0   : > { %v5585_v11 = vpop.f32.mrb[75].mxu1 }
 0xeb5   : > { %v4400_v62 = vpop.f32.mrb[76].mxu1 }
 0xeb6   : > { %v4401_v59 = vadd.f32 %v4400_v62, %v4354_v27  ;;  %v5590_v48 = vpop.f32.mrb[77].mxu1 }
 0xeb7   : > { %v4403_v38 = vpop.f32.mrb[78].mxu1 }
 0xeb8   : > { %v5591_v18 = vpop.f32.mrb[79].mxu1 }
 0xebd   : > { %v4451_v26 = vpop.f32.mrb[80].mxu1 }
 0xebe   : > { %v4457_v25 = vadd.f32 %v4451_v26, %v4401_v59  ;;  %v5596_v33 = vpop.f32.mrb[81].mxu1 }
 0xebf   : > { %v4454_v9 = vpop.f32.mrb[82].mxu1 }
 0xec0   : > { %v5597_v53 = vpop.f32.mrb[83].mxu1 }
 0xec5   : > { %v4503_v36 = vpop.f32.mrb[84].mxu1 }
 0xec6   : > { %v4509_v32 = vadd.f32 %v4503_v36, %v4457_v25  ;;  %v5602_v21 = vpop.f32.mrb[85].mxu1 }
 0xec7   : > { %v4506_v30 = vpop.f32.mrb[86].mxu1 }
 0xec8   : > { %v5603_v16 = vpop.f32.mrb[87].mxu1 }
 0xecd   : > { %v4555_v28 = vpop.f32.mrb[88].mxu1 }
 0xece   : > { %v4561_v7 = vadd.f32 %v4555_v28, %v4509_v32  ;;  %v5608_v31 = vpop.f32.mrb[89].mxu1 }
 0xecf   : > { %v4558_v51 = vpop.f32.mrb[90].mxu1 }
 0xed0   : > { %v4569_v1 = vadd.f32 %v4567_v61, %v4561_v7  ;;  %v5609_v8 = vpop.f32.mrb[91].mxu1 }
 0xed2   : > { %v4570_v44 = vadd.f32 %v4569_v1, %v4023_v42 }
 0xed4   : > { %v4571_v23 = vmax.f32 %v4570_v44, 0.0 }
 0xed6   : > { %4573 = vst.msk [vmem:[%s192_s19] sm:$0xff] %vm4572_vm13, %v4571_v23 }
 0xed7 PF: > { %s14_s15 = sadd.s32 1, %s6214_s15  }
 0xed8   : > { %p11_p4 = scmp.ge.s32.totalorder %s14_s15, 4  }
 0xeda   :  { %13 = sbr.rel (!%p11_p4) target bundleno = 1 (0x1), region = 99 }

// kernel: graphchiar_noseq_forward.5
= control target key start
LH: loop header
LB: loop body
LE: loop exit
PB: predicated region body
PF: predicated region fallthrough
CT: control target
= control target key end

     0   :  { %s3500_s12 = smov 0   ;;  %s4936_s0 = inlined_call_operand.vmem [shape: f32[2,8,16], index: 0, kind: input, shape index: {}]   ;;  %s4937_s1 = inlined_call_operand.vmem [shape: f32[2,1,256], index: 1, kind: input, shape index: {}]   ;;  %s4938_s2 = inlined_call_operand.vmem [shape: f32[200,145], index: 2, kind: input, shape index: {}]   ;;  %s4939_s3 = inlined_call_operand.vmem [shape: f32[2,1,256], index: 3, kind: output, shape index: {}]  }
   0x1 LB: > { %s2801_s13 = sadd.s32 4294967295, %s3440_s12   ;;  %p2805_p0 = scmp.ge.s32.totalorder %s3440_s12, 1  ;;  %s3440_s12 = sphi %s3500_s12, %s13_s12  }
   0x2   : > { %p145_p1 = scmp.lt.s32.totalorder %s3440_s12, 3 }
   0x4   : > { %p146_p2 = pnand %p2805_p0, %p145_p1 }
   0x5   : > { %p171_p3 = scmp.lt.s32.totalorder (!%p146_p2), %s2801_s13, 1  ;;  %v184_v0 = vlaneseq (!%p146_p2)  ;;  %s3442_s18 = smov (!%p146_p2), 1   ;;  %v3444_v13 = vmov (!%p146_p2), 0.0   ;;  %vm297_vm6 = vcmask (!%p146_p2), 1040384   ;;  %vm300_vm7 = vcmask (!%p146_p2), 1041408   ;;  %v261_v37 = vld [vmem:[%s4938_s2 + $0x8] sm:$0xff] (!%p146_p2) }
   0x6   : > { %149 = sbr.rel (%p146_p2) target bundleno = 5733 (0x1665), region = 32  ;;  %s3443_s19 = smov (!%p146_p2), 127   ;;  %v3447_v36 = vmov (!%p146_p2), 0   ;;  %v3448_v38 = vmov (!%p146_p2), 16   ;;  %vm349_vm8 = vcmask (!%p146_p2), 1043456   ;;  %vm309_vm9 = vcmask (!%p146_p2), 130048  }
   0x7   : > { %v3511_v1 = vshrl.u32 (!%p146_p2), %v184_v0, 7  ;;  %v3526_v7 = vand.u32 (!%p146_p2), 127, %v184_v0  ;;  %s3445_s20 = smov (!%p146_p2), 16   ;;  %s3446_s21 = smov (!%p146_p2), 112   ;;  %391 = vmatprep.mubr.bf16.mxu0 (!%p146_p2), %v3447_v36  ;;  %539 = vmatprep.mubr.bf16.mxu1 (!%p146_p2), %v3447_v36  ;;  %vm318_vm10 = vcmask (!%p146_p2), 916480   ;;  %vm331_vm11 = vcmask (!%p146_p2), 1042432  }
   0x8   : > { %3073 = vset.pattern.permute.xlu0 (!%p146_p2), %v3448_v38  ;;  %3104 = vset.pattern.permute.xlu1 (!%p146_p2), %v3448_v38  ;;  %vm334_vm12 = vcmask (!%p146_p2), 1045504   ;;  %vm350_vm13 = vcmask (!%p146_p2), 1044480   ;;  %v3449_v47 = vmov (!%p146_p2), 65535   ;;  %v260_v62 = vld [vmem:[%s4938_s2] sm:$0xff] (!%p146_p2)  ;;  %vm345_vm14 = vcmask (!%p146_p2), 72704   ;;  %s3451_s7 = smov (!%p146_p2), 120  }
   0x9   : > { %v265_v2 = vsub.s32 (!%p146_p2), 0, %v3511_v1  ;;  %v269_v3 = vsub.s32 (!%p146_p2), 1, %v3511_v1  ;;  %v186_v8 = vadd.s32 (!%p146_p2), 128, %v3526_v7  ;;  %v3530_v9 = vand.u32 (!%p146_p2), 15, %v3526_v7  ;;  %s3468_s27 = smov (!%p146_p2), 32   ;;  %s3469_s28 = smov (!%p146_p2), 48  }
   0xa   : > { %vm277_vm4 = vcmp.lt.s32.totalorder (!%p146_p2), %v3526_v7, 1  ;;  %vm286_vm5 = vcmp.lt.s32.totalorder (!%p146_p2), %v3526_v7, 127  ;;  %v351_v48 = vsel (!%p146_p2), %vm349_vm8, 4294967295, %v3449_v47  ;;  %vm3450_vm15 = vmmov (!%p146_p2), 0   ;;  %s3471_s30 = smov (!%p146_p2), 80   ;;  %s3472_s4 = smov (!%p146_p2), 96  }
   0xb   : > { %v3532_v10 = vand.u32 (!%p146_p2), 15, %v186_v8  ;;  %vm211_vm0 = vcmp.ge.s32.totalorder (!%p146_p2), %v3530_v9, 1  ;;  %vm217_vm2 = vcmp.lt.s32.totalorder (!%p146_p2), %v3530_v9, 15  ;;  %v352_v58 = vsel (!%p146_p2), %vm350_vm13, %v351_v48, 0  ;;  %s3473_s25 = smov (!%p146_p2), 2   ;;  %s3477_s24 = smov (!%p146_p2), 8  }
   0xc   : > { %v3541_v14 = vsel (!%p146_p2), %vm211_vm0, 1.0, %v3444_v13  ;;  %v3547_v16 = vsel (!%p146_p2), %vm217_vm2, 1.0, %v3444_v13  ;;  %vm561_vm0 = vcmask (!%p146_p2), 64512   ;;  %vm935_vm13 = vcmask (!%p146_p2), 392192  }
   0xd   : > { %s4955_s13 = smov (!%p171_p3, %s2801_s13), 1  ;;  %vm212_vm1 = vcmp.ge.s32.totalorder %v3532_v10, 1  ;;  %vm218_vm3 = vcmp.lt.s32.totalorder %v3532_v10, 15 }
   0xe   : > { %s2807_s14 = sshll.u32 %s4955_s13, 1  ;;  %v3544_v15 = vsel %vm212_vm1, 1.0, %v3444_v13  ;;  %v3550_v17 = vsel %vm218_vm3, 1.0, %v3444_v13  ;;  %s2806_s26 = sshll.u32 %s4955_s13, 3  ;;  %vm3642_vm1 = vmneg %vm309_vm9  ;;  %vm3453_vm3 = vmmov 1  }
   0xf   : > { %s178_s17 = scalar_lea.vmem %s4937_s1, %s2807_s14  ;;  %s174_s29 = scalar_lea.vmem %s4936_s0, %s2806_s26  ;;  %vm3651_vm2 = vmpackc.low %vm3642_vm1, %vm3642_vm1 }
  0x10   : > { %v259_v4 = vld [vmem:[%s178_s17] sm:$0x3]  ;;  %s3474_s26 = smov 126  }
  0x11   : > { %v266_v5 = vrot.slane %v259_v4, %v265_v2  ;;  %v270_v6 = vrot.slane %v259_v4, %v269_v3  ;;  %v337_v3 = vpack.c.bf16 %v260_v62, %v260_v62 }
  0x13   : > { %273 = vrot.lane.b32.xlu1 %v266_v5, %s3442_s18  ;;  %282 = vrot.lane.b32.xlu0 %v266_v5, %s3443_s19 }
  0x17   : > { %275 = vrot.lane.b32.xlu1 %v270_v6, %s3442_s18  ;;  %284 = vrot.lane.b32.xlu0 %v270_v6, %s3443_s19 }
  0x85   : > { %v274_v11 = vpop.permute.xlu1 %273  ;;  %v283_v12 = vpop.permute.xlu0 %282 }
  0x89   : > { %v276_v18 = vpop.permute.xlu1 %275  ;;  %v285_v19 = vpop.permute.xlu0 %284 }
  0x8a   : > { %v278_v20 = vsel %vm277_vm4, %v274_v11, %v276_v18  ;;  %v279_v21 = vsel %vm277_vm4, %v276_v18, %v274_v11  ;;  %v287_v22 = vsel %vm286_vm5, %v283_v12, %v285_v19  ;;  %v288_v23 = vsel %vm286_vm5, %v285_v19, %v283_v12 }
  0x8b   : > { %v280_v24 = vmul.f32 %v3541_v14, %v279_v21  ;;  %v281_v25 = vmul.f32 %v3544_v15, %v278_v20  ;;  %v289_v26 = vmul.f32 %v3547_v16, %v287_v22  ;;  %v290_v27 = vmul.f32 %v3550_v17, %v288_v23  ;;  %v554_v22 = vld [vmem:[%s174_s29] sm:$0xff]  ;;  %s3470_s29 = smov 64  }
  0x8c   : > { %v560_v23 = vpack.c.bf16 %v554_v22, %v554_v22 }
  0x8d   : > { %v293_v28 = vrot.slane %v289_v26, 6  ;;  %v294_v29 = vrot.slane %v290_v27, 6  ;;  %v298_v30 = vsel %vm297_vm6, %v280_v24, %v266_v5  ;;  %v299_v31 = vsel %vm297_vm6, %v281_v25, %v270_v6  ;;  %v555_v25 = vld [vmem:[%s4938_s2 + $0x130] sm:$0xff]  ;;  %v556_v26 = vld [vmem:[%s4938_s2 + $0x140] sm:$0xff]  ;;  %vm2832_vm6 = vmpackc.low %vm3453_vm3, %vm3642_vm1 }
  0x8e   : > { %v566_v24 = vsel %vm349_vm8, %v560_v23, 0  ;;  %v559_v27 = vpack.c.bf16 %v556_v26, %v555_v25  ;;  %vm944_vm1 = vcmask 785408   ;;  %vm230_vm3 = vcmp.lt.s32.totalorder %v3532_v10, 14 }
  0x8f   : > { %v301_v32 = vsel %vm300_vm7, %v298_v30, %v293_v28  ;;  %v302_v33 = vsel %vm300_vm7, %v299_v31, %v294_v29  ;;  %vm3665_vm7 = vmpackc.low %vm318_vm10, %vm318_vm10 }
  0x90   : > { %v3068_v34 = vpack.i.bf16 %v302_v33, %v301_v32  ;;  %v3063_v35 = vpack.i.bf16 %v301_v32, %v302_v33  ;;  %v323_v45 = vrot.slane %v302_v33, 5  ;;  %v322_v46 = vrot.slane %v301_v32, 5 }
  0x92   : > { %3069 = vrot.lane.b32.xlu1 %v3068_v34, %s3445_s20  ;;  %3064 = vrot.lane.b32.xlu0 %v3063_v35, %s3446_s21 }
  0x96   : > { %342 = vperm.xlu0 %3073, %v261_v37  }
 0x104   : > { %v3070_v39 = vpop.permute.xlu1 %3069  ;;  %v3065_v40 = vpop.permute.xlu0 %3064 }
 0x105   : > { %v3072_v41 = vunpack.i.h.bf16 %v3070_v39  ;;  %v3071_v42 = vunpack.i.l.bf16 %v3070_v39  ;;  %v3067_v43 = vunpack.i.h.bf16 %v3065_v40  ;;  %v3066_v44 = vunpack.i.l.bf16 %v3065_v40 }
 0x107   : > { %v313_v49 = vsel %vm309_vm9, 0.0, %v3071_v42  ;;  %v310_v50 = vsel %vm309_vm9, %v3071_v42, %v3072_v41  ;;  %v321_v51 = vsel %vm318_vm10, %v3066_v44, 0.0  ;;  %v319_v52 = vsel %vm318_vm10, %v3067_v43, %v3066_v44  ;;  %v405_v44 = vld [vmem:[%s4938_s2 + $0x28] sm:$0xff] }
 0x108   : > { %v328_v53 = vrot.slane %v321_v51, 2  ;;  %v333_v54 = vsel %vm331_vm11, %v310_v50, %v323_v45  ;;  %v327_v55 = vrot.slane %v319_v52, 2  ;;  %v332_v56 = vsel %vm331_vm11, %v313_v49, %v322_v46  ;;  %v404_v45 = vld [vmem:[%s4938_s2 + $0x18] sm:$0xff] }
 0x109   : > { %v3452_v46 = vmov 1   ;;  %vm497_vm11 = vcmask 588800  }
 0x10a   : > { %v336_v57 = vsel %vm334_vm12, %v333_v54, %v328_v53  ;;  %v335_v59 = vsel %vm334_vm12, %v332_v56, %v327_v55  ;;  %vm932_vm12 = vcmask 261120  }
 0x10b   : > { %v339_v60 = vpack.c.bf16 %v328_v53, %v336_v57  ;;  %v338_v61 = vpack.c.bf16 %v327_v55, %v335_v59 }
 0x10d   : > { %v357_v63 = vand.u32 %v352_v58, %v339_v60  ;;  %v354_v2 = vand.u32 %v352_v58, %v338_v61 }
 0x10f   : > { %359 = vmatprep.subr.bf16.mxu0 %v357_v63 }
 0x110   : > { %360 = vmatpush1.bf16.msra.mxu0 %v354_v2 }
 0x111   : > { %3005 = vmatprep.subr.bf16.mxu0 %v3444_v13 }
 0x113   : > { %2825 = vmatmul.mubr.msk.bf16.vlgmr.msra.gmra.mrb[0].mxu0 %vm345_vm14, %v337_v3  ;;  %vm938_vm14 = vcmask 523264  }
 0x114   : > { %3006 = vmatpush3.bf16.msra.mxu0 %v566_v24  ;;  %3007 = vmatprep.mubr.msk.bf16.mxu0 %vm3450_vm15, %v3444_v13 }
 0x115   : > { %v343_v4 = vpop.permute.xlu0 %342  ;;  %3011 = vmatprep.subr.bf16.mxu0 %v3444_v13 }
 0x11b   : > { %3008 = vmatmul.mubr.msk.bf16.vlgmr.msra.gmra.mrb[4].mxu0 %vm561_vm0, %v559_v27 }
 0x11c   : > { %3012 = vmatpush3.bf16.msra.mxu0 %v566_v24  ;;  %3013 = vmatprep.mubr.msk.bf16.mxu0 %vm3450_vm15, %v3444_v13  ;;  %vm941_vm15 = vcmask 654336  }
 0x1e6   : > { %v393_v5 = vpop.f32.mrb[0].mxu0 }
 0x1e7   : > { %v394_v6 = vadd.f32 %v393_v5, %v343_v4  ;;  %v395_v8 = vpop.f32.mrb[1].mxu0 }
 0x1e8   : > { %v397_v11 = vpop.f32.mrb[2].mxu0  ;;  %v396_v18 = vadd.f32 %v395_v8, %v343_v4 }
 0x1e9   : > { %v3586_v12 = vmax.f32 %v394_v6, 0.0  ;;  %v398_v19 = vpop.f32.mrb[3].mxu0 }
 0x1ea   : > { %v3592_v20 = vmax.f32 %v396_v18, 0.0 }
 0x1eb   : > { %414 = vrot.lane.b32.xlu0 %v3586_v12, %s3443_s19  ;;  %406 = vrot.lane.b32.xlu1 %v3586_v12, %s3442_s18 }
 0x1ec   : > { %v3074_v21 = vpack.i.bf16 %v3592_v20, %v3586_v12 }
 0x1ef   : > { %408 = vrot.lane.b32.xlu1 %v3592_v20, %s3442_s18 }
 0x1f3   : > { %416 = vrot.lane.b32.xlu1 %v3592_v20, %s3443_s19 }
 0x1f7   : > { %3075 = vrot.lane.b32.xlu1 %v3074_v21, %s3445_s20 }
 0x25d   : > { %v407_v28 = vpop.permute.xlu1 %406  ;;  %v415_v34 = vpop.permute.xlu0 %414 }
 0x261   : > { %v409_v29 = vpop.permute.xlu1 %408 }
 0x262   : > { %v410_v30 = vsel %vm277_vm4, %v407_v28, %v409_v29  ;;  %v411_v31 = vsel %vm277_vm4, %v409_v29, %v407_v28 }
 0x263   : > { %v412_v32 = vmul.f32 %v3541_v14, %v411_v31  ;;  %v413_v33 = vmul.f32 %v3544_v15, %v410_v30 }
 0x265   : > { %v417_v35 = vpop.permute.xlu1 %416  ;;  %v3094_v37 = vpack.i.bf16 %v413_v33, %v412_v32 }
 0x266   : > { %v418_v39 = vsel %vm286_vm5, %v415_v34, %v417_v35  ;;  %v419_v40 = vsel %vm286_vm5, %v417_v35, %v415_v34 }
 0x267   : > { %v420_v41 = vmul.f32 %v3547_v16, %v418_v39  ;;  %v421_v42 = vmul.f32 %v3550_v17, %v419_v40  ;;  %3095 = vrot.lane.b32.xlu1 %v3094_v37, %s3446_s21  ;;  %3080 = vrot.lane.b32.xlu0 %v3094_v37, %s3445_s20  ;;  %v3684_v37 = vpop.f32.mrb[4].mxu0 }
 0x268   : > { %v3009_v39 = vpop.f32.mrb[5].mxu0 }
 0x269   : > { %v3099_v43 = vpack.i.bf16 %v421_v42, %v420_v41  ;;  %v3076_v47 = vpop.permute.xlu1 %3075  ;;  %v482_v11 = vpack.c.bf16 %v421_v42, %v3592_v20  ;;  %v481_v24 = vpack.c.bf16 %v420_v41, %v3586_v12  ;;  %v3686_v40 = vpop.f32.mrb[6].mxu0 }
 0x26a   : > { %v3078_v48 = vunpack.i.h.bf16 %v3076_v47  ;;  %v3077_v49 = vunpack.i.l.bf16 %v3076_v47  ;;  %v3010_v41 = vpop.f32.mrb[7].mxu0  ;;  %v3455_v47 = vmov 10  }
 0x26b   : > { %3100 = vrot.lane.b32.xlu1 %v3099_v43, %s3446_s21  ;;  %3085 = vrot.lane.b32.xlu0 %v3099_v43, %s3445_s20 }
 0x26c   : > { %v441_v56 = vsel %vm309_vm9, %v3077_v49, %v3078_v48 }
 0x26f   : > { %3090 = vrot.lane.b32.xlu0 %v3074_v21, %s3446_s21  ;;  %489 = vperm.xlu1 %3104, %v404_v45  }
 0x273   : > { %610 = vrot.lane.b32.xlu0 %v559_v27, %s3451_s7  ;;  %965 = vrot.lane.b32.xlu1 %v559_v27, %s3446_s21 }
 0x274   : > { %3106 = vset.pattern.permute.xlu1 %v3452_v46 }
 0x277   : > { %494 = vperm.xlu0 %3073, %v405_v44  }
 0x27b   : > { %3105 = vset.pattern.permute.xlu0 %v3452_v46  ;;  %v3454_v46 = vmov 9  }
 0x2d9   : > { %v3081_v50 = vpop.permute.xlu0 %3080  ;;  %v3096_v54 = vpop.permute.xlu1 %3095 }
 0x2da   : > { %v3083_v51 = vunpack.i.h.bf16 %v3081_v50  ;;  %v3082_v52 = vunpack.i.l.bf16 %v3081_v50  ;;  %v3098_v21 = vunpack.i.h.bf16 %v3096_v54  ;;  %v3097_v22 = vunpack.i.l.bf16 %v3096_v54 }
 0x2dc   : > { %v440_v55 = vsel %vm309_vm9, %v3082_v52, %v3083_v51  ;;  %v2829_v62 = vpack.c.bf16 %v3077_v49, %v3082_v52  ;;  %v464_v12 = vsel %vm318_vm10, %v3097_v22, %v3098_v21  ;;  %v3456_v49 = vmov 2  }
 0x2dd   : > { %v3086_v57 = vpop.permute.xlu0 %3085  ;;  %v478_v58 = vpack.c.bf16 %v441_v56, %v440_v55  ;;  %v3101_v2 = vpop.permute.xlu1 %3100  ;;  %v3457_v56 = vmov 3   ;;  %v3464_v22 = vmov 15  }
 0x2de   : > { %v3088_v60 = vunpack.i.h.bf16 %v3086_v57  ;;  %v3087_v61 = vunpack.i.l.bf16 %v3086_v57  ;;  %v3103_v18 = vunpack.i.h.bf16 %v3101_v2  ;;  %v3102_v19 = vunpack.i.l.bf16 %v3101_v2 }
 0x2df   : > { %507 = vmatprep.subr.bf16.mxu1 %v478_v58 }
 0x2e0   : > { %2830 = vmatpush1.bf16.msk.msra.mxu1 %vm3651_vm2, %v2829_v62  ;;  %v442_v63 = vsel %vm309_vm9, %v3087_v61, %v3088_v60  ;;  %v2833_v5 = vpack.c.bf16 %v412_v32, %v3087_v61  ;;  %v475_v27 = vsel %vm318_vm10, %v3103_v18, 0.0  ;;  %v466_v28 = vsel %vm318_vm10, %v3102_v19, %v3103_v18  ;;  %v402_v32 = vld [vmem:[%s4938_s2 + $0x10] sm:$0xff] }
 0x2e1   : > { %v3091_v3 = vpop.permute.xlu0 %3090  ;;  %v480_v4 = vpack.c.bf16 %v413_v33, %v442_v63  ;;  %v486_v30 = vpack.c.bf16 %v475_v27, %v475_v27  ;;  %v485_v31 = vpack.c.bf16 %v466_v28, %v466_v28  ;;  %v403_v33 = vld [vmem:[%s4938_s2 + $0x20] sm:$0xff]  ;;  %v3461_v18 = vmov 11   ;;  %v557_v27 = vld [vmem:[%s4938_s2 + $0x138] sm:$0xff] }
 0x2e2   : > { %v3093_v6 = vunpack.i.h.bf16 %v3091_v3  ;;  %v3092_v8 = vunpack.i.l.bf16 %v3091_v3  ;;  %v476_v35 = vpack.c.bf16 %v403_v33, %v402_v32  ;;  %v3462_v19 = vmov 6  }
 0x2e3   : > { %509 = vmatprep.subr.bf16.mxu1 %v480_v4  ;;  %v502_v34 = vsel %vm349_vm8, %v485_v31, 0  ;;  %v3458_v4 = vmov 4  }
 0x2e4   : > { %2834 = vmatpush1.bf16.msk.msra.mxu1 %vm2832_vm6, %v2833_v5  ;;  %v2836_v26 = vpack.c.bf16 %v3093_v6, %v3098_v21  ;;  %v465_v20 = vsel %vm318_vm10, %v3092_v8, %v3093_v6  ;;  %v3459_v8 = vmov 12   ;;  %v3463_v21 = vmov 7  }
 0x2e5   : > { %v611_v23 = vpop.permute.xlu0 %610  ;;  %511 = vmatprep.subr.bf16.mxu1 %v482_v11  ;;  %v483_v29 = vpack.c.bf16 %v465_v20, %v464_v12  ;;  %v3460_v11 = vmov 13   ;;  %v3467_v20 = vmov 14   ;;  %vm1512_vm6 = vcmp.lt.s32.totalorder %v3526_v7, 126 }
 0x2e6   : > { %3014 = vmatmul.mubr.msk.bf16.vlgmr.msra.gmra.mrb[8].mxu0 %vm561_vm0, %v611_v23  ;;  %v3465_v23 = vmov 8  }
 0x2e7   : > { %1002 = vmatprep.mubr.bf16.mxu0 %v3447_v36 }
 0x2e8   : > { %512 = vmatpush1.bf16.msra.mxu1 %v481_v24  ;;  %v3466_v24 = vmov 5  }
 0x2e9   : > { %2837 = vmatprep.subr.msk.bf16.mxu1 %vm3665_vm7, %v2836_v26  ;;  %v558_v26 = vld [vmem:[%s4938_s2 + $0x148] sm:$0xff] }
 0x2ec   : > { %514 = vmatpush1.bf16.msra.mxu1 %v483_v29 }
 0x2ed   : > { %2838 = vmatprep.subr.msk.bf16.mxu1 %vm349_vm8, %v486_v30 }
 0x2ee   : > { %v490_v48 = vpop.permute.xlu1 %489 }
 0x2f0   : > { %516 = vmatpush1.bf16.msra.mxu1 %v502_v34 }
 0x2f2   : > { %v966_v6 = vpop.permute.xlu1 %965 }
 0x2f3   : > { %2839 = vmatmul.mubr.msk.bf16.vlgmr.msra.gmra.mrb[0].mxu1 %vm497_vm11, %v476_v35 }
 0x2f6   : > { %v495_v53 = vpop.permute.xlu0 %494 }
 0x3b9   : > { %v3688_v42 = vpop.f32.mrb[8].mxu0 }
 0x3ba   : > { %669 = vperm.xlu0 %3105, %v3688_v42   ;;  %v3015_v43 = vpop.f32.mrb[9].mxu0 }
 0x3bb   : > { %v3691_v44 = vpop.f32.mrb[10].mxu0 }
 0x3bc   : > { %673 = vperm.xlu1 %3106, %v3691_v44   ;;  %v3016_v45 = vpop.f32.mrb[11].mxu0 }
 0x3be   : > { %3108 = vset.pattern.permute.xlu0 %v3454_v46 }
 0x3bf   : > { %753 = vperm.xlu0 %3108, %v3691_v44  }
 0x3c0   : > { %3107 = vset.pattern.permute.xlu1 %v3454_v46 }
 0x3c1   : > { %749 = vperm.xlu1 %3107, %v3688_v42  }
 0x3c3   : > { %3110 = vset.pattern.permute.xlu0 %v3455_v47 }
 0x3c4   : > { %759 = vperm.xlu0 %3110, %v3688_v42  }
 0x3c5   : > { %3109 = vset.pattern.permute.xlu1 %v3456_v49 }
 0x3c6   : > { %v541_v50 = vpop.f32.mrb[0].mxu1  ;;  %679 = vperm.xlu1 %3109, %v3688_v42  }
 0x3c7   : > { %v543_v51 = vpop.f32.mrb[1].mxu1  ;;  %v542_v52 = vadd.f32 %v541_v50, %v490_v48 }
 0x3c8   : > { %v544_v54 = vadd.f32 %v543_v51, %v490_v48  ;;  %v545_v55 = vpop.f32.mrb[2].mxu1  ;;  %3113 = vset.pattern.permute.xlu0 %v3457_v56 }
 0x3c9   : > { %v550_v57 = vmax.f32 %v542_v52, 0.0  ;;  %v546_v58 = vadd.f32 %v545_v55, %v495_v53  ;;  %v547_v60 = vpop.f32.mrb[3].mxu1  ;;  %693 = vperm.xlu0 %3113, %v3691_v44  }
 0x3ca   : > { %v551_v61 = vmax.f32 %v544_v54, 0.0  ;;  %v548_v62 = vadd.f32 %v547_v60, %v495_v53  ;;  %683 = vperm.xlu1 %3109, %v3691_v44  }
 0x3cb   : > { %v552_v63 = vmax.f32 %v546_v58, 0.0 }
 0x3cc   : > { %v553_v2 = vmax.f32 %v548_v62, 0.0 }
 0x3cd   : > { %v963_v3 = vpack.c.bf16 %v552_v63, %v550_v57  ;;  %3115 = vset.pattern.permute.xlu0 %v3458_v4 }
 0x3ce   : > { %v964_v5 = vpack.c.bf16 %v553_v2, %v551_v61  ;;  %699 = vperm.xlu0 %3115, %v3688_v42   ;;  %3111 = vset.pattern.permute.xlu1 %v3455_v47 }
 0x3cf   : > { %763 = vperm.xlu1 %3111, %v3691_v44  }
 0x3d0   : > { %970 = vmatprep.subr.bf16.mxu0 %v964_v5 }
 0x3d1   : > { %971 = vmatpush1.bf16.msra.mxu0 %v963_v3 }
 0x3d2   : > { %3118 = vset.pattern.permute.xlu0 %v3459_v8 }
 0x3d3   : > { %783 = vperm.xlu0 %3118, %v3691_v44   ;;  %3112 = vset.pattern.permute.xlu1 %v3457_v56 }
 0x3d4   : > { %689 = vperm.xlu1 %3112, %v3688_v42   ;;  %2842 = vmatmul.mubr.msk.bf16.vlgmr.msra.gmra.mrb[12].mxu0 %vm309_vm9, %v966_v6 }
 0x3d7   : > { %3120 = vset.pattern.permute.xlu0 %v3460_v11 }
 0x3d8   : > { %789 = vperm.xlu0 %3120, %v3688_v42   ;;  %3114 = vset.pattern.permute.xlu1 %v3461_v18 }
 0x3d9   : > { %769 = vperm.xlu1 %3114, %v3688_v42  }
 0x3dc   : > { %3123 = vset.pattern.permute.xlu0 %v3462_v19 }
 0x3dd   : > { %723 = vperm.xlu0 %3123, %v3691_v44   ;;  %773 = vperm.xlu1 %3114, %v3691_v44  }
 0x3e1   : > { %3125 = vset.pattern.permute.xlu0 %v3463_v21  ;;  %3116 = vset.pattern.permute.xlu1 %v3458_v4 }
 0x3e2   : > { %729 = vperm.xlu0 %3125, %v3688_v42   ;;  %703 = vperm.xlu1 %3116, %v3691_v44  }
 0x3e6   : > { %3128 = vset.pattern.permute.xlu0 %v3464_v22  ;;  %3117 = vset.pattern.permute.xlu1 %v3459_v8 }
 0x3e7   : > { %813 = vperm.xlu0 %3128, %v3691_v44   ;;  %779 = vperm.xlu1 %3117, %v3688_v42  }
 0x3eb   : > { %3130 = vset.pattern.permute.xlu0 %v3465_v23  ;;  %3119 = vset.pattern.permute.xlu1 %v3466_v24 }
 0x3ec   : > { %739 = vperm.xlu0 %3130, %v3688_v42   ;;  %709 = vperm.xlu1 %3119, %v3688_v42  }
 0x3f0   : > { %713 = vperm.xlu1 %3119, %v3691_v44   ;;  %3133 = vset.pattern.permute.xlu0 %v3448_v38 }
 0x3f1   : > { %1024 = vperm.xlu0 %3133, %v558_v26  }
 0x3f4   : > { %3121 = vset.pattern.permute.xlu1 %v3460_v11 }
 0x3f5   : > { %793 = vperm.xlu1 %3121, %v3691_v44  }
 0x3f9   : > { %3122 = vset.pattern.permute.xlu1 %v3462_v19 }
 0x3fa   : > { %719 = vperm.xlu1 %3122, %v3688_v42  }
 0x3fe   : > { %3124 = vset.pattern.permute.xlu1 %v3467_v20 }
 0x3ff   : > { %799 = vperm.xlu1 %3124, %v3688_v42  }
 0x403   : > { %803 = vperm.xlu1 %3124, %v3691_v44  }
 0x407   : > { %3126 = vset.pattern.permute.xlu1 %v3463_v21 }
 0x408   : > { %733 = vperm.xlu1 %3126, %v3691_v44  }
 0x40c   : > { %3127 = vset.pattern.permute.xlu1 %v3464_v22 }
 0x40d   : > { %809 = vperm.xlu1 %3127, %v3688_v42  }
 0x411   : > { %3129 = vset.pattern.permute.xlu1 %v3447_v36 }
 0x412   : > { %658 = vperm.xlu1 %3129, %v3688_v42  }
 0x416   : > { %663 = vperm.xlu1 %3129, %v3691_v44  }
 0x41a   : > { %3131 = vset.pattern.permute.xlu1 %v3465_v23 }
 0x41b   : > { %743 = vperm.xlu1 %3131, %v3691_v44  }
 0x41f   : > { %3132 = vset.pattern.permute.xlu1 %v3448_v38 }
 0x420   : > { %1019 = vperm.xlu1 %3132, %v557_v27  }
 0x439   : > { %v670_v28 = vpop.permute.xlu0 %669 }
 0x43a   : > { %v676_v12 = vadd.f32 %v670_v28, %v3684_v37 }
 0x43b   : > { %v3735_v29 = vpop.permute.xlu1 %673 }
 0x43c   : > { %820 = vrot.lane.b32.xlu1 %v676_v12, %s3445_s20  ;;  %v677_v23 = vadd.f32 %v3735_v29, %v3686_v40 }
 0x43e   : > { %v3738_v31 = vpop.permute.xlu0 %753 }
 0x43f   : > { %v757_v27 = vadd.f32 %v3738_v31, %v3686_v40 }
 0x440   : > { %v750_v30 = vpop.permute.xlu1 %749 }
 0x441   : > { %v756_v32 = vadd.f32 %v750_v30, %v3684_v37 }
 0x443   : > { %876 = vrot.lane.b32.xlu1 %v756_v32, %s3445_s20  ;;  %v760_v35 = vpop.permute.xlu0 %759 }
 0x444   : > { %v766_v39 = vadd.f32 %v760_v35, %v3684_v37 }
 0x445   : > { %v680_v33 = vpop.permute.xlu1 %679 }
 0x446   : > { %v686_v34 = vadd.f32 %v680_v33, %v3684_v37 }
 0x448   : > { %828 = vrot.lane.b32.xlu1 %v686_v34, %s3468_s27  ;;  %v3750_v43 = vpop.permute.xlu0 %693 }
 0x449   : > { %v3744_v38 = vpop.permute.xlu1 %683  ;;  %v697_v30 = vadd.f32 %v3750_v43, %v3686_v40 }
 0x44a   : > { %v687_v12 = vadd.f32 %v3744_v38, %v3686_v40 }
 0x44c   : > { %884 = vrot.lane.b32.xlu1 %v766_v39, %s3468_s27 }
 0x44d   : > { %v700_v47 = vpop.permute.xlu0 %699 }
 0x44e   : > { %v3748_v41 = vpop.permute.xlu1 %763  ;;  %v706_v49 = vadd.f32 %v700_v47, %v3684_v37 }
 0x44f   : > { %v767_v29 = vadd.f32 %v3748_v41, %v3686_v40 }
 0x452   : > { %v784_v52 = vpop.permute.xlu0 %783 }
 0x453   : > { %v690_v42 = vpop.permute.xlu1 %689  ;;  %v787_v53 = vadd.f32 %v784_v52, %v3686_v40 }
 0x454   : > { %v696_v44 = vadd.f32 %v690_v42, %v3684_v37 }
 0x456   : > { %836 = vrot.lane.b32.xlu1 %v696_v44, %s3469_s28 }
 0x457   : > { %v790_v58 = vpop.permute.xlu0 %789 }
 0x458   : > { %v770_v45 = vpop.permute.xlu1 %769  ;;  %v796_v61 = vadd.f32 %v790_v58, %v3684_v37 }
 0x459   : > { %v776_v46 = vadd.f32 %v770_v45, %v3684_v37 }
 0x45b   : > { %892 = vrot.lane.b32.xlu1 %v776_v46, %s3469_s28 }
 0x45c   : > { %v774_v48 = vpop.permute.xlu1 %773  ;;  %v724_v3 = vpop.permute.xlu0 %723 }
 0x45d   : > { %v727_v4 = vadd.f32 %v724_v3, %v3686_v40  ;;  %v777_v31 = vadd.f32 %v774_v48, %v3686_v40 }
 0x45f   : > { %844 = vrot.lane.b32.xlu1 %v706_v49, %s3470_s29 }
 0x461   : > { %v704_v50 = vpop.permute.xlu1 %703  ;;  %v730_v18 = vpop.permute.xlu0 %729 }
 0x462   : > { %v707_v51 = vadd.f32 %v704_v50, %v3686_v40  ;;  %v736_v21 = vadd.f32 %v730_v18, %v3684_v37 }
 0x464   : > { %846 = vrot.lane.b32.xlu1 %v707_v51, %s3470_s29 }
 0x466   : > { %v780_v54 = vpop.permute.xlu1 %779  ;;  %v814_v20 = vpop.permute.xlu0 %813 }
 0x467   : > { %v786_v55 = vadd.f32 %v780_v54, %v3684_v37  ;;  %v817_v28 = vadd.f32 %v814_v20, %v3686_v40 }
 0x468   : > { %902 = vrot.lane.b32.xlu1 %v787_v53, %s3470_s29 }
 0x469   : > { %900 = vrot.lane.b32.xlu0 %v786_v55, %s3470_s29 }
 0x46b   : > { %v710_v56 = vpop.permute.xlu1 %709  ;;  %v740_v48 = vpop.permute.xlu0 %739 }
 0x46c   : > { %v716_v57 = vadd.f32 %v710_v56, %v3684_v37 }
 0x46e   : > { %852 = vrot.lane.b32.xlu0 %v716_v57, %s3471_s30 }
 0x46f   : > { %v714_v60 = vpop.permute.xlu1 %713 }
 0x470   : > { %v717_v62 = vadd.f32 %v714_v60, %v3686_v40  ;;  %v3809_v50 = vpop.permute.xlu0 %1024 }
 0x472   : > { %908 = vrot.lane.b32.xlu0 %v796_v61, %s3471_s30  ;;  %854 = vrot.lane.b32.xlu1 %v717_v62, %s3471_s30 }
 0x474   : > { %v794_v63 = vpop.permute.xlu1 %793 }
 0x475   : > { %v797_v2 = vadd.f32 %v794_v63, %v3686_v40 }
 0x477   : > { %910 = vrot.lane.b32.xlu1 %v797_v2, %s3471_s30 }
 0x479   : > { %v720_v5 = vpop.permute.xlu1 %719 }
 0x47a   : > { %v726_v6 = vadd.f32 %v720_v5, %v3684_v37 }
 0x47b   : > { %862 = vrot.lane.b32.xlu1 %v727_v4, %s3472_s4 }
 0x47c   : > { %860 = vrot.lane.b32.xlu0 %v726_v6, %s3472_s4 }
 0x47e   : > { %v800_v8 = vpop.permute.xlu1 %799 }
 0x47f   : > { %v806_v11 = vadd.f32 %v800_v8, %v3684_v37 }
 0x481   : > { %916 = vrot.lane.b32.xlu0 %v806_v11, %s3472_s4 }
 0x482   : > { %v804_v19 = vpop.permute.xlu1 %803 }
 0x483   : > { %v807_v22 = vadd.f32 %v804_v19, %v3686_v40 }
 0x485   : > { %868 = vrot.lane.b32.xlu0 %v736_v21, %s3446_s21  ;;  %918 = vrot.lane.b32.xlu1 %v807_v22, %s3472_s4 }
 0x487   : > { %v734_v24 = vpop.permute.xlu1 %733 }
 0x488   : > { %v737_v26 = vadd.f32 %v734_v24, %v3686_v40 }
 0x489   : > { %822 = vrot.lane.b32.xlu0 %v677_v23, %s3445_s20 }
 0x48a   : > { %870 = vrot.lane.b32.xlu1 %v737_v26, %s3446_s21 }
 0x48c   : > { %v810_v32 = vpop.permute.xlu1 %809 }
 0x48d   : > { %878 = vrot.lane.b32.xlu0 %v757_v27, %s3445_s20  ;;  %v816_v33 = vadd.f32 %v810_v32, %v3684_v37  ;;  %v746_v32 = vadd.f32 %v740_v48, %v3684_v37 }
 0x48e   : > { %926 = vrot.lane.b32.xlu1 %v817_v28, %s3446_s21 }
 0x491   : > { %830 = vrot.lane.b32.xlu0 %v687_v12, %s3468_s27  ;;  %v659_v41 = vpop.permute.xlu1 %658 }
 0x492   : > { %v666_v60 = vadd.f32 %v659_v41, %v3684_v37 }
 0x495   : > { %886 = vrot.lane.b32.xlu0 %v767_v29, %s3468_s27  ;;  %v664_v42 = vpop.permute.xlu1 %663 }
 0x496   : > { %v667_v12 = vadd.f32 %v664_v42, %v3686_v40 }
 0x499   : > { %838 = vrot.lane.b32.xlu0 %v697_v30, %s3469_s28 }
 0x49a   : > { %v744_v43 = vpop.permute.xlu1 %743 }
 0x49d   : > { %894 = vrot.lane.b32.xlu0 %v777_v31, %s3469_s28  ;;  %s182_s28 = scalar_lea.vmem %s4939_s3, %s2807_s14 }
 0x49f   : > { %v3807_v44 = vpop.permute.xlu1 %1019 }
 0x4a1   : > { %924 = vrot.lane.b32.xlu0 %v816_v33, %s3446_s21  ;;  %v747_v33 = vadd.f32 %v744_v43, %v3686_v40 }
 0x4a7   : > { %v1004_v34 = vpop.f32.mrb[12].mxu0 }
 0x4a8   : > { %v3801_v35 = vpop.f32.mrb[13].mxu0 }
 0x4a9   : > { %v3803_v38 = vpop.f32.mrb[14].mxu0 }
 0x4aa   : > { %v3805_v39 = vpop.f32.mrb[15].mxu0 }
 0x4ae   : > { %v821_v45 = vpop.permute.xlu1 %820 }
 0x4af   : > { %v930_v61 = vsel %vm309_vm9, %v666_v60, %v821_v45 }
 0x4b5   : > { %v877_v46 = vpop.permute.xlu1 %876 }
 0x4ba   : > { %v829_v47 = vpop.permute.xlu1 %828 }
 0x4bb   : > { %v933_v62 = vsel %vm932_vm12, %v930_v61, %v829_v47  ;;  %v949_v47 = vsel %vm309_vm9, %v746_v32, %v877_v46 }
 0x4be   : > { %v885_v49 = vpop.permute.xlu1 %884 }
 0x4c8   : > { %v837_v51 = vpop.permute.xlu1 %836 }
 0x4c9   : > { %v936_v3 = vsel %vm935_vm13, %v933_v62, %v837_v51 }
 0x4cd   : > { %v893_v53 = vpop.permute.xlu1 %892 }
 0x4d1   : > { %v845_v55 = vpop.permute.xlu1 %844 }
 0x4d2   : > { %v939_v4 = vsel %vm938_vm14, %v936_v3, %v845_v55 }
 0x4d6   : > { %v847_v57 = vpop.permute.xlu1 %846 }
 0x4da   : > { %v903_v63 = vpop.permute.xlu1 %902 }
 0x4db   : > { %v901_v52 = vpop.permute.xlu0 %900 }
 0x4e0   : > { %v853_v54 = vpop.permute.xlu0 %852 }
 0x4e1   : > { %v942_v5 = vsel %vm941_vm15, %v939_v4, %v853_v54  ;;  %v951_v54 = vsel %vm932_vm12, %v949_v47, %v885_v49 }
 0x4e2   : > { %v953_v40 = vsel %vm935_vm13, %v951_v54, %v893_v53 }
 0x4e4   : > { %v909_v56 = vpop.permute.xlu0 %908  ;;  %v855_v6 = vpop.permute.xlu1 %854 }
 0x4e9   : > { %v911_v23 = vpop.permute.xlu1 %910 }
 0x4ed   : > { %v863_v26 = vpop.permute.xlu1 %862 }
 0x4ee   : > { %v861_v58 = vpop.permute.xlu0 %860 }
 0x4ef   : > { %v945_v8 = vsel %vm944_vm1, %v942_v5, %v861_v58 }
 0x4f3   : > { %v917_v2 = vpop.permute.xlu0 %916 }
 0x4f7   : > { %v869_v11 = vpop.permute.xlu0 %868  ;;  %v919_v27 = vpop.permute.xlu1 %918 }
 0x4f8   : > { %v947_v18 = vsel %vm318_vm10, %v945_v8, %v869_v11 }
 0x4f9   : > { %v1013_v19 = vadd.f32 %v1004_v34, %v947_v18 }
 0x4fb   : > { %v3820_v21 = vadd.f32 %v3807_v44, %v1013_v19  ;;  %v823_v22 = vpop.permute.xlu0 %822 }
 0x4fc   : > { %v931_v29 = vsel %vm309_vm9, %v667_v12, %v823_v22  ;;  %v871_v41 = vpop.permute.xlu1 %870 }
 0x4fd   : > { %1035 = vrot.lane.b32.xlu0 %v3820_v21, %s3442_s18 }
 0x4ff   : > { %v879_v24 = vpop.permute.xlu0 %878 }
 0x500   : > { %v950_v51 = vsel %vm309_vm9, %v747_v33, %v879_v24  ;;  %v927_v3 = vpop.permute.xlu1 %926 }
 0x503   : > { %v831_v20 = vpop.permute.xlu0 %830 }
 0x504   : > { %v934_v30 = vsel %vm932_vm12, %v931_v29, %v831_v20 }
 0x507   : > { %v887_v28 = vpop.permute.xlu0 %886 }
 0x508   : > { %v952_v55 = vsel %vm932_vm12, %v950_v51, %v887_v28 }
 0x50b   : > { %v839_v31 = vpop.permute.xlu0 %838 }
 0x50c   : > { %v937_v34 = vsel %vm935_vm13, %v934_v30, %v839_v31 }
 0x50d   : > { %v940_v45 = vsel %vm938_vm14, %v937_v34, %v847_v57  ;;  %v955_v57 = vsel %vm938_vm14, %v953_v40, %v901_v52 }
 0x50e   : > { %v943_v42 = vsel %vm941_vm15, %v940_v45, %v855_v6  ;;  %v957_v61 = vsel %vm941_vm15, %v955_v57, %v909_v56 }
 0x50f   : > { %v946_v58 = vsel %vm944_vm1, %v943_v42, %v863_v26  ;;  %v895_v37 = vpop.permute.xlu0 %894  ;;  %v959_v62 = vsel %vm944_vm1, %v957_v61, %v917_v2 }
 0x510   : > { %v948_v43 = vsel %vm318_vm10, %v946_v58, %v871_v41  ;;  %v954_v48 = vsel %vm935_vm13, %v952_v55, %v895_v37  ;;  %vm4302_vm13 = vmpackc.low %vm944_vm1, %vm944_vm1 }
 0x511   : > { %v1015_v46 = vadd.f32 %v3803_v38, %v948_v43  ;;  %v956_v60 = vsel %vm938_vm14, %v954_v48, %v903_v63 }
 0x512   : > { %v958_v49 = vsel %vm941_vm15, %v956_v60, %v911_v23  ;;  %vm236_vm15 = vcmp.ge.s32.totalorder %v3532_v10, 4 }
 0x513   : > { %v3847_v4 = vadd.f32 %v3809_v50, %v1015_v46  ;;  %v960_v53 = vsel %vm944_vm1, %v958_v49, %v919_v27  ;;  %v925_v5 = vpop.permute.xlu0 %924 }
 0x514   : > { %v962_v6 = vsel %vm318_vm10, %v960_v53, %v927_v3  ;;  %v961_v52 = vsel %vm318_vm10, %v959_v62, %v925_v5 }
 0x515   : > { %v1016_v38 = vadd.f32 %v3805_v39, %v962_v6  ;;  %v1014_v63 = vadd.f32 %v3801_v35, %v961_v52  ;;  %1037 = vrot.lane.b32.xlu1 %v3847_v4, %s3442_s18  ;;  %v1032_v35 = vld [vmem:[%s4938_s2 + $0x38] sm:$0xff]  ;;  %v1034_v39 = vld [vmem:[%s4938_s2 + $0x48] sm:$0xff] }
 0x517   : > { %v3857_v56 = vadd.f32 %v3809_v50, %v1016_v38  ;;  %v3860_v2 = vadd.f32 %v3807_v44, %v1014_v63  ;;  %v1176_v44 = vpack.c.bf16 %v1034_v39, %v1032_v35 }
 0x519   : > { %1039 = vrot.lane.b32.xlu0 %v3860_v2, %s3442_s18  ;;  %1041 = vrot.lane.b32.xlu1 %v3857_v56, %s3442_s18  ;;  %v3139_v45 = vpack.i.bf16 %v3860_v2, %v3820_v21  ;;  %v3149_v47 = vpack.i.bf16 %v3857_v56, %v3847_v4 }
 0x51a   : > { %2867 = vmatprep.mubr.msk.bf16.mxu1 %vm309_vm9, %v1176_v44 }
 0x51d   : > { %1051 = vrot.lane.b32.xlu0 %v3820_v21, %s3443_s19  ;;  %1053 = vrot.lane.b32.xlu1 %v3847_v4, %s3443_s19 }
 0x521   : > { %1055 = vrot.lane.b32.xlu0 %v3860_v2, %s3443_s19  ;;  %1057 = vrot.lane.b32.xlu1 %v3857_v56, %s3443_s19 }
 0x56f   : > { %v1036_v50 = vpop.permute.xlu0 %1035 }
 0x587   : > { %v1038_v8 = vpop.permute.xlu1 %1037 }
 0x58b   : > { %v1040_v11 = vpop.permute.xlu0 %1039  ;;  %v1042_v18 = vpop.permute.xlu1 %1041 }
 0x58c   : > { %v1043_v19 = vsel %vm277_vm4, %v1036_v50, %v1040_v11  ;;  %v1045_v22 = vsel %vm277_vm4, %v1040_v11, %v1036_v50  ;;  %v1044_v23 = vsel %vm277_vm4, %v1038_v8, %v1042_v18  ;;  %v1046_v24 = vsel %vm277_vm4, %v1042_v18, %v1038_v8 }
 0x58d   : > { %v3890_v26 = vmul.f32 %v3541_v14, %v1045_v22  ;;  %v3893_v20 = vmul.f32 %v3544_v15, %v1043_v19  ;;  %v3896_v27 = vmul.f32 %v3541_v14, %v1046_v24  ;;  %v3899_v28 = vmul.f32 %v3544_v15, %v1044_v23 }
 0x58f   : > { %v1052_v12 = vpop.permute.xlu0 %1051  ;;  %v1054_v29 = vpop.permute.xlu1 %1053  ;;  %v3134_v30 = vpack.i.bf16 %v3893_v20, %v3890_v26  ;;  %v3144_v31 = vpack.i.bf16 %v3899_v28, %v3896_v27  ;;  %v1184_v32 = vpack.c.bf16 %v3899_v28, %v3893_v20  ;;  %v1183_v33 = vpack.c.bf16 %v3896_v27, %v3890_v26 }
 0x591   : > { %3135 = vrot.lane.b32.xlu0 %v3134_v30, %s3445_s20  ;;  %3145 = vrot.lane.b32.xlu1 %v3144_v31, %s3445_s20 }
 0x593   : > { %v1056_v34 = vpop.permute.xlu0 %1055  ;;  %v1058_v41 = vpop.permute.xlu1 %1057 }
 0x594   : > { %v1059_v51 = vsel %vm286_vm5, %v1052_v12, %v1056_v34  ;;  %v1061_v42 = vsel %vm286_vm5, %v1056_v34, %v1052_v12  ;;  %v1060_v54 = vsel %vm286_vm5, %v1054_v29, %v1058_v41  ;;  %v1062_v55 = vsel %vm286_vm5, %v1058_v41, %v1054_v29 }
 0x595   : > { %v3924_v58 = vmul.f32 %v3547_v16, %v1059_v51  ;;  %v3927_v37 = vmul.f32 %v3550_v17, %v1061_v42  ;;  %v3930_v40 = vmul.f32 %v3547_v16, %v1060_v54  ;;  %v3933_v43 = vmul.f32 %v3550_v17, %v1062_v55  ;;  %3140 = vrot.lane.b32.xlu0 %v3139_v45, %s3445_s20 }
 0x596   : > { %3150 = vrot.lane.b32.xlu1 %v3149_v47, %s3445_s20  ;;  %v1186_v55 = vpack.c.bf16 %v3857_v56, %v3860_v2 }
 0x597   : > { %v3154_v48 = vpack.i.bf16 %v3927_v37, %v3924_v58  ;;  %v3159_v57 = vpack.i.bf16 %v3933_v43, %v3930_v40  ;;  %v1188_v46 = vpack.c.bf16 %v3933_v43, %v3927_v37  ;;  %v1187_v60 = vpack.c.bf16 %v3930_v40, %v3924_v58 }
 0x599   : > { %3155 = vrot.lane.b32.xlu0 %v3154_v48, %s3445_s20 }
 0x59a   : > { %3160 = vrot.lane.b32.xlu1 %v3159_v57, %s3445_s20 }
 0x59d   : > { %3165 = vrot.lane.b32.xlu0 %v3134_v30, %s3446_s21 }
 0x59e   : > { %3175 = vrot.lane.b32.xlu1 %v3144_v31, %s3446_s21 }
 0x5a1   : > { %3170 = vrot.lane.b32.xlu0 %v3139_v45, %s3446_s21 }
 0x5a2   : > { %3180 = vrot.lane.b32.xlu1 %v3149_v47, %s3446_s21 }
 0x5a5   : > { %3185 = vrot.lane.b32.xlu0 %v3154_v48, %s3446_s21  ;;  %v1185_v48 = vpack.c.bf16 %v3847_v4, %v3820_v21 }
 0x5a6   : > { %3190 = vrot.lane.b32.xlu1 %v3159_v57, %s3446_s21 }
 0x5a9   : > { %1197 = vperm.xlu0 %3133, %v1032_v35  }
 0x5aa   : > { %1202 = vperm.xlu1 %3132, %v1034_v39  }
 0x603   : > { %v3136_v61 = vpop.permute.xlu0 %3135  ;;  %v3146_v49 = vpop.permute.xlu1 %3145 }
 0x604   : > { %v3138_v62 = vunpack.i.h.bf16 %v3136_v61  ;;  %v3137_v3 = vunpack.i.l.bf16 %v3136_v61  ;;  %v3148_v53 = vunpack.i.h.bf16 %v3146_v49  ;;  %v3147_v5 = vunpack.i.l.bf16 %v3146_v49 }
 0x606   : > { %v1103_v6 = vsel %vm309_vm9, %v3137_v3, %v3138_v62  ;;  %v1104_v52 = vsel %vm309_vm9, %v3147_v5, %v3148_v53  ;;  %v2846_v44 = vpack.c.bf16 %v3147_v5, %v3137_v3 }
 0x607   : > { %v3141_v38 = vpop.permute.xlu0 %3140  ;;  %v1178_v63 = vpack.c.bf16 %v1104_v52, %v1103_v6 }
 0x608   : > { %v3143_v50 = vunpack.i.h.bf16 %v3141_v38  ;;  %v3142_v8 = vunpack.i.l.bf16 %v3141_v38  ;;  %v3151_v11 = vpop.permute.xlu1 %3150 }
 0x609   : > { %v3153_v18 = vunpack.i.h.bf16 %v3151_v11  ;;  %v3152_v19 = vunpack.i.l.bf16 %v3151_v11  ;;  %1208 = vmatprep.subr.bf16.mxu1 %v1178_v63 }
 0x60a   : > { %2847 = vmatpush1.bf16.msk.msra.mxu1 %vm3651_vm2, %v2846_v44  ;;  %v1105_v35 = vsel %vm309_vm9, %v3142_v8, %v3143_v50 }
 0x60b   : > { %v3156_v39 = vpop.permute.xlu0 %3155  ;;  %v1106_v22 = vsel %vm309_vm9, %v3152_v19, %v3153_v18  ;;  %v2851_v30 = vpack.c.bf16 %v3152_v19, %v3142_v8  ;;  %v1031_v18 = vld [vmem:[%s4938_s2 + $0x30] sm:$0xff]  ;;  %v1033_v19 = vld [vmem:[%s4938_s2 + $0x40] sm:$0xff] }
 0x60c   : > { %v3158_v23 = vunpack.i.h.bf16 %v3156_v39  ;;  %v3157_v24 = vunpack.i.l.bf16 %v3156_v39  ;;  %v3161_v12 = vpop.permute.xlu1 %3160  ;;  %v1180_v29 = vpack.c.bf16 %v1106_v22, %v1105_v35  ;;  %v1175_v39 = vpack.c.bf16 %v1033_v19, %v1031_v18 }
 0x60d   : > { %v3163_v31 = vunpack.i.h.bf16 %v3161_v12  ;;  %v3162_v34 = vunpack.i.l.bf16 %v3161_v12 }
 0x60e   : > { %1210 = vmatprep.subr.bf16.mxu1 %v1180_v29  ;;  %v1107_v41 = vsel %vm309_vm9, %v3157_v24, %v3158_v23 }
 0x60f   : > { %2852 = vmatpush1.bf16.msk.msra.mxu1 %vm3651_vm2, %v2851_v30  ;;  %v1108_v45 = vsel %vm309_vm9, %v3162_v34, %v3163_v31  ;;  %v2856_v51 = vpack.c.bf16 %v3162_v34, %v3157_v24  ;;  %v3166_v42 = vpop.permute.xlu0 %3165 }
 0x610   : > { %v1182_v47 = vpack.c.bf16 %v1108_v45, %v1107_v41  ;;  %v3176_v54 = vpop.permute.xlu1 %3175  ;;  %v3168_v57 = vunpack.i.h.bf16 %v3166_v42  ;;  %v3167_v61 = vunpack.i.l.bf16 %v3166_v42 }
 0x611   : > { %v3178_v49 = vunpack.i.h.bf16 %v3176_v54  ;;  %v3177_v62 = vunpack.i.l.bf16 %v3176_v54 }
 0x612   : > { %1212 = vmatprep.subr.bf16.mxu1 %v1182_v47  ;;  %v1151_v53 = vsel %vm318_vm10, %v3167_v61, %v3168_v57  ;;  %v1258_v61 = vld [vmem:[%s4938_s2 + $0x68] sm:$0xff] }
 0x613   : > { %2857 = vmatpush1.bf16.msk.msra.mxu1 %vm3651_vm2, %v2856_v51  ;;  %v3171_v37 = vpop.permute.xlu0 %3170  ;;  %v2859_v26 = vpack.c.bf16 %v3178_v49, %v3168_v57  ;;  %v1152_v27 = vsel %vm318_vm10, %v3177_v62, %v3178_v49  ;;  %v1256_v57 = vld [vmem:[%s4938_s2 + $0x58] sm:$0xff] }
 0x614   : > { %1214 = vmatprep.subr.bf16.mxu1 %v1184_v32  ;;  %v3181_v43 = vpop.permute.xlu1 %3180  ;;  %v3173_v20 = vunpack.i.h.bf16 %v3171_v37  ;;  %v3172_v28 = vunpack.i.l.bf16 %v3171_v37  ;;  %v1189_v38 = vpack.c.bf16 %v1152_v27, %v1151_v53  ;;  %v1400_v49 = vpack.c.bf16 %v1258_v61, %v1256_v57 }
 0x615   : > { %v3183_v32 = vunpack.i.h.bf16 %v3181_v43  ;;  %v3182_v3 = vunpack.i.l.bf16 %v3181_v43 }
 0x616   : > { %2892 = vmatprep.mubr.msk.bf16.mxu0 %vm309_vm9, %v1400_v49 }
 0x617   : > { %1215 = vmatpush1.bf16.msra.mxu1 %v1183_v33  ;;  %v3186_v33 = vpop.permute.xlu0 %3185  ;;  %v2862_v6 = vpack.c.bf16 %v3183_v32, %v3173_v20  ;;  %v1154_v52 = vsel %vm318_vm10, %v3182_v3, %v3183_v32 }
 0x618   : > { %1216 = vmatprep.subr.bf16.mxu1 %v1186_v55  ;;  %v3191_v5 = vpop.permute.xlu1 %3190  ;;  %v3188_v63 = vunpack.i.h.bf16 %v3186_v33  ;;  %v3187_v44 = vunpack.i.l.bf16 %v3186_v33 }
 0x619   : > { %v3193_v50 = vunpack.i.h.bf16 %v3191_v5  ;;  %v3192_v8 = vunpack.i.l.bf16 %v3191_v5 }
 0x61a   : > { %v1155_v58 = vsel %vm318_vm10, %v3187_v44, %v3188_v63 }
 0x61b   : > { %1217 = vmatpush1.bf16.msra.mxu1 %v1185_v48  ;;  %v2865_v40 = vpack.c.bf16 %v3193_v50, %v3188_v63 }
 0x61c   : > { %1218 = vmatprep.subr.bf16.mxu1 %v1188_v46  ;;  %v1153_v46 = vsel %vm318_vm10, %v3172_v28, %v3173_v20 }
 0x61d   : > { %v1191_v11 = vpack.c.bf16 %v1154_v52, %v1153_v46 }
 0x61f   : > { %1219 = vmatpush1.bf16.msra.mxu1 %v1187_v60  ;;  %v1156_v60 = vsel %vm318_vm10, %v3192_v8, %v3193_v50 }
 0x620   : > { %2860 = vmatprep.subr.msk.bf16.mxu1 %vm3665_vm7, %v2859_v26  ;;  %v1193_v35 = vpack.c.bf16 %v1156_v60, %v1155_v58 }
 0x623   : > { %1221 = vmatpush1.bf16.msra.mxu1 %v1189_v38 }
 0x624   : > { %2863 = vmatprep.subr.msk.bf16.mxu1 %vm3665_vm7, %v2862_v6 }
 0x627   : > { %1223 = vmatpush1.bf16.msra.mxu1 %v1191_v11 }
 0x628   : > { %2866 = vmatprep.subr.msk.bf16.mxu1 %vm3665_vm7, %v2865_v40  ;;  %v1198_v22 = vpop.permute.xlu0 %1197 }
 0x629   : > { %v1203_v29 = vpop.permute.xlu1 %1202 }
 0x62b   : > { %1225 = vmatpush1.bf16.msra.mxu1 %v1193_v35 }
 0x62e   : > { %1241 = vmatmul.mubr.bf16.vlgmr.msra.gmra.mrb[4].mxu1 %v1175_v39 }
 0x701   : > { %v1242_v23 = vpop.f32.mrb[4].mxu1 }
 0x702   : > { %v1243_v24 = vadd.f32 %v1242_v23, %v1198_v22  ;;  %v1244_v12 = vpop.f32.mrb[5].mxu1 }
 0x703   : > { %v1245_v30 = vadd.f32 %v1244_v12, %v1198_v22  ;;  %v1246_v31 = vpop.f32.mrb[6].mxu1 }
 0x704   : > { %v3996_v34 = vmax.f32 %v1243_v24, 0.0  ;;  %v1247_v41 = vadd.f32 %v1246_v31, %v1203_v29  ;;  %v1248_v45 = vpop.f32.mrb[7].mxu1 }
 0x705   : > { %v3998_v47 = vmax.f32 %v1245_v30, 0.0  ;;  %v1249_v51 = vadd.f32 %v1248_v45, %v1203_v29 }
 0x706   : > { %v4000_v42 = vmax.f32 %v1247_v41, 0.0  ;;  %1259 = vrot.lane.b32.xlu0 %v3996_v34, %s3442_s18 }
 0x707   : > { %v4004_v54 = vmax.f32 %v1249_v51, 0.0  ;;  %v3199_v55 = vpack.i.bf16 %v3998_v47, %v3996_v34 }
 0x708   : > { %1261 = vrot.lane.b32.xlu1 %v4000_v42, %s3442_s18  ;;  %v1409_v37 = vpack.c.bf16 %v4000_v42, %v3996_v34 }
 0x709   : > { %v3209_v43 = vpack.i.bf16 %v4004_v54, %v4000_v42  ;;  %v1410_v48 = vpack.c.bf16 %v4004_v54, %v3998_v47 }
 0x70a   : > { %1263 = vrot.lane.b32.xlu0 %v3998_v47, %s3442_s18 }
 0x70c   : > { %1265 = vrot.lane.b32.xlu1 %v4004_v54, %s3442_s18  ;;  %s3475_s18 = smov 4  }
 0x70e   : > { %1275 = vrot.lane.b32.xlu0 %v3996_v34, %s3443_s19 }
 0x710   : > { %1277 = vrot.lane.b32.xlu1 %v4000_v42, %s3443_s19 }
 0x712   : > { %1279 = vrot.lane.b32.xlu0 %v3998_v47, %s3443_s19 }
 0x714   : > { %1281 = vrot.lane.b32.xlu1 %v4004_v54, %s3443_s19  ;;  %s3476_s19 = smov 124  }
 0x778   : > { %v1260_v62 = vpop.permute.xlu0 %1259 }
 0x77a   : > { %v1262_v20 = vpop.permute.xlu1 %1261 }
 0x77c   : > { %v1264_v28 = vpop.permute.xlu0 %1263 }
 0x77d   : > { %v1267_v32 = vsel %vm277_vm4, %v1260_v62, %v1264_v28  ;;  %v1269_v3 = vsel %vm277_vm4, %v1264_v28, %v1260_v62 }
 0x77e   : > { %v4040_v53 = vmul.f32 %v3541_v14, %v1269_v3  ;;  %v4043_v26 = vmul.f32 %v3544_v15, %v1267_v32  ;;  %v1266_v27 = vpop.permute.xlu1 %1265 }
 0x77f   : > { %v1268_v33 = vsel %vm277_vm4, %v1262_v20, %v1266_v27  ;;  %v1270_v5 = vsel %vm277_vm4, %v1266_v27, %v1262_v20  ;;  %vm223_vm4 = vcmp.ge.s32.totalorder %v3530_v9, 2 }
 0x780   : > { %v4050_v46 = vmul.f32 %v3541_v14, %v1270_v5  ;;  %v4053_v6 = vmul.f32 %v3544_v15, %v1268_v33  ;;  %v1276_v52 = vpop.permute.xlu0 %1275  ;;  %v3194_v38 = vpack.i.bf16 %v4043_v26, %v4040_v53 }
 0x782   : > { %v1278_v63 = vpop.permute.xlu1 %1277  ;;  %3195 = vrot.lane.b32.xlu0 %v3194_v38, %s3445_s20  ;;  %v3204_v44 = vpack.i.bf16 %v4053_v6, %v4050_v46  ;;  %v1408_v50 = vpack.c.bf16 %v4053_v6, %v4043_v26  ;;  %v1407_v14 = vpack.c.bf16 %v4050_v46, %v4040_v53 }
 0x784   : > { %3205 = vrot.lane.b32.xlu1 %v3204_v44, %s3445_s20  ;;  %v1280_v15 = vpop.permute.xlu0 %1279 }
 0x785   : > { %v1283_v8 = vsel %vm286_vm5, %v1276_v52, %v1280_v15  ;;  %v1285_v11 = vsel %vm286_vm5, %v1280_v15, %v1276_v52 }
 0x786   : > { %v4070_v58 = vmul.f32 %v3547_v16, %v1283_v8  ;;  %v4073_v40 = vmul.f32 %v3550_v17, %v1285_v11  ;;  %v1282_v60 = vpop.permute.xlu1 %1281  ;;  %3200 = vrot.lane.b32.xlu0 %v3199_v55, %s3445_s20 }
 0x787   : > { %v1284_v18 = vsel %vm286_vm5, %v1278_v63, %v1282_v60  ;;  %v1286_v19 = vsel %vm286_vm5, %v1282_v60, %v1278_v63  ;;  %vm224_vm5 = vcmp.ge.s32.totalorder %v3532_v10, 2 }
 0x788   : > { %v4081_v35 = vmul.f32 %v3547_v16, %v1284_v18  ;;  %v4084_v39 = vmul.f32 %v3550_v17, %v1286_v19  ;;  %3210 = vrot.lane.b32.xlu1 %v3209_v43, %s3445_s20  ;;  %v3214_v22 = vpack.i.bf16 %v4073_v40, %v4070_v58 }
 0x78a   : > { %3215 = vrot.lane.b32.xlu0 %v3214_v22, %s3445_s20  ;;  %v3219_v23 = vpack.i.bf16 %v4084_v39, %v4081_v35  ;;  %v1412_v24 = vpack.c.bf16 %v4084_v39, %v4073_v40  ;;  %v1411_v16 = vpack.c.bf16 %v4081_v35, %v4070_v58 }
 0x78c   : > { %3220 = vrot.lane.b32.xlu1 %v3219_v23, %s3445_s20 }
 0x78e   : > { %3225 = vrot.lane.b32.xlu0 %v3194_v38, %s3446_s21 }
 0x790   : > { %3235 = vrot.lane.b32.xlu1 %v3204_v44, %s3446_s21 }
 0x792   : > { %3230 = vrot.lane.b32.xlu0 %v3199_v55, %s3446_s21 }
 0x794   : > { %3240 = vrot.lane.b32.xlu1 %v3209_v43, %s3446_s21 }
 0x796   : > { %3245 = vrot.lane.b32.xlu0 %v3214_v22, %s3446_s21 }
 0x798   : > { %3250 = vrot.lane.b32.xlu1 %v3219_v23, %s3446_s21 }
 0x79a   : > { %1421 = vperm.xlu0 %3133, %v1256_v57  }
 0x79c   : > { %1426 = vperm.xlu1 %3132, %v1258_v61  }
 0x7f4   : > { %v3196_v17 = vpop.permute.xlu0 %3195 }
 0x7f5   : > { %v3198_v12 = vunpack.i.h.bf16 %v3196_v17  ;;  %v3197_v29 = vunpack.i.l.bf16 %v3196_v17 }
 0x7f6   : > { %v3206_v30 = vpop.permute.xlu1 %3205 }
 0x7f7   : > { %v3208_v31 = vunpack.i.h.bf16 %v3206_v30  ;;  %v3207_v41 = vunpack.i.l.bf16 %v3206_v30  ;;  %v1327_v62 = vsel %vm309_vm9, %v3197_v29, %v3198_v12 }
 0x7f8   : > { %v3201_v45 = vpop.permute.xlu0 %3200 }
 0x7f9   : > { %v3203_v51 = vunpack.i.h.bf16 %v3201_v45  ;;  %v3202_v49 = vunpack.i.l.bf16 %v3201_v45  ;;  %v1328_v55 = vsel %vm309_vm9, %v3207_v41, %v3208_v31  ;;  %v2871_v28 = vpack.c.bf16 %v3207_v41, %v3197_v29  ;;  %v1255_v45 = vld [vmem:[%s4938_s2 + $0x50] sm:$0xff] }
 0x7fa   : > { %v3211_v43 = vpop.permute.xlu1 %3210  ;;  %v1402_v20 = vpack.c.bf16 %v1328_v55, %v1327_v62 }
 0x7fb   : > { %v3213_v32 = vunpack.i.h.bf16 %v3211_v43  ;;  %v3212_v3 = vunpack.i.l.bf16 %v3211_v43  ;;  %v1329_v33 = vsel %vm309_vm9, %v3202_v49, %v3203_v51  ;;  %v1257_v51 = vld [vmem:[%s4938_s2 + $0x60] sm:$0xff] }
 0x7fc   : > { %v3216_v57 = vpop.permute.xlu0 %3215  ;;  %1432 = vmatprep.subr.bf16.mxu0 %v1402_v20  ;;  %v1399_v55 = vpack.c.bf16 %v1257_v51, %v1255_v45 }
 0x7fd   : > { %v3218_v61 = vunpack.i.h.bf16 %v3216_v57  ;;  %v3217_v27 = vunpack.i.l.bf16 %v3216_v57  ;;  %2872 = vmatpush1.bf16.msk.msra.mxu0 %vm3651_vm2, %v2871_v28  ;;  %v1330_v5 = vsel %vm309_vm9, %v3212_v3, %v3213_v32  ;;  %v2876_v63 = vpack.c.bf16 %v3212_v3, %v3202_v49 }
 0x7fe   : > { %v3221_v52 = vpop.permute.xlu1 %3220  ;;  %v1404_v38 = vpack.c.bf16 %v1330_v5, %v1329_v33 }
 0x7ff   : > { %v3223_v44 = vunpack.i.h.bf16 %v3221_v52  ;;  %v3222_v15 = vunpack.i.l.bf16 %v3221_v52  ;;  %v1331_v8 = vsel %vm309_vm9, %v3217_v27, %v3218_v61 }
 0x800   : > { %1434 = vmatprep.subr.bf16.mxu0 %v1404_v38  ;;  %v3226_v19 = vpop.permute.xlu0 %3225 }
 0x801   : > { %2877 = vmatpush1.bf16.msk.msra.mxu0 %vm3651_vm2, %v2876_v63  ;;  %v1332_v11 = vsel %vm309_vm9, %v3222_v15, %v3223_v44  ;;  %v2881_v60 = vpack.c.bf16 %v3222_v15, %v3217_v27  ;;  %v3228_v59 = vunpack.i.h.bf16 %v3226_v19  ;;  %v3227_v26 = vunpack.i.l.bf16 %v3226_v19 }
 0x802   : > { %v1406_v40 = vpack.c.bf16 %v1332_v11, %v1331_v8  ;;  %v3236_v18 = vpop.permute.xlu1 %3235 }
 0x803   : > { %v3238_v22 = vunpack.i.h.bf16 %v3236_v18  ;;  %v3237_v23 = vunpack.i.l.bf16 %v3236_v18  ;;  %v1375_v47 = vsel %vm318_vm10, %v3227_v26, %v3228_v59  ;;  %v4190_v18 = vsel %vm224_vm5, 1.0, %v3444_v13 }
 0x804   : > { %1436 = vmatprep.subr.bf16.mxu0 %v1406_v40  ;;  %v3231_v17 = vpop.permute.xlu0 %3230  ;;  %vm242_vm5 = vcmp.lt.s32.totalorder %v3532_v10, 12 }
 0x805   : > { %2882 = vmatpush1.bf16.msk.msra.mxu0 %vm3651_vm2, %v2881_v60  ;;  %v1376_v6 = vsel %vm318_vm10, %v3237_v23, %v3238_v22  ;;  %v3233_v54 = vunpack.i.h.bf16 %v3231_v17  ;;  %v4187_v60 = vsel %vm223_vm4, 1.0, %v3444_v13  ;;  %vm229_vm2 = vcmp.lt.s32.totalorder %v3530_v9, 14 }
 0x806   : > { %1438 = vmatprep.subr.bf16.mxu0 %v1408_v50  ;;  %v3241_v39 = vpop.permute.xlu1 %3240  ;;  %v2884_v50 = vpack.c.bf16 %v3238_v22, %v3228_v59  ;;  %v1413_v42 = vpack.c.bf16 %v1376_v6, %v1375_v47  ;;  %vm241_vm4 = vcmp.lt.s32.totalorder %v3530_v9, 12 }
 0x807   : > { %v3243_v53 = vunpack.i.h.bf16 %v3241_v39  ;;  %v3242_v46 = vunpack.i.l.bf16 %v3241_v39 }
 0x808   : > { %v3246_v34 = vpop.permute.xlu0 %3245 }
 0x809   : > { %1439 = vmatpush1.bf16.msra.mxu0 %v1407_v14  ;;  %v3248_v31 = vunpack.i.h.bf16 %v3246_v34  ;;  %v3247_v58 = vunpack.i.l.bf16 %v3246_v34 }
 0x80a   : > { %1440 = vmatprep.subr.bf16.mxu0 %v1410_v48  ;;  %v3251_v14 = vpop.permute.xlu1 %3250  ;;  %v3232_v48 = vunpack.i.l.bf16 %v3231_v17 }
 0x80b   : > { %v3253_v12 = vunpack.i.h.bf16 %v3251_v14  ;;  %v3252_v29 = vunpack.i.l.bf16 %v3251_v14  ;;  %v1379_v49 = vsel %vm318_vm10, %v3247_v58, %v3248_v31 }
 0x80c   : > { %v1377_v30 = vsel %vm318_vm10, %v3232_v48, %v3233_v54 }
 0x80d   : > { %1441 = vmatpush1.bf16.msra.mxu0 %v1409_v37  ;;  %v1378_v37 = vsel %vm318_vm10, %v3242_v46, %v3243_v53  ;;  %v2890_v41 = vpack.c.bf16 %v3253_v12, %v3248_v31 }
 0x80e   : > { %1442 = vmatprep.subr.bf16.mxu0 %v1412_v24  ;;  %v2887_v24 = vpack.c.bf16 %v3243_v53, %v3233_v54  ;;  %v1415_v35 = vpack.c.bf16 %v1378_v37, %v1377_v30  ;;  %v4228_v37 = vsel %vm230_vm3, 1.0, %v3444_v13 }
 0x811   : > { %1443 = vmatpush1.bf16.msra.mxu0 %v1411_v16  ;;  %v1380_v16 = vsel %vm318_vm10, %v3252_v29, %v3253_v12  ;;  %vm1495_vm10 = vcmp.lt.s32.totalorder %v3526_v7, 2 }
 0x812   : > { %2885 = vmatprep.subr.msk.bf16.mxu0 %vm3665_vm7, %v2884_v50  ;;  %v1417_v62 = vpack.c.bf16 %v1380_v16, %v1379_v49 }
 0x815   : > { %1445 = vmatpush1.bf16.msra.mxu0 %v1413_v42  ;;  %v4225_v42 = vsel %vm229_vm2, 1.0, %v3444_v13  ;;  %vm2943_vm2 = vmneg %vm938_vm14 }
 0x816   : > { %2888 = vmatprep.subr.msk.bf16.mxu0 %vm3665_vm7, %v2887_v24  ;;  %vm4589_vm3 = vmpackc.low %vm2943_vm2, %vm2943_vm2 }
 0x819   : > { %1447 = vmatpush1.bf16.msra.mxu0 %v1415_v35  ;;  %v1422_v43 = vpop.permute.xlu0 %1421 }
 0x81a   : > { %2891 = vmatprep.subr.msk.bf16.mxu0 %vm3665_vm7, %v2890_v41  ;;  %vm2893_vm7 = vmneg %vm932_vm12 }
 0x81b   : > { %v1427_v3 = vpop.permute.xlu1 %1426  ;;  %vm4276_vm11 = vmpackc.low %vm2893_vm7, %vm2893_vm7  ;;  %vm2325_vm7 = vcmp.lt.s32.totalorder %v3526_v7, 8 }
 0x81d   : > { %1449 = vmatpush1.bf16.msra.mxu0 %v1417_v62 }
 0x820   : > { %1465 = vmatmul.mubr.bf16.vlgmr.msra.gmra.mrb[16].mxu0 %v1399_v55 }
 0x8f3   : > { %v1466_v20 = vpop.f32.mrb[16].mxu0 }
 0x8f4   : > { %v1467_v28 = vadd.f32 %v1466_v20, %v1422_v43  ;;  %v1468_v32 = vpop.f32.mrb[17].mxu0 }
 0x8f5   : > { %v1469_v57 = vadd.f32 %v1468_v32, %v1422_v43  ;;  %v1470_v61 = vpop.f32.mrb[18].mxu0 }
 0x8f6   : > { %v1475_v27 = vadd.f32 %v1467_v28, %v3820_v21  ;;  %v1471_v33 = vadd.f32 %v1470_v61, %v1427_v3  ;;  %v1472_v5 = vpop.f32.mrb[19].mxu0 }
 0x8f7   : > { %v1473_v52 = vadd.f32 %v1472_v5, %v1427_v3  ;;  %v1476_v25 = vadd.f32 %v1469_v57, %v3860_v2 }
 0x8f8   : > { %v4149_v38 = vmax.f32 %v1475_v27, 0.0  ;;  %v1477_v63 = vadd.f32 %v1471_v33, %v3847_v4  ;;  %v1484_v4 = vld [vmem:[%s4938_s2 + $0x78] sm:$0xff] }
 0x8f9   : > { %v1478_v15 = vadd.f32 %v1473_v52, %v3857_v56  ;;  %v4158_v8 = vmax.f32 %v1476_v25, 0.0  ;;  %v1486_v56 = vld [vmem:[%s4938_s2 + $0x88] sm:$0xff] }
 0x8fa   : > { %v4153_v44 = vmax.f32 %v1477_v63, 0.0  ;;  %1487 = vrot.lane.b32.xlu0 %v4149_v38, %s3473_s25  ;;  %v1630_v2 = vpack.c.bf16 %v1486_v56, %v1484_v4 }
 0x8fb   : > { %v4162_v21 = vmax.f32 %v1478_v15, 0.0  ;;  %v3259_v12 = vpack.i.bf16 %v4158_v8, %v4149_v38 }
 0x8fc   : > { %1489 = vrot.lane.b32.xlu1 %v4153_v44, %s3473_s25  ;;  %2917 = vmatprep.mubr.msk.bf16.mxu1 %vm309_vm9, %v1630_v2 }
 0x8fd   : > { %v3269_v16 = vpack.i.bf16 %v4162_v21, %v4153_v44 }
 0x8fe   : > { %1491 = vrot.lane.b32.xlu0 %v4158_v8, %s3473_s25 }
 0x900   : > { %1493 = vrot.lane.b32.xlu1 %v4162_v21, %s3473_s25 }
 0x902   : > { %1504 = vrot.lane.b32.xlu0 %v4149_v38, %s3474_s26 }
 0x904   : > { %1506 = vrot.lane.b32.xlu1 %v4153_v44, %s3474_s26 }
 0x906   : > { %1508 = vrot.lane.b32.xlu0 %v4158_v8, %s3474_s26 }
 0x908   : > { %1510 = vrot.lane.b32.xlu1 %v4162_v21, %s3474_s26 }
 0x96c   : > { %v1488_v11 = vpop.permute.xlu0 %1487 }
 0x96e   : > { %v1490_v40 = vpop.permute.xlu1 %1489 }
 0x970   : > { %v1492_v19 = vpop.permute.xlu0 %1491 }
 0x971   : > { %v1496_v39 = vsel %vm1495_vm10, %v1488_v11, %v1492_v19  ;;  %v1498_v22 = vsel %vm1495_vm10, %v1492_v19, %v1488_v11 }
 0x972   : > { %v4197_v23 = vmul.f32 %v4187_v60, %v1498_v22  ;;  %v4200_v17 = vmul.f32 %v4190_v18, %v1496_v39  ;;  %v1494_v59 = vpop.permute.xlu1 %1493 }
 0x973   : > { %v1497_v26 = vsel %vm1495_vm10, %v1490_v40, %v1494_v59  ;;  %v1499_v6 = vsel %vm1495_vm10, %v1494_v59, %v1490_v40 }
 0x974   : > { %v3254_v50 = vpack.i.bf16 %v4200_v17, %v4197_v23  ;;  %v4210_v53 = vmul.f32 %v4187_v60, %v1499_v6  ;;  %v4213_v46 = vmul.f32 %v4190_v18, %v1497_v26  ;;  %v1505_v14 = vpop.permute.xlu0 %1504 }
 0x976   : > { %v3264_v47 = vpack.i.bf16 %v4213_v46, %v4210_v53  ;;  %v1637_v54 = vpack.c.bf16 %v4210_v53, %v4197_v23  ;;  %v1507_v48 = vpop.permute.xlu1 %1506  ;;  %3255 = vrot.lane.b32.xlu0 %v3254_v50, %s3468_s27  ;;  %v1638_v34 = vpack.c.bf16 %v4213_v46, %v4200_v17 }
 0x978   : > { %3265 = vrot.lane.b32.xlu1 %v3264_v47, %s3468_s27  ;;  %v1509_v24 = vpop.permute.xlu0 %1508 }
 0x979   : > { %v1513_v29 = vsel %vm1512_vm6, %v1505_v14, %v1509_v24  ;;  %v1515_v30 = vsel %vm1512_vm6, %v1509_v24, %v1505_v14 }
 0x97a   : > { %v4238_v31 = vmul.f32 %v4225_v42, %v1513_v29  ;;  %v4241_v58 = vmul.f32 %v4228_v37, %v1515_v30  ;;  %v1511_v35 = vpop.permute.xlu1 %1510  ;;  %3260 = vrot.lane.b32.xlu0 %v3259_v12, %s3468_s27 }
 0x97b   : > { %v1514_v41 = vsel %vm1512_vm6, %v1507_v48, %v1511_v35  ;;  %v1516_v45 = vsel %vm1512_vm6, %v1511_v35, %v1507_v48 }
 0x97c   : > { %v3274_v51 = vpack.i.bf16 %v4241_v58, %v4238_v31  ;;  %v4253_v49 = vmul.f32 %v4225_v42, %v1514_v41  ;;  %v4256_v62 = vmul.f32 %v4228_v37, %v1516_v45  ;;  %3270 = vrot.lane.b32.xlu1 %v3269_v16, %s3468_s27  ;;  %v1639_v45 = vpack.c.bf16 %v4153_v44, %v4149_v38 }
 0x97e   : > { %v3279_v55 = vpack.i.bf16 %v4256_v62, %v4253_v49  ;;  %v1641_v43 = vpack.c.bf16 %v4253_v49, %v4238_v31  ;;  %3275 = vrot.lane.b32.xlu0 %v3274_v51, %s3468_s27  ;;  %v1642_v20 = vpack.c.bf16 %v4256_v62, %v4241_v58 }
 0x980   : > { %3280 = vrot.lane.b32.xlu1 %v3279_v55, %s3468_s27 }
 0x982   : > { %3285 = vrot.lane.b32.xlu0 %v3254_v50, %s3472_s4 }
 0x984   : > { %3295 = vrot.lane.b32.xlu1 %v3264_v47, %s3472_s4 }
 0x986   : > { %3290 = vrot.lane.b32.xlu0 %v3259_v12, %s3472_s4 }
 0x988   : > { %3300 = vrot.lane.b32.xlu1 %v3269_v16, %s3472_s4  ;;  %v1640_v16 = vpack.c.bf16 %v4162_v21, %v4158_v8 }
 0x98a   : > { %3305 = vrot.lane.b32.xlu0 %v3274_v51, %s3472_s4 }
 0x98c   : > { %3310 = vrot.lane.b32.xlu1 %v3279_v55, %s3472_s4 }
 0x98e   : > { %1651 = vperm.xlu0 %3133, %v1484_v4  }
 0x990   : > { %1656 = vperm.xlu1 %3132, %v1486_v56  }
 0x9e8   : > { %v3256_v28 = vpop.permute.xlu0 %3255 }
 0x9e9   : > { %v3258_v32 = vunpack.i.h.bf16 %v3256_v28  ;;  %v3257_v3 = vunpack.i.l.bf16 %v3256_v28 }
 0x9ea   : > { %v3266_v57 = vpop.permute.xlu1 %3265 }
 0x9eb   : > { %v3268_v61 = vunpack.i.h.bf16 %v3266_v57  ;;  %v3267_v27 = vunpack.i.l.bf16 %v3266_v57  ;;  %v1557_v25 = vsel %vm932_vm12, %v3257_v3, %v3258_v32 }
 0x9ec   : > { %v3261_v33 = vpop.permute.xlu0 %3260 }
 0x9ed   : > { %v3263_v5 = vunpack.i.h.bf16 %v3261_v33  ;;  %v3262_v52 = vunpack.i.l.bf16 %v3261_v33  ;;  %v1558_v63 = vsel %vm932_vm12, %v3267_v27, %v3268_v61  ;;  %v2896_v56 = vpack.c.bf16 %v3267_v27, %v3257_v3 }
 0x9ee   : > { %v3271_v15 = vpop.permute.xlu1 %3270  ;;  %v1632_v2 = vpack.c.bf16 %v1558_v63, %v1557_v25 }
 0x9ef   : > { %v3273_v11 = vunpack.i.h.bf16 %v3271_v15  ;;  %v3272_v40 = vunpack.i.l.bf16 %v3271_v15  ;;  %v1559_v59 = vsel %vm932_vm12, %v3262_v52, %v3263_v5 }
 0x9f0   : > { %v3276_v19 = vpop.permute.xlu0 %3275  ;;  %1662 = vmatprep.subr.bf16.mxu1 %v1632_v2 }
 0x9f1   : > { %v3278_v39 = vunpack.i.h.bf16 %v3276_v19  ;;  %v3277_v22 = vunpack.i.l.bf16 %v3276_v19  ;;  %2897 = vmatpush1.bf16.msk.msra.mxu1 %vm4276_vm11, %v2896_v56  ;;  %v1560_v26 = vsel %vm932_vm12, %v3272_v40, %v3273_v11  ;;  %v2901_v14 = vpack.c.bf16 %v3272_v40, %v3262_v52  ;;  %v1483_v56 = vld [vmem:[%s4938_s2 + $0x70] sm:$0xff]  ;;  %v1485_v11 = vld [vmem:[%s4938_s2 + $0x80] sm:$0xff] }
 0x9f2   : > { %v3281_v6 = vpop.permute.xlu1 %3280  ;;  %v1634_v50 = vpack.c.bf16 %v1560_v26, %v1559_v59 }
 0x9f3   : > { %v3283_v47 = vunpack.i.h.bf16 %v3281_v6  ;;  %v3282_v48 = vunpack.i.l.bf16 %v3281_v6  ;;  %v1561_v24 = vsel %vm932_vm12, %v3277_v22, %v3278_v39  ;;  %v1629_v39 = vpack.c.bf16 %v1485_v11, %v1483_v56 }
 0x9f4   : > { %1664 = vmatprep.subr.bf16.mxu1 %v1634_v50  ;;  %v3286_v35 = vpop.permute.xlu0 %3285 }
 0x9f5   : > { %2902 = vmatpush1.bf16.msk.msra.mxu1 %vm4276_vm11, %v2901_v14  ;;  %v1562_v12 = vsel %vm932_vm12, %v3282_v48, %v3283_v47  ;;  %v2906_v30 = vpack.c.bf16 %v3282_v48, %v3277_v22  ;;  %v3288_v28 = vunpack.i.h.bf16 %v3286_v35  ;;  %v3287_v17 = vunpack.i.l.bf16 %v3286_v35 }
 0x9f6   : > { %v1636_v29 = vpack.c.bf16 %v1562_v12, %v1561_v24  ;;  %v3296_v58 = vpop.permute.xlu1 %3295 }
 0x9f7   : > { %v3298_v51 = vunpack.i.h.bf16 %v3296_v58  ;;  %v3297_v62 = vunpack.i.l.bf16 %v3296_v58  ;;  %v1605_v3 = vsel %vm944_vm1, %v3287_v17, %v3288_v28 }
 0x9f8   : > { %1666 = vmatprep.subr.bf16.mxu1 %v1636_v29  ;;  %v3291_v55 = vpop.permute.xlu0 %3290 }
 0x9f9   : > { %2907 = vmatpush1.bf16.msk.msra.mxu1 %vm4276_vm11, %v2906_v30  ;;  %v1606_v23 = vsel %vm944_vm1, %v3297_v62, %v3298_v51  ;;  %v2909_v53 = vpack.c.bf16 %v3298_v51, %v3288_v28  ;;  %v3293_v57 = vunpack.i.h.bf16 %v3291_v55  ;;  %v1710_v62 = vld [vmem:[%s4938_s2 + $0x98] sm:$0xff] }
 0x9fa   : > { %1668 = vmatprep.subr.bf16.mxu1 %v1638_v34  ;;  %v3301_v41 = vpop.permute.xlu1 %3300  ;;  %v1643_v61 = vpack.c.bf16 %v1606_v23, %v1605_v3 }
 0x9fb   : > { %v3302_v34 = vunpack.i.l.bf16 %v3301_v41 }
 0x9fc   : > { %v3306_v27 = vpop.permute.xlu0 %3305 }
 0x9fd   : > { %1669 = vmatpush1.bf16.msra.mxu1 %v1637_v54  ;;  %v3303_v54 = vunpack.i.h.bf16 %v3301_v41  ;;  %v3308_v15 = vunpack.i.h.bf16 %v3306_v27  ;;  %v3307_v31 = vunpack.i.l.bf16 %v3306_v27 }
 0x9fe   : > { %1670 = vmatprep.subr.bf16.mxu1 %v1640_v16  ;;  %v3311_v32 = vpop.permute.xlu1 %3310 }
 0x9ff   : > { %v1608_v33 = vsel %vm944_vm1, %v3302_v34, %v3303_v54  ;;  %v2912_v5 = vpack.c.bf16 %v3303_v54, %v3293_v57  ;;  %v3313_v52 = vunpack.i.h.bf16 %v3311_v32  ;;  %v3312_v25 = vunpack.i.l.bf16 %v3311_v32 }
 0xa00   : > { %v1609_v40 = vsel %vm944_vm1, %v3307_v31, %v3308_v15 }
 0xa01   : > { %1671 = vmatpush1.bf16.msra.mxu1 %v1639_v45  ;;  %v2915_v2 = vpack.c.bf16 %v3313_v52, %v3308_v15 }
 0xa02   : > { %1672 = vmatprep.subr.bf16.mxu1 %v1642_v20  ;;  %v3292_v20 = vunpack.i.l.bf16 %v3291_v55  ;;  %v1712_v55 = vld [vmem:[%s4938_s2 + $0xa8] sm:$0xff] }
 0xa03   : > { %v1854_v28 = vpack.c.bf16 %v1712_v55, %v1710_v62 }
 0xa04   : > { %v1607_v63 = vsel %vm944_vm1, %v3292_v20, %v3293_v57 }
 0xa05   : > { %1673 = vmatpush1.bf16.msra.mxu1 %v1641_v43  ;;  %v1645_v49 = vpack.c.bf16 %v1608_v33, %v1607_v63  ;;  %v1610_v43 = vsel %vm944_vm1, %v3312_v25, %v3313_v52  ;;  %2942 = vmatprep.mubr.msk.bf16.mxu0 %vm309_vm9, %v1854_v28 }
 0xa06   : > { %2910 = vmatprep.subr.msk.bf16.mxu1 %vm4302_vm13, %v2909_v53  ;;  %v1647_v19 = vpack.c.bf16 %v1610_v43, %v1609_v40 }
 0xa09   : > { %1675 = vmatpush1.bf16.msra.mxu1 %v1643_v61 }
 0xa0a   : > { %2913 = vmatprep.subr.msk.bf16.mxu1 %vm4302_vm13, %v2912_v5 }
 0xa0d   : > { %1677 = vmatpush1.bf16.msra.mxu1 %v1645_v49  ;;  %v1652_v22 = vpop.permute.xlu0 %1651 }
 0xa0e   : > { %2916 = vmatprep.subr.msk.bf16.mxu1 %vm4302_vm13, %v2915_v2 }
 0xa0f   : > { %v1657_v50 = vpop.permute.xlu1 %1656 }
 0xa11   : > { %1679 = vmatpush1.bf16.msra.mxu1 %v1647_v19 }
 0xa14   : > { %1695 = vmatmul.mubr.bf16.vlgmr.msra.gmra.mrb[8].mxu1 %v1629_v39 }
 0xae7   : > { %v1696_v59 = vpop.f32.mrb[8].mxu1 }
 0xae8   : > { %v1697_v26 = vadd.f32 %v1696_v59, %v1652_v22  ;;  %v1698_v6 = vpop.f32.mrb[9].mxu1 }
 0xae9   : > { %v1699_v14 = vadd.f32 %v1698_v6, %v1652_v22  ;;  %v1700_v47 = vpop.f32.mrb[10].mxu1 }
 0xaea   : > { %v4327_v48 = vmax.f32 %v1697_v26, 0.0  ;;  %v1701_v24 = vadd.f32 %v1700_v47, %v1657_v50  ;;  %v1702_v12 = vpop.f32.mrb[11].mxu1 }
 0xaeb   : > { %v4329_v29 = vmax.f32 %v1699_v14, 0.0  ;;  %v1703_v30 = vadd.f32 %v1702_v12, %v1657_v50 }
 0xaec   : > { %v4331_v58 = vmax.f32 %v1701_v24, 0.0  ;;  %1713 = vrot.lane.b32.xlu0 %v4327_v48, %s3473_s25 }
 0xaed   : > { %v4335_v35 = vmax.f32 %v1703_v30, 0.0  ;;  %v3319_v16 = vpack.i.bf16 %v4329_v29, %v4327_v48 }
 0xaee   : > { %1715 = vrot.lane.b32.xlu1 %v4331_v58, %s3473_s25  ;;  %v1863_v41 = vpack.c.bf16 %v4331_v58, %v4327_v48 }
 0xaef   : > { %v3329_v45 = vpack.i.bf16 %v4335_v35, %v4331_v58  ;;  %v1864_v51 = vpack.c.bf16 %v4335_v35, %v4329_v29 }
 0xaf0   : > { %1717 = vrot.lane.b32.xlu0 %v4329_v29, %s3473_s25 }
 0xaf2   : > { %1719 = vrot.lane.b32.xlu1 %v4335_v35, %s3473_s25 }
 0xaf4   : > { %1729 = vrot.lane.b32.xlu0 %v4327_v48, %s3474_s26 }
 0xaf6   : > { %1731 = vrot.lane.b32.xlu1 %v4331_v58, %s3474_s26 }
 0xaf8   : > { %1733 = vrot.lane.b32.xlu0 %v4329_v29, %s3474_s26 }
 0xafa   : > { %1735 = vrot.lane.b32.xlu1 %v4335_v35, %s3474_s26 }
 0xb5e   : > { %v1714_v17 = vpop.permute.xlu0 %1713 }
 0xb60   : > { %v1716_v23 = vpop.permute.xlu1 %1715 }
 0xb62   : > { %v1718_v53 = vpop.permute.xlu0 %1717 }
 0xb63   : > { %v1721_v54 = vsel %vm1495_vm10, %v1714_v17, %v1718_v53  ;;  %v1723_v34 = vsel %vm1495_vm10, %v1718_v53, %v1714_v17 }
 0xb64   : > { %v4371_v32 = vmul.f32 %v4187_v60, %v1723_v34  ;;  %v4374_v3 = vmul.f32 %v4190_v18, %v1721_v54  ;;  %v1720_v57 = vpop.permute.xlu1 %1719 }
 0xb65   : > { %v1722_v20 = vsel %vm1495_vm10, %v1716_v23, %v1720_v57  ;;  %v1724_v61 = vsel %vm1495_vm10, %v1720_v57, %v1716_v23  ;;  %vm1966_vm10 = vcmp.lt.s32.totalorder %v3526_v7, 124 }
 0xb66   : > { %v3314_v27 = vpack.i.bf16 %v4374_v3, %v4371_v32  ;;  %v4383_v33 = vmul.f32 %v4187_v60, %v1724_v61  ;;  %v4386_v5 = vmul.f32 %v4190_v18, %v1722_v20  ;;  %v1730_v52 = vpop.permute.xlu0 %1729 }
 0xb68   : > { %v3324_v25 = vpack.i.bf16 %v4386_v5, %v4383_v33  ;;  %v1861_v63 = vpack.c.bf16 %v4383_v33, %v4371_v32  ;;  %v1732_v15 = vpop.permute.xlu1 %1731  ;;  %3315 = vrot.lane.b32.xlu0 %v3314_v27, %s3468_s27  ;;  %v1862_v31 = vpack.c.bf16 %v4386_v5, %v4374_v3 }
 0xb6a   : > { %3325 = vrot.lane.b32.xlu1 %v3324_v25, %s3468_s27  ;;  %v1734_v60 = vpop.permute.xlu0 %1733 }
 0xb6b   : > { %v1737_v18 = vsel %vm1512_vm6, %v1730_v52, %v1734_v60  ;;  %v1739_v49 = vsel %vm1512_vm6, %v1734_v60, %v1730_v52 }
 0xb6c   : > { %v4401_v43 = vmul.f32 %v4225_v42, %v1737_v18  ;;  %v4404_v2 = vmul.f32 %v4228_v37, %v1739_v49  ;;  %v1736_v56 = vpop.permute.xlu1 %1735  ;;  %3320 = vrot.lane.b32.xlu0 %v3319_v16, %s3468_s27 }
 0xb6d   : > { %v1738_v11 = vsel %vm1512_vm6, %v1732_v15, %v1736_v56  ;;  %v1740_v40 = vsel %vm1512_vm6, %v1736_v56, %v1732_v15  ;;  %vm4615_vm6 = vmpackc.low %vm938_vm14, %vm938_vm14 }
 0xb6e   : > { %v3334_v19 = vpack.i.bf16 %v4404_v2, %v4401_v43  ;;  %v4414_v39 = vmul.f32 %v4225_v42, %v1738_v11  ;;  %v4417_v22 = vmul.f32 %v4228_v37, %v1740_v40  ;;  %3330 = vrot.lane.b32.xlu1 %v3329_v45, %s3468_s27 }
 0xb70   : > { %v3339_v59 = vpack.i.bf16 %v4417_v22, %v4414_v39  ;;  %v1865_v26 = vpack.c.bf16 %v4414_v39, %v4401_v43  ;;  %3335 = vrot.lane.b32.xlu0 %v3334_v19, %s3468_s27  ;;  %v1866_v6 = vpack.c.bf16 %v4417_v22, %v4404_v2 }
 0xb72   : > { %3340 = vrot.lane.b32.xlu1 %v3339_v59, %s3468_s27 }
 0xb74   : > { %3345 = vrot.lane.b32.xlu0 %v3314_v27, %s3472_s4 }
 0xb76   : > { %3355 = vrot.lane.b32.xlu1 %v3324_v25, %s3472_s4 }
 0xb78   : > { %3350 = vrot.lane.b32.xlu0 %v3319_v16, %s3472_s4 }
 0xb7a   : > { %3360 = vrot.lane.b32.xlu1 %v3329_v45, %s3472_s4 }
 0xb7c   : > { %3365 = vrot.lane.b32.xlu0 %v3334_v19, %s3472_s4 }
 0xb7e   : > { %3370 = vrot.lane.b32.xlu1 %v3339_v59, %s3472_s4 }
 0xb80   : > { %1875 = vperm.xlu0 %3133, %v1710_v62  }
 0xb82   : > { %1880 = vperm.xlu1 %3132, %v1712_v55  }
 0xbda   : > { %v3316_v42 = vpop.permute.xlu0 %3315 }
 0xbdb   : > { %v3318_v37 = vunpack.i.h.bf16 %v3316_v42  ;;  %v3317_v50 = vunpack.i.l.bf16 %v3316_v42 }
 0xbdc   : > { %v3326_v14 = vpop.permute.xlu1 %3325 }
 0xbdd   : > { %v3328_v47 = vunpack.i.h.bf16 %v3326_v14  ;;  %v3327_v24 = vunpack.i.l.bf16 %v3326_v14  ;;  %v1781_v17 = vsel %vm932_vm12, %v3317_v50, %v3318_v37 }
 0xbde   : > { %v3321_v12 = vpop.permute.xlu0 %3320 }
 0xbdf   : > { %v3323_v30 = vunpack.i.h.bf16 %v3321_v12  ;;  %v3322_v28 = vunpack.i.l.bf16 %v3321_v12  ;;  %v1782_v16 = vsel %vm932_vm12, %v3327_v24, %v3328_v47  ;;  %v2921_v53 = vpack.c.bf16 %v3327_v24, %v3317_v50  ;;  %v1709_v12 = vld [vmem:[%s4938_s2 + $0x90] sm:$0xff] }
 0xbe0   : > { %v3331_v45 = vpop.permute.xlu1 %3330  ;;  %v1856_v23 = vpack.c.bf16 %v1782_v16, %v1781_v17 }
 0xbe1   : > { %v3333_v54 = vunpack.i.h.bf16 %v3331_v45  ;;  %v3332_v34 = vunpack.i.l.bf16 %v3331_v45  ;;  %v1783_v20 = vsel %vm932_vm12, %v3322_v28, %v3323_v30  ;;  %v1711_v30 = vld [vmem:[%s4938_s2 + $0xa0] sm:$0xff] }
 0xbe2   : > { %v3336_v62 = vpop.permute.xlu0 %3335  ;;  %1886 = vmatprep.subr.bf16.mxu0 %v1856_v23  ;;  %v1853_v16 = vpack.c.bf16 %v1711_v30, %v1709_v12 }
 0xbe3   : > { %v3338_v55 = vunpack.i.h.bf16 %v3336_v62  ;;  %v3337_v57 = vunpack.i.l.bf16 %v3336_v62  ;;  %2922 = vmatpush1.bf16.msk.msra.mxu0 %vm4276_vm11, %v2921_v53  ;;  %v1784_v61 = vsel %vm932_vm12, %v3332_v34, %v3333_v54  ;;  %v2926_v25 = vpack.c.bf16 %v3332_v34, %v3322_v28 }
 0xbe4   : > { %v3341_v27 = vpop.permute.xlu1 %3340  ;;  %v1858_v52 = vpack.c.bf16 %v1784_v61, %v1783_v20 }
 0xbe5   : > { %v3343_v15 = vunpack.i.h.bf16 %v3341_v27  ;;  %v3342_v60 = vunpack.i.l.bf16 %v3341_v27  ;;  %v1785_v18 = vsel %vm932_vm12, %v3337_v57, %v3338_v55 }
 0xbe6   : > { %1888 = vmatprep.subr.bf16.mxu0 %v1858_v52  ;;  %v3346_v40 = vpop.permute.xlu0 %3345 }
 0xbe7   : > { %2927 = vmatpush1.bf16.msk.msra.mxu0 %vm4276_vm11, %v2926_v25  ;;  %v1786_v49 = vsel %vm932_vm12, %v3342_v60, %v3343_v15  ;;  %v2931_v56 = vpack.c.bf16 %v3342_v60, %v3337_v57  ;;  %v3348_v4 = vunpack.i.h.bf16 %v3346_v40  ;;  %v3347_v3 = vunpack.i.l.bf16 %v3346_v40 }
 0xbe8   : > { %v1860_v2 = vpack.c.bf16 %v1786_v49, %v1785_v18  ;;  %v3356_v11 = vpop.permute.xlu1 %3355  ;;  %vm235_vm12 = vcmp.ge.s32.totalorder %v3530_v9, 4 }
 0xbe9   : > { %v3358_v22 = vunpack.i.h.bf16 %v3356_v11  ;;  %v3357_v59 = vunpack.i.l.bf16 %v3356_v11  ;;  %v1829_v29 = vsel %vm944_vm1, %v3347_v3, %v3348_v4  ;;  %v4521_v11 = vsel %vm236_vm15, 1.0, %v3444_v13 }
 0xbea   : > { %1890 = vmatprep.subr.bf16.mxu0 %v1860_v2  ;;  %v3351_v42 = vpop.permute.xlu0 %3350  ;;  %vm254_vm15 = vcmp.lt.s32.totalorder %v3532_v10, 8 }
 0xbeb   : > { %2932 = vmatpush1.bf16.msk.msra.mxu0 %vm4276_vm11, %v2931_v56  ;;  %v1830_v5 = vsel %vm944_vm1, %v3357_v59, %v3358_v22  ;;  %v3353_v35 = vunpack.i.h.bf16 %v3351_v42  ;;  %v4518_v56 = vsel %vm235_vm12, 1.0, %v3444_v13  ;;  %vm253_vm11 = vcmp.lt.s32.totalorder %v3530_v9, 8 }
 0xbec   : > { %1892 = vmatprep.subr.bf16.mxu0 %v1862_v31  ;;  %v3361_v19 = vpop.permute.xlu1 %3360  ;;  %v2934_v31 = vpack.c.bf16 %v3358_v22, %v3348_v4  ;;  %v1867_v48 = vpack.c.bf16 %v1830_v5, %v1829_v29  ;;  %vm248_vm12 = vcmp.ge.s32.totalorder %v3532_v10, 8 }
 0xbed   : > { %v3363_v32 = vunpack.i.h.bf16 %v3361_v19  ;;  %v3362_v33 = vunpack.i.l.bf16 %v3361_v19 }
 0xbee   : > { %v3366_v58 = vpop.permute.xlu0 %3365 }
 0xbef   : > { %1893 = vmatpush1.bf16.msra.mxu0 %v1861_v63  ;;  %v3368_v47 = vunpack.i.h.bf16 %v3366_v58  ;;  %v3367_v43 = vunpack.i.l.bf16 %v3366_v58  ;;  %v4556_v58 = vsel %vm241_vm4, 1.0, %v3444_v13 }
 0xbf0   : > { %1894 = vmatprep.subr.bf16.mxu0 %v1864_v51  ;;  %v3371_v63 = vpop.permute.xlu1 %3370  ;;  %v3352_v51 = vunpack.i.l.bf16 %v3351_v42 }
 0xbf1   : > { %v3373_v37 = vunpack.i.h.bf16 %v3371_v63  ;;  %v3372_v50 = vunpack.i.l.bf16 %v3371_v63  ;;  %v1833_v28 = vsel %vm944_vm1, %v3367_v43, %v3368_v47 }
 0xbf2   : > { %v1831_v14 = vsel %vm944_vm1, %v3352_v51, %v3353_v35 }
 0xbf3   : > { %1895 = vmatpush1.bf16.msra.mxu0 %v1863_v41  ;;  %v1832_v41 = vsel %vm944_vm1, %v3362_v33, %v3363_v32  ;;  %v2940_v24 = vpack.c.bf16 %v3373_v37, %v3368_v47 }
 0xbf4   : > { %1896 = vmatprep.subr.bf16.mxu0 %v1866_v6  ;;  %v2937_v6 = vpack.c.bf16 %v3363_v32, %v3353_v35  ;;  %v1869_v39 = vpack.c.bf16 %v1832_v41, %v1831_v14  ;;  %v4559_v41 = vsel %vm242_vm5, 1.0, %v3444_v13 }
 0xbf7   : > { %1897 = vmatpush1.bf16.msra.mxu0 %v1865_v26  ;;  %v1834_v26 = vsel %vm944_vm1, %v3372_v50, %v3373_v37  ;;  %vm1949_vm1 = vcmp.lt.s32.totalorder %v3526_v7, 4 }
 0xbf8   : > { %2935 = vmatprep.subr.msk.bf16.mxu0 %vm4302_vm13, %v2934_v31  ;;  %v1871_v17 = vpack.c.bf16 %v1834_v26, %v1833_v28 }
 0xbfb   : > { %1899 = vmatpush1.bf16.msra.mxu0 %v1867_v48 }
 0xbfc   : > { %2938 = vmatprep.subr.msk.bf16.mxu0 %vm4302_vm13, %v2937_v6 }
 0xbff   : > { %1901 = vmatpush1.bf16.msra.mxu0 %v1869_v39  ;;  %v1876_v45 = vpop.permute.xlu0 %1875 }
 0xc00   : > { %2941 = vmatprep.subr.msk.bf16.mxu0 %vm4302_vm13, %v2940_v24  ;;  %vm2342_vm13 = vcmp.lt.s32.totalorder %v3526_v7, 120  ;;  %v2420_v7 = vld [vmem:[%s4938_s2 + $0x110] sm:$0xff] }
 0xc01   : > { %v1881_v34 = vpop.permute.xlu1 %1880 }
 0xc03   : > { %1903 = vmatpush1.bf16.msra.mxu0 %v1871_v17 }
 0xc06   : > { %1919 = vmatmul.mubr.bf16.vlgmr.msra.gmra.mrb[20].mxu0 %v1853_v16 }
 0xcd9   : > { %v1920_v23 = vpop.f32.mrb[20].mxu0 }
 0xcda   : > { %v1921_v53 = vadd.f32 %v1920_v23, %v1876_v45  ;;  %v1922_v54 = vpop.f32.mrb[21].mxu0 }
 0xcdb   : > { %v1923_v62 = vadd.f32 %v1922_v54, %v1876_v45  ;;  %v1924_v55 = vpop.f32.mrb[22].mxu0 }
 0xcdc   : > { %v1929_v57 = vadd.f32 %v1921_v53, %v4149_v38  ;;  %v1925_v20 = vadd.f32 %v1924_v55, %v1881_v34  ;;  %v1926_v61 = vpop.f32.mrb[23].mxu0 }
 0xcdd   : > { %v1927_v27 = vadd.f32 %v1926_v61, %v1881_v34  ;;  %v1930_v46 = vadd.f32 %v1923_v62, %v4158_v8  ;;  %v1940_v8 = vld [vmem:[%s4938_s2 + $0xc8] sm:$0xff] }
 0xcde   : > { %v4480_v52 = vmax.f32 %v1929_v57, 0.0  ;;  %v1931_v25 = vadd.f32 %v1925_v20, %v4153_v44  ;;  %v1938_v44 = vld [vmem:[%s4938_s2 + $0xb8] sm:$0xff] }
 0xcdf   : > { %v1932_v60 = vadd.f32 %v1927_v27, %v4162_v21  ;;  %v4489_v18 = vmax.f32 %v1930_v46, 0.0  ;;  %v2048_v21 = vpack.c.bf16 %v1940_v8, %v1938_v44 }
 0xce0   : > { %v4484_v15 = vmax.f32 %v1931_v25, 0.0  ;;  %1941 = vrot.lane.b32.xlu0 %v4480_v52, %s3475_s18 }
 0xce1   : > { %v4493_v38 = vmax.f32 %v1932_v60, 0.0  ;;  %2967 = vmatprep.mubr.msk.bf16.mxu1 %vm309_vm9, %v2048_v21  ;;  %v3379_v37 = vpack.i.bf16 %v4489_v18, %v4480_v52 }
 0xce2   : > { %1943 = vrot.lane.b32.xlu1 %v4484_v15, %s3475_s18 }
 0xce3   : > { %v3389_v26 = vpack.i.bf16 %v4493_v38, %v4484_v15 }
 0xce4   : > { %1945 = vrot.lane.b32.xlu0 %v4489_v18, %s3475_s18 }
 0xce6   : > { %1947 = vrot.lane.b32.xlu1 %v4493_v38, %s3475_s18 }
 0xce8   : > { %1958 = vrot.lane.b32.xlu0 %v4480_v52, %s3476_s19 }
 0xcea   : > { %1960 = vrot.lane.b32.xlu1 %v4484_v15, %s3476_s19 }
 0xcec   : > { %1962 = vrot.lane.b32.xlu0 %v4489_v18, %s3476_s19 }
 0xcee   : > { %1964 = vrot.lane.b32.xlu1 %v4493_v38, %s3476_s19 }
 0xd52   : > { %v1942_v49 = vpop.permute.xlu0 %1941 }
 0xd54   : > { %v1944_v2 = vpop.permute.xlu1 %1943 }
 0xd56   : > { %v1946_v40 = vpop.permute.xlu0 %1945 }
 0xd57   : > { %v1950_v19 = vsel %vm1949_vm1, %v1942_v49, %v1946_v40  ;;  %v1952_v22 = vsel %vm1949_vm1, %v1946_v40, %v1942_v49 }
 0xd58   : > { %v4528_v59 = vmul.f32 %v4518_v56, %v1952_v22  ;;  %v4531_v42 = vmul.f32 %v4521_v11, %v1950_v19  ;;  %v1948_v4 = vpop.permute.xlu1 %1947 }
 0xd59   : > { %v1951_v3 = vsel %vm1949_vm1, %v1944_v2, %v1948_v4  ;;  %v1953_v5 = vsel %vm1949_vm1, %v1948_v4, %v1944_v2 }
 0xd5a   : > { %v3374_v31 = vpack.i.bf16 %v4531_v42, %v4528_v59  ;;  %v4541_v32 = vmul.f32 %v4518_v56, %v1953_v5  ;;  %v4544_v33 = vmul.f32 %v4521_v11, %v1951_v3  ;;  %v1959_v63 = vpop.permute.xlu0 %1958 }
 0xd5c   : > { %v3384_v29 = vpack.i.bf16 %v4544_v33, %v4541_v32  ;;  %v2055_v35 = vpack.c.bf16 %v4541_v32, %v4528_v59  ;;  %v1961_v51 = vpop.permute.xlu1 %1960  ;;  %3375 = vrot.lane.b32.xlu0 %v3374_v31, %s3470_s29  ;;  %v2056_v48 = vpack.c.bf16 %v4544_v33, %v4531_v42  ;;  %v1937_v32 = vld [vmem:[%s4938_s2 + $0xb0] sm:$0xff] }
 0xd5e   : > { %3385 = vrot.lane.b32.xlu1 %v3384_v29, %s3470_s29  ;;  %v1963_v6 = vpop.permute.xlu0 %1962 }
 0xd5f   : > { %v1967_v50 = vsel %vm1966_vm10, %v1959_v63, %v1963_v6  ;;  %v1969_v14 = vsel %vm1966_vm10, %v1963_v6, %v1959_v63 }
 0xd60   : > { %v4569_v47 = vmul.f32 %v4556_v58, %v1967_v50  ;;  %v1972_v43 = vmul.f32 %v4559_v41, %v1969_v14  ;;  %v1965_v39 = vpop.permute.xlu1 %1964  ;;  %3380 = vrot.lane.b32.xlu0 %v3379_v37, %s3470_s29 }
 0xd61   : > { %v1968_v24 = vsel %vm1966_vm10, %v1961_v51, %v1965_v39  ;;  %v1970_v12 = vsel %vm1966_vm10, %v1965_v39, %v1961_v51 }
 0xd62   : > { %v3394_v30 = vpack.i.bf16 %v1972_v43, %v4569_v47  ;;  %v1973_v28 = vmul.f32 %v4556_v58, %v1968_v24  ;;  %v1974_v17 = vmul.f32 %v4559_v41, %v1970_v12  ;;  %3390 = vrot.lane.b32.xlu1 %v3389_v26, %s3470_s29 }
 0xd64   : > { %v3399_v16 = vpack.i.bf16 %v1974_v17, %v1973_v28  ;;  %v2059_v45 = vpack.c.bf16 %v1973_v28, %v4569_v47  ;;  %3395 = vrot.lane.b32.xlu0 %v3394_v30, %s3470_s29  ;;  %v2060_v23 = vpack.c.bf16 %v1974_v17, %v1972_v43  ;;  %v2058_v47 = vpack.c.bf16 %v4493_v38, %v4489_v18 }
 0xd65   : > { %v2057_v43 = vpack.c.bf16 %v4484_v15, %v4480_v52 }
 0xd66   : > { %3400 = vrot.lane.b32.xlu1 %v3399_v16, %s3470_s29 }
 0xd68   : > { %2066 = vperm.xlu0 %3133, %v1938_v44  }
 0xd6a   : > { %2071 = vperm.xlu1 %3132, %v1940_v8  }
 0xdce   : > { %v3376_v53 = vpop.permute.xlu0 %3375 }
 0xdcf   : > { %v3378_v54 = vunpack.i.h.bf16 %v3376_v53  ;;  %v3377_v34 = vunpack.i.l.bf16 %v3376_v53 }
 0xdd0   : > { %v3386_v62 = vpop.permute.xlu1 %3385 }
 0xdd1   : > { %v3388_v55 = vunpack.i.h.bf16 %v3386_v62  ;;  %v3387_v57 = vunpack.i.l.bf16 %v3386_v62  ;;  %v2011_v25 = vsel %vm938_vm14, %v3377_v34, %v3378_v54 }
 0xdd2   : > { %v3381_v20 = vpop.permute.xlu0 %3380 }
 0xdd3   : > { %v3383_v61 = vunpack.i.h.bf16 %v3381_v20  ;;  %v3382_v27 = vunpack.i.l.bf16 %v3381_v20  ;;  %v2012_v60 = vsel %vm938_vm14, %v3387_v57, %v3388_v55  ;;  %v2946_v2 = vpack.c.bf16 %v3387_v57, %v3377_v34 }
 0xdd4   : > { %v3391_v46 = vpop.permute.xlu1 %3390  ;;  %v2050_v44 = vpack.c.bf16 %v2012_v60, %v2011_v25  ;;  %v2959_v42 = vpack.c.bf16 %v3388_v55, %v3378_v54  ;;  %v2127_v25 = vld [vmem:[%s4938_s2 + $0xe8] sm:$0xff] }
 0xdd5   : > { %v3393_v21 = vunpack.i.h.bf16 %v3391_v46  ;;  %v3392_v49 = vunpack.i.l.bf16 %v3391_v46  ;;  %v2013_v3 = vsel %vm938_vm14, %v3382_v27, %v3383_v61  ;;  %v2125_v46 = vld [vmem:[%s4938_s2 + $0xd8] sm:$0xff] }
 0xdd6   : > { %v3396_v40 = vpop.permute.xlu0 %3395  ;;  %2077 = vmatprep.subr.bf16.mxu1 %v2050_v44  ;;  %v2233_v60 = vpack.c.bf16 %v2127_v25, %v2125_v46 }
 0xdd7   : > { %v3398_v19 = vunpack.i.h.bf16 %v3396_v40  ;;  %v3397_v22 = vunpack.i.l.bf16 %v3396_v40  ;;  %2947 = vmatpush1.bf16.msk.msra.mxu1 %vm4589_vm3, %v2946_v2  ;;  %v2014_v5 = vsel %vm938_vm14, %v3392_v49, %v3393_v21  ;;  %v2951_v51 = vpack.c.bf16 %v3392_v49, %v3382_v27 }
 0xdd8   : > { %v3401_v4 = vpop.permute.xlu1 %3400  ;;  %v2052_v29 = vpack.c.bf16 %v2014_v5, %v2013_v3  ;;  %v2962_v33 = vpack.c.bf16 %v3393_v21, %v3383_v61  ;;  %2992 = vmatprep.mubr.msk.bf16.mxu0 %vm309_vm9, %v2233_v60 }
 0xdd9   : > { %v3403_v31 = vunpack.i.h.bf16 %v3401_v4  ;;  %v3402_v63 = vunpack.i.l.bf16 %v3401_v4  ;;  %v2015_v6 = vsel %vm938_vm14, %v3397_v22, %v3398_v19 }
 0xdda   : > { %2079 = vmatprep.subr.bf16.mxu1 %v2052_v29 }
 0xddb   : > { %v2016_v37 = vsel %vm938_vm14, %v3402_v63, %v3403_v31  ;;  %2952 = vmatpush1.bf16.msk.msra.mxu1 %vm4589_vm3, %v2951_v51  ;;  %v2956_v14 = vpack.c.bf16 %v3402_v63, %v3397_v22  ;;  %v2965_v59 = vpack.c.bf16 %v3403_v31, %v3398_v19 }
 0xddc   : > { %v2054_v50 = vpack.c.bf16 %v2016_v37, %v2015_v6 }
 0xdde   : > { %2081 = vmatprep.subr.bf16.mxu1 %v2054_v50 }
 0xddf   : > { %2957 = vmatpush1.bf16.msk.msra.mxu1 %vm4589_vm3, %v2956_v14 }
 0xde0   : > { %2083 = vmatprep.subr.bf16.mxu1 %v2056_v48 }
 0xde3   : > { %2084 = vmatpush1.bf16.msra.mxu1 %v2055_v35  ;;  %v1939_v35 = vld [vmem:[%s4938_s2 + $0xc0] sm:$0xff] }
 0xde4   : > { %2085 = vmatprep.subr.bf16.mxu1 %v2058_v47  ;;  %v2047_v48 = vpack.c.bf16 %v1939_v35, %v1937_v32 }
 0xde7   : > { %2086 = vmatpush1.bf16.msra.mxu1 %v2057_v43  ;;  %v2067_v26 = vpop.permute.xlu0 %2066 }
 0xde8   : > { %2087 = vmatprep.subr.bf16.mxu1 %v2060_v23 }
 0xde9   : > { %v2072_v28 = vpop.permute.xlu1 %2071 }
 0xdeb   : > { %2088 = vmatpush1.bf16.msra.mxu1 %v2059_v45 }
 0xdec   : > { %2960 = vmatprep.subr.msk.bf16.mxu1 %vm4615_vm6, %v2959_v42 }
 0xdef   : > { %2090 = vmatpush1.bf16.msra.mxu1 %v2050_v44 }
 0xdf0   : > { %2963 = vmatprep.subr.msk.bf16.mxu1 %vm4615_vm6, %v2962_v33 }
 0xdf3   : > { %2092 = vmatpush1.bf16.msra.mxu1 %v2052_v29 }
 0xdf4   : > { %2966 = vmatprep.subr.msk.bf16.mxu1 %vm4615_vm6, %v2965_v59 }
 0xdf7   : > { %2094 = vmatpush1.bf16.msra.mxu1 %v2054_v50 }
 0xdfa   : > { %2110 = vmatmul.mubr.bf16.vlgmr.msra.gmra.mrb[12].mxu1 %v2047_v48 }
 0xecd   : > { %v2111_v24 = vpop.f32.mrb[12].mxu1 }
 0xece   : > { %v2112_v12 = vadd.f32 %v2111_v24, %v2067_v26  ;;  %v2113_v30 = vpop.f32.mrb[13].mxu1 }
 0xecf   : > { %v2114_v17 = vadd.f32 %v2113_v30, %v2067_v26  ;;  %v2115_v16 = vpop.f32.mrb[14].mxu1 }
 0xed0   : > { %v4631_v45 = vmax.f32 %v2112_v12, 0.0  ;;  %v2116_v23 = vadd.f32 %v2115_v16, %v2072_v28  ;;  %v2117_v53 = vpop.f32.mrb[15].mxu1 }
 0xed1   : > { %v4633_v54 = vmax.f32 %v2114_v17, 0.0  ;;  %v2118_v34 = vadd.f32 %v2117_v53, %v2072_v28 }
 0xed2   : > { %v4635_v62 = vmax.f32 %v2116_v23, 0.0  ;;  %2128 = vrot.lane.b32.xlu0 %v4631_v45, %s3475_s18 }
 0xed3   : > { %v4639_v55 = vmax.f32 %v2118_v34, 0.0  ;;  %v3409_v57 = vpack.i.bf16 %v4633_v54, %v4631_v45 }
 0xed4   : > { %2130 = vrot.lane.b32.xlu1 %v4635_v62, %s3475_s18  ;;  %v2242_v20 = vpack.c.bf16 %v4635_v62, %v4631_v45 }
 0xed5   : > { %v3419_v61 = vpack.i.bf16 %v4639_v55, %v4635_v62  ;;  %v2243_v27 = vpack.c.bf16 %v4639_v55, %v4633_v54 }
 0xed6   : > { %2132 = vrot.lane.b32.xlu0 %v4633_v54, %s3475_s18 }
 0xed8   : > { %2134 = vrot.lane.b32.xlu1 %v4639_v55, %s3475_s18 }
 0xeda   : > { %2144 = vrot.lane.b32.xlu0 %v4631_v45, %s3476_s19  ;;  %v2126_v45 = vld [vmem:[%s4938_s2 + $0xe0] sm:$0xff] }
 0xedc   : > { %2146 = vrot.lane.b32.xlu1 %v4635_v62, %s3476_s19 }
 0xede   : > { %2148 = vrot.lane.b32.xlu0 %v4633_v54, %s3476_s19  ;;  %v2124_v54 = vld [vmem:[%s4938_s2 + $0xd0] sm:$0xff] }
 0xedf   : > { %v2232_v62 = vpack.c.bf16 %v2126_v45, %v2124_v54  ;;  %v2315_v54 = vld [vmem:[%s4938_s2 + $0x100] sm:$0xff] }
 0xee0   : > { %2150 = vrot.lane.b32.xlu1 %v4639_v55, %s3476_s19  ;;  %v2314_v55 = vld [vmem:[%s4938_s2 + $0xf8] sm:$0xff] }
 0xf44   : > { %v2129_v21 = vpop.permute.xlu0 %2128 }
 0xf46   : > { %v2131_v49 = vpop.permute.xlu1 %2130 }
 0xf48   : > { %v2133_v44 = vpop.permute.xlu0 %2132 }
 0xf49   : > { %v2136_v2 = vsel %vm1949_vm1, %v2129_v21, %v2133_v44  ;;  %v2138_v40 = vsel %vm1949_vm1, %v2133_v44, %v2129_v21 }
 0xf4a   : > { %v4675_v19 = vmul.f32 %v4518_v56, %v2138_v40  ;;  %v4678_v22 = vmul.f32 %v4521_v11, %v2136_v2  ;;  %v2135_v4 = vpop.permute.xlu1 %2134 }
 0xf4b   : > { %v2137_v3 = vsel %vm1949_vm1, %v2131_v49, %v2135_v4  ;;  %v2139_v5 = vsel %vm1949_vm1, %v2135_v4, %v2131_v49 }
 0xf4c   : > { %v3404_v31 = vpack.i.bf16 %v4678_v22, %v4675_v19  ;;  %v4687_v63 = vmul.f32 %v4518_v56, %v2139_v5  ;;  %v4690_v29 = vmul.f32 %v4521_v11, %v2137_v3  ;;  %v2145_v51 = vpop.permute.xlu0 %2144 }
 0xf4e   : > { %v3414_v6 = vpack.i.bf16 %v4690_v29, %v4687_v63  ;;  %v2240_v37 = vpack.c.bf16 %v4687_v63, %v4675_v19  ;;  %v2147_v50 = vpop.permute.xlu1 %2146  ;;  %3405 = vrot.lane.b32.xlu0 %v3404_v31, %s3470_s29  ;;  %v2241_v14 = vpack.c.bf16 %v4690_v29, %v4678_v22 }
 0xf50   : > { %3415 = vrot.lane.b32.xlu1 %v3414_v6, %s3470_s29  ;;  %v2149_v56 = vpop.permute.xlu0 %2148 }
 0xf51   : > { %v2152_v11 = vsel %vm1966_vm10, %v2145_v51, %v2149_v56  ;;  %v2154_v47 = vsel %vm1966_vm10, %v2149_v56, %v2145_v51 }
 0xf52   : > { %v2156_v43 = vmul.f32 %v4556_v58, %v2152_v11  ;;  %v2157_v42 = vmul.f32 %v4559_v41, %v2154_v47  ;;  %v2151_v33 = vpop.permute.xlu1 %2150  ;;  %3410 = vrot.lane.b32.xlu0 %v3409_v57, %s3470_s29 }
 0xf53   : > { %v2153_v59 = vsel %vm1966_vm10, %v2147_v50, %v2151_v33  ;;  %v2155_v32 = vsel %vm1966_vm10, %v2151_v33, %v2147_v50 }
 0xf54   : > { %v3424_v35 = vpack.i.bf16 %v2157_v42, %v2156_v43  ;;  %v2158_v48 = vmul.f32 %v4556_v58, %v2153_v59  ;;  %v2159_v26 = vmul.f32 %v4559_v41, %v2155_v32  ;;  %3420 = vrot.lane.b32.xlu1 %v3419_v61, %s3470_s29 }
 0xf56   : > { %v3429_v24 = vpack.i.bf16 %v2159_v26, %v2158_v48  ;;  %v2244_v12 = vpack.c.bf16 %v2158_v48, %v2156_v43  ;;  %3425 = vrot.lane.b32.xlu0 %v3424_v35, %s3470_s29  ;;  %v2245_v30 = vpack.c.bf16 %v2159_v26, %v2157_v42 }
 0xf58   : > { %3430 = vrot.lane.b32.xlu1 %v3429_v24, %s3470_s29 }
 0xf5a   : > { %2251 = vperm.xlu0 %3133, %v2125_v46  }
 0xf5c   : > { %2256 = vperm.xlu1 %3132, %v2127_v25  }
 0xfc0   : > { %v3406_v28 = vpop.permute.xlu0 %3405 }
 0xfc1   : > { %v3408_v17 = vunpack.i.h.bf16 %v3406_v28  ;;  %v3407_v16 = vunpack.i.l.bf16 %v3406_v28 }
 0xfc2   : > { %v3416_v23 = vpop.permute.xlu1 %3415 }
 0xfc3   : > { %v3418_v53 = vunpack.i.h.bf16 %v3416_v23  ;;  %v3417_v34 = vunpack.i.l.bf16 %v3416_v23  ;;  %v2196_v61 = vsel %vm938_vm14, %v3407_v16, %v3408_v17 }
 0xfc4   : > { %v3411_v58 = vpop.permute.xlu0 %3410 }
 0xfc5   : > { %v3413_v57 = vunpack.i.h.bf16 %v3411_v58  ;;  %v3412_v41 = vunpack.i.l.bf16 %v3411_v58  ;;  %v2197_v21 = vsel %vm938_vm14, %v3417_v34, %v3418_v53  ;;  %v2971_v40 = vpack.c.bf16 %v3417_v34, %v3407_v16 }
 0xfc6   : > { %v3421_v60 = vpop.permute.xlu1 %3420  ;;  %v2235_v2 = vpack.c.bf16 %v2197_v21, %v2196_v61  ;;  %v2984_v11 = vpack.c.bf16 %v3418_v53, %v3408_v17 }
 0xfc7   : > { %v3423_v49 = vunpack.i.h.bf16 %v3421_v60  ;;  %v3422_v44 = vunpack.i.l.bf16 %v3421_v60  ;;  %v2198_v4 = vsel %vm938_vm14, %v3412_v41, %v3413_v57 }
 0xfc8   : > { %v3426_v46 = vpop.permute.xlu0 %3425  ;;  %2262 = vmatprep.subr.bf16.mxu0 %v2235_v2 }
 0xfc9   : > { %v3428_v25 = vunpack.i.h.bf16 %v3426_v46  ;;  %v3427_v19 = vunpack.i.l.bf16 %v3426_v46  ;;  %2972 = vmatpush1.bf16.msk.msra.mxu0 %vm4589_vm3, %v2971_v40  ;;  %v2199_v3 = vsel %vm938_vm14, %v3422_v44, %v3423_v49  ;;  %v2976_v29 = vpack.c.bf16 %v3422_v44, %v3412_v41 }
 0xfca   : > { %v3431_v22 = vpop.permute.xlu1 %3430  ;;  %v2237_v63 = vpack.c.bf16 %v2199_v3, %v2198_v4  ;;  %v2987_v47 = vpack.c.bf16 %v3423_v49, %v3413_v57  ;;  %v4800_v40 = vsel %vm253_vm11, 1.0, %v3444_v13 }
 0xfcb   : > { %v3433_v5 = vunpack.i.h.bf16 %v3431_v22  ;;  %v3432_v31 = vunpack.i.l.bf16 %v3431_v22  ;;  %v2200_v51 = vsel %vm938_vm14, %v3427_v19, %v3428_v25 }
 0xfcc   : > { %2264 = vmatprep.subr.bf16.mxu0 %v2237_v63 }
 0xfcd   : > { %v2201_v6 = vsel %vm938_vm14, %v3432_v31, %v3433_v5  ;;  %2977 = vmatpush1.bf16.msk.msra.mxu0 %vm4589_vm3, %v2976_v29  ;;  %v2981_v56 = vpack.c.bf16 %v3432_v31, %v3427_v19  ;;  %v2990_v8 = vpack.c.bf16 %v3433_v5, %v3428_v25  ;;  %vm247_vm14 = vcmp.ge.s32.totalorder %v3530_v9, 8 }
 0xfce   : > { %v2239_v50 = vpack.c.bf16 %v2201_v6, %v2200_v51  ;;  %v4784_v23 = vsel %vm247_vm14, 1.0, %v3444_v13  ;;  %v3478_v25 = vmov 0.0|0.0   ;;  %v4806_v19 = vsel %vm248_vm12, 1.0, %v3444_v13 }
 0xfd0   : > { %2266 = vmatprep.subr.bf16.mxu0 %v2239_v50 }
 0xfd1   : > { %2982 = vmatpush1.bf16.msk.msra.mxu0 %vm4589_vm3, %v2981_v56 }
 0xfd2   : > { %2268 = vmatprep.subr.bf16.mxu0 %v2241_v14 }
 0xfd5   : > { %2269 = vmatpush1.bf16.msra.mxu0 %v2240_v37 }
 0xfd6   : > { %2270 = vmatprep.subr.bf16.mxu0 %v2243_v27 }
 0xfd9   : > { %2271 = vmatpush1.bf16.msra.mxu0 %v2242_v20  ;;  %v2316_v20 = vld [vmem:[%s4938_s2 + $0x108] sm:$0xff]  ;;  %v2252_v37 = vpop.permute.xlu0 %2251 }
 0xfda   : > { %2272 = vmatprep.subr.bf16.mxu0 %v2245_v30  ;;  %v2352_v27 = vpack.c.bf16 %v2316_v20, %v2314_v55 }
 0xfdb   : > { %v2257_v39 = vpop.permute.xlu1 %2256 }
 0xfdc   : > { %2993 = vmatprep.mubr.msk.bf16.mxu1 %vm309_vm9, %v2352_v27 }
 0xfdd   : > { %2273 = vmatpush1.bf16.msra.mxu0 %v2244_v12 }
 0xfde   : > { %2985 = vmatprep.subr.msk.bf16.mxu0 %vm4615_vm6, %v2984_v11 }
 0xfe1   : > { %2275 = vmatpush1.bf16.msra.mxu0 %v2235_v2 }
 0xfe2   : > { %2988 = vmatprep.subr.msk.bf16.mxu0 %vm4615_vm6, %v2987_v47 }
 0xfe5   : > { %2277 = vmatpush1.bf16.msra.mxu0 %v2237_v63 }
 0xfe6   : > { %2991 = vmatprep.subr.msk.bf16.mxu0 %vm4615_vm6, %v2990_v8 }
 0xfe9   : > { %2279 = vmatpush1.bf16.msra.mxu0 %v2239_v50  ;;  %v4822_v50 = vsel %vm254_vm15, 1.0, %v3444_v13  ;;  %v2313_v13 = vld [vmem:[%s4938_s2 + $0xf0] sm:$0xff] }
 0xfea   : > { %v2351_v45 = vpack.c.bf16 %v2315_v54, %v2313_v13 }
 0xfec   : > { %2295 = vmatmul.mubr.bf16.vlgmr.msra.gmra.mrb[24].mxu0 %v2232_v62  ;;  %v2421_v62 = vld [vmem:[%s4938_s2 + $0x118] sm:$0xff] }
0x10bf   : > { %v2296_v14 = vpop.f32.mrb[24].mxu0 }
0x10c0   : > { %v2297_v43 = vadd.f32 %v2296_v14, %v2252_v37  ;;  %v2298_v42 = vpop.f32.mrb[25].mxu0 }
0x10c1   : > { %v2299_v33 = vadd.f32 %v2298_v42, %v2252_v37  ;;  %v2300_v59 = vpop.f32.mrb[26].mxu0 }
0x10c2   : > { %v2305_v32 = vadd.f32 %v2297_v43, %v4480_v52  ;;  %v2301_v35 = vadd.f32 %v2300_v59, %v2257_v39  ;;  %v2302_v48 = vpop.f32.mrb[27].mxu0 }
0x10c3   : > { %v2303_v26 = vadd.f32 %v2302_v48, %v2257_v39  ;;  %v2306_v12 = vadd.f32 %v2299_v33, %v4489_v18 }
0x10c4   : > { %v4754_v24 = vmax.f32 %v2305_v32, 0.0  ;;  %v2307_v30 = vadd.f32 %v2301_v35, %v4484_v15 }
0x10c5   : > { %v2308_v17 = vadd.f32 %v2303_v26, %v4493_v38  ;;  %v4763_v16 = vmax.f32 %v2306_v12, 0.0 }
0x10c6   : > { %v4758_v28 = vmax.f32 %v2307_v30, 0.0  ;;  %2317 = vrot.lane.b32.xlu0 %v4754_v24, %s3477_s24 }
0x10c7   : > { %v4767_v52 = vmax.f32 %v2308_v17, 0.0 }
0x10c8   : > { %2319 = vrot.lane.b32.xlu1 %v4758_v28, %s3477_s24  ;;  %v2355_v44 = vpack.c.bf16 %v4758_v28, %v4754_v24 }
0x10c9   : > { %v2358_v47 = vpack.c.bf16 %v4767_v52, %v4763_v16 }
0x10ca   : > { %2321 = vrot.lane.b32.xlu0 %v4763_v16, %s3477_s24 }
0x10cc   : > { %2323 = vrot.lane.b32.xlu1 %v4767_v52, %s3477_s24 }
0x10ce   : > { %2334 = vrot.lane.b32.xlu0 %v4754_v24, %s3451_s7 }
0x10d0   : > { %2336 = vrot.lane.b32.xlu1 %v4758_v28, %s3451_s7 }
0x10d2   : > { %2338 = vrot.lane.b32.xlu0 %v4763_v16, %s3451_s7 }
0x10d4   : > { %2340 = vrot.lane.b32.xlu1 %v4767_v52, %s3451_s7 }
0x10d6   : > { %2362 = vperm.xlu0 %3133, %v2314_v55   ;;  %v2423_v55 = vld [vmem:[%s4938_s2 + $0x128] sm:$0xff] }
0x10d8   : > { %2367 = vperm.xlu1 %3132, %v2316_v20   ;;  %v2457_v20 = vpack.c.bf16 %v2423_v55, %v2421_v62 }
0x10da   : > { %2994 = vmatprep.mubr.msk.bf16.mxu0 %vm309_vm9, %v2457_v20 }
0x1138   : > { %v2318_v15 = vpop.permute.xlu0 %2317 }
0x113a   : > { %v2320_v18 = vpop.permute.xlu1 %2319 }
0x113c   : > { %v2322_v38 = vpop.permute.xlu0 %2321 }
0x113d   : > { %v2328_v53 = vsel %vm2325_vm7, %v2322_v38, %v2318_v15  ;;  %v2326_v22 = vsel %vm2325_vm7, %v2318_v15, %v2322_v38  ;;  %v2531_v38 = vld [vmem:[%s4938_s2 + $0x168] sm:$0xff] }
0x113e   : > { %v2324_v34 = vpop.permute.xlu1 %2323  ;;  %v2330_v57 = vmul.f32 %v4784_v23, %v2328_v53  ;;  %v2331_v63 = vmul.f32 %v4806_v19, %v2326_v22  ;;  %v2533_v53 = vld [vmem:[%s4938_s2 + $0x178] sm:$0xff] }
0x113f   : > { %v2329_v58 = vsel %vm2325_vm7, %v2324_v34, %v2320_v18  ;;  %v2327_v2 = vsel %vm2325_vm7, %v2320_v18, %v2324_v34  ;;  %v2530_v18 = vld [vmem:[%s4938_s2 + $0x158] sm:$0xff]  ;;  %v2535_v34 = vld [vmem:[%s4938_s2 + $0x188] ss:$0 sm:$0xff] }
0x1140   : > { %v2332_v41 = vmul.f32 %v4784_v23, %v2329_v58  ;;  %v2335_v60 = vpop.permute.xlu0 %2334  ;;  %v2333_v3 = vmul.f32 %v4806_v19, %v2327_v2 }
0x1142   : > { %v2337_v61 = vpop.permute.xlu1 %2336  ;;  %v2354_v21 = vpack.c.bf16 %v2332_v41, %v2330_v57  ;;  %v2357_v51 = vpack.c.bf16 %v2333_v3, %v2331_v63 }
0x1144   : > { %2373 = vmatprep.subr.bf16.mxu1 %v2354_v21  ;;  %v2339_v49 = vpop.permute.xlu0 %2338 }
0x1145   : > { %v2343_v46 = vsel %vm2342_vm13, %v2335_v60, %v2339_v49  ;;  %2374 = vmatpush1.bf16.msra.mxu1 %v3478_v25  ;;  %v2345_v56 = vsel %vm2342_vm13, %v2339_v49, %v2335_v60 }
0x1146   : > { %v2341_v9 = vpop.permute.xlu1 %2340  ;;  %2375 = vmatprep.subr.bf16.mxu1 %v2355_v44  ;;  %v2347_v5 = vmul.f32 %v4800_v40, %v2343_v46  ;;  %v2348_v10 = vmul.f32 %v4822_v50, %v2345_v56 }
0x1147   : > { %v2344_v4 = vsel %vm2342_vm13, %v2337_v61, %v2341_v9  ;;  %v2346_v6 = vsel %vm2342_vm13, %v2341_v9, %v2337_v61 }
0x1148   : > { %v2349_v31 = vmul.f32 %v4800_v40, %v2344_v4  ;;  %v2350_v11 = vmul.f32 %v4822_v50, %v2346_v6 }
0x1149   : > { %2376 = vmatpush1.bf16.msra.mxu1 %v3478_v25 }
0x114a   : > { %v2356_v29 = vpack.c.bf16 %v2349_v31, %v2347_v5  ;;  %v2359_v8 = vpack.c.bf16 %v2350_v11, %v2348_v10 }
0x114c   : > { %2377 = vmatprep.subr.bf16.mxu1 %v2356_v29 }
0x114d   : > { %2378 = vmatpush1.bf16.msra.mxu1 %v3478_v25 }
0x114e   : > { %2379 = vmatprep.subr.bf16.mxu1 %v2357_v51 }
0x1151   : > { %2380 = vmatpush1.bf16.msra.mxu1 %v2354_v21 }
0x1152   : > { %2381 = vmatprep.subr.bf16.mxu1 %v2358_v47 }
0x1155   : > { %2382 = vmatpush1.bf16.msra.mxu1 %v2355_v44  ;;  %v2363_v27 = vpop.permute.xlu0 %2362 }
0x1156   : > { %2383 = vmatprep.subr.bf16.mxu1 %v2359_v8 }
0x1157   : > { %v2368_v42 = vpop.permute.xlu1 %2367 }
0x1159   : > { %2384 = vmatpush1.bf16.msra.mxu1 %v2356_v29 }
0x115a   : > { %2385 = vmatprep.subr.bf16.mxu1 %v3478_v25 }
0x115d   : > { %2386 = vmatpush1.bf16.msra.mxu1 %v2357_v51 }
0x115e   : > { %2387 = vmatprep.subr.bf16.mxu1 %v3478_v25 }
0x1161   : > { %2388 = vmatpush1.bf16.msra.mxu1 %v2358_v47 }
0x1162   : > { %2389 = vmatprep.subr.bf16.mxu1 %v3478_v25 }
0x1165   : > { %2390 = vmatpush1.bf16.msra.mxu1 %v2359_v8 }
0x1168   : > { %2406 = vmatmul.mubr.bf16.vlgmr.msra.gmra.mrb[16].mxu1 %v2351_v45 }
0x1169   : > { %2584 = vmatprep.mubr.bf16.mxu1 %v3447_v36 }
0x123b   : > { %v2407_v37 = vpop.f32.mrb[16].mxu1 }
0x123c   : > { %v2408_v14 = vadd.f32 %v2407_v37, %v2363_v27  ;;  %v2409_v43 = vpop.f32.mrb[17].mxu1 }
0x123d   : > { %v2410_v39 = vadd.f32 %v2409_v43, %v2363_v27  ;;  %v2411_v33 = vpop.f32.mrb[18].mxu1 }
0x123e   : > { %v2416_v59 = vmax.f32 %v2408_v14, 0.0  ;;  %v2412_v32 = vadd.f32 %v2411_v33, %v2368_v42  ;;  %v2413_v35 = vpop.f32.mrb[19].mxu1 }
0x123f   : > { %v2414_v48 = vadd.f32 %v2413_v35, %v2368_v42  ;;  %v2417_v12 = vmax.f32 %v2410_v39, 0.0 }
0x1240   : > { %v2418_v26 = vmax.f32 %v2412_v32, 0.0  ;;  %2424 = vrot.lane.b32.xlu0 %v2416_v59, %s3477_s24 }
0x1241   : > { %v2419_v30 = vmax.f32 %v2414_v48, 0.0 }
0x1242   : > { %2426 = vrot.lane.b32.xlu1 %v2418_v26, %s3477_s24  ;;  %v2459_v17 = vpack.c.bf16 %v2418_v26, %v2416_v59 }
0x1243   : > { %v2462_v15 = vpack.c.bf16 %v2419_v30, %v2417_v12 }
0x1244   : > { %2428 = vrot.lane.b32.xlu0 %v2417_v12, %s3477_s24 }
0x1246   : > { %2430 = vrot.lane.b32.xlu1 %v2419_v30, %s3477_s24 }
0x1248   : > { %2440 = vrot.lane.b32.xlu0 %v2416_v59, %s3451_s7 }
0x124a   : > { %2442 = vrot.lane.b32.xlu1 %v2418_v26, %s3451_s7 }
0x124c   : > { %2444 = vrot.lane.b32.xlu0 %v2417_v12, %s3451_s7 }
0x124e   : > { %2446 = vrot.lane.b32.xlu1 %v2419_v30, %s3451_s7  ;;  %v2528_v30 = vld [vmem:[%s4938_s2 + $0x150] sm:$0xff] }
0x1250   : > { %2466 = vperm.xlu0 %3133, %v2421_v62  }
0x1252   : > { %2471 = vperm.xlu1 %3132, %v2423_v55  }
0x1254   : > { %2541 = vperm.xlu0 %3133, %v2530_v18  }
0x1256   : > { %2546 = vperm.xlu1 %3132, %v2531_v38  }
0x1258   : > { %2604 = vperm.xlu0 %3133, %v2533_v53  }
0x125a   : > { %2658 = vperm.xlu1 %3132, %v2535_v34  }
0x12b2   : > { %v2425_v58 = vpop.permute.xlu0 %2424 }
0x12b4   : > { %v2427_v57 = vpop.permute.xlu1 %2426 }
0x12b6   : > { %v2429_v41 = vpop.permute.xlu0 %2428 }
0x12b7   : > { %v2434_v60 = vsel %vm2325_vm7, %v2429_v41, %v2425_v58  ;;  %v2432_v31 = vsel %vm2325_vm7, %v2425_v58, %v2429_v41 }
0x12b8   : > { %v2431_v61 = vpop.permute.xlu1 %2430  ;;  %v2436_v49 = vmul.f32 %v4784_v23, %v2434_v60  ;;  %v2437_v6 = vmul.f32 %v4806_v19, %v2432_v31 }
0x12b9   : > { %v2435_v21 = vsel %vm2325_vm7, %v2431_v61, %v2427_v57  ;;  %v2433_v4 = vsel %vm2325_vm7, %v2427_v57, %v2431_v61 }
0x12ba   : > { %v2438_v44 = vmul.f32 %v4784_v23, %v2435_v21  ;;  %v2441_v2 = vpop.permute.xlu0 %2440  ;;  %v2439_v63 = vmul.f32 %v4806_v19, %v2433_v4  ;;  %v2422_v19 = vld [vmem:[%s4938_s2 + $0x120] sm:$0xff] }
0x12bc   : > { %v2443_v46 = vpop.permute.xlu1 %2442  ;;  %v2458_v9 = vpack.c.bf16 %v2438_v44, %v2436_v49  ;;  %v2461_v11 = vpack.c.bf16 %v2439_v63, %v2437_v6  ;;  %v2534_v6 = vld [vmem:[%s4938_s2 + $0x180] ss:$0 sm:$0xff] }
0x12be   : > { %2477 = vmatprep.subr.bf16.mxu0 %v2458_v9  ;;  %v2445_v22 = vpop.permute.xlu0 %2444 }
0x12bf   : > { %v2448_v3 = vsel %vm2342_vm13, %v2441_v2, %v2445_v22  ;;  %2478 = vmatpush1.bf16.msra.mxu0 %v3478_v25  ;;  %v2450_v10 = vsel %vm2342_vm13, %v2445_v22, %v2441_v2  ;;  %v2532_v2 = vld [vmem:[%s4938_s2 + $0x170] sm:$0xff] }
0x12c0   : > { %v2447_v5 = vpop.permute.xlu1 %2446  ;;  %2479 = vmatprep.subr.bf16.mxu0 %v2459_v17  ;;  %v2452_v29 = vmul.f32 %v4800_v40, %v2448_v3 }
0x12c1   : > { %v2449_v23 = vsel %vm2342_vm13, %v2443_v46, %v2447_v5  ;;  %v2451_v47 = vsel %vm2342_vm13, %v2447_v5, %v2443_v46  ;;  %v2599_v46 = vpack.c.bf16 %v2532_v2, %v2532_v2 }
0x12c2   : > { %v2454_v51 = vmul.f32 %v4800_v40, %v2449_v23  ;;  %v2455_v8 = vmul.f32 %v4822_v50, %v2451_v47  ;;  %v2453_v40 = vmul.f32 %v4822_v50, %v2450_v10  ;;  %v2456_v50 = vpack.c.bf16 %v2422_v19, %v2420_v7 }
0x12c3   : > { %2480 = vmatpush1.bf16.msra.mxu0 %v3478_v25  ;;  %v2653_v47 = vpack.c.bf16 %v2534_v6, %v2534_v6  ;;  %v3479_v10 = vmov 1966171168  }
0x12c4   : > { %v2460_v56 = vpack.c.bf16 %v2454_v51, %v2452_v29  ;;  %v2463_v13 = vpack.c.bf16 %v2455_v8, %v2453_v40  ;;  %v2717_v8 = vunpack.c.l.s4 %v3479_v10 }
0x12c6   : > { %2481 = vmatprep.subr.bf16.mxu0 %v2460_v56  ;;  %v2718_v7 = vunpack.c.0.s8 %v2717_v8 }
0x12c7   : > { %2482 = vmatpush1.bf16.msra.mxu0 %v3478_v25 }
0x12c8   : > { %2483 = vmatprep.subr.bf16.mxu0 %v2461_v11 }
0x12cb   : > { %2484 = vmatpush1.bf16.msra.mxu0 %v2458_v9 }
0x12cc   : > { %2485 = vmatprep.subr.bf16.mxu0 %v2462_v15 }
0x12cf   : > { %2486 = vmatpush1.bf16.msra.mxu0 %v2459_v17  ;;  %v2467_v54 = vpop.permute.xlu0 %2466 }
0x12d0   : > { %2487 = vmatprep.subr.bf16.mxu0 %v2463_v13 }
0x12d1   : > { %v2472_v20 = vpop.permute.xlu1 %2471 }
0x12d3   : > { %2488 = vmatpush1.bf16.msra.mxu0 %v2460_v56 }
0x12d4   : > { %2489 = vmatprep.subr.bf16.mxu0 %v3478_v25 }
0x12d5   : > { %v2547_v38 = vpop.permute.xlu1 %2546 }
0x12d7   : > { %2490 = vmatpush1.bf16.msra.mxu0 %v2461_v11 }
0x12d8   : > { %2491 = vmatprep.subr.bf16.mxu0 %v3478_v25 }
0x12d9   : > { %v2659_v40 = vpop.permute.xlu1 %2658 }
0x12db   : > { %2492 = vmatpush1.bf16.msra.mxu0 %v2462_v15 }
0x12dc   : > { %2493 = vmatprep.subr.bf16.mxu0 %v3478_v25 }
0x12df   : > { %2494 = vmatpush1.bf16.msra.mxu0 %v2463_v13 }
0x12e2   : > { %2510 = vmatmul.mubr.bf16.vlgmr.msra.gmra.mrb[28].mxu0 %v2456_v50 }
0x12e3   : > { %2642 = vmatprep.mubr.bf16.mxu0 %v3447_v36 }
0x13b5   : > { %v2511_v45 = vpop.f32.mrb[28].mxu0 }
0x13b6   : > { %v2512_v62 = vadd.f32 %v2511_v45, %v2467_v54  ;;  %v2513_v55 = vpop.f32.mrb[29].mxu0 }
0x13b7   : > { %v2514_v27 = vadd.f32 %v2513_v55, %v2467_v54  ;;  %v2515_v37 = vpop.f32.mrb[30].mxu0 }
0x13b8   : > { %v2520_v14 = vadd.f32 %v2512_v62, %v4754_v24  ;;  %v2516_v43 = vadd.f32 %v2515_v37, %v2472_v20  ;;  %v2517_v42 = vpop.f32.mrb[31].mxu0  ;;  %v2529_v24 = vld [vmem:[%s4938_s2 + $0x160] sm:$0xff] }
0x13b9   : > { %v2521_v39 = vadd.f32 %v2514_v27, %v4763_v16  ;;  %v2518_v33 = vadd.f32 %v2517_v42, %v2472_v20  ;;  %v2536_v16 = vpack.c.bf16 %v2529_v24, %v2528_v30  ;;  %v2721_v27 = vsub.s32 %v2718_v7, %v3511_v1 }
0x13ba   : > { %v2522_v25 = vadd.f32 %v2516_v43, %v4758_v28  ;;  %v2524_v32 = vmax.f32 %v2520_v14, 0.0  ;;  %v2542_v28 = vpop.permute.xlu0 %2541 }
0x13bb   : > { %v2523_v59 = vadd.f32 %v2518_v33, %v4767_v52  ;;  %v2525_v48 = vmax.f32 %v2521_v39, 0.0 }
0x13bc   : > { %v2526_v35 = vmax.f32 %v2522_v25, 0.0 }
0x13bd   : > { %v2527_v26 = vmax.f32 %v2523_v59, 0.0 }
0x13be   : > { %v2537_v12 = vpack.c.bf16 %v2526_v35, %v2524_v32  ;;  %v2605_v9 = vpop.permute.xlu0 %2604 }
0x13bf   : > { %v2538_v17 = vpack.c.bf16 %v2527_v26, %v2525_v48 }
0x13c1   : > { %2552 = vmatprep.subr.bf16.mxu1 %v2538_v17 }
0x13c2   : > { %2553 = vmatpush1.bf16.msra.mxu1 %v2537_v12 }
0x13c5   : > { %2995 = vmatmul.mubr.msk.bf16.vlgmr.msra.gmra.mrb[20].mxu1 %vm309_vm9, %v2536_v16 }
0x13c6   : > { %2702 = vmatprep.mubr.bf16.mxu1 %v3447_v36 }
0x1498   : > { %v2586_v52 = vpop.f32.mrb[20].mxu1 }
0x1499   : > { %v2587_v15 = vadd.f32 %v2586_v52, %v2542_v28  ;;  %v2588_v18 = vpop.f32.mrb[21].mxu1 }
0x149a   : > { %v2589_v53 = vadd.f32 %v2588_v18, %v2542_v28  ;;  %v2590_v34 = vpop.f32.mrb[22].mxu1 }
0x149b   : > { %v2591_v58 = vadd.f32 %v2590_v34, %v2547_v38  ;;  %v2592_v57 = vpop.f32.mrb[23].mxu1  ;;  %v2595_v60 = vmax.f32 %v2587_v15, 0.0 }
0x149c   : > { %v2593_v41 = vadd.f32 %v2592_v57, %v2547_v38  ;;  %v2596_v21 = vmax.f32 %v2589_v53, 0.0 }
0x149d   : > { %v2597_v61 = vmax.f32 %v2591_v58, 0.0 }
0x149e   : > { %v2598_v49 = vmax.f32 %v2593_v41, 0.0 }
0x149f   : > { %v2600_v44 = vpack.c.bf16 %v2597_v61, %v2595_v60 }
0x14a0   : > { %v2601_v36 = vpack.c.bf16 %v2598_v49, %v2596_v21 }
0x14a2   : > { %2610 = vmatprep.subr.bf16.mxu0 %v2601_v36 }
0x14a3   : > { %2611 = vmatpush1.bf16.msra.mxu0 %v2600_v44 }
0x14a6   : > { %2996 = vmatmul.mubr.msk.bf16.vlgmr.msra.gmra.mrb[32].mxu0 %vm309_vm9, %v2599_v46 }
0x1579   : > { %v2644_v22 = vpop.f32.mrb[32].mxu0 }
0x157a   : > { %v2645_v4 = vadd.f32 %v2644_v22, %v2605_v9  ;;  %v2646_v3 = vpop.f32.mrb[33].mxu0 }
0x157b   : > { %v2647_v5 = vadd.f32 %v2646_v3, %v2605_v9  ;;  %v2648_v31 = vpop.f32.mrb[34].mxu0 }
0x157c   : > { %v2651_v23 = vmax.f32 %v2645_v4, 0.0  ;;  %v2649_v63 = vpop.f32.mrb[35].mxu0 }
0x157d   : > { %v2652_v29 = vmax.f32 %v2647_v5, 0.0 }
0x157e   : > { %v2654_v51 = vpack.c.bf16 %v2651_v23, %v2651_v23 }
0x157f   : > { %v2655_v56 = vpack.c.bf16 %v2652_v29, %v2652_v29 }
0x1580   : > { %v2665_v11 = vsel %vm349_vm8, %v2654_v51, 0 }
0x1581   : > { %2997 = vmatprep.subr.msk.bf16.mxu1 %vm349_vm8, %v2655_v56  ;;  %vm2733_vm8 = vcmp.lt.s32.totalorder %v184_v0, 256 }
0x1582   : > { %2671 = vmatpush1.bf16.msra.mxu1 %v2665_v11 }
0x1585   : > { %2998 = vmatmul.mubr.msk.bf16.vlgmr.msra.gmra.mrb[24].mxu1 %vm561_vm0, %v2653_v47 }
0x1658   : > { %v2704_v13 = vpop.f32.mrb[24].mxu1 }
0x1659   : > { %v2705_v19 = vadd.f32 %v2704_v13, %v2659_v40  ;;  %v2706_v50 = vpop.f32.mrb[25].mxu1 }
0x165a   : > { %v2707_v54 = vadd.f32 %v2706_v50, %v2659_v40  ;;  %v2708_v45 = vpop.f32.mrb[26].mxu1 }
0x165b   : > { %v2711_v62 = vmax.f32 %v2705_v19, 0.0  ;;  %v2709_v55 = vpop.f32.mrb[27].mxu1 }
0x165c   : > { %v2712_v20 = vmax.f32 %v2707_v54, 0.0 }
0x165e   : > { %v2715_v37 = vcombine.low %v2711_v62, %v2712_v20 }
0x1660   : > { %v2722_v14 = vrot.slane %v2715_v37, %v2721_v27 }
0x1662   : > { %v2729_v43 = vrot.slane %v2722_v14, %v2721_v27 }
0x1664   : > { %2735 = vst.msk [vmem:[%s182_s28] sm:$0x3] %vm2733_vm8, %v2729_v43 }
0x1665 PF: > { %s13_s12 = sadd.s32 1, %s3440_s12  }
0x1666   : > { %p10_p4 = scmp.ge.s32.totalorder %s13_s12, 4  }
0x1668   :  { %12 = sbr.rel (!%p10_p4) target bundleno = 1 (0x1), region = 65 }

</bundles_post_ra>
